<compile_context>
chip_gen: v5e
topology: v5e:2x2
jax: 0.10.0
libtpu: 0.0.40
codegen_flags: <defaults>
</compile_context>

<pallas_src>
import functools

import jax
import jax.numpy as jnp
import numpy as np
from jax.experimental import pallas as pl
from jax.experimental.pallas import tpu as pltpu

BN_EPS = 1e-5
MXU_DTYPE = jnp.bfloat16   # MXU operand dtype; accumulation / epilogue stay f32
LANES = 128                # channel axis is zero-padded to this for lane density


def _round_up(x, m):
    return (x + m - 1) // m * m


# ---------------------------------------------------------------------------
# Fused BasicBlock kernel
# ---------------------------------------------------------------------------
def _basic_block_kernel(x_ref, w1_ref, b1_ref, w2_ref, b2_ref, o_ref, h1_ref, *,
                        tile_h, W, W1, CP):
    # x_ref : (H+4, slab_w, CP) f32  zero-padded NHWC image (channels padded to
    #                                CP lanes), VMEM-resident per batch element
    # w1_ref: (9*CP, CP) bf16  conv1 tap matrix, BN1 scale folded
    # b1_ref: (1, CP)    f32   folded BN1 bias
    # w2_ref: (9*CP, CP) bf16  conv2 tap matrix, BN2 scale folded
    # b2_ref: (1, CP)    f32   folded BN2 bias
    # o_ref : (tile_h, W, CP) f32   output row tile (lane-dense, CP = 128k)
    # h1_ref: (tile_h+2, W1, CP) bf16 scratch for the conv1 activation strip
    i = pl.program_id(1)
    th2 = tile_h + 2
    row0 = pl.multiple_of(i * tile_h, tile_h)

    # ---- conv1 + bn1 + relu : single K=9*CP matmul over in-kernel halo taps
    # Load the (tile_h+4)-row halo window once, cast to bf16 once; the nine
    # taps are shifted slices of that bf16 value.  Because CP is a multiple of
    # 128 the concatenate is vreg-aligned (no lane packing).
    xw = x_ref[pl.ds(row0, tile_h + 4), :, :].astype(MXU_DTYPE)
    taps1 = [xw[kh:kh + th2, kw:kw + W1, :]
             for kh in range(3) for kw in range(3)]
    p1 = jnp.concatenate(taps1, axis=-1).reshape(th2 * W1, 9 * CP)
    h1 = jnp.maximum(
        jnp.dot(p1, w1_ref[...], preferred_element_type=jnp.float32)
        + b1_ref[...], 0.0)

    # Stage the activation strip in bf16 VMEM scratch, then realize conv2's
    # zero padding by zeroing exactly the strip positions conv2 will read that
    # lie outside the real out1 domain:
    #   strip col 0   <-> out1 col -1      strip col W+1 <-> out1 col W
    #   strip row 0   <-> out1 row -1 (first tile only)
    #   strip row th2-1 <-> out1 row H (last tile only)
    h1_ref[...] = h1.reshape(th2, W1, CP).astype(MXU_DTYPE)
    zcol = jnp.zeros((th2, 1, CP), MXU_DTYPE)
    h1_ref[:, 0:1, :] = zcol
    h1_ref[:, W + 1:W + 2, :] = zcol

    @pl.when(i == 0)
    def _():
        h1_ref[0:1, :, :] = jnp.zeros((1, W1, CP), MXU_DTYPE)

    @pl.when(i == pl.num_programs(1) - 1)
    def _():
        h1_ref[th2 - 1:th2, :, :] = jnp.zeros((1, W1, CP), MXU_DTYPE)

    # ---- conv2 + bn2 + residual + relu (intermediate never leaves VMEM) ----
    taps2 = [h1_ref[kh:kh + tile_h, kw:kw + W, :]
             for kh in range(3) for kw in range(3)]
    p2 = jnp.concatenate(taps2, axis=-1).reshape(tile_h * W, 9 * CP)
    h2 = jnp.dot(p2, w2_ref[...], preferred_element_type=jnp.float32)

    # Residual read stays f32 (exact) from the resident image.
    res = x_ref[pl.ds(row0 + 2, tile_h), pl.ds(2, W), :].reshape(tile_h * W, CP)
    out = jnp.maximum(h2 + b2_ref[...] + res, 0.0)
    o_ref[...] = out.reshape(tile_h, W, CP).astype(o_ref.dtype)


# ---------------------------------------------------------------------------
# Wrapper (plain-JAX glue: layout, padding, BN folding)
# ---------------------------------------------------------------------------
def _fold_bn(gamma, beta, mean, var):
    """Eval-mode BN -> per-channel (scale, bias)."""
    scale = gamma / jnp.sqrt(var + BN_EPS)
    bias = beta - mean * scale
    return scale.astype(jnp.float32), bias.astype(jnp.float32)


def _conv_weight_matrix(w_oihw, scale, cp):
    """(Cout, Cin, 3, 3) -> (9*cp, cp) bf16 tap matrix, BN scale folded in,
    zero rows/cols for the lane-padding channels."""
    cout, cin = w_oihw.shape[0], w_oihw.shape[1]
    wt = jnp.transpose(w_oihw, (2, 3, 1, 0)) * scale[None, None, None, :]
    full = jnp.zeros((3, 3, cp, cp), jnp.float32).at[:, :, :cin, :cout].set(wt)
    return full.reshape(9 * cp, cp).astype(MXU_DTYPE)


def _pad_bias(bias, cp):
    return jnp.zeros((1, cp), jnp.float32).at[0, :bias.shape[0]].set(bias)


def basic_block_forward(x_nchw, params, *, tile_h=16):
    """relu(bn2(conv2(relu(bn1(conv1(x))))) + x)  — stride=1, downsample=None."""
    n, c, h, w = x_nchw.shape
    planes = params["w1"].shape[0]
    assert params["w1"].shape == (planes, c, 3, 3)
    assert params["w2"].shape == (planes, planes, 3, 3)
    assert c == planes, "downsample=None requires inplanes == planes"

    # Row tile: largest divisor of H <= tile_h.  Guard against degenerate tiny
    # tiles (e.g. prime H): fall back to the full height so the MXU M dim and
    # the per-grid-step overhead stay sane.
    tile_h = max(d for d in range(1, min(tile_h, h) + 1) if h % d == 0)
    if tile_h < min(8, h):
        tile_h = h

    cp = _round_up(c, LANES)             # lane-dense channel axis
    w1_cols = _round_up(w + 2, 8)        # out1 strip width (covers cols [-1, W+1))
    slab_w = _round_up(w1_cols + 2, 8)   # padded-image width incl. halo columns

    # Zero-padded NHWC image, channels padded to `cp`.  Kept f32 so the
    # residual add is exact; taps are cast to bf16 once inside the kernel.
    x_nhwc = jnp.transpose(x_nchw, (0, 2, 3, 1)).astype(jnp.float32)
    xp = jnp.pad(x_nhwc, ((0, 0), (2, 2), (2, slab_w - 2 - w), (0, cp - c)))

    s1, b1 = _fold_bn(*params["bn1"])
    s2, b2 = _fold_bn(*params["bn2"])
    w1m = _conv_weight_matrix(params["w1"], s1, cp)
    w2m = _conv_weight_matrix(params["w2"], s2, cp)
    b1p = _pad_bias(b1, cp)
    b2p = _pad_bias(b2, cp)

    kernel = functools.partial(_basic_block_kernel, tile_h=tile_h, W=w,
                               W1=w1_cols, CP=cp)

    out_nhwc = pl.pallas_call(
        kernel,
        out_shape=jax.ShapeDtypeStruct((n, h, w, cp), jnp.float32),
        grid=(n, h // tile_h),
        in_specs=[
            # Padded image: resident per batch elem (block index constant in i).
            pl.BlockSpec((None, h + 4, slab_w, cp), lambda b, i: (b, 0, 0, 0)),
            pl.BlockSpec((9 * cp, cp), lambda b, i: (0, 0)),
            pl.BlockSpec((1, cp), lambda b, i: (0, 0)),
            pl.BlockSpec((9 * cp, cp), lambda b, i: (0, 0)),
            pl.BlockSpec((1, cp), lambda b, i: (0, 0)),
        ],
        out_specs=pl.BlockSpec((None, tile_h, w, cp),
                               lambda b, i: (b, i, 0, 0)),
        scratch_shapes=[pltpu.VMEM((tile_h + 2, w1_cols, cp), MXU_DTYPE)],
        compiler_params=pltpu.CompilerParams(
            # Only batch is core-parallel: splitting the row-tile axis across
            # TensorCores would duplicate the resident-image DMA.
            dimension_semantics=("parallel", "arbitrary"),
            vmem_limit_bytes=32 * 1024 * 1024,
        ),
    )(xp, w1m, b1p, w2m, b2p)

    # Drop the lane-padding channels and return NCHW (module semantics).
    return jnp.transpose(out_nhwc[..., :planes], (0, 3, 1, 2))


# ---------------------------------------------------------------------------
# Pure-JAX reference (for correctness check)
# ---------------------------------------------------------------------------
def _ref_forward(x, params):
    def conv(x, w):
        return jax.lax.conv_general_dilated(
            x, w, window_strides=(1, 1), padding=((1, 1), (1, 1)),
            dimension_numbers=("NCHW", "OIHW", "NCHW"))

    def bn(x, p):
        g, b, m, v = p
        inv = 1.0 / jnp.sqrt(v + BN_EPS)
        return (x - m[None, :, None, None]) * (g * inv)[None, :, None, None] \
            + b[None, :, None, None]

    out = jax.nn.relu(bn(conv(x, params["w1"]), params["bn1"]))
    out = bn(conv(out, params["w2"]), params["bn2"])
    return jax.nn.relu(out + x)


# ---------------------------------------------------------------------------
# Main
# ---------------------------------------------------------------------------
if __name__ == "__main__":
    N, C, H, W = 2, 8, 16, 16          # inplanes == planes (downsample is None)
    planes = C

    key = jax.random.PRNGKey(0)
    kx, kw1, kw2 = jax.random.split(key, 3)

    x = jax.random.normal(kx, (N, C, H, W), dtype=jnp.float32)
    params = {
        "w1": 0.1 * jax.random.normal(kw1, (planes, C, 3, 3), dtype=jnp.float32),
        "w2": 0.1 * jax.random.normal(kw2, (planes, planes, 3, 3), dtype=jnp.float32),
        # (gamma, beta, running_mean, running_var) — deterministic, non-trivial
        "bn1": (
            1.0 + 0.1 * jnp.arange(planes, dtype=jnp.float32),
            0.05 * jnp.arange(planes, dtype=jnp.float32) - 0.1,
            0.02 * jnp.arange(planes, dtype=jnp.float32),
            1.0 + 0.05 * jnp.arange(planes, dtype=jnp.float32),
        ),
        "bn2": (
            1.0 - 0.05 * jnp.arange(planes, dtype=jnp.float32),
            0.03 * jnp.arange(planes, dtype=jnp.float32),
            -0.01 * jnp.arange(planes, dtype=jnp.float32),
            1.0 + 0.1 * jnp.arange(planes, dtype=jnp.float32),
        ),
    }

    fwd = jax.jit(basic_block_forward)
    out = jax.block_until_ready(fwd(x, params))
    ref = jax.block_until_ready(_ref_forward(x, params))

    assert out.shape == (N, planes, H, W), out.shape
    # bf16 MXU operands (f32 accumulation + f32 epilogue) => loosened tolerance.
    np.testing.assert_allclose(np.asarray(out), np.asarray(ref),
                               atol=3e-2, rtol=3e-2)

    print("KERNEL_OK")
</pallas_src>

<mosaic_0001>
module attributes {stable_mosaic.version = 11 : i64} {
  func.func @_basic_block_kernel(%arg0: i32, %arg1: i32, %arg2: memref<1x20x32x128xf32, #tpu.memory_space<vmem>>, %arg3: memref<1152x128xbf16, #tpu.memory_space<vmem>>, %arg4: memref<1x128xf32, #tpu.memory_space<vmem>>, %arg5: memref<1152x128xbf16, #tpu.memory_space<vmem>>, %arg6: memref<1x128xf32, #tpu.memory_space<vmem>>, %arg7: memref<1x16x16x128xf32, #tpu.memory_space<vmem>>, %arg8: memref<18x24x128xbf16, #tpu.memory_space<vmem>>) attributes {dimension_semantics = [#tpu.dimension_semantics<parallel>, #tpu.dimension_semantics<arbitrary>], iteration_bounds = array<i64: 2, 1>, scalar_prefetch = 0 : i64, scratch_operands = 1 : i64, tpu.core_type = #tpu.core_type<tc>, window_params = [{transform_indices = @transform_0, window_bounds = array<i64: 1, 20, 32, 128>}, {pipeline_mode = #tpu.pipeline_mode<synchronous>, transform_indices = @transform_1, window_bounds = array<i64: 1152, 128>}, {pipeline_mode = #tpu.pipeline_mode<synchronous>, transform_indices = @transform_2, window_bounds = array<i64: 1, 128>}, {pipeline_mode = #tpu.pipeline_mode<synchronous>, transform_indices = @transform_3, window_bounds = array<i64: 1152, 128>}, {pipeline_mode = #tpu.pipeline_mode<synchronous>, transform_indices = @transform_4, window_bounds = array<i64: 1, 128>}, {transform_indices = @transform_5, window_bounds = array<i64: 1, 16, 16, 128>}]} {
    %c16_i32 = arith.constant 16 : i32
    %0 = arith.muli %arg1, %c16_i32 : i32
    %1 = tpu.assume_multiple %0, 16 : i32
    %c0 = arith.constant 0 : index
    %2 = arith.index_cast %1 : i32 to index
    %c0_0 = arith.constant 0 : index
    %c0_1 = arith.constant 0 : index
    %3 = vector.load %arg2[%c0, %2, %c0_0, %c0_1] : memref<1x20x32x128xf32, #tpu.memory_space<vmem>>, vector<1x20x32x128xf32>
    %4 = vector.shape_cast %3 : vector<1x20x32x128xf32> to vector<20x32x128xf32>
    %5 = arith.truncf %4 : vector<20x32x128xf32> to vector<20x32x128xbf16>
    %6 = vector.extract_strided_slice %5 {offsets = [0, 0, 0], sizes = [18, 24, 128], strides = [1, 1, 1]} : vector<20x32x128xbf16> to vector<18x24x128xbf16>
    %7 = vector.extract_strided_slice %5 {offsets = [0, 1, 0], sizes = [18, 24, 128], strides = [1, 1, 1]} : vector<20x32x128xbf16> to vector<18x24x128xbf16>
    %8 = vector.extract_strided_slice %5 {offsets = [0, 2, 0], sizes = [18, 24, 128], strides = [1, 1, 1]} : vector<20x32x128xbf16> to vector<18x24x128xbf16>
    %9 = vector.extract_strided_slice %5 {offsets = [1, 0, 0], sizes = [18, 24, 128], strides = [1, 1, 1]} : vector<20x32x128xbf16> to vector<18x24x128xbf16>
    %10 = vector.extract_strided_slice %5 {offsets = [1, 1, 0], sizes = [18, 24, 128], strides = [1, 1, 1]} : vector<20x32x128xbf16> to vector<18x24x128xbf16>
    %11 = vector.extract_strided_slice %5 {offsets = [1, 2, 0], sizes = [18, 24, 128], strides = [1, 1, 1]} : vector<20x32x128xbf16> to vector<18x24x128xbf16>
    %12 = vector.extract_strided_slice %5 {offsets = [2, 0, 0], sizes = [18, 24, 128], strides = [1, 1, 1]} : vector<20x32x128xbf16> to vector<18x24x128xbf16>
    %13 = vector.extract_strided_slice %5 {offsets = [2, 1, 0], sizes = [18, 24, 128], strides = [1, 1, 1]} : vector<20x32x128xbf16> to vector<18x24x128xbf16>
    %14 = vector.extract_strided_slice %5 {offsets = [2, 2, 0], sizes = [18, 24, 128], strides = [1, 1, 1]} : vector<20x32x128xbf16> to vector<18x24x128xbf16>
    %15 = tpu.concatenate %6, %7, %8, %9, %10, %11, %12, %13, %14 in 2 : vector<18x24x128xbf16>, vector<18x24x128xbf16>, vector<18x24x128xbf16>, vector<18x24x128xbf16>, vector<18x24x128xbf16>, vector<18x24x128xbf16>, vector<18x24x128xbf16>, vector<18x24x128xbf16>, vector<18x24x128xbf16> -> vector<18x24x1152xbf16>
    %16 = vector.shape_cast %15 : vector<18x24x1152xbf16> to vector<432x1152xbf16>
    %c0_2 = arith.constant 0 : index
    %c0_3 = arith.constant 0 : index
    %17 = vector.load %arg3[%c0_2, %c0_3] : memref<1152x128xbf16, #tpu.memory_space<vmem>>, vector<1152x128xbf16>
    %cst = arith.constant dense<0.000000e+00> : vector<432x128xf32>
    %18 = tpu.matmul %16, %17, %cst {dimension_numbers = #tpu.dot_dimension_numbers<[1], [0], [0], [1], [0, 0, 1, 1], [], []>} : vector<432x1152xbf16>, vector<1152x128xbf16>, vector<432x128xf32> -> vector<432x128xf32>
    %c0_4 = arith.constant 0 : index
    %c0_5 = arith.constant 0 : index
    %19 = vector.load %arg4[%c0_4, %c0_5] : memref<1x128xf32, #tpu.memory_space<vmem>>, vector<1x128xf32>
    %20 = vector.broadcast %19 : vector<1x128xf32> to vector<432x128xf32>
    %21 = arith.addf %18, %20 : vector<432x128xf32>
    %cst_6 = arith.constant 0.000000e+00 : f32
    %22 = vector.broadcast %cst_6 : f32 to vector<432x128xf32>
    %23 = arith.maximumf %21, %22 : vector<432x128xf32>
    %24 = vector.shape_cast %23 : vector<432x128xf32> to vector<18x24x128xf32>
    %25 = arith.truncf %24 : vector<18x24x128xf32> to vector<18x24x128xbf16>
    %c0_7 = arith.constant 0 : index
    %c0_8 = arith.constant 0 : index
    %c0_9 = arith.constant 0 : index
    %26 = vector.load %arg8[%c0_7, %c0_8, %c0_9] : memref<18x24x128xbf16, #tpu.memory_space<vmem>>, vector<18x24x128xbf16>
    tpu.vector_store %arg8[%c0_7, %c0_8, %c0_9], %25 {strides = array<i32>} : memref<18x24x128xbf16, #tpu.memory_space<vmem>>, vector<18x24x128xbf16>,
    %cst_10 = arith.constant 0.000000e+00 : bf16
    %27 = vector.broadcast %cst_10 : bf16 to vector<18x1x128xbf16>
    %c0_11 = arith.constant 0 : index
    %c0_12 = arith.constant 0 : index
    %c0_13 = arith.constant 0 : index
    %28 = vector.load %arg8[%c0_11, %c0_12, %c0_13] : memref<18x24x128xbf16, #tpu.memory_space<vmem>>, vector<18x1x128xbf16>
    tpu.vector_store %arg8[%c0_11, %c0_12, %c0_13], %27 {strides = array<i32>} : memref<18x24x128xbf16, #tpu.memory_space<vmem>>, vector<18x1x128xbf16>,
    %c0_14 = arith.constant 0 : index
    %c17 = arith.constant 17 : index
    %c0_15 = arith.constant 0 : index
    %29 = vector.load %arg8[%c0_14, %c17, %c0_15] : memref<18x24x128xbf16, #tpu.memory_space<vmem>>, vector<18x1x128xbf16>
    tpu.vector_store %arg8[%c0_14, %c17, %c0_15], %27 {strides = array<i32>} : memref<18x24x128xbf16, #tpu.memory_space<vmem>>, vector<18x1x128xbf16>,
    %c0_i32 = arith.constant 0 : i32
    %30 = arith.cmpi eq, %arg1, %c0_i32 : i32
    %31 = arith.extui %30 : i1 to i32
    %c0_i32_16 = arith.constant 0 : i32
    %32 = arith.cmpi ne, %31, %c0_i32_16 : i32
    scf.if %32 {
      %cst_57 = arith.constant 0.000000e+00 : bf16
      %64 = vector.broadcast %cst_57 : bf16 to vector<1x24x128xbf16>
      %c0_58 = arith.constant 0 : index
      %c0_59 = arith.constant 0 : index
      %c0_60 = arith.constant 0 : index
      %65 = vector.load %arg8[%c0_58, %c0_59, %c0_60] : memref<18x24x128xbf16, #tpu.memory_space<vmem>>, vector<1x24x128xbf16>
      tpu.vector_store %arg8[%c0_58, %c0_59, %c0_60], %64 {strides = array<i32>} : memref<18x24x128xbf16, #tpu.memory_space<vmem>>, vector<1x24x128xbf16>,
    } else {
    }
    %c0_i32_17 = arith.constant 0 : i32
    %33 = arith.cmpi eq, %arg1, %c0_i32_17 : i32
    %34 = arith.extui %33 : i1 to i32
    %c0_i32_18 = arith.constant 0 : i32
    %35 = arith.cmpi ne, %34, %c0_i32_18 : i32
    scf.if %35 {
      %cst_57 = arith.constant 0.000000e+00 : bf16
      %64 = vector.broadcast %cst_57 : bf16 to vector<1x24x128xbf16>
      %c17_58 = arith.constant 17 : index
      %c0_59 = arith.constant 0 : index
      %c0_60 = arith.constant 0 : index
      %65 = vector.load %arg8[%c17_58, %c0_59, %c0_60] : memref<18x24x128xbf16, #tpu.memory_space<vmem>>, vector<1x24x128xbf16>
      tpu.vector_store %arg8[%c17_58, %c0_59, %c0_60], %64 {strides = array<i32>} : memref<18x24x128xbf16, #tpu.memory_space<vmem>>, vector<1x24x128xbf16>,
    } else {
    }
    %c0_19 = arith.constant 0 : index
    %c0_20 = arith.constant 0 : index
    %c0_21 = arith.constant 0 : index
    %36 = vector.load %arg8[%c0_19, %c0_20, %c0_21] : memref<18x24x128xbf16, #tpu.memory_space<vmem>>, vector<16x16x128xbf16>
    %c0_22 = arith.constant 0 : index
    %c1 = arith.constant 1 : index
    %c0_23 = arith.constant 0 : index
    %37 = vector.load %arg8[%c0_22, %c1, %c0_23] : memref<18x24x128xbf16, #tpu.memory_space<vmem>>, vector<16x16x128xbf16>
    %c0_24 = arith.constant 0 : index
    %c2 = arith.constant 2 : index
    %c0_25 = arith.constant 0 : index
    %38 = vector.load %arg8[%c0_24, %c2, %c0_25] : memref<18x24x128xbf16, #tpu.memory_space<vmem>>, vector<16x16x128xbf16>
    %c1_26 = arith.constant 1 : index
    %c0_27 = arith.constant 0 : index
    %c0_28 = arith.constant 0 : index
    %39 = vector.load %arg8[%c1_26, %c0_27, %c0_28] : memref<18x24x128xbf16, #tpu.memory_space<vmem>>, vector<16x16x128xbf16>
    %c1_29 = arith.constant 1 : index
    %c1_30 = arith.constant 1 : index
    %c0_31 = arith.constant 0 : index
    %40 = vector.load %arg8[%c1_29, %c1_30, %c0_31] : memref<18x24x128xbf16, #tpu.memory_space<vmem>>, vector<16x16x128xbf16>
    %c1_32 = arith.constant 1 : index
    %c2_33 = arith.constant 2 : index
    %c0_34 = arith.constant 0 : index
    %41 = vector.load %arg8[%c1_32, %c2_33, %c0_34] : memref<18x24x128xbf16, #tpu.memory_space<vmem>>, vector<16x16x128xbf16>
    %c2_35 = arith.constant 2 : index
    %c0_36 = arith.constant 0 : index
    %c0_37 = arith.constant 0 : index
    %42 = vector.load %arg8[%c2_35, %c0_36, %c0_37] : memref<18x24x128xbf16, #tpu.memory_space<vmem>>, vector<16x16x128xbf16>
    %c2_38 = arith.constant 2 : index
    %c1_39 = arith.constant 1 : index
    %c0_40 = arith.constant 0 : index
    %43 = vector.load %arg8[%c2_38, %c1_39, %c0_40] : memref<18x24x128xbf16, #tpu.memory_space<vmem>>, vector<16x16x128xbf16>
    %c2_41 = arith.constant 2 : index
    %c2_42 = arith.constant 2 : index
    %c0_43 = arith.constant 0 : index
    %44 = vector.load %arg8[%c2_41, %c2_42, %c0_43] : memref<18x24x128xbf16, #tpu.memory_space<vmem>>, vector<16x16x128xbf16>
    %45 = tpu.concatenate %36, %37, %38, %39, %40, %41, %42, %43, %44 in 2 : vector<16x16x128xbf16>, vector<16x16x128xbf16>, vector<16x16x128xbf16>, vector<16x16x128xbf16>, vector<16x16x128xbf16>, vector<16x16x128xbf16>, vector<16x16x128xbf16>, vector<16x16x128xbf16>, vector<16x16x128xbf16> -> vector<16x16x1152xbf16>
    %46 = vector.shape_cast %45 : vector<16x16x1152xbf16> to vector<256x1152xbf16>
    %c0_44 = arith.constant 0 : index
    %c0_45 = arith.constant 0 : index
    %47 = vector.load %arg5[%c0_44, %c0_45] : memref<1152x128xbf16, #tpu.memory_space<vmem>>, vector<1152x128xbf16>
    %cst_46 = arith.constant dense<0.000000e+00> : vector<256x128xf32>
    %48 = tpu.matmul %46, %47, %cst_46 {dimension_numbers = #tpu.dot_dimension_numbers<[1], [0], [0], [1], [0, 0, 1, 1], [], []>} : vector<256x1152xbf16>, vector<1152x128xbf16>, vector<256x128xf32> -> vector<256x128xf32>
    %c2_i32 = arith.constant 2 : i32
    %49 = arith.addi %1, %c2_i32 : i32
    %c0_47 = arith.constant 0 : index
    %50 = arith.index_cast %49 : i32 to index
    %c2_48 = arith.constant 2 : index
    %c0_49 = arith.constant 0 : index
    %51 = vector.load %arg2[%c0_47, %50, %c2_48, %c0_49] : memref<1x20x32x128xf32, #tpu.memory_space<vmem>>, vector<1x16x16x128xf32>
    %52 = vector.shape_cast %51 : vector<1x16x16x128xf32> to vector<16x16x128xf32>
    %53 = vector.shape_cast %52 : vector<16x16x128xf32> to vector<256x128xf32>
    %c0_50 = arith.constant 0 : index
    %c0_51 = arith.constant 0 : index
    %54 = vector.load %arg6[%c0_50, %c0_51] : memref<1x128xf32, #tpu.memory_space<vmem>>, vector<1x128xf32>
    %55 = vector.broadcast %54 : vector<1x128xf32> to vector<256x128xf32>
    %56 = arith.addf %48, %55 : vector<256x128xf32>
    %57 = arith.addf %56, %53 : vector<256x128xf32>
    %cst_52 = arith.constant 0.000000e+00 : f32
    %58 = vector.broadcast %cst_52 : f32 to vector<256x128xf32>
    %59 = arith.maximumf %57, %58 : vector<256x128xf32>
    %60 = vector.shape_cast %59 : vector<256x128xf32> to vector<16x16x128xf32>
    %c0_53 = arith.constant 0 : index
    %c0_54 = arith.constant 0 : index
    %c0_55 = arith.constant 0 : index
    %c0_56 = arith.constant 0 : index
    %61 = vector.load %arg7[%c0_53, %c0_54, %c0_55, %c0_56] : memref<1x16x16x128xf32, #tpu.memory_space<vmem>>, vector<1x16x16x128xf32>
    %62 = vector.shape_cast %61 : vector<1x16x16x128xf32> to vector<16x16x128xf32>
    %63 = vector.shape_cast %60 : vector<16x16x128xf32> to vector<1x16x16x128xf32>
    tpu.vector_store %arg7[%c0_53, %c0_54, %c0_55, %c0_56], %63 {strides = array<i32>} : memref<1x16x16x128xf32, #tpu.memory_space<vmem>>, vector<1x16x16x128xf32>,
    return
  }
  func.func @transform_0(%arg0: i32, %arg1: i32) -> (i32, i32, i32, i32) {
    %c0_i32 = arith.constant 0 : i32
    %c0_i32_0 = arith.constant 0 : i32
    %c0_i32_1 = arith.constant 0 : i32
    %c0_i32_2 = arith.constant 0 : i32
    return %arg0, %c0_i32, %c0_i32_0, %c0_i32_1 : i32, i32, i32, i32
  }
  func.func @transform_1(%arg0: i32, %arg1: i32) -> (i32, i32) {
    %c0_i32 = arith.constant 0 : i32
    %c0_i32_0 = arith.constant 0 : i32
    %c0_i32_1 = arith.constant 0 : i32
    return %c0_i32, %c0_i32_0 : i32, i32
  }
  func.func @transform_2(%arg0: i32, %arg1: i32) -> (i32, i32) {
    %c0_i32 = arith.constant 0 : i32
    %c0_i32_0 = arith.constant 0 : i32
    %c0_i32_1 = arith.constant 0 : i32
    return %c0_i32, %c0_i32_0 : i32, i32
  }
  func.func @transform_3(%arg0: i32, %arg1: i32) -> (i32, i32) {
    %c0_i32 = arith.constant 0 : i32
    %c0_i32_0 = arith.constant 0 : i32
    %c0_i32_1 = arith.constant 0 : i32
    return %c0_i32, %c0_i32_0 : i32, i32
  }
  func.func @transform_4(%arg0: i32, %arg1: i32) -> (i32, i32) {
    %c0_i32 = arith.constant 0 : i32
    %c0_i32_0 = arith.constant 0 : i32
    %c0_i32_1 = arith.constant 0 : i32
    return %c0_i32, %c0_i32_0 : i32, i32
  }
  func.func @transform_5(%arg0: i32, %arg1: i32) -> (i32, i32, i32, i32) {
    %c0_i32 = arith.constant 0 : i32
    %c0_i32_0 = arith.constant 0 : i32
    %c0_i32_1 = arith.constant 0 : i32
    return %arg0, %arg1, %c0_i32, %c0_i32_0 : i32, i32, i32, i32
  }
}

</mosaic_0001>

<bundles_post_ra>
// kernel: basic_block_forward.1
= control target key start
LH: loop header
LB: loop body
LE: loop exit
PB: predicated region body
PF: predicated region fallthrough
CT: control target
= control target key end

     0   :  { %s8061_s18 = smov 0   ;;  %s8063_s19 = smov 0   ;;  %s11448_s0 = inlined_call_operand.vmem [shape: f32[2,20,32,128], index: 0, kind: input, shape index: {}]   ;;  %s11449_s1 = inlined_call_operand.vmem [shape: bf16[1152,128], index: 1, kind: input, shape index: {}]   ;;  %s11450_s2 = inlined_call_operand.vmem [shape: f32[1,128], index: 2, kind: input, shape index: {}]   ;;  %s11451_s3 = inlined_call_operand.vmem [shape: bf16[1152,128], index: 3, kind: input, shape index: {}]   ;;  %s11452_s4 = inlined_call_operand.vmem [shape: f32[1,128], index: 4, kind: input, shape index: {}]   ;;  %s11453_s5 = inlined_call_operand.vmem [shape: f32[2,16,16,128], index: 5, kind: output, shape index: {}]  }
   0x1   :  { %s8065_s20 = smov 0  }
   0x2 LB: > { %s27_s21 = sadd.s32 1, %s8024_s19  ;;  %p6776_p0 = scmp.ge.s32.totalorder %s8028_s20, 1  ;;  %s8028_s20 = sphi %s8065_s20, %s15_s20   ;;  %s8024_s19 = sphi %s8063_s19, %s12271_s19   ;;  %s8020_s18 = sphi %s8061_s18, %s12270_s18  }
   0x3   : > { %p29_p1 = scmp.ge.s32.totalorder %s27_s21, 2  ;;  %p201_p2 = scmp.lt.s32.totalorder %s8028_s20, 3 }
   0x5   : > { %s12273_s21 = smov (%p29_p1, %s27_s21), 0  ;;  %p202_p3 = pnand %p6776_p0, %p201_p2 }
   0x7   : > { %205 = sbr.rel (%p202_p3) target bundleno = 2102 (0x836), region = 40 }
   0xc   : > { %v7398_v0 = vld [vmem:[%s11449_s1 + $0x38] sm:$0xff]  ;;  %p234_p4 = scmp.lt.s32.totalorder %s8020_s18, 1  ;;  %v7397_v3 = vld [vmem:[%s11449_s1 + $0x30] sm:$0xff]  ;;  %v7396_v6 = vld [vmem:[%s11449_s1 + $0x28] sm:$0xff]  ;;  %vm594_vm0 = vsmask.f32 7424 }
   0xd   : > { %v7406_v1 = vld [vmem:[%s11449_s1 + $0x78] sm:$0xff]  ;;  %1999 = vmatpush.bf16.msra.mxu0 %v7398_v0  ;;  %v7405_v4 = vld [vmem:[%s11449_s1 + $0x70] sm:$0xff]  ;;  %v7404_v7 = vld [vmem:[%s11449_s1 + $0x68] sm:$0xff]  ;;  %vm865_vm1 = vcmask 1046528   ;;  %vm3457_vm2 = vcmask 1040384  }
   0xe   : > { %v8088_v2 = vld [vmem:[%s11449_s1 + $0xb8] sm:$0xff]  ;;  %7886 = vmatpush.bf16.msra.mxu3 %v7406_v1  ;;  %s12275_s18 = smov (!%p234_p4, %s8020_s18), 1  ;;  %2143 = vmatpush.bf16.msra.mxu1 %v7406_v1  ;;  %v8102_v5 = vld [vmem:[%s11449_s1 + $0xb0] sm:$0xff]  ;;  %v8120_v8 = vld [vmem:[%s11449_s1 + $0xa8] sm:$0xff]  ;;  %vm3458_vm3 = vsmask.f32 256 }
   0xf   : > { %2287 = vmatpush.bf16.msra.mxu2 %v8088_v2  ;;  %s7902_s9 = smul.u32 640, %s12275_s18  ;;  %v7395_v9 = vld [vmem:[%s11449_s1 + $0x20] sm:$0xff]  ;;  %v7394_v39 = vld [vmem:[%s11449_s1 + $0x18] sm:$0xff]  ;;  %v7393_v58 = vld [vmem:[%s11449_s1 + $0x10] sm:$0xff]  ;;  %vm3514_vm5 = vsmask.f32 7938 }
  0x10   : > { %v7403_v10 = vld [vmem:[%s11449_s1 + $0x60] sm:$0xff]  ;;  %v7402_v40 = vld [vmem:[%s11449_s1 + $0x58] sm:$0xff]  ;;  %v7401_v59 = vld [vmem:[%s11449_s1 + $0x50] sm:$0xff]  ;;  %s7390_s25 = sshll.u32 %s12275_s18, 8 }
  0x11   : > { %2000 = vmatpush.bf16.msra.mxu0 %v7397_v3  ;;  %s8114_s16 = scalar_lea.vmem %s11448_s0, %s7902_s9  ;;  %v8141_v26 = vld [vmem:[%s11449_s1 + $0xa0] sm:$0xff]  ;;  %v8170_v45 = vld [vmem:[%s11449_s1 + $0x98] sm:$0xff]  ;;  %v8198_v63 = vld [vmem:[%s11449_s1 + $0x90] sm:$0xff]  ;;  %s11250_s28 = scalar_lea.vmem %s11453_s5, %s7390_s25 }
  0x12   : > { %7887 = vmatpush.bf16.msra.mxu3 %v7405_v4  ;;  %2144 = vmatpush.bf16.msra.mxu1 %v7405_v4  ;;  %v254_v11 = vld [vmem:[%s8114_s16] sm:$0xff]  ;;  %v255_v12 = vld [vmem:[%s8114_s16 + $0x8] sm:$0xff]  ;;  %v312_v13 = vld [vmem:[%s8114_s16 + $0x1d0] sm:$0xff] }
  0x13   : > { %2288 = vmatpush.bf16.msra.mxu2 %v8102_v5  ;;  %v334_v14 = vpack.c.bf16 %v254_v11, %v254_v11  ;;  %v335_v15 = vpack.c.bf16 %v255_v12, %v255_v12  ;;  %v313_v16 = vld [vmem:[%s8114_s16 + $0x1d8] sm:$0xff]  ;;  %v314_v17 = vld [vmem:[%s8114_s16 + $0x1e0] sm:$0xff]  ;;  %v315_v18 = vld [vmem:[%s8114_s16 + $0x1e8] sm:$0xff]  ;;  %v392_v19 = vpack.c.bf16 %v312_v13, %v312_v13 }
  0x14   : > { %v316_v20 = vld [vmem:[%s8114_s16 + $0x1f0] sm:$0xff]  ;;  %v317_v21 = vld [vmem:[%s8114_s16 + $0x1f8] sm:$0xff]  ;;  %v393_v22 = vpack.c.bf16 %v313_v16, %v313_v16  ;;  %v394_v23 = vpack.c.bf16 %v314_v17, %v314_v17  ;;  %v395_v24 = vpack.c.bf16 %v315_v18, %v315_v18  ;;  %v258_v44 = vld [vmem:[%s8114_s16 + $0x20] sm:$0xff] }
  0x15   : > { %2001 = vmatpush.bf16.msra.mxu0 %v7396_v6  ;;  %v256_v25 = vld [vmem:[%s8114_s16 + $0x10] sm:$0xff]  ;;  %v468_v27 = vunpack.c.l.b16 %v334_v14  ;;  %v469_v28 = vunpack.c.l.b16 %v335_v15  ;;  %v396_v29 = vpack.c.bf16 %v316_v20, %v316_v20  ;;  %v397_v30 = vpack.c.bf16 %v317_v21, %v317_v21  ;;  %v257_v31 = vld [vmem:[%s8114_s16 + $0x18] sm:$0xff]  ;;  %v259_v49 = vld [vmem:[%s8114_s16 + $0x28] sm:$0xff] }
  0x16   : > { %7888 = vmatpush.bf16.msra.mxu3 %v7404_v7  ;;  %2145 = vmatpush.bf16.msra.mxu1 %v7404_v7  ;;  %v8144_v32 = vunpack.c.l.b16 %v392_v19  ;;  %v8146_v33 = vunpack.c.l.b16 %v394_v23  ;;  %v8148_v34 = vunpack.c.l.b16 %v395_v24  ;;  %v554_v35 = vunpack.c.l.b16 %v393_v22  ;;  %v260_v57 = vld [vmem:[%s8114_s16 + $0x30] sm:$0xff]  ;;  %v261_v11 = vld [vmem:[%s8114_s16 + $0x38] sm:$0xff]  ;;  %v7392_v12 = vld [vmem:[%s11449_s1 + $0x8] sm:$0xff] }
  0x17   : > { %2289 = vmatpush.bf16.msra.mxu2 %v8120_v8  ;;  %v8150_v36 = vunpack.c.l.b16 %v396_v29  ;;  %v555_v37 = vunpack.c.l.b16 %v397_v30  ;;  %v336_v38 = vpack.c.bf16 %v256_v25, %v256_v25  ;;  %v337_v43 = vpack.c.bf16 %v257_v31, %v257_v31  ;;  %v7400_v13 = vld [vmem:[%s11449_s1 + $0x48] sm:$0xff]  ;;  %v7391_v24 = vld [vmem:[%s11449_s1] sm:$0xff]  ;;  %vm10327_vm4 = vmand %vm3457_vm2, %vm3458_vm3 }
  0x18   : > { %v8159_v41 = vpack.c.b16 %v554_v35, %v8144_v32  ;;  %v8163_v42 = vpack.c.b16 %v8148_v34, %v8146_v33  ;;  %v8172_v46 = vpack.c.b16 %v469_v28, %v468_v27  ;;  %v338_v56 = vpack.c.bf16 %v258_v44, %v258_v44  ;;  %v8228_v15 = vld [vmem:[%s11449_s1 + $0x88] sm:$0xff]  ;;  %v7399_v25 = vld [vmem:[%s11449_s1 + $0x40] sm:$0xff]  ;;  %vm10349_vm6 = vmand %vm3457_vm2, %vm3514_vm5 }
  0x19   : > { %2002 = vmatpush.bf16.msra.mxu0 %v7395_v9  ;;  %v8175_v47 = vpack.c.b16 %v555_v37, %v8150_v36  ;;  %v8177_v48 = vunpack.c.l.b16 %v336_v38  ;;  %v540_v55 = vunpack.c.l.b16 %v337_v43  ;;  %v339_v62 = vpack.c.bf16 %v259_v49, %v259_v49  ;;  %v8252_v30 = vld [vmem:[%s11449_s1 + $0x80] sm:$0xff]  ;;  %v7430_v38 = vld [vmem:[%s11449_s1 + $0x138] sm:$0xff] }
  0x1a   : > { %7889 = vmatpush.bf16.msra.mxu3 %v7403_v10  ;;  %11656 = vst [vmem:[#allocation3_spill] sm:$0xff] %v8163_v42  ;;  %2146 = vmatpush.bf16.msra.mxu1 %v7403_v10  ;;  %v813_v50 = vshll.u32 %v8159_v41, 16  ;;  %v821_v51 = vshrl.u32 %v8163_v42, 16  ;;  %v823_v52 = vshll.u32 %v8163_v42, 16  ;;  %v817_v53 = vshrl.u32 %v8159_v41, 16 }
  0x1b   : > { %2290 = vmatpush.bf16.msra.mxu2 %v8141_v26  ;;  %v828_v54 = vshll.u32 %v8175_v47, 16  ;;  %v8203_v1 = vpack.c.b16 %v540_v55, %v8177_v48  ;;  %v598_v3 = vshll.u32 %v8172_v46, 16  ;;  %v8206_v4 = vunpack.c.l.b16 %v338_v56  ;;  %v319_v55 = vld [vmem:[%s8114_s16 + $0x208] sm:$0xff] }
  0x1c   : > { %v8192_v60 = vrot.slane %v813_v50, 1  ;;  %v825_v61 = vrot.slane %v823_v52, 1  ;;  %v8208_v7 = vunpack.c.l.b16 %v339_v62  ;;  %v340_v9 = vpack.c.bf16 %v260_v57, %v260_v57 }
  0x1d   : > { %2003 = vmatpush.bf16.msra.mxu0 %v7394_v39  ;;  %v8200_v0 = vrot.slane %v828_v54, 1  ;;  %v596_v16 = vshrl.u32 %v8172_v46, 16  ;;  %v600_v17 = vrot.slane %v598_v3, 1  ;;  %v603_v18 = vshll.u32 %v8203_v1, 16  ;;  %v318_v54 = vld [vmem:[%s8114_s16 + $0x200] sm:$0xff]  ;;  %v320_v3 = vld [vmem:[%s8114_s16 + $0x210] sm:$0xff] }
  0x1e   : > { %7890 = vmatpush.bf16.msra.mxu3 %v7402_v40  ;;  %2147 = vmatpush.bf16.msra.mxu1 %v7402_v40  ;;  %v826_v6 = vor.u32 %v825_v61, %v821_v51  ;;  %v8211_v10 = vor.u32 %v817_v53, %v8192_v60  ;;  %v8234_v19 = vpack.c.b16 %v8208_v7, %v8206_v4  ;;  %v8236_v21 = vunpack.c.l.b16 %v340_v9 }
  0x1f   : > { %2291 = vmatpush.bf16.msra.mxu2 %v8170_v45  ;;  %v341_v20 = vpack.c.bf16 %v261_v11, %v261_v11  ;;  %v866_v27 = vrot.slane %v8172_v46, 1  ;;  %v867_v28 = vrot.slane %v8203_v1, 1  ;;  %v601_v31 = vor.u32 %v600_v17, %v596_v16 }
  0x20   : > { %11657 = vst [vmem:[#allocation4_spill] sm:$0xff] %v8211_v10  ;;  %v8222_v14 = vsel %vm594_vm0, %v826_v6, %v8200_v0  ;;  %v11456_v22 = vunpack.c.l.b16 %v8211_v10  ;;  %v605_v35 = vrot.slane %v603_v18, 1  ;;  %v613_v37 = vshll.u32 %v8234_v19, 16 }
  0x21   : > { %2004 = vmatpush.bf16.msra.mxu0 %v7393_v58  ;;  %11658 = vst [vmem:[#allocation5_spill] sm:$0xff] %v8222_v14  ;;  %v1066_v23 = vunpack.c.l.b16 %v8222_v14  ;;  %v541_v29 = vunpack.c.l.b16 %v341_v20  ;;  %v868_v43 = vsel %vm865_vm1, %v866_v27, %v867_v28  ;;  %v611_v49 = vshrl.u32 %v8234_v19, 16 }
  0x22   : > { %7891 = vmatpush.bf16.msra.mxu3 %v7401_v59  ;;  %2148 = vmatpush.bf16.msra.mxu1 %v7401_v59  ;;  %v606_v44 = vsel %vm594_vm0, %v601_v31, %v605_v35  ;;  %v615_v50 = vrot.slane %v613_v37, 1  ;;  %v832_v52 = vshrl.u32 %v8175_v47, 16  ;;  %v607_v53 = vshrl.u32 %v8203_v1, 16  ;;  %v321_v1 = vld [vmem:[%s8114_s16 + $0x218] sm:$0xff] }
  0x23   : > { %2292 = vmatpush.bf16.msra.mxu2 %v8198_v63  ;;  %v8259_v39 = vpack.c.b16 %v541_v29, %v8236_v21  ;;  %v8263_v40 = vpack.c.b16 %v1066_v23, %v11456_v22  ;;  %v869_v56 = vrot.slane %v8234_v19, 1  ;;  %v399_v61 = vpack.c.bf16 %v319_v55, %v319_v55 }
  0x24   : > { %v616_v58 = vor.u32 %v615_v50, %v611_v49  ;;  %v609_v62 = vor.u32 %v607_v53, %v605_v35  ;;  %v989_v18 = vunpack.c.l.b16 %v867_v28  ;;  %v1250_v27 = vpack.c.b16 %v8206_v4, %v8177_v48  ;;  %v324_v48 = vld [vmem:[%s8114_s16 + $0x230] sm:$0xff]  ;;  %v325_v4 = vld [vmem:[%s8114_s16 + $0x238] sm:$0xff]  ;;  %v262_v50 = vld [vmem:[%s8114_s16 + $0x40] sm:$0xff] }
  0x25   : > { %2005 = vmatpush.bf16.msra.mxu0 %v7392_v12  ;;  %11659 = vst [vmem:[#allocation6_spill] sm:$0xff] %v8263_v40  ;;  %v618_v51 = vshll.u32 %v8259_v39, 16  ;;  %v870_v57 = vrot.slane %v8259_v39, 1  ;;  %v401_v12 = vpack.c.bf16 %v321_v1, %v321_v1  ;;  %v8298_v16 = vunpack.c.l.b16 %v399_v61 }
  0x26   : > { %7892 = vmatpush.bf16.msra.mxu3 %v7400_v13  ;;  %2149 = vmatpush.bf16.msra.mxu1 %v7400_v13  ;;  %v988_v23 = vunpack.c.l.b16 %v609_v62  ;;  %v405_v53 = vpack.c.bf16 %v325_v4, %v325_v4  ;;  %v342_v62 = vpack.c.bf16 %v262_v50, %v262_v50 }
  0x27   : > { %2293 = vmatpush.bf16.msra.mxu2 %v8228_v15  ;;  %v620_v59 = vrot.slane %v618_v51, 1  ;;  %v8288_v6 = vsel %vm865_vm1, %v869_v56, %v870_v57  ;;  %11664 = vst [vmem:[#allocation11_spill] sm:$0xff] %v8298_v16  ;;  %v556_v31 = vunpack.c.l.b16 %v401_v12  ;;  %v263_v51 = vld [vmem:[%s8114_s16 + $0x48] sm:$0xff]  ;;  %v264_v12 = vld [vmem:[%s8114_s16 + $0x50] sm:$0xff] }
  0x28   : > { %11661 = vst [vmem:[#allocation8_spill] sm:$0xff] %v8288_v6  ;;  %v979_v17 = vunpack.c.l.b16 %v8288_v6 }
  0x29   : > { %2006 = vmatpush.bf16.msra.mxu0 %v7391_v24  ;;  %v8291_v9 = vsel %vm594_vm0, %v616_v58, %v620_v59  ;;  %v322_v24 = vld [vmem:[%s8114_s16 + $0x220] sm:$0xff] }
  0x2a   : > { %7893 = vmatpush.bf16.msra.mxu3 %v7399_v25  ;;  %2150 = vmatpush.bf16.msra.mxu1 %v7399_v25  ;;  %11662 = vst [vmem:[#allocation9_spill] sm:$0xff] %v8291_v9  ;;  %v978_v20 = vunpack.c.l.b16 %v8291_v9  ;;  %v323_v25 = vld [vmem:[%s8114_s16 + $0x228] sm:$0xff]  ;;  %v1252_v35 = vpack.c.b16 %v979_v17, %v989_v18  ;;  %v265_v17 = vld [vmem:[%s8114_s16 + $0x58] sm:$0xff]  ;;  %v984_v18 = vunpack.c.h.b16 %v8291_v9 }
  0x2b   : > { %2294 = vmatpush.bf16.msra.mxu2 %v8252_v30 }
  0x2c   : > { %2007 = vmatmul.bf16.vlgmr.msra.gmra.mxu0 %v8172_v46  ;;  %v398_v46 = vpack.c.bf16 %v318_v54, %v318_v54  ;;  %v1251_v37 = vpack.c.b16 %v978_v20, %v988_v23 }
  0x2d   : > { %2575 = vmatpush.bf16.msrb.mxu0 %v7430_v38  ;;  %2261 = vmatmul.bf16.vlgmr.msra.gmra.mxu3 %v8263_v40  ;;  %v402_v38 = vpack.c.bf16 %v322_v24, %v322_v24 }
  0x2e   : > { %7894 = vmatpush.bf16.msrb.mxu3 %v8088_v2  ;;  %2295 = vmatmul.bf16.vlgmr.msra.gmra.mxu2 %v868_v43  ;;  %v8280_v2 = vor.u32 %v832_v52, %v8200_v0  ;;  %v1068_v0 = vunpack.c.h.b16 %v8222_v14  ;;  %v8296_v13 = vunpack.c.l.b16 %v398_v46  ;;  %v403_v43 = vpack.c.bf16 %v323_v25, %v323_v25  ;;  %v277_v14 = vld [vmem:[%s8114_s16 + $0xb8] sm:$0xff] }
  0x2f   : > { %2151 = vmatmul.bf16.vlgmr.msra.gmra.mxu1 %v606_v44  ;;  %v404_v52 = vpack.c.bf16 %v324_v48, %v324_v48  ;;  %v8328_v54 = vunpack.c.l.b16 %v402_v38  ;;  %v8356_v25 = vunpack.c.l.b16 %v342_v62  ;;  %v266_v38 = vld [vmem:[%s8114_s16 + $0x60] sm:$0xff] }
  0x30   : > { %11660 = vst [vmem:[#allocation7_spill] sm:$0xff] %v8280_v2  ;;  %v11455_v11 = vunpack.c.l.b16 %v8280_v2  ;;  %v8315_v28 = vpack.c.b16 %v8298_v16, %v8296_v13  ;;  %v8330_v55 = vunpack.c.l.b16 %v403_v43  ;;  %v267_v43 = vld [vmem:[%s8114_s16 + $0x68] sm:$0xff] }
  0x31   : > { %11663 = vst [vmem:[#allocation10_spill] sm:$0xff] %v8296_v13  ;;  %v8340_v1 = vunpack.c.l.b16 %v404_v52 }
  0x32   : > { %7895 = vmatpush.bf16.msrb.mxu3 %v8102_v5  ;;  %v400_v5 = vpack.c.bf16 %v320_v3, %v320_v3  ;;  %11667 = vst [vmem:[#allocation14_spill] sm:$0xff] %v8315_v28  ;;  %v838_v49 = vshll.u32 %v8315_v28, 16  ;;  %v836_v56 = vshrl.u32 %v8315_v28, 16  ;;  %v343_v3 = vpack.c.bf16 %v263_v51, %v263_v51 }
  0x33   : > { %11668 = vst [vmem:[#allocation15_spill] sm:$0xff] %v8328_v54 }
  0x34   : > { %v8311_v29 = vunpack.c.l.b16 %v400_v5  ;;  %11669 = vst [vmem:[#allocation16_spill] sm:$0xff] %v8330_v55  ;;  %v840_v46 = vrot.slane %v838_v49, 1  ;;  %v8344_v5 = vpack.c.b16 %v8330_v55, %v8328_v54 }
  0x35   : > { %11671 = vst [vmem:[#allocation18_spill] sm:$0xff] %v8340_v1 }
  0x36   : > { %7896 = vmatpush.bf16.msrb.mxu3 %v8120_v8  ;;  %v8309_v8 = vpack.c.b16 %v11455_v11, %v1068_v0  ;;  %11666 = vst [vmem:[#allocation13_spill] sm:$0xff] %v8311_v29  ;;  %v8323_v44 = vpack.c.b16 %v556_v31, %v8311_v29  ;;  %v557_v0 = vunpack.c.l.b16 %v405_v53  ;;  %v841_v23 = vor.u32 %v840_v46, %v836_v56  ;;  %v269_v56 = vld [vmem:[%s8114_s16 + $0x78] sm:$0xff] }
  0x37   : > { %11672 = vst [vmem:[#allocation19_spill] sm:$0xff] %v8344_v5  ;;  %v851_v49 = vshrl.u32 %v8344_v5, 16  ;;  %v346_v53 = vpack.c.bf16 %v266_v38, %v266_v38 }
  0x38   : > { %11665 = vst [vmem:[#allocation12_spill] sm:$0xff] %v8309_v8  ;;  %v843_v61 = vshll.u32 %v8323_v44, 16  ;;  %v8361_v31 = vpack.c.b16 %v557_v0, %v8340_v1  ;;  %v847_v46 = vshrl.u32 %v8323_v44, 16 }
  0x3a   : > { %7897 = vmatpush.bf16.msrb.mxu3 %v8141_v26  ;;  %v622_v26 = vshrl.u32 %v8259_v39, 16  ;;  %v845_v24 = vrot.slane %v843_v61, 1  ;;  %v853_v39 = vshll.u32 %v8344_v5, 16  ;;  %v858_v50 = vshll.u32 %v8361_v31, 16 }
  0x3c   : > { %2012 = vmatmul.bf16.gmra.mxu0 %v1250_v27  ;;  %v8336_v58 = vor.u32 %v622_v26, %v620_v59  ;;  %v985_v59 = vunpack.c.h.b16 %v8288_v6  ;;  %v8358_v27 = vunpack.c.l.b16 %v343_v3  ;;  %v8371_v48 = vsel %vm594_vm0, %v841_v23, %v845_v24 }
  0x3d   : > { %2266 = vmatmul.bf16.gmra.mxu3 %v8309_v8  ;;  %11674 = vst [vmem:[#allocation21_spill] sm:$0xff] %v8371_v48  ;;  %v860_v62 = vrot.slane %v858_v50, 1  ;;  %v8391_v23 = vor.u32 %v847_v46, %v845_v24 }
  0x3e   : > { %7898 = vmatpush.bf16.msrb.mxu3 %v8170_v45  ;;  %2300 = vmatmul.bf16.gmra.mxu2 %v1252_v35  ;;  %v7429_v45 = vld [vmem:[%s11449_s1 + $0x130] sm:$0xff]  ;;  %11670 = vst [vmem:[#allocation17_spill] sm:$0xff] %v8336_v58  ;;  %v11459_v20 = vunpack.c.l.b16 %v8336_v58  ;;  %v344_v35 = vpack.c.bf16 %v264_v12, %v264_v12  ;;  %v8377_v26 = vpack.c.b16 %v8358_v27, %v8356_v25  ;;  %v477_v12 = vunpack.c.l.b16 %v346_v53 }
  0x3f   : > { %2156 = vmatmul.bf16.gmra.mxu1 %v1251_v37  ;;  %2576 = vmatpush.bf16.msrb.mxu0 %v7429_v45  ;;  %v1259_v37 = vpack.c.b16 %v8236_v21, %v8208_v7  ;;  %v855_v7 = vrot.slane %v853_v39, 1  ;;  %v268_v45 = vld [vmem:[%s8114_s16 + $0x70] sm:$0xff]  ;;  %11676 = vst [vmem:[#allocation23_spill] sm:$0xff] %v8391_v23 }
  0x40   : > { %v1260_v4 = vpack.c.b16 %v11459_v20, %v984_v18  ;;  %11675 = vst [vmem:[#allocation22_spill] sm:$0xff] %v8377_v26  ;;  %v8381_v51 = vunpack.c.l.b16 %v344_v35  ;;  %v628_v0 = vshll.u32 %v8377_v26, 16  ;;  %v349_v18 = vpack.c.bf16 %v269_v56, %v269_v56 }
  0x41   : > { %v856_v61 = vor.u32 %v855_v7, %v851_v49  ;;  %v626_v35 = vshrl.u32 %v8377_v26, 16  ;;  %v872_v24 = vrot.slane %v8377_v26, 1 }
  0x42   : > { %7899 = vmatpush.bf16.msrb.mxu3 %v8198_v63  ;;  %v8351_v63 = vunpack.c.l.b16 %v870_v57  ;;  %v345_v57 = vpack.c.bf16 %v265_v17, %v265_v17 }
  0x43   : > { %v8394_v39 = vsel %vm594_vm0, %v856_v61, %v860_v62 }
  0x44   : > { %11673 = vst [vmem:[#allocation20_spill] sm:$0xff] %v8351_v63  ;;  %v542_v52 = vunpack.c.l.b16 %v345_v57  ;;  %v630_v57 = vrot.slane %v628_v0, 1  ;;  %v1078_v49 = vunpack.c.l.b16 %v8394_v39  ;;  %v1080_v11 = vunpack.c.h.b16 %v8394_v39 }
  0x45   : > { %11677 = vst [vmem:[#allocation24_spill] sm:$0xff] %v8394_v39 }
  0x46   : > { %7900 = vmatpush.bf16.msrb.mxu3 %v8228_v15  ;;  %v1261_v15 = vpack.c.b16 %v8351_v63, %v985_v59  ;;  %v563_v3 = vpack.c.b16 %v542_v52, %v8381_v51  ;;  %v348_v59 = vpack.c.bf16 %v268_v45, %v268_v45  ;;  %v631_v50 = vor.u32 %v630_v57, %v626_v35 }
  0x48   : > { %v8400_v38 = vunpack.c.l.b16 %v348_v59  ;;  %v873_v7 = vrot.slane %v563_v3, 1  ;;  %v637_v35 = vshrl.u32 %v563_v3, 16 }
  0x4a   : > { %7901 = vmatpush.bf16.msrb.mxu3 %v8252_v30  ;;  %v347_v30 = vpack.c.bf16 %v267_v43, %v267_v43  ;;  %v543_v43 = vunpack.c.l.b16 %v349_v18  ;;  %v8412_v56 = vsel %vm865_vm1, %v872_v24, %v873_v7  ;;  %v862_v18 = vshrl.u32 %v8361_v31, 16 }
  0x4b   : > { %11679 = vst [vmem:[#allocation26_spill] sm:$0xff] %v8412_v56 }
  0x4c   : > { %2017 = vmatmul.bf16.gmra.mxu0 %v1259_v37  ;;  %v8389_v17 = vunpack.c.l.b16 %v347_v30  ;;  %v633_v37 = vshll.u32 %v563_v3, 16  ;;  %v565_v53 = vpack.c.b16 %v543_v43, %v8400_v38  ;;  %v8424_v24 = vor.u32 %v862_v18, %v860_v62 }
  0x4d   : > { %2271 = vmatmul.bf16.gmra.mxu3 %v8371_v48  ;;  %v8436_v3 = vunpack.c.l.b16 %v873_v7  ;;  %v276_v48 = vld [vmem:[%s8114_s16 + $0xb0] sm:$0xff] }
  0x4e   : > { %2305 = vmatmul.bf16.gmra.mxu2 %v1261_v15  ;;  %v8398_v15 = vpack.c.b16 %v8389_v17, %v477_v12  ;;  %v635_v52 = vrot.slane %v633_v37, 1  ;;  %v648_v59 = vshll.u32 %v565_v53, 16  ;;  %v876_v37 = vrot.slane %v565_v53, 1  ;;  %11681 = vst [vmem:[#allocation28_spill] sm:$0xff] %v8424_v24 }
  0x4f   : > { %2161 = vmatmul.bf16.gmra.mxu1 %v1260_v4  ;;  %v11454_v4 = vunpack.c.l.b16 %v8391_v23  ;;  %v11457_v22 = vunpack.c.l.b16 %v8424_v24  ;;  %11685 = vst [vmem:[#allocation32_spill] sm:$0xff] %v8436_v3  ;;  %v275_v24 = vld [vmem:[%s8114_s16 + $0xa8] sm:$0xff] }
  0x50   : > { %v643_v30 = vshll.u32 %v8398_v15, 16  ;;  %v8415_v46 = vsel %vm594_vm0, %v631_v50, %v635_v52  ;;  %v641_v61 = vshrl.u32 %v8398_v15, 16  ;;  %v875_v57 = vrot.slane %v8398_v15, 1 }
  0x51   : > { %v8409_v45 = vpack.c.b16 %v1078_v49, %v11454_v4  ;;  %11680 = vst [vmem:[#allocation27_spill] sm:$0xff] %v8415_v46  ;;  %v650_v49 = vrot.slane %v648_v59, 1  ;;  %v8426_v50 = vor.u32 %v637_v35, %v635_v52  ;;  %v8446_v59 = vpack.c.b16 %v11457_v22, %v1080_v11 }
  0x52   : > { %v645_v0 = vrot.slane %v643_v30, 1  ;;  %v8429_v30 = vsel %vm865_vm1, %v875_v57, %v876_v37  ;;  %v652_v35 = vshrl.u32 %v565_v53, 16  ;;  %v911_v11 = vrot.slane %v8163_v42, 1  ;;  %v7428_v57 = vld [vmem:[%s11449_s1 + $0x128] sm:$0xff] }
  0x53   : > { %11678 = vst [vmem:[#allocation25_spill] sm:$0xff] %v8409_v45  ;;  %v11458_v62 = vunpack.c.l.b16 %v8426_v50  ;;  %2577 = vmatpush.bf16.msrb.mxu0 %v7428_v57  ;;  %v8475_v8 = vunpack.c.l.b16 %v876_v37  ;;  %v274_v37 = vld [vmem:[%s8114_s16 + $0xa0] sm:$0xff] }
  0x54   : > { %v646_v43 = vor.u32 %v645_v0, %v641_v61  ;;  %11682 = vst [vmem:[#allocation29_spill] sm:$0xff] %v8426_v50  ;;  %v995_v61 = vunpack.c.l.b16 %v8429_v30  ;;  %v8442_v0 = vpack.c.b16 %v477_v12, %v8381_v51  ;;  %v912_v12 = vrot.slane %v8175_v47, 1  ;;  %v273_v47 = vld [vmem:[%s8114_s16 + $0x98] sm:$0xff] }
  0x55   : > { %11683 = vst [vmem:[#allocation30_spill] sm:$0xff] %v8429_v30  ;;  %v8467_v22 = vor.u32 %v652_v35, %v650_v49  ;;  %v354_v2 = vpack.c.bf16 %v274_v37, %v274_v37  ;;  %v357_v37 = vpack.c.bf16 %v277_v14, %v277_v14 }
  0x56   : > { %v8432_v4 = vsel %vm594_vm0, %v646_v43, %v650_v49  ;;  %11686 = vst [vmem:[#allocation33_spill] sm:$0xff] %v8442_v0  ;;  %v8449_v18 = vpack.c.b16 %v995_v61, %v8436_v3  ;;  %v270_v43 = vld [vmem:[%s8114_s16 + $0x80] sm:$0xff]  ;;  %v271_v61 = vld [vmem:[%s8114_s16 + $0x88] sm:$0xff]  ;;  %v8470_v53 = vsel %vm865_vm1, %v911_v11, %v912_v12 }
  0x57   : > { %11684 = vst [vmem:[#allocation31_spill] sm:$0xff] %v8432_v4  ;;  %v994_v52 = vunpack.c.l.b16 %v8432_v4  ;;  %v351_v20 = vpack.c.bf16 %v271_v61, %v271_v61  ;;  %v1067_v49 = vunpack.c.l.b16 %v8470_v53  ;;  %v996_v35 = vunpack.c.h.b16 %v8432_v4 }
  0x58   : > { %11687 = vst [vmem:[#allocation34_spill] sm:$0xff] %v8446_v59  ;;  %v11473_v11 = vunpack.c.l.b16 %v8467_v22 }
  0x59   : > { %11688 = vst [vmem:[#allocation35_spill] sm:$0xff] %v8449_v18  ;;  %v8453_v7 = vpack.c.b16 %v994_v52, %v11458_v62  ;;  %v11466_v52 = vrot.slane %v8159_v41, 1  ;;  %v350_v62 = vpack.c.bf16 %v270_v43, %v270_v43  ;;  %v8486_v43 = vunpack.c.l.b16 %v351_v20 }
  0x5a   : > { %11690 = vst [vmem:[#allocation37_spill] sm:$0xff] %v8467_v22 }
  0x5b   : > { %11689 = vst [vmem:[#allocation36_spill] sm:$0xff] %v8453_v7  ;;  %v8479_v57 = vunpack.c.l.b16 %v11466_v52  ;;  %v8484_v40 = vunpack.c.l.b16 %v350_v62  ;;  %v8492_v52 = vpack.c.b16 %v8400_v38, %v8389_v17  ;;  %v8502_v62 = vpack.c.b16 %v11473_v11, %v996_v35 }
  0x5c   : > { %2022 = vmatmul.bf16.gmra.mxu0 %v8377_v26  ;;  %11691 = vst [vmem:[#allocation38_spill] sm:$0xff] %v8470_v53  ;;  %v355_v17 = vpack.c.bf16 %v275_v24, %v275_v24  ;;  %v483_v35 = vunpack.c.l.b16 %v354_v2 }
  0x5d   : > { %2276 = vmatmul.bf16.gmra.mxu3 %v8409_v45  ;;  %v997_v45 = vunpack.c.h.b16 %v8429_v30  ;;  %11692 = vst [vmem:[#allocation39_spill] sm:$0xff] %v8475_v8  ;;  %v8498_v23 = vpack.c.b16 %v1067_v49, %v8479_v57  ;;  %v8506_v20 = vpack.c.b16 %v8486_v43, %v8484_v40 }
  0x5e   : > { %2310 = vmatmul.bf16.gmra.mxu2 %v8412_v56  ;;  %11693 = vst [vmem:[#allocation40_spill] sm:$0xff] %v8479_v57  ;;  %v299_v56 = vld [vmem:[%s8114_s16 + $0x168] sm:$0xff] }
  0x5f   : > { %2166 = vmatmul.bf16.gmra.mxu1 %v8415_v46  ;;  %11694 = vst [vmem:[#allocation41_spill] sm:$0xff] %v8492_v52  ;;  %v8495_v39 = vpack.c.b16 %v8475_v8, %v997_v45  ;;  %v658_v49 = vshll.u32 %v8506_v20, 16  ;;  %v656_v24 = vshrl.u32 %v8506_v20, 16  ;;  %v878_v2 = vrot.slane %v8506_v20, 1  ;;  %v284_v8 = vld [vmem:[%s8114_s16 + $0xf0] sm:$0xff]  ;;  %v291_v46 = vld [vmem:[%s8114_s16 + $0x128] sm:$0xff] }
  0x60   : > { %11696 = vst [vmem:[#allocation43_spill] sm:$0xff] %v8498_v23  ;;  %v371_v3 = vpack.c.bf16 %v291_v46, %v291_v46  ;;  %v379_v1 = vpack.c.bf16 %v299_v56, %v299_v56 }
  0x61   : > { %11695 = vst [vmem:[#allocation42_spill] sm:$0xff] %v8495_v39  ;;  %v660_v11 = vrot.slane %v658_v49, 1 }
  0x62   : > { %11697 = vst [vmem:[#allocation44_spill] sm:$0xff] %v8502_v62 }
  0x63   : > { %11698 = vst [vmem:[#allocation45_spill] sm:$0xff] %v8506_v20 }
  0x6c   : > { %2027 = vmatmul.bf16.gmra.mxu0 %v8442_v0 }
  0x6d   : > { %2281 = vmatmul.bf16.gmra.mxu3 %v8446_v59  ;;  %v272_v59 = vld [vmem:[%s8114_s16 + $0x90] sm:$0xff] }
  0x6e   : > { %2315 = vmatmul.bf16.gmra.mxu2 %v8449_v18  ;;  %v352_v61 = vpack.c.bf16 %v272_v59, %v272_v59  ;;  %v353_v18 = vpack.c.bf16 %v273_v47, %v273_v47 }
  0x6f   : > { %2171 = vmatmul.bf16.gmra.mxu1 %v8453_v7  ;;  %v661_v7 = vor.u32 %v660_v11, %v656_v24 }
  0x70   : > { %v8508_v59 = vunpack.c.l.b16 %v352_v61  ;;  %v544_v47 = vunpack.c.l.b16 %v353_v18  ;;  %v8518_v61 = vunpack.c.l.b16 %v355_v17  ;;  %v356_v18 = vpack.c.bf16 %v276_v48, %v276_v48 }
  0x72   : > { %v567_v45 = vpack.c.b16 %v544_v47, %v8508_v59  ;;  %v8522_v57 = vpack.c.b16 %v8518_v61, %v483_v35  ;;  %v8527_v47 = vunpack.c.l.b16 %v912_v12  ;;  %v1278_v26 = vpack.c.b16 %v8508_v59, %v8486_v43 }
  0x74   : > { %v663_v10 = vshll.u32 %v567_v45, 16  ;;  %11699 = vst [vmem:[#allocation46_spill] sm:$0xff] %v8527_v47  ;;  %v879_v17 = vrot.slane %v567_v45, 1  ;;  %v673_v49 = vshll.u32 %v8522_v57, 16  ;;  %v671_v12 = vshrl.u32 %v8522_v57, 16 }
  0x75   : > { %v667_v11 = vshrl.u32 %v567_v45, 16 }
  0x76   : > { %v665_v48 = vrot.slane %v663_v10, 1  ;;  %v7422_v10 = vld [vmem:[%s11449_s1 + $0xf8] sm:$0xff]  ;;  %v8561_v42 = vunpack.c.l.b16 %v879_v17 }
  0x77   : > { %2431 = vmatpush.bf16.msra.mxu3 %v7422_v10 }
  0x78   : > { %11706 = vst [vmem:[#allocation53_spill] sm:$0xff] %v8561_v42 }
  0x7c   : > { %2032 = vmatmul.bf16.gmra.mxu0 %v8492_v52 }
  0x7d   : > { %2405 = vmatmul.bf16.vlgmr.msrb.gmra.mxu3 %v8498_v23  ;;  %v8524_v23 = vunpack.c.l.b16 %v356_v18  ;;  %v8536_v18 = vsel %vm865_vm1, %v878_v2, %v879_v17  ;;  %v7421_v2 = vld [vmem:[%s11449_s1 + $0xf0] sm:$0xff]  ;;  %v8572_v17 = vpack.c.b16 %v483_v35, %v8508_v59 }
  0x7e   : > { %2320 = vmatmul.bf16.gmra.mxu2 %v8495_v39  ;;  %v545_v39 = vunpack.c.l.b16 %v357_v37  ;;  %11701 = vst [vmem:[#allocation48_spill] sm:$0xff] %v8536_v18  ;;  %v8539_v37 = vsel %vm594_vm0, %v661_v7, %v665_v48  ;;  %2432 = vmatpush.bf16.msra.mxu3 %v7421_v2  ;;  %v7418_v2 = vld [vmem:[%s11449_s1 + $0xd8] sm:$0xff] }
  0x7f   : > { %2176 = vmatmul.bf16.gmra.mxu1 %v8502_v62  ;;  %v1069_v62 = vunpack.c.h.b16 %v8470_v53  ;;  %11702 = vst [vmem:[#allocation49_spill] sm:$0xff] %v8539_v37  ;;  %v675_v53 = vrot.slane %v673_v49, 1 }
  0x80   : > { %v569_v14 = vpack.c.b16 %v545_v39, %v8524_v23  ;;  %v881_v39 = vrot.slane %v8522_v57, 1  ;;  %11707 = vst [vmem:[#allocation54_spill] sm:$0xff] %v8572_v17 }
  0x81   : > { %v8533_v16 = vpack.c.b16 %v8527_v47, %v1069_v62  ;;  %v676_v62 = vor.u32 %v675_v53, %v671_v12  ;;  %v914_v53 = vrot.slane %v8315_v28, 1  ;;  %v915_v12 = vrot.slane %v8323_v44, 1 }
  0x82   : > { %v678_v13 = vshll.u32 %v569_v14, 16  ;;  %v882_v7 = vrot.slane %v569_v14, 1  ;;  %v682_v35 = vshrl.u32 %v569_v14, 16  ;;  %v7417_v14 = vld [vmem:[%s11449_s1 + $0xd0] sm:$0xff] }
  0x83   : > { %11700 = vst [vmem:[#allocation47_spill] sm:$0xff] %v8533_v16 }
  0x84   : > { %v680_v24 = vrot.slane %v678_v13, 1  ;;  %v8554_v49 = vsel %vm865_vm1, %v881_v39, %v882_v7  ;;  %v7420_v13 = vld [vmem:[%s11449_s1 + $0xe8] sm:$0xff]  ;;  %v7419_v39 = vld [vmem:[%s11449_s1 + $0xe0] sm:$0xff] }
  0x85   : > { %11703 = vst [vmem:[#allocation50_spill] sm:$0xff] %v8554_v49  ;;  %v1007_v45 = vunpack.c.l.b16 %v8554_v49  ;;  %2433 = vmatpush.bf16.msra.mxu3 %v7420_v13  ;;  %v11494_v13 = vrot.slane %v8361_v31, 1 }
  0x86   : > { %v8559_v47 = vsel %vm594_vm0, %v676_v62, %v680_v24  ;;  %v8581_v62 = vsel %vm865_vm1, %v914_v53, %v915_v12  ;;  %v278_v53 = vld [vmem:[%s8114_s16 + $0xc0] sm:$0xff] }
  0x87   : > { %11705 = vst [vmem:[#allocation52_spill] sm:$0xff] %v8559_v47  ;;  %v1008_v22 = vunpack.c.h.b16 %v8559_v47 }
  0x88   : > { %11709 = vst [vmem:[#allocation56_spill] sm:$0xff] %v8581_v62 }
  0x89   : > { %2434 = vmatpush.bf16.msra.mxu3 %v7419_v39  ;;  %v8598_v39 = vor.u32 %v682_v35, %v680_v24  ;;  %v8611_v24 = vunpack.c.l.b16 %v882_v7  ;;  %v8613_v35 = vunpack.c.l.b16 %v915_v12  ;;  %v8628_v7 = vld [vmem:[%s11450_s2] ss:$0 sm:$0xff] }
  0x8a   : > { %v282_v12 = vld [vmem:[%s8114_s16 + $0xe0] sm:$0xff] }
  0x8b   : > { %11711 = vst [vmem:[#allocation58_spill] sm:$0xff] %v8598_v39 }
  0x8c   : > { %2037 = vmatmul.bf16.gmra.mxu0 %v8506_v20  ;;  %11713 = vst [vmem:[#allocation60_spill] sm:$0xff] %v8611_v24 }
  0x8d   : > { %2410 = vmatmul.bf16.gmra.mxu3 %v8533_v16  ;;  %v8556_v16 = vor.u32 %v667_v11, %v665_v48  ;;  %v1006_v48 = vunpack.c.l.b16 %v8559_v47  ;;  %v8578_v11 = vpack.c.b16 %v1007_v45, %v8561_v42  ;;  %v917_v45 = vrot.slane %v8344_v5, 1  ;;  %v281_v5 = vld [vmem:[%s8114_s16 + $0xd8] sm:$0xff]  ;;  %11714 = vst [vmem:[#allocation61_spill] sm:$0xff] %v8613_v35  ;;  %v283_v47 = vld [vmem:[%s8114_s16 + $0xe8] sm:$0xff] }
  0x8e   : > { %2325 = vmatmul.bf16.gmra.mxu2 %v8536_v18  ;;  %2435 = vmatpush.bf16.msra.mxu3 %v7418_v2  ;;  %v1009_v2 = vunpack.c.h.b16 %v8554_v49  ;;  %v361_v49 = vpack.c.bf16 %v281_v5, %v281_v5  ;;  %v7415_v5 = vld [vmem:[%s11449_s1 + $0xc0] sm:$0xff]  ;;  %v363_v4 = vpack.c.bf16 %v283_v47, %v283_v47 }
  0x8f   : > { %2181 = vmatmul.bf16.gmra.mxu1 %v8539_v37  ;;  %11704 = vst [vmem:[#allocation51_spill] sm:$0xff] %v8556_v16  ;;  %v11486_v10 = vunpack.c.l.b16 %v8556_v16 }
  0x90   : > { %11708 = vst [vmem:[#allocation55_spill] sm:$0xff] %v8578_v11 }
  0x91   : > { %v8585_v44 = vpack.c.b16 %v1006_v48, %v11486_v10  ;;  %v279_v48 = vld [vmem:[%s8114_s16 + $0xc8] sm:$0xff]  ;;  %v8606_v10 = vsel %vm865_vm1, %v917_v45, %v11494_v13  ;;  %v8634_v45 = vpack.c.b16 %v8524_v23, %v8518_v61 }
  0x92   : > { %11712 = vst [vmem:[#allocation59_spill] sm:$0xff] %v8606_v10  ;;  %2436 = vmatpush.bf16.msra.mxu3 %v7417_v14  ;;  %v1079_v16 = vunpack.c.l.b16 %v8606_v10 }
  0x93   : > { %11710 = vst [vmem:[#allocation57_spill] sm:$0xff] %v8585_v44 }
  0x94   : > { %11715 = vst [vmem:[#allocation62_spill] sm:$0xff] %v8634_v45 }
  0x9c   : > { %2042 = vmatmul.bf16.gmra.mxu0 %v8572_v17  ;;  %v285_v17 = vld [vmem:[%s8114_s16 + $0xf8] sm:$0xff] }
  0x9d   : > { %2415 = vmatmul.bf16.gmra.mxu3 %v8581_v62  ;;  %v359_v62 = vpack.c.bf16 %v279_v48, %v279_v48 }
  0x9e   : > { %2330 = vmatmul.bf16.gmra.mxu2 %v8578_v11  ;;  %v358_v11 = vpack.c.bf16 %v278_v53, %v278_v53  ;;  %v7416_v53 = vld [vmem:[%s11449_s1 + $0xc8] sm:$0xff] }
  0x9f   : > { %2186 = vmatmul.bf16.gmra.mxu1 %v8585_v44  ;;  %v280_v44 = vld [vmem:[%s8114_s16 + $0xd0] sm:$0xff]  ;;  %v8623_v13 = vunpack.c.l.b16 %v359_v62  ;;  %2437 = vmatpush.bf16.msra.mxu3 %v7416_v53  ;;  %v8640_v62 = vpack.c.b16 %v1079_v16, %v8613_v35  ;;  %v11718_v53 = vunpack.c.l.b16 %v8598_v39  ;;  %v362_v35 = vpack.c.bf16 %v282_v12, %v282_v12 }
  0xa0   : > { %v8621_v48 = vunpack.c.l.b16 %v358_v11  ;;  %v360_v14 = vpack.c.bf16 %v280_v44, %v280_v44  ;;  %v8637_v11 = vpack.c.b16 %v8611_v24, %v1009_v2  ;;  %v546_v2 = vunpack.c.l.b16 %v361_v49 }
  0xa1   : > { %11717 = vst [vmem:[#allocation64_spill] sm:$0xff] %v8640_v62  ;;  %v8647_v37 = vpack.c.b16 %v11718_v53, %v1008_v22  ;;  %v8667_v47 = vunpack.c.l.b16 %v362_v35  ;;  %v8669_v12 = vunpack.c.l.b16 %v363_v4 }
  0xa2   : > { %11716 = vst [vmem:[#allocation63_spill] sm:$0xff] %v8637_v11  ;;  %v8651_v42 = vpack.c.b16 %v8623_v13, %v8621_v48  ;;  %v8653_v61 = vunpack.c.l.b16 %v360_v14  ;;  %v7427_v14 = vld [vmem:[%s11449_s1 + $0x120] sm:$0xff] }
  0xa3   : > { %11719 = vst [vmem:[#allocation65_spill] sm:$0xff] %v8647_v37  ;;  %2438 = vmatpush.bf16.msra.mxu3 %v7415_v5  ;;  %v365_v5 = vpack.c.bf16 %v285_v17, %v285_v17  ;;  %2578 = vmatpush.bf16.msrb.mxu0 %v7427_v14  ;;  %v8679_v4 = vpack.c.b16 %v8669_v12, %v8667_v47  ;;  %v1081_v14 = vunpack.c.h.b16 %v8606_v10 }
  0xa4   : > { %11720 = vst [vmem:[#allocation66_spill] sm:$0xff] %v8651_v42  ;;  %v571_v22 = vpack.c.b16 %v546_v2, %v8653_v61  ;;  %v688_v49 = vshll.u32 %v8651_v42, 16  ;;  %v686_v2 = vshrl.u32 %v8651_v42, 16 }
  0xa5   : > { %v547_v17 = vunpack.c.l.b16 %v365_v5  ;;  %v703_v20 = vshll.u32 %v8679_v4, 16 }
  0xa7   : > { %v705_v10 = vrot.slane %v703_v20, 1 }
  0xa9   : > { %v2008_v44 = vpop.f32.mrf.mxu0 }
  0xaa   : > { %v2009_v24 = vadd.f32 %v8628_v7, %v2008_v44 }
  0xac   : > { %v2152_v16 = vpop.f32.mrf.mxu1  ;;  %2047 = vmatmul.bf16.gmra.mxu0 %v8634_v45 }
  0xad   : > { %v2153_v18 = vadd.f32 %v2152_v16, %v2009_v24  ;;  %2420 = vmatmul.bf16.gmra.mxu3 %v8640_v62  ;;  %v364_v24 = vpack.c.bf16 %v284_v8, %v284_v8 }
  0xae   : > { %2335 = vmatmul.bf16.gmra.mxu2 %v8637_v11  ;;  %v690_v11 = vrot.slane %v688_v49, 1  ;;  %v884_v49 = vrot.slane %v8651_v42, 1 }
  0xaf   : > { %2191 = vmatmul.bf16.gmra.mxu1 %v8647_v37  ;;  %v693_v37 = vshll.u32 %v571_v22, 16  ;;  %v8681_v8 = vunpack.c.l.b16 %v364_v24 }
  0xb0   : > { %v8671_v44 = vpop.f32.mrf.mxu3  ;;  %v691_v50 = vor.u32 %v690_v11, %v686_v2 }
  0xb1   : > { %11721 = vst [vmem:[#allocation67_spill] sm:$0xff] %v8671_v44  ;;  %v2296_v53 = vpop.f32.mrf.mxu2  ;;  %v2010_v62 = vpop.f32.mrf.mxu0  ;;  %v885_v44 = vrot.slane %v571_v22, 1  ;;  %v8690_v30 = vpack.c.b16 %v547_v17, %v8681_v8  ;;  %v701_v17 = vshrl.u32 %v8679_v4, 16 }
  0xb2   : > { %v8673_v16 = vadd.f32 %v2296_v53, %v2153_v18  ;;  %v2011_v39 = vadd.f32 %v8628_v7, %v2010_v62  ;;  %v11722_v18 = vrot.slane %v8361_v31, 1  ;;  %v695_v62 = vrot.slane %v693_v37, 1 }
  0xb4   : > { %v2154_v45 = vpop.f32.mrf.mxu1  ;;  %v8686_v53 = vunpack.c.l.b16 %v11722_v18  ;;  %v8701_v18 = vsel %vm865_vm1, %v884_v49, %v885_v44  ;;  %v8704_v11 = vsel %vm594_vm0, %v691_v50, %v695_v62  ;;  %v887_v50 = vrot.slane %v8679_v4, 1 }
  0xb5   : > { %v2155_v35 = vadd.f32 %v2154_v45, %v2011_v39  ;;  %11726 = vst [vmem:[#allocation71_spill] sm:$0xff] %v8701_v18  ;;  %v706_v49 = vor.u32 %v705_v10, %v701_v17  ;;  %v8728_v10 = vunpack.c.l.b16 %v885_v44 }
  0xb6   : > { %11723 = vst [vmem:[#allocation68_spill] sm:$0xff] %v8686_v53  ;;  %v8696_v39 = vpack.c.b16 %v8686_v53, %v1081_v14  ;;  %v888_v14 = vrot.slane %v8690_v30, 1 }
  0xb7   : > { %11727 = vst [vmem:[#allocation72_spill] sm:$0xff] %v8704_v11 }
  0xb8   : > { %v8693_v24 = vpop.f32.mrf.mxu3  ;;  %11725 = vst [vmem:[#allocation70_spill] sm:$0xff] %v8696_v39 }
  0xb9   : > { %11724 = vst [vmem:[#allocation69_spill] sm:$0xff] %v8693_v24  ;;  %v2298_v5 = vpop.f32.mrf.mxu2  ;;  %v2013_v31 = vpop.f32.mrf.mxu0  ;;  %v708_v24 = vshll.u32 %v8690_v30, 16 }
  0xba   : > { %v8698_v45 = vadd.f32 %v2298_v5, %v2155_v35  ;;  %v2014_v37 = vadd.f32 %v8628_v7, %v2013_v31  ;;  %v697_v35 = vshrl.u32 %v571_v22, 16  ;;  %11732 = vst [vmem:[#allocation77_spill] sm:$0xff] %v8728_v10 }
  0xbb   : > { %v710_v5 = vrot.slane %v708_v24, 1 }
  0xbc   : > { %v2157_v2 = vpop.f32.mrf.mxu1  ;;  %2052 = vmatmul.bf16.gmra.mxu0 %v8651_v42 }
  0xbd   : > { %v2158_v58 = vadd.f32 %v2157_v2, %v2014_v37  ;;  %2425 = vmatmul.bf16.gmra.mxu3 %v8696_v39  ;;  %v8719_v2 = vor.u32 %v697_v35, %v695_v62  ;;  %v8726_v22 = vsel %vm594_vm0, %v706_v49, %v710_v5 }
  0xbe   : > { %2340 = vmatmul.bf16.gmra.mxu2 %v8701_v18  ;;  %11731 = vst [vmem:[#allocation76_spill] sm:$0xff] %v8726_v22  ;;  %v1018_v17 = vunpack.c.l.b16 %v8726_v22 }
  0xbf   : > { %2196 = vmatmul.bf16.gmra.mxu1 %v8704_v11  ;;  %11729 = vst [vmem:[#allocation74_spill] sm:$0xff] %v8719_v2  ;;  %v8723_v11 = vsel %vm865_vm1, %v887_v50, %v888_v14  ;;  %v8737_v50 = vpack.c.b16 %v8667_v47, %v8653_v61  ;;  %v286_v47 = vld [vmem:[%s8114_s16 + $0x100] sm:$0xff] }
  0xc0   : > { %v8715_v31 = vpop.f32.mrf.mxu3  ;;  %11730 = vst [vmem:[#allocation75_spill] sm:$0xff] %v8723_v11  ;;  %v1019_v24 = vunpack.c.l.b16 %v8723_v11 }
  0xc1   : > { %11728 = vst [vmem:[#allocation73_spill] sm:$0xff] %v8715_v31  ;;  %v2301_v20 = vpop.f32.mrf.mxu2  ;;  %v2015_v37 = vpop.f32.mrf.mxu0 }
  0xc2   : > { %v8717_v53 = vadd.f32 %v2301_v20, %v2158_v58  ;;  %v2016_v39 = vadd.f32 %v8628_v7, %v2015_v37  ;;  %v11524_v58 = vunpack.c.l.b16 %v8719_v2  ;;  %11734 = vst [vmem:[#allocation79_spill] sm:$0xff] %v8737_v50  ;;  %v8742_v44 = vpack.c.b16 %v1019_v24, %v8728_v10  ;;  %v287_v24 = vld [vmem:[%s8114_s16 + $0x108] sm:$0xff]  ;;  %v289_v2 = vld [vmem:[%s8114_s16 + $0x118] sm:$0xff] }
  0xc4   : > { %v2159_v18 = vpop.f32.mrf.mxu1  ;;  %11735 = vst [vmem:[#allocation80_spill] sm:$0xff] %v8742_v44 }
  0xc5   : > { %v2160_v42 = vadd.f32 %v2159_v18, %v2016_v39  ;;  %v8746_v18 = vpack.c.b16 %v1018_v17, %v11524_v58  ;;  %v366_v58 = vpack.c.bf16 %v286_v47, %v286_v47 }
  0xc7   : > { %11736 = vst [vmem:[#allocation81_spill] sm:$0xff] %v8746_v18 }
  0xc8   : > { %v8733_v62 = vpop.f32.mrf.mxu3 }
  0xc9   : > { %11733 = vst [vmem:[#allocation78_spill] sm:$0xff] %v8733_v62  ;;  %v2303_v35 = vpop.f32.mrf.mxu2  ;;  %v2018_v39 = vpop.f32.mrf.mxu0 }
  0xca   : > { %v8739_v49 = vadd.f32 %v2303_v35, %v2160_v42  ;;  %v2019_v20 = vadd.f32 %v8628_v7, %v2018_v39  ;;  %v712_v42 = vshrl.u32 %v8690_v30, 16 }
  0xcc   : > { %v2162_v37 = vpop.f32.mrf.mxu1  ;;  %2057 = vmatmul.bf16.gmra.mxu0 %v8737_v50  ;;  %v8758_v39 = vor.u32 %v712_v42, %v710_v5  ;;  %v8766_v50 = vunpack.c.l.b16 %v888_v14  ;;  %v1020_v5 = vunpack.c.h.b16 %v8726_v22  ;;  %v8770_v42 = vunpack.c.l.b16 %v366_v58 }
  0xcd   : > { %v2163_v62 = vadd.f32 %v2162_v37, %v2019_v20  ;;  %2439 = vmatmul.bf16.vlgmr.msra.gmra.mxu3 %v8234_v19  ;;  %v367_v19 = vpack.c.bf16 %v287_v24, %v287_v24  ;;  %v8780_v14 = vpack.c.b16 %v8681_v8, %v8669_v12  ;;  %v1253_v58 = vpack.c.b16 %v8356_v25, %v8236_v21  ;;  %v292_v21 = vld [vmem:[%s8114_s16 + $0x130] sm:$0xff]  ;;  %v293_v25 = vld [vmem:[%s8114_s16 + $0x138] sm:$0xff] }
  0xce   : > { %2345 = vmatmul.bf16.gmra.mxu2 %v8742_v44  ;;  %11738 = vst [vmem:[#allocation83_spill] sm:$0xff] %v8758_v39  ;;  %v288_v44 = vld [vmem:[%s8114_s16 + $0x110] sm:$0xff]  ;;  %v373_v46 = vpack.c.bf16 %v293_v25, %v293_v25 }
  0xcf   : > { %2201 = vmatmul.bf16.gmra.mxu1 %v8746_v18  ;;  %v1021_v18 = vunpack.c.h.b16 %v8723_v11  ;;  %11739 = vst [vmem:[#allocation84_spill] sm:$0xff] %v8766_v50  ;;  %v8772_v47 = vunpack.c.l.b16 %v367_v19  ;;  %v368_v24 = vpack.c.bf16 %v288_v44, %v288_v44 }
  0xd0   : > { %v8756_v17 = vpop.f32.mrf.mxu3  ;;  %11741 = vst [vmem:[#allocation86_spill] sm:$0xff] %v8780_v14 }
  0xd1   : > { %11737 = vst [vmem:[#allocation82_spill] sm:$0xff] %v8756_v17  ;;  %v2306_v35 = vpop.f32.mrf.mxu2  ;;  %v2020_v37 = vpop.f32.mrf.mxu0 }
  0xd2   : > { %v8760_v20 = vadd.f32 %v2306_v35, %v2163_v62  ;;  %v2021_v30 = vadd.f32 %v8628_v7, %v2020_v37  ;;  %v11537_v62 = vunpack.c.l.b16 %v8758_v39  ;;  %v369_v35 = vpack.c.bf16 %v289_v2, %v289_v2  ;;  %v290_v37 = vld [vmem:[%s8114_s16 + $0x120] sm:$0xff] }
  0xd4   : > { %v2164_v31 = vpop.f32.mrf.mxu1  ;;  %v8789_v2 = vpack.c.b16 %v11537_v62, %v1020_v5  ;;  %v548_v12 = vunpack.c.l.b16 %v369_v35  ;;  %v372_v35 = vpack.c.bf16 %v292_v21, %v292_v21  ;;  %v549_v21 = vunpack.c.l.b16 %v373_v46 }
  0xd5   : > { %v2165_v10 = vadd.f32 %v2164_v31, %v2021_v30  ;;  %v8783_v31 = vpack.c.b16 %v8766_v50, %v1021_v18  ;;  %v8795_v30 = vpack.c.b16 %v8772_v47, %v8770_v42  ;;  %v370_v50 = vpack.c.bf16 %v290_v37, %v290_v37 }
  0xd6   : > { %11743 = vst [vmem:[#allocation88_spill] sm:$0xff] %v8789_v2 }
  0xd7   : > { %11742 = vst [vmem:[#allocation87_spill] sm:$0xff] %v8783_v31  ;;  %v8807_v5 = vunpack.c.l.b16 %v370_v50 }
  0xd8   : > { %v8774_v17 = vpop.f32.mrf.mxu3  ;;  %11744 = vst [vmem:[#allocation89_spill] sm:$0xff] %v8795_v30 }
  0xd9   : > { %11740 = vst [vmem:[#allocation85_spill] sm:$0xff] %v8774_v17  ;;  %v2308_v11 = vpop.f32.mrf.mxu2  ;;  %v2023_v19 = vpop.f32.mrf.mxu0  ;;  %v8797_v17 = vunpack.c.l.b16 %v368_v24  ;;  %v8809_v24 = vunpack.c.l.b16 %v371_v3  ;;  %v8821_v3 = vunpack.c.l.b16 %v372_v35 }
  0xda   : > { %v8791_v44 = vadd.f32 %v2308_v11, %v2165_v10  ;;  %v2024_v18 = vadd.f32 %v8628_v7, %v2023_v19  ;;  %v718_v10 = vshll.u32 %v8795_v30, 16 }
  0xdb   : > { %v575_v11 = vpack.c.b16 %v548_v12, %v8797_v17  ;;  %v8819_v50 = vpack.c.b16 %v8809_v24, %v8807_v5 }
  0xdc   : > { %v2167_v22 = vpop.f32.mrf.mxu1  ;;  %2062 = vmatmul.bf16.gmra.mxu0 %v8780_v14  ;;  %v720_v62 = vrot.slane %v718_v10, 1 }
  0xdd   : > { %v2168_v39 = vadd.f32 %v2167_v22, %v2024_v18  ;;  %2444 = vmatmul.bf16.gmra.mxu3 %v1253_v58  ;;  %v716_v18 = vshrl.u32 %v8795_v30, 16  ;;  %v733_v52 = vshll.u32 %v8819_v50, 16 }
  0xde   : > { %2350 = vmatmul.bf16.gmra.mxu2 %v8783_v31  ;;  %v723_v31 = vshll.u32 %v575_v11, 16 }
  0xdf   : > { %2206 = vmatmul.bf16.gmra.mxu1 %v8789_v2  ;;  %v721_v10 = vor.u32 %v720_v62, %v716_v18 }
  0xe0   : > { %v8811_v37 = vpop.f32.mrf.mxu3  ;;  %v725_v14 = vrot.slane %v723_v31, 1 }
  0xe1   : > { %11745 = vst [vmem:[#allocation90_spill] sm:$0xff] %v8811_v37  ;;  %v2311_v22 = vpop.f32.mrf.mxu2  ;;  %v2025_v58 = vpop.f32.mrf.mxu0  ;;  %v891_v37 = vrot.slane %v575_v11, 1 }
  0xe2   : > { %v8813_v19 = vadd.f32 %v2311_v22, %v2168_v39  ;;  %v2026_v12 = vadd.f32 %v8628_v7, %v2025_v58  ;;  %v7426_v39 = vld [vmem:[%s11449_s1 + $0x118] sm:$0xff]  ;;  %v890_v22 = vrot.slane %v8795_v30, 1  ;;  %v8828_v58 = vpack.c.b16 %v549_v21, %v8821_v3 }
  0xe3   : > { %2579 = vmatpush.bf16.msrb.mxu0 %v7426_v39  ;;  %v8841_v62 = vsel %vm594_vm0, %v721_v10, %v725_v14  ;;  %v731_v21 = vshrl.u32 %v8819_v50, 16  ;;  %v735_v39 = vrot.slane %v733_v52, 1 }
  0xe4   : > { %v2169_v2 = vpop.f32.mrf.mxu1  ;;  %v8838_v63 = vsel %vm865_vm1, %v890_v22, %v891_v37  ;;  %11748 = vst [vmem:[#allocation93_spill] sm:$0xff] %v8841_v62 }
  0xe5   : > { %v2170_v25 = vadd.f32 %v2169_v2, %v2026_v12  ;;  %v1262_v2 = vpack.c.b16 %v8381_v51, %v8358_v27  ;;  %11747 = vst [vmem:[#allocation92_spill] sm:$0xff] %v8838_v63  ;;  %v727_v27 = vshrl.u32 %v575_v11, 16  ;;  %v893_v51 = vrot.slane %v8819_v50, 1 }
  0xe6   : > { %v736_v22 = vor.u32 %v735_v39, %v731_v21  ;;  %v8864_v21 = vunpack.c.l.b16 %v891_v37 }
  0xe8   : > { %v8831_v9 = vpop.f32.mrf.mxu3  ;;  %11753 = vst [vmem:[#allocation98_spill] sm:$0xff] %v8864_v21 }
  0xe9   : > { %11746 = vst [vmem:[#allocation91_spill] sm:$0xff] %v8831_v9  ;;  %v2313_v35 = vpop.f32.mrf.mxu2  ;;  %v2028_v12 = vpop.f32.mrf.mxu0  ;;  %v738_v9 = vshll.u32 %v8828_v58, 16 }
  0xea   : > { %v8835_v46 = vadd.f32 %v2313_v35, %v2170_v25  ;;  %v2029_v31 = vadd.f32 %v8628_v7, %v2028_v12  ;;  %v894_v25 = vrot.slane %v8828_v58, 1 }
  0xeb   : > { %v740_v10 = vrot.slane %v738_v9, 1 }
  0xec   : > { %v2172_v18 = vpop.f32.mrf.mxu1  ;;  %2067 = vmatmul.bf16.gmra.mxu0 %v8795_v30 }
  0xed   : > { %v2173_v0 = vadd.f32 %v2172_v18, %v2029_v31  ;;  %2449 = vmatmul.bf16.gmra.mxu3 %v1262_v2  ;;  %v8855_v18 = vor.u32 %v727_v27, %v725_v14  ;;  %v8862_v11 = vsel %vm594_vm0, %v736_v22, %v740_v10 }
  0xee   : > { %2355 = vmatmul.bf16.gmra.mxu2 %v8838_v63  ;;  %11752 = vst [vmem:[#allocation97_spill] sm:$0xff] %v8862_v11  ;;  %v1030_v39 = vunpack.c.l.b16 %v8862_v11 }
  0xef   : > { %2211 = vmatmul.bf16.gmra.mxu1 %v8841_v62  ;;  %11750 = vst [vmem:[#allocation95_spill] sm:$0xff] %v8855_v18  ;;  %v8859_v62 = vsel %vm865_vm1, %v893_v51, %v894_v25  ;;  %v8873_v51 = vpack.c.b16 %v8807_v5, %v8797_v17  ;;  %v294_v5 = vld [vmem:[%s8114_s16 + $0x140] sm:$0xff] }
  0xf0   : > { %v8851_v35 = vpop.f32.mrf.mxu3  ;;  %11751 = vst [vmem:[#allocation96_spill] sm:$0xff] %v8859_v62  ;;  %v1031_v9 = vunpack.c.l.b16 %v8859_v62 }
  0xf1   : > { %11749 = vst [vmem:[#allocation94_spill] sm:$0xff] %v8851_v35  ;;  %v2316_v52 = vpop.f32.mrf.mxu2  ;;  %v2030_v31 = vpop.f32.mrf.mxu0 }
  0xf2   : > { %v8853_v12 = vadd.f32 %v2316_v52, %v2173_v0  ;;  %v2031_v2 = vadd.f32 %v8628_v7, %v2030_v31  ;;  %v11550_v0 = vunpack.c.l.b16 %v8855_v18  ;;  %11755 = vst [vmem:[#allocation100_spill] sm:$0xff] %v8873_v51  ;;  %v8878_v37 = vpack.c.b16 %v1031_v9, %v8864_v21  ;;  %v295_v9 = vld [vmem:[%s8114_s16 + $0x148] sm:$0xff]  ;;  %v297_v18 = vld [vmem:[%s8114_s16 + $0x158] sm:$0xff] }
  0xf4   : > { %v2174_v63 = vpop.f32.mrf.mxu1  ;;  %11756 = vst [vmem:[#allocation101_spill] sm:$0xff] %v8878_v37  ;;  %v8882_v52 = vpack.c.b16 %v1030_v39, %v11550_v0  ;;  %v374_v0 = vpack.c.bf16 %v294_v5, %v294_v5 }
  0xf5   : > { %v2175_v30 = vadd.f32 %v2174_v63, %v2031_v2 }
  0xf6   : > { %11757 = vst [vmem:[#allocation102_spill] sm:$0xff] %v8882_v52 }
  0xf8   : > { %v8869_v14 = vpop.f32.mrf.mxu3 }
  0xf9   : > { %11754 = vst [vmem:[#allocation99_spill] sm:$0xff] %v8869_v14  ;;  %v2318_v27 = vpop.f32.mrf.mxu2  ;;  %v2033_v63 = vpop.f32.mrf.mxu0 }
  0xfa   : > { %v8875_v22 = vadd.f32 %v2318_v27, %v2175_v30  ;;  %v2034_v31 = vadd.f32 %v8628_v7, %v2033_v63  ;;  %v742_v30 = vshrl.u32 %v8828_v58, 16 }
  0xfc   : > { %v2177_v2 = vpop.f32.mrf.mxu1  ;;  %2072 = vmatmul.bf16.gmra.mxu0 %v8873_v51  ;;  %v8894_v63 = vor.u32 %v742_v30, %v740_v10  ;;  %v8902_v51 = vunpack.c.l.b16 %v894_v25  ;;  %v1032_v10 = vunpack.c.h.b16 %v8862_v11  ;;  %v8906_v30 = vunpack.c.l.b16 %v374_v0 }
  0xfd   : > { %v2178_v14 = vadd.f32 %v2177_v2, %v2034_v31  ;;  %2454 = vmatmul.bf16.gmra.mxu3 %v8398_v15  ;;  %v375_v15 = vpack.c.bf16 %v295_v9, %v295_v9  ;;  %v8916_v25 = vpack.c.b16 %v8821_v3, %v8809_v24  ;;  %v1272_v0 = vpack.c.b16 %v8484_v40, %v8400_v38  ;;  %v300_v40 = vld [vmem:[%s8114_s16 + $0x170] sm:$0xff]  ;;  %v301_v38 = vld [vmem:[%s8114_s16 + $0x178] sm:$0xff] }
  0xfe   : > { %2360 = vmatmul.bf16.gmra.mxu2 %v8878_v37  ;;  %11759 = vst [vmem:[#allocation104_spill] sm:$0xff] %v8894_v63  ;;  %v296_v37 = vld [vmem:[%s8114_s16 + $0x150] sm:$0xff]  ;;  %v381_v56 = vpack.c.bf16 %v301_v38, %v301_v38 }
  0xff   : > { %2216 = vmatmul.bf16.gmra.mxu1 %v8882_v52  ;;  %v1033_v52 = vunpack.c.h.b16 %v8859_v62  ;;  %11760 = vst [vmem:[#allocation105_spill] sm:$0xff] %v8902_v51  ;;  %v8908_v5 = vunpack.c.l.b16 %v375_v15  ;;  %v376_v9 = vpack.c.bf16 %v296_v37, %v296_v37 }
 0x100   : > { %v8892_v39 = vpop.f32.mrf.mxu3  ;;  %11762 = vst [vmem:[#allocation107_spill] sm:$0xff] %v8916_v25 }
 0x101   : > { %11758 = vst [vmem:[#allocation103_spill] sm:$0xff] %v8892_v39  ;;  %v2321_v27 = vpop.f32.mrf.mxu2  ;;  %v2035_v2 = vpop.f32.mrf.mxu0 }
 0x102   : > { %v8896_v31 = vadd.f32 %v2321_v27, %v2178_v14  ;;  %v2036_v58 = vadd.f32 %v8628_v7, %v2035_v2  ;;  %v11564_v14 = vunpack.c.l.b16 %v8894_v63  ;;  %v377_v27 = vpack.c.bf16 %v297_v18, %v297_v18  ;;  %v298_v2 = vld [vmem:[%s8114_s16 + $0x160] sm:$0xff] }
 0x104   : > { %v2179_v35 = vpop.f32.mrf.mxu1  ;;  %v8925_v18 = vpack.c.b16 %v11564_v14, %v1032_v10  ;;  %v550_v24 = vunpack.c.l.b16 %v377_v27  ;;  %v380_v27 = vpack.c.bf16 %v300_v40, %v300_v40  ;;  %v551_v40 = vunpack.c.l.b16 %v381_v56 }
 0x105   : > { %v2180_v21 = vadd.f32 %v2179_v35, %v2036_v58  ;;  %v8919_v35 = vpack.c.b16 %v8902_v51, %v1033_v52  ;;  %v8931_v58 = vpack.c.b16 %v8908_v5, %v8906_v30  ;;  %v378_v51 = vpack.c.bf16 %v298_v2, %v298_v2 }
 0x106   : > { %11764 = vst [vmem:[#allocation109_spill] sm:$0xff] %v8925_v18 }
 0x107   : > { %11763 = vst [vmem:[#allocation108_spill] sm:$0xff] %v8919_v35  ;;  %v8943_v10 = vunpack.c.l.b16 %v378_v51 }
 0x108   : > { %v8910_v39 = vpop.f32.mrf.mxu3  ;;  %11765 = vst [vmem:[#allocation110_spill] sm:$0xff] %v8931_v58 }
 0x109   : > { %11761 = vst [vmem:[#allocation106_spill] sm:$0xff] %v8910_v39  ;;  %v2323_v62 = vpop.f32.mrf.mxu2  ;;  %v2038_v15 = vpop.f32.mrf.mxu0  ;;  %v8933_v39 = vunpack.c.l.b16 %v376_v9  ;;  %v8945_v9 = vunpack.c.l.b16 %v379_v1  ;;  %v8957_v1 = vunpack.c.l.b16 %v380_v27 }
 0x10a   : > { %v8927_v37 = vadd.f32 %v2323_v62, %v2180_v21  ;;  %v2039_v52 = vadd.f32 %v8628_v7, %v2038_v15  ;;  %v748_v21 = vshll.u32 %v8931_v58, 16 }
 0x10b   : > { %v579_v62 = vpack.c.b16 %v550_v24, %v8933_v39  ;;  %v8955_v51 = vpack.c.b16 %v8945_v9, %v8943_v10  ;;  %v8961_v55 = vpack.c.b16 %v551_v40, %v8957_v1 }
 0x10c   : > { %v2182_v11 = vpop.f32.mrf.mxu1  ;;  %2077 = vmatmul.bf16.gmra.mxu0 %v8916_v25  ;;  %v750_v14 = vrot.slane %v748_v21, 1 }
 0x10d   : > { %v2183_v63 = vadd.f32 %v2182_v11, %v2039_v52  ;;  %2459 = vmatmul.bf16.gmra.mxu3 %v1272_v0  ;;  %v746_v52 = vshrl.u32 %v8931_v58, 16  ;;  %v763_v21 = vshll.u32 %v8955_v51, 16  ;;  %v757_v59 = vshrl.u32 %v579_v62, 16 }
 0x10e   : > { %2365 = vmatmul.bf16.gmra.mxu2 %v8919_v35  ;;  %v753_v35 = vshll.u32 %v579_v62, 16 }
 0x10f   : > { %2221 = vmatmul.bf16.gmra.mxu1 %v8925_v18  ;;  %v765_v40 = vrot.slane %v763_v21, 1 }
 0x110   : > { %v8947_v2 = vpop.f32.mrf.mxu3  ;;  %v755_v25 = vrot.slane %v753_v35, 1 }
 0x111   : > { %11766 = vst [vmem:[#allocation111_spill] sm:$0xff] %v8947_v2  ;;  %v2326_v11 = vpop.f32.mrf.mxu2  ;;  %v2040_v0 = vpop.f32.mrf.mxu0  ;;  %v896_v2 = vrot.slane %v8931_v58, 1 }
 0x112   : > { %v8949_v15 = vadd.f32 %v2326_v11, %v2183_v63  ;;  %v2041_v24 = vadd.f32 %v8628_v7, %v2040_v0  ;;  %v897_v63 = vrot.slane %v579_v62, 1  ;;  %v751_v11 = vor.u32 %v750_v14, %v746_v52 }
 0x114   : > { %v2184_v18 = vpop.f32.mrf.mxu1  ;;  %v8974_v14 = vsel %vm594_vm0, %v751_v11, %v755_v25 }
 0x115   : > { %v2185_v38 = vadd.f32 %v2184_v18, %v2041_v24  ;;  %v8971_v18 = vsel %vm865_vm1, %v896_v2, %v897_v63  ;;  %11769 = vst [vmem:[#allocation114_spill] sm:$0xff] %v8974_v14  ;;  %v761_v24 = vshrl.u32 %v8955_v51, 16  ;;  %v899_v2 = vrot.slane %v8955_v51, 1 }
 0x116   : > { %11768 = vst [vmem:[#allocation113_spill] sm:$0xff] %v8971_v18 }
 0x117   : > { %v766_v11 = vor.u32 %v765_v40, %v761_v24 }
 0x118   : > { %v8964_v0 = vpop.f32.mrf.mxu3 }
 0x119   : > { %11767 = vst [vmem:[#allocation112_spill] sm:$0xff] %v8964_v0  ;;  %v2328_v6 = vpop.f32.mrf.mxu2  ;;  %v2043_v56 = vpop.f32.mrf.mxu0  ;;  %v768_v0 = vshll.u32 %v8961_v55, 16 }
 0x11a   : > { %v8968_v27 = vadd.f32 %v2328_v6, %v2185_v38  ;;  %v2044_v35 = vadd.f32 %v8628_v7, %v2043_v56  ;;  %v7425_v6 = vld [vmem:[%s11449_s1 + $0x110] sm:$0xff]  ;;  %v900_v38 = vrot.slane %v8961_v55, 1 }
 0x11b   : > { %v770_v21 = vrot.slane %v768_v0, 1  ;;  %2580 = vmatpush.bf16.msrb.mxu0 %v7425_v6  ;;  %v9000_v0 = vunpack.c.l.b16 %v897_v63 }
 0x11c   : > { %v2187_v52 = vpop.f32.mrf.mxu1  ;;  %2082 = vmatmul.bf16.gmra.mxu0 %v8931_v58  ;;  %v8995_v62 = vsel %vm865_vm1, %v899_v2, %v900_v38  ;;  %v307_v58 = vld [vmem:[%s8114_s16 + $0x1a8] sm:$0xff] }
 0x11d   : > { %v2188_v43 = vadd.f32 %v2187_v52, %v2044_v35  ;;  %2464 = vmatmul.bf16.gmra.mxu3 %v1278_v26  ;;  %v8991_v52 = vor.u32 %v757_v59, %v755_v25  ;;  %11772 = vst [vmem:[#allocation117_spill] sm:$0xff] %v8995_v62  ;;  %v1043_v40 = vunpack.c.l.b16 %v8995_v62  ;;  %v9009_v59 = vpack.c.b16 %v8943_v10, %v8933_v39 }
 0x11e   : > { %2370 = vmatmul.bf16.gmra.mxu2 %v8971_v18  ;;  %11774 = vst [vmem:[#allocation119_spill] sm:$0xff] %v9000_v0  ;;  %v772_v10 = vshrl.u32 %v8961_v55, 16 }
 0x11f   : > { %2226 = vmatmul.bf16.gmra.mxu1 %v8974_v14  ;;  %11771 = vst [vmem:[#allocation116_spill] sm:$0xff] %v8991_v52  ;;  %v8998_v14 = vsel %vm594_vm0, %v766_v11, %v770_v21  ;;  %v9014_v63 = vpack.c.b16 %v1043_v40, %v9000_v0  ;;  %v303_v40 = vld [vmem:[%s8114_s16 + $0x188] sm:$0xff] }
 0x120   : > { %v8987_v56 = vpop.f32.mrf.mxu3  ;;  %11773 = vst [vmem:[#allocation118_spill] sm:$0xff] %v8998_v14  ;;  %v1042_v6 = vunpack.c.l.b16 %v8998_v14 }
 0x121   : > { %11770 = vst [vmem:[#allocation115_spill] sm:$0xff] %v8987_v56  ;;  %v2331_v54 = vpop.f32.mrf.mxu2  ;;  %v2045_v35 = vpop.f32.mrf.mxu0 }
 0x122   : > { %v8989_v29 = vadd.f32 %v2331_v54, %v2188_v43  ;;  %v2046_v26 = vadd.f32 %v8628_v7, %v2045_v35  ;;  %v11578_v54 = vunpack.c.l.b16 %v8991_v52  ;;  %11776 = vst [vmem:[#allocation121_spill] sm:$0xff] %v9009_v59  ;;  %v305_v52 = vld [vmem:[%s8114_s16 + $0x198] sm:$0xff] }
 0x123   : > { %11777 = vst [vmem:[#allocation122_spill] sm:$0xff] %v9014_v63 }
 0x124   : > { %v2189_v18 = vpop.f32.mrf.mxu1  ;;  %v9018_v11 = vpack.c.b16 %v1042_v6, %v11578_v54 }
 0x125   : > { %v2190_v24 = vadd.f32 %v2189_v18, %v2046_v26 }
 0x126   : > { %11778 = vst [vmem:[#allocation123_spill] sm:$0xff] %v9018_v11 }
 0x128   : > { %v9005_v25 = vpop.f32.mrf.mxu3 }
 0x129   : > { %11775 = vst [vmem:[#allocation120_spill] sm:$0xff] %v9005_v25  ;;  %v2333_v43 = vpop.f32.mrf.mxu2  ;;  %v2048_v18 = vpop.f32.mrf.mxu0 }
 0x12a   : > { %v9011_v2 = vadd.f32 %v2333_v43, %v2190_v24  ;;  %v2049_v35 = vadd.f32 %v8628_v7, %v2048_v18  ;;  %v302_v24 = vld [vmem:[%s8114_s16 + $0x180] sm:$0xff]  ;;  %v9030_v18 = vor.u32 %v772_v10, %v770_v21  ;;  %v1044_v21 = vunpack.c.h.b16 %v8998_v14 }
 0x12b   : > { %v382_v54 = vpack.c.bf16 %v302_v24, %v302_v24 }
 0x12c   : > { %v2192_v26 = vpop.f32.mrf.mxu1  ;;  %2087 = vmatmul.bf16.gmra.mxu0 %v9009_v59  ;;  %11780 = vst [vmem:[#allocation125_spill] sm:$0xff] %v9030_v18  ;;  %v9038_v59 = vunpack.c.l.b16 %v900_v38  ;;  %v9052_v38 = vpack.c.b16 %v8957_v1, %v8945_v9 }
 0x12d   : > { %v2193_v25 = vadd.f32 %v2192_v26, %v2049_v35  ;;  %2469 = vmatmul.bf16.gmra.mxu3 %v8522_v57  ;;  %v383_v57 = vpack.c.bf16 %v303_v40, %v303_v40  ;;  %v9042_v10 = vunpack.c.l.b16 %v382_v54  ;;  %v1288_v54 = vpack.c.b16 %v8621_v48, %v8524_v23  ;;  %v308_v23 = vld [vmem:[%s8114_s16 + $0x1b0] sm:$0xff]  ;;  %v309_v48 = vld [vmem:[%s8114_s16 + $0x1b8] sm:$0xff] }
 0x12e   : > { %2375 = vmatmul.bf16.gmra.mxu2 %v9014_v63  ;;  %v304_v63 = vld [vmem:[%s8114_s16 + $0x190] sm:$0xff]  ;;  %11782 = vst [vmem:[#allocation127_spill] sm:$0xff] %v9038_v59 }
 0x12f   : > { %2231 = vmatmul.bf16.gmra.mxu1 %v9018_v11  ;;  %v1045_v11 = vunpack.c.h.b16 %v8995_v62  ;;  %11783 = vst [vmem:[#allocation128_spill] sm:$0xff] %v9042_v10  ;;  %v9044_v24 = vunpack.c.l.b16 %v383_v57  ;;  %v384_v40 = vpack.c.bf16 %v304_v63, %v304_v63 }
 0x130   : > { %v9028_v6 = vpop.f32.mrf.mxu3  ;;  %11786 = vst [vmem:[#allocation131_spill] sm:$0xff] %v9052_v38 }
 0x131   : > { %11779 = vst [vmem:[#allocation124_spill] sm:$0xff] %v9028_v6  ;;  %v2336_v43 = vpop.f32.mrf.mxu2  ;;  %v2050_v26 = vpop.f32.mrf.mxu0 }
 0x132   : > { %v9032_v35 = vadd.f32 %v2336_v43, %v2193_v25  ;;  %v2051_v55 = vadd.f32 %v8628_v7, %v2050_v26  ;;  %v11589_v25 = vunpack.c.l.b16 %v9030_v18  ;;  %11784 = vst [vmem:[#allocation129_spill] sm:$0xff] %v9044_v24  ;;  %v385_v43 = vpack.c.bf16 %v305_v52, %v305_v52  ;;  %v306_v26 = vld [vmem:[%s8114_s16 + $0x1a0] sm:$0xff] }
 0x134   : > { %11781 = vst [vmem:[#allocation126_spill] sm:$0xff] %v9032_v35  ;;  %v2194_v56 = vpop.f32.mrf.mxu1  ;;  %v9061_v52 = vpack.c.b16 %v11589_v25, %v1044_v21  ;;  %v552_v9 = vunpack.c.l.b16 %v385_v43  ;;  %v387_v35 = vpack.c.bf16 %v307_v58, %v307_v58  ;;  %v388_v43 = vpack.c.bf16 %v308_v23, %v308_v23 }
 0x135   : > { %v2195_v0 = vadd.f32 %v2194_v56, %v2051_v55  ;;  %v9055_v56 = vpack.c.b16 %v9038_v59, %v1045_v11  ;;  %v9067_v55 = vpack.c.b16 %v9044_v24, %v9042_v10  ;;  %v386_v59 = vpack.c.bf16 %v306_v26, %v306_v26 }
 0x136   : > { %11788 = vst [vmem:[#allocation133_spill] sm:$0xff] %v9061_v52  ;;  %v389_v58 = vpack.c.bf16 %v309_v48, %v309_v48 }
 0x137   : > { %11787 = vst [vmem:[#allocation132_spill] sm:$0xff] %v9055_v56  ;;  %v9079_v21 = vunpack.c.l.b16 %v386_v59 }
 0x138   : > { %v9046_v6 = vpop.f32.mrf.mxu3  ;;  %11790 = vst [vmem:[#allocation135_spill] sm:$0xff] %v9067_v55  ;;  %v553_v23 = vunpack.c.l.b16 %v389_v58 }
 0x139   : > { %11785 = vst [vmem:[#allocation130_spill] sm:$0xff] %v9046_v6  ;;  %v2338_v62 = vpop.f32.mrf.mxu2  ;;  %v2053_v57 = vpop.f32.mrf.mxu0  ;;  %v9069_v6 = vunpack.c.l.b16 %v384_v40  ;;  %v9081_v40 = vunpack.c.l.b16 %v387_v35  ;;  %v9093_v35 = vunpack.c.l.b16 %v388_v43 }
 0x13a   : > { %v9063_v63 = vadd.f32 %v2338_v62, %v2195_v0  ;;  %v2054_v11 = vadd.f32 %v8628_v7, %v2053_v57  ;;  %v778_v0 = vshll.u32 %v9067_v55, 16 }
 0x13b   : > { %v583_v62 = vpack.c.b16 %v552_v9, %v9069_v6  ;;  %v9091_v59 = vpack.c.b16 %v9081_v40, %v9079_v21 }
 0x13c   : > { %11789 = vst [vmem:[#allocation134_spill] sm:$0xff] %v9063_v63  ;;  %v2197_v14 = vpop.f32.mrf.mxu1  ;;  %2092 = vmatmul.bf16.gmra.mxu0 %v9052_v38  ;;  %v780_v25 = vrot.slane %v778_v0, 1  ;;  %v1294_v63 = vpack.c.b16 %v8653_v61, %v8623_v13 }
 0x13d   : > { %v2198_v18 = vadd.f32 %v2197_v14, %v2054_v11  ;;  %2474 = vmatmul.bf16.gmra.mxu3 %v1288_v54  ;;  %v776_v11 = vshrl.u32 %v9067_v55, 16  ;;  %v793_v0 = vshll.u32 %v9091_v59, 16  ;;  %v787_v13 = vshrl.u32 %v583_v62, 16 }
 0x13e   : > { %2380 = vmatmul.bf16.gmra.mxu2 %v9055_v56  ;;  %v783_v56 = vshll.u32 %v583_v62, 16  ;;  %v905_v61 = vrot.slane %v9091_v59, 1 }
 0x13f   : > { %2236 = vmatmul.bf16.gmra.mxu1 %v9061_v52 }
 0x140   : > { %v9083_v26 = vpop.f32.mrf.mxu3  ;;  %v785_v38 = vrot.slane %v783_v56, 1 }
 0x141   : > { %11791 = vst [vmem:[#allocation136_spill] sm:$0xff] %v9083_v26  ;;  %v2341_v14 = vpop.f32.mrf.mxu2  ;;  %v2055_v54 = vpop.f32.mrf.mxu0  ;;  %v902_v26 = vrot.slane %v9067_v55, 1 }
 0x142   : > { %v9085_v57 = vadd.f32 %v2341_v14, %v2198_v18  ;;  %v2056_v9 = vadd.f32 %v8628_v7, %v2055_v54  ;;  %v903_v18 = vrot.slane %v583_v62, 1  ;;  %v781_v14 = vor.u32 %v780_v25, %v776_v11  ;;  %v7424_v62 = vld [vmem:[%s11449_s1 + $0x108] sm:$0xff] }
 0x143   : > { %2581 = vmatpush.bf16.msrb.mxu0 %v7424_v62 }
 0x144   : > { %11792 = vst [vmem:[#allocation137_spill] sm:$0xff] %v9085_v57  ;;  %v2199_v52 = vpop.f32.mrf.mxu1  ;;  %v9097_v57 = vpack.c.b16 %v553_v23, %v9093_v35  ;;  %v9110_v25 = vsel %vm594_vm0, %v781_v14, %v785_v38  ;;  %v795_v23 = vrot.slane %v793_v0, 1 }
 0x145   : > { %v2200_v48 = vadd.f32 %v2199_v52, %v2056_v9  ;;  %v9107_v52 = vsel %vm865_vm1, %v902_v26, %v903_v18  ;;  %11795 = vst [vmem:[#allocation140_spill] sm:$0xff] %v9110_v25  ;;  %v791_v9 = vshrl.u32 %v9091_v59, 16 }
 0x146   : > { %11794 = vst [vmem:[#allocation139_spill] sm:$0xff] %v9107_v52 }
 0x147   : > { %v796_v26 = vor.u32 %v795_v23, %v791_v9 }
 0x148   : > { %v9100_v54 = vpop.f32.mrf.mxu3 }
 0x149   : > { %11793 = vst [vmem:[#allocation138_spill] sm:$0xff] %v9100_v54  ;;  %v2343_v24 = vpop.f32.mrf.mxu2  ;;  %v2058_v58 = vpop.f32.mrf.mxu0  ;;  %v798_v54 = vshll.u32 %v9097_v57, 16 }
 0x14a   : > { %v9104_v43 = vadd.f32 %v2343_v24, %v2200_v48  ;;  %v2059_v56 = vadd.f32 %v8628_v7, %v2058_v58  ;;  %v906_v24 = vrot.slane %v9097_v57, 1 }
 0x14b   : > { %v800_v48 = vrot.slane %v798_v54, 1 }
 0x14c   : > { %v2202_v11 = vpop.f32.mrf.mxu1  ;;  %2097 = vmatmul.bf16.gmra.mxu0 %v9067_v55  ;;  %v9135_v9 = vsel %vm865_vm1, %v905_v61, %v906_v24 }
 0x14d   : > { %v2203_v10 = vadd.f32 %v2202_v11, %v2059_v56  ;;  %2479 = vmatmul.bf16.gmra.mxu3 %v1294_v63  ;;  %v9127_v63 = vor.u32 %v787_v13, %v785_v38  ;;  %11798 = vst [vmem:[#allocation143_spill] sm:$0xff] %v9135_v9  ;;  %v9138_v54 = vsel %vm594_vm0, %v796_v26, %v800_v48 }
 0x14e   : > { %2385 = vmatmul.bf16.gmra.mxu2 %v9107_v52  ;;  %11799 = vst [vmem:[#allocation144_spill] sm:$0xff] %v9138_v54  ;;  %v1054_v23 = vunpack.c.l.b16 %v9138_v54  ;;  %v9152_v26 = vpack.c.b16 %v9079_v21, %v9069_v6 }
 0x14f   : > { %2241 = vmatmul.bf16.gmra.mxu1 %v9110_v25  ;;  %11797 = vst [vmem:[#allocation142_spill] sm:$0xff] %v9127_v63  ;;  %v11601_v38 = vunpack.c.l.b16 %v9127_v63 }
 0x150   : > { %v2440_v14 = vpop.f32.mrf.mxu3  ;;  %11801 = vst [vmem:[#allocation146_spill] sm:$0xff] %v9152_v26 }
 0x151   : > { %v2346_v58 = vpop.f32.mrf.mxu2  ;;  %v9121_v0 = vadd.f32 %v2440_v14, %v8673_v16  ;;  %v9125_v11 = vpop.f32.mrf.mxu0  ;;  %v9140_v16 = vunpack.c.l.b16 %v903_v18  ;;  %v9159_v62 = vpack.c.b16 %v1054_v23, %v11601_v38 }
 0x152   : > { %v9123_v56 = vadd.f32 %v2346_v58, %v2203_v10  ;;  %v1055_v10 = vunpack.c.l.b16 %v9135_v9 }
 0x153   : > { %11796 = vst [vmem:[#allocation141_spill] sm:$0xff] %v9121_v0 }
 0x154   : > { %v9132_v25 = vpop.f32.mrf.mxu1  ;;  %11800 = vst [vmem:[#allocation145_spill] sm:$0xff] %v9140_v16  ;;  %v9155_v58 = vpack.c.b16 %v1055_v10, %v9140_v16  ;;  %v310_v10 = vld [vmem:[%s8114_s16 + $0x1c0] sm:$0xff]  ;;  %v1056_v16 = vunpack.c.h.b16 %v9138_v54 }
 0x155   : > { %11803 = vst [vmem:[#allocation148_spill] sm:$0xff] %v9159_v62  ;;  %v390_v38 = vpack.c.bf16 %v310_v10, %v310_v10 }
 0x156   : > { %11802 = vst [vmem:[#allocation147_spill] sm:$0xff] %v9155_v58 }
 0x158   : > { %v2442_v13 = vpop.f32.mrf.mxu3 }
 0x159   : > { %v9145_v14 = vpop.f32.mrf.mxu2  ;;  %v9148_v61 = vadd.f32 %v2442_v13, %v8698_v45  ;;  %v2063_v18 = vpop.f32.mrf.mxu0  ;;  %v802_v45 = vshrl.u32 %v9097_v57, 16  ;;  %v311_v13 = vld [vmem:[%s8114_s16 + $0x1c8] sm:$0xff]  ;;  %v9181_v57 = vunpack.c.l.b16 %v906_v24  ;;  %v1304_v24 = vpack.c.b16 %v8770_v42, %v8681_v8 }
 0x15a   : > { %v2064_v52 = vadd.f32 %v8628_v7, %v2063_v18 }
 0x15b   : > { %11805 = vst [vmem:[#allocation150_spill] sm:$0xff] %v9181_v57 }
 0x15c   : > { %v2207_v55 = vpop.f32.mrf.mxu1  ;;  %2102 = vmatmul.bf16.gmra.mxu0 %v9152_v26 }
 0x15d   : > { %v2208_v0 = vadd.f32 %v2207_v55, %v2064_v52  ;;  %2484 = vmatmul.bf16.gmra.mxu3 %v8679_v4  ;;  %v9176_v52 = vor.u32 %v802_v45, %v800_v48  ;;  %v9196_v45 = vpack.c.b16 %v9093_v35, %v9081_v40 }
 0x15e   : > { %2390 = vmatmul.bf16.gmra.mxu2 %v9155_v58  ;;  %v391_v58 = vpack.c.bf16 %v311_v13, %v311_v13 }
 0x15f   : > { %2246 = vmatmul.bf16.gmra.mxu1 %v9159_v62  ;;  %11804 = vst [vmem:[#allocation149_spill] sm:$0xff] %v9176_v52  ;;  %v1057_v62 = vunpack.c.h.b16 %v9135_v9  ;;  %v11607_v26 = vunpack.c.l.b16 %v9176_v52 }
 0x160   : > { %v2445_v21 = vpop.f32.mrf.mxu3  ;;  %11806 = vst [vmem:[#allocation151_spill] sm:$0xff] %v9196_v45 }
 0x161   : > { %v2351_v63 = vpop.f32.mrf.mxu2  ;;  %v9170_v23 = vadd.f32 %v2445_v21, %v8717_v53  ;;  %v9174_v55 = vpop.f32.mrf.mxu0  ;;  %v9185_v53 = vunpack.c.l.b16 %v390_v38  ;;  %v9201_v13 = vpack.c.b16 %v9181_v57, %v1057_v62  ;;  %v9205_v38 = vpack.c.b16 %v11607_v26, %v1056_v16 }
 0x162   : > { %v9172_v18 = vadd.f32 %v2351_v63, %v2208_v0  ;;  %v9187_v0 = vunpack.c.l.b16 %v391_v58 }
 0x163   : > { %11807 = vst [vmem:[#allocation152_spill] sm:$0xff] %v9201_v13 }
 0x164   : > { %v9178_v4 = vpop.f32.mrf.mxu1  ;;  %11808 = vst [vmem:[#allocation153_spill] sm:$0xff] %v9205_v38 }
 0x168   : > { %v2447_v63 = vpop.f32.mrf.mxu3 }
 0x169   : > { %v9189_v21 = vpop.f32.mrf.mxu2  ;;  %v9192_v48 = vadd.f32 %v2447_v63, %v8739_v49  ;;  %v2068_v10 = vpop.f32.mrf.mxu0  ;;  %v9210_v49 = vpack.c.b16 %v9187_v0, %v9185_v53 }
 0x16a   : > { %v2069_v58 = vadd.f32 %v8628_v7, %v2068_v10 }
 0x16b   : > { %11809 = vst [vmem:[#allocation154_spill] sm:$0xff] %v9210_v49  ;;  %v808_v8 = vshll.u32 %v9210_v49, 16 }
 0x16c   : > { %v2212_v54 = vpop.f32.mrf.mxu1  ;;  %2107 = vmatmul.bf16.gmra.mxu0 %v9196_v45 }
 0x16d   : > { %v2213_v40 = vadd.f32 %v2212_v54, %v2069_v58  ;;  %2489 = vmatmul.bf16.gmra.mxu3 %v1304_v24  ;;  %v806_v54 = vshrl.u32 %v9210_v49, 16  ;;  %v810_v24 = vrot.slane %v808_v8, 1  ;;  %v908_v58 = vrot.slane %v9210_v49, 1 }
 0x16e   : > { %2395 = vmatmul.bf16.gmra.mxu2 %v9201_v13 }
 0x16f   : > { %2251 = vmatmul.bf16.gmra.mxu1 %v9205_v38  ;;  %v811_v26 = vor.u32 %v810_v24, %v806_v54  ;;  %v11812_v54 = vrot.slane %v8159_v41, 1 }
 0x170   : > { %v2450_v42 = vpop.f32.mrf.mxu3 }
 0x171   : > { %v2356_v16 = vpop.f32.mrf.mxu2  ;;  %v9217_v62 = vadd.f32 %v2450_v42, %v8760_v20  ;;  %v9221_v63 = vpop.f32.mrf.mxu0  ;;  %v1310_v20 = vpack.c.b16 %v8797_v17, %v8772_v47  ;;  %v9237_v42 = vld [vmem:[%s11450_s2] ss:$0 sm:$0xff]  ;;  %v9243_v24 = vsel %vm865_vm1, %v908_v58, %v11812_v54 }
 0x172   : > { %v9219_v7 = vadd.f32 %v2356_v16, %v2213_v40  ;;  %11813 = vst [vmem:[#allocation157_spill] sm:$0xff] %v9243_v24 }
 0x173   : > { %11810 = vst [vmem:[#allocation155_spill] sm:$0xff] %v9217_v62  ;;  %v11848_v62 = vld [vmem:[#allocation32_spill] sm:$0xff] }
 0x174   : > { %v9223_v10 = vpop.f32.mrf.mxu1 }
 0x178   : > { %v2452_v13 = vpop.f32.mrf.mxu3 }
 0x179   : > { %v9227_v38 = vpop.f32.mrf.mxu2  ;;  %v9230_v52 = vadd.f32 %v2452_v13, %v8791_v44  ;;  %v2073_v40 = vpop.f32.mrf.mxu0  ;;  %v9247_v44 = vsel %vm594_vm0, %v811_v26, %v8192_v60  ;;  %v7446_v60 = vld [vmem:[%s11449_s1 + $0x1b8] sm:$0xff]  ;;  %v7423_v26 = vld [vmem:[%s11449_s1 + $0x100] sm:$0xff] }
 0x17a   : > { %v2074_v8 = vadd.f32 %v9237_v42, %v2073_v40  ;;  %11814 = vst [vmem:[#allocation158_spill] sm:$0xff] %v9247_v44  ;;  %2863 = vmatpush.bf16.msrb.mxu2 %v7446_v60  ;;  %2582 = vmatpush.bf16.msrb.mxu0 %v7423_v26 }
 0x17b   : > { %11811 = vst [vmem:[#allocation156_spill] sm:$0xff] %v9230_v52 }
 0x17c   : > { %v2217_v16 = vpop.f32.mrf.mxu1  ;;  %2112 = vmatmul.bf16.gmra.mxu0 %v9210_v49  ;;  %v7442_v49 = vld [vmem:[%s11449_s1 + $0x198] sm:$0xff] }
 0x17d   : > { %v2218_v13 = vadd.f32 %v2217_v16, %v2074_v8  ;;  %2494 = vmatmul.bf16.gmra.mxu3 %v1310_v20 }
 0x17e   : > { %2400 = vmatmul.bf16.gmra.mxu2 %v9243_v24 }
 0x17f   : > { %2256 = vmatmul.bf16.gmra.mxu1 %v9247_v44 }
 0x180   : > { %v2455_v17 = vpop.f32.mrf.mxu3 }
 0x181   : > { %v2361_v47 = vpop.f32.mrf.mxu2  ;;  %v9253_v40 = vadd.f32 %v2455_v17, %v8813_v19  ;;  %v9257_v58 = vpop.f32.mrf.mxu0  ;;  %v7438_v19 = vld [vmem:[%s11449_s1 + $0x178] sm:$0xff] }
 0x182   : > { %v9255_v41 = vadd.f32 %v2361_v47, %v2218_v13  ;;  %2719 = vmatpush.bf16.msrb.mxu1 %v7438_v19  ;;  %v9277_v13 = vpack.c.b16 %v8146_v33, %v8144_v32 }
 0x183   : > { %11815 = vst [vmem:[#allocation159_spill] sm:$0xff] %v9253_v40  ;;  %v11839_v40 = vld [vmem:[#allocation126_spill] sm:$0xff] }
 0x184   : > { %v9259_v54 = vpop.f32.mrf.mxu1  ;;  %11817 = vst [vmem:[#allocation161_spill] sm:$0xff] %v9277_v13 }
 0x188   : > { %v2457_v20 = vpop.f32.mrf.mxu3 }
 0x189   : > { %v9270_v8 = vpop.f32.mrf.mxu2  ;;  %v9273_v16 = vadd.f32 %v2457_v20, %v8835_v46  ;;  %v2078_v17 = vpop.f32.mrf.mxu0 }
 0x18a   : > { %v2079_v47 = vadd.f32 %v9237_v42, %v2078_v17 }
 0x18b   : > { %11816 = vst [vmem:[#allocation160_spill] sm:$0xff] %v9273_v16  ;;  %v11837_v16 = vld [vmem:[#allocation33_spill] sm:$0xff] }
 0x18c   : > { %v2222_v60 = vpop.f32.mrf.mxu1  ;;  %2117 = vmatmul.bf16.gmra.mxu0 %v9277_v13 }
 0x18d   : > { %v2223_v44 = vadd.f32 %v2222_v60, %v2079_v47  ;;  %2499 = vmatmul.bf16.gmra.mxu3 %v8819_v50  ;;  %v9298_v50 = vpack.c.b16 %v8150_v36, %v8148_v34 }
 0x18f   : > { %11820 = vst [vmem:[#allocation164_spill] sm:$0xff] %v9298_v50 }
 0x190   : > { %v2460_v26 = vpop.f32.mrf.mxu3 }
 0x191   : > { %v2366_v19 = vpop.f32.mrf.mxu2  ;;  %v9283_v57 = vadd.f32 %v2460_v26, %v8853_v12  ;;  %v9287_v20 = vpop.f32.mrf.mxu0  ;;  %v1320_v12 = vpack.c.b16 %v8906_v30, %v8821_v3 }
 0x192   : > { %v9285_v46 = vadd.f32 %v2366_v19, %v2223_v44 }
 0x193   : > { %11818 = vst [vmem:[#allocation162_spill] sm:$0xff] %v9283_v57 }
 0x194   : > { %v9289_v33 = vpop.f32.mrf.mxu1 }
 0x198   : > { %v2462_v24 = vpop.f32.mrf.mxu3 }
 0x199   : > { %v9291_v9 = vpop.f32.mrf.mxu2  ;;  %v9294_v17 = vadd.f32 %v2462_v24, %v8875_v22  ;;  %v2083_v47 = vpop.f32.mrf.mxu0  ;;  %v7445_v22 = vld [vmem:[%s11449_s1 + $0x1b0] sm:$0xff] }
 0x19a   : > { %v2084_v44 = vadd.f32 %v9237_v42, %v2083_v47  ;;  %2864 = vmatpush.bf16.msrb.mxu2 %v7445_v22  ;;  %v7444_v47 = vld [vmem:[%s11449_s1 + $0x1a8] sm:$0xff] }
 0x19b   : > { %11819 = vst [vmem:[#allocation163_spill] sm:$0xff] %v9294_v17 }
 0x19c   : > { %v2227_v60 = vpop.f32.mrf.mxu1  ;;  %2122 = vmatmul.bf16.gmra.mxu0 %v9298_v50  ;;  %v7435_v50 = vld [vmem:[%s11449_s1 + $0x160] sm:$0xff] }
 0x19d   : > { %v2228_v26 = vadd.f32 %v2227_v60, %v2084_v44  ;;  %2504 = vmatmul.bf16.gmra.mxu3 %v1320_v12  ;;  %v7437_v12 = vld [vmem:[%s11449_s1 + $0x170] sm:$0xff]  ;;  %v7443_v44 = vld [vmem:[%s11449_s1 + $0x1a0] sm:$0xff] }
 0x19e   : > { %2720 = vmatpush.bf16.msrb.mxu1 %v7437_v12  ;;  %2865 = vmatpush.bf16.msrb.mxu2 %v7444_v47 }
 0x1a0   : > { %v2465_v24 = vpop.f32.mrf.mxu3 }
 0x1a1   : > { %v2371_v19 = vpop.f32.mrf.mxu2  ;;  %v9308_v34 = vadd.f32 %v2465_v24, %v8896_v31  ;;  %v9312_v3 = vpop.f32.mrf.mxu0  ;;  %v7436_v31 = vld [vmem:[%s11449_s1 + $0x168] sm:$0xff]  ;;  %v1326_v24 = vpack.c.b16 %v8933_v39, %v8908_v5  ;;  %v7434_v39 = vld [vmem:[%s11449_s1 + $0x158] sm:$0xff]  ;;  %v7441_v5 = vld [vmem:[%s11449_s1 + $0x190] sm:$0xff] }
 0x1a2   : > { %v9310_v13 = vadd.f32 %v2371_v19, %v2228_v26  ;;  %2721 = vmatpush.bf16.msrb.mxu1 %v7436_v31  ;;  %2866 = vmatpush.bf16.msrb.mxu2 %v7443_v44 }
 0x1a3   : > { %11821 = vst [vmem:[#allocation165_spill] sm:$0xff] %v9308_v34 }
 0x1a4   : > { %v9314_v30 = vpop.f32.mrf.mxu1 }
 0x1a6   : > { %2722 = vmatpush.bf16.msrb.mxu1 %v7435_v50  ;;  %2867 = vmatpush.bf16.msrb.mxu2 %v7442_v49  ;;  %v7433_v50 = vld [vmem:[%s11449_s1 + $0x150] sm:$0xff] }
 0x1a8   : > { %v2467_v60 = vpop.f32.mrf.mxu3 }
 0x1a9   : > { %v9328_v26 = vpop.f32.mrf.mxu2  ;;  %v9331_v22 = vadd.f32 %v2467_v60, %v8927_v37  ;;  %v2088_v19 = vpop.f32.mrf.mxu0 }
 0x1aa   : > { %v2089_v12 = vadd.f32 %v9237_v42, %v2088_v19  ;;  %2723 = vmatpush.bf16.msrb.mxu1 %v7434_v39  ;;  %2868 = vmatpush.bf16.msrb.mxu2 %v7441_v5 }
 0x1ab   : > { %11822 = vst [vmem:[#allocation166_spill] sm:$0xff] %v9331_v22 }
 0x1ac   : > { %v2232_v47 = vpop.f32.mrf.mxu1  ;;  %2127 = vmatmul.bf16.gmra.mxu0 %v8315_v28 }
 0x1ad   : > { %v2233_v45 = vadd.f32 %v2232_v47, %v2089_v12  ;;  %2509 = vmatmul.bf16.gmra.mxu3 %v1326_v24  ;;  %v7440_v24 = vld [vmem:[%s11449_s1 + $0x188] sm:$0xff]  ;;  %v7439_v12 = vld [vmem:[%s11449_s1 + $0x180] sm:$0xff] }
 0x1ae   : > { %2724 = vmatpush.bf16.msrb.mxu1 %v7433_v50  ;;  %2869 = vmatpush.bf16.msrb.mxu2 %v7440_v24 }
 0x1b0   : > { %v2470_v37 = vpop.f32.mrf.mxu3 }
 0x1b1   : > { %v2376_v31 = vpop.f32.mrf.mxu2  ;;  %v9350_v44 = vadd.f32 %v2470_v37, %v8949_v15  ;;  %v9354_v19 = vpop.f32.mrf.mxu0  ;;  %v7454_v15 = vld [vmem:[%s11449_s1 + $0x1f8] sm:$0xff]  ;;  %v11825_v37 = vld [vmem:[#allocation13_spill] sm:$0xff] }
 0x1b2   : > { %v9352_v60 = vadd.f32 %v2376_v31, %v2233_v45  ;;  %3007 = vmatpush.bf16.msrb.mxu3 %v7454_v15  ;;  %v7432_v45 = vld [vmem:[%s11449_s1 + $0x148] sm:$0xff]  ;;  %v11826_v31 = vld [vmem:[#allocation15_spill] sm:$0xff]  ;;  %2870 = vmatpush.bf16.msrb.mxu2 %v7439_v12 }
 0x1b3   : > { %11823 = vst [vmem:[#allocation167_spill] sm:$0xff] %v9350_v44  ;;  %v9380_v28 = vpack.c.b16 %v11826_v31, %v11825_v37  ;;  %2725 = vmatpush.bf16.msrb.mxu1 %v7432_v45  ;;  %v7431_v44 = vld [vmem:[%s11449_s1 + $0x140] sm:$0xff] }
 0x1b4   : > { %v9356_v49 = vpop.f32.mrf.mxu1 }
 0x1b5   : > { %11827 = vst [vmem:[#allocation13_spill] sm:$0xff] %v9380_v28 }
 0x1b7   : > { %2726 = vmatpush.bf16.msrb.mxu1 %v7431_v44  ;;  %v11832_v44 = vld [vmem:[#allocation16_spill] sm:$0xff] }
 0x1b8   : > { %v2472_v47 = vpop.f32.mrf.mxu3 }
 0x1b9   : > { %v9373_v39 = vpop.f32.mrf.mxu2  ;;  %v9376_v5 = vadd.f32 %v2472_v47, %v8968_v27  ;;  %v2093_v50 = vpop.f32.mrf.mxu0  ;;  %v7462_v27 = vld [vmem:[%s11449_s1 + $0x238] sm:$0xff]  ;;  %v11828_v47 = vld [vmem:[#allocation22_spill] sm:$0xff] }
 0x1ba   : > { %v2094_v24 = vadd.f32 %v9237_v42, %v2093_v50  ;;  %2871 = vmatmul.bf16.vlgmr.msrb.gmra.mxu2 %v11828_v47  ;;  %3151 = vmatpush.bf16.msra.mxu0 %v7462_v27  ;;  %v11830_v50 = vld [vmem:[#allocation8_spill] sm:$0xff]  ;;  %v11833_v27 = vld [vmem:[#allocation18_spill] sm:$0xff] }
 0x1bb   : > { %11824 = vst [vmem:[#allocation168_spill] sm:$0xff] %v9376_v5  ;;  %2727 = vmatmul.bf16.vlgmr.msrb.gmra.mxu1 %v11830_v50  ;;  %v9409_v34 = vpack.c.b16 %v11833_v27, %v11832_v44 }
 0x1bc   : > { %v2237_v15 = vpop.f32.mrf.mxu1  ;;  %2132 = vmatmul.bf16.gmra.mxu0 %v9380_v28 }
 0x1bd   : > { %v2238_v22 = vadd.f32 %v2237_v15, %v2094_v24  ;;  %2514 = vmatmul.bf16.gmra.mxu3 %v8955_v51  ;;  %11834 = vst [vmem:[#allocation8_spill] sm:$0xff] %v9409_v34 }
 0x1c0   : > { %v2475_v45 = vpop.f32.mrf.mxu3 }
 0x1c1   : > { %v2381_v12 = vpop.f32.mrf.mxu2  ;;  %v9393_v31 = vadd.f32 %v2475_v45, %v8989_v29  ;;  %v9398_v15 = vpop.f32.mrf.mxu0  ;;  %v11835_v29 = vld [vmem:[#allocation128_spill] sm:$0xff] }
 0x1c2   : > { %v9396_v24 = vadd.f32 %v2381_v12, %v2238_v22  ;;  %v1336_v45 = vpack.c.b16 %v11835_v29, %v8957_v1 }
 0x1c3   : > { %11829 = vst [vmem:[#allocation15_spill] sm:$0xff] %v9393_v31  ;;  %v11836_v31 = vld [vmem:[#allocation26_spill] sm:$0xff] }
 0x1c4   : > { %v9400_v51 = vpop.f32.mrf.mxu1  ;;  %v981_v17 = vunpack.c.l.b16 %v11836_v31 }
 0x1c8   : > { %v2477_v28 = vpop.f32.mrf.mxu3 }
 0x1c9   : > { %v9402_v5 = vpop.f32.mrf.mxu2  ;;  %v9405_v47 = vadd.f32 %v2477_v28, %v9011_v2  ;;  %v2098_v50 = vpop.f32.mrf.mxu0  ;;  %v11838_v28 = vld [vmem:[#allocation20_spill] sm:$0xff] }
 0x1ca   : > { %v2099_v22 = vadd.f32 %v9237_v42, %v2098_v50  ;;  %2876 = vmatmul.bf16.gmra.mxu2 %v11837_v16  ;;  %v1255_v2 = vpack.c.b16 %v981_v17, %v11838_v28  ;;  %v11845_v16 = vld [vmem:[#allocation129_spill] sm:$0xff] }
 0x1cb   : > { %11831 = vst [vmem:[#allocation22_spill] sm:$0xff] %v9405_v47  ;;  %v1342_v17 = vpack.c.b16 %v9069_v6, %v11845_v16 }
 0x1cc   : > { %v2242_v12 = vpop.f32.mrf.mxu1  ;;  %2137 = vmatmul.bf16.gmra.mxu0 %v9409_v34  ;;  %2732 = vmatmul.bf16.gmra.mxu1 %v1255_v2 }
 0x1cd   : > { %v2243_v57 = vadd.f32 %v2242_v12, %v2099_v22  ;;  %2519 = vmatmul.bf16.gmra.mxu3 %v1336_v45  ;;  %v11843_v45 = vld [vmem:[#allocation134_spill] sm:$0xff] }
 0x1d0   : > { %v2480_v47 = vpop.f32.mrf.mxu3 }
 0x1d1   : > { %v2386_v44 = vpop.f32.mrf.mxu2  ;;  %v9419_v52 = vadd.f32 %v2480_v47, %v11839_v40  ;;  %v9423_v29 = vpop.f32.mrf.mxu0 }
 0x1d2   : > { %v9421_v1 = vadd.f32 %v2386_v44, %v2243_v57  ;;  %v987_v57 = vunpack.c.h.b16 %v11836_v31  ;;  %v11846_v44 = vld [vmem:[#allocation9_spill] sm:$0xff] }
 0x1d3   : > { %11840 = vst [vmem:[#allocation16_spill] sm:$0xff] %v9419_v52  ;;  %v11847_v52 = vld [vmem:[#allocation41_spill] sm:$0xff] }
 0x1d4   : > { %v9425_v50 = vpop.f32.mrf.mxu1 }
 0x1d5   : > { %11841 = vst [vmem:[#allocation18_spill] sm:$0xff] %v9425_v50 }
 0x1d8   : > { %v2482_v22 = vpop.f32.mrf.mxu3 }
 0x1d9   : > { %v9427_v12 = vpop.f32.mrf.mxu2  ;;  %v9430_v34 = vadd.f32 %v2482_v22, %v11843_v45  ;;  %v2103_v28 = vpop.f32.mrf.mxu0  ;;  %v11849_v45 = vld [vmem:[#allocation137_spill] sm:$0xff] }
 0x1da   : > { %11842 = vst [vmem:[#allocation128_spill] sm:$0xff] %v9427_v12  ;;  %v2104_v40 = vadd.f32 %v9237_v42, %v2103_v28  ;;  %2881 = vmatmul.bf16.gmra.mxu2 %v11847_v52  ;;  %v1264_v12 = vpack.c.b16 %v11848_v62, %v987_v57  ;;  %v11853_v62 = vld [vmem:[#allocation17_spill] sm:$0xff] }
 0x1db   : > { %11844 = vst [vmem:[#allocation33_spill] sm:$0xff] %v9430_v34  ;;  %v11854_v57 = vunpack.c.l.b16 %v11853_v62 }
 0x1dc   : > { %v2247_v47 = vpop.f32.mrf.mxu1  ;;  %2583 = vmatmul.bf16.vlgmr.msrb.gmra.mxu0 %v11846_v44  ;;  %2737 = vmatmul.bf16.gmra.mxu1 %v1264_v12 }
 0x1dd   : > { %v2248_v2 = vadd.f32 %v2247_v47, %v2104_v40  ;;  %2524 = vmatmul.bf16.gmra.mxu3 %v1342_v17  ;;  %v11851_v40 = vld [vmem:[#allocation27_spill] sm:$0xff] }
 0x1de   : > { %v980_v17 = vunpack.c.l.b16 %v11851_v40 }
 0x1e0   : > { %v2485_v50 = vpop.f32.mrf.mxu3  ;;  %v1254_v31 = vpack.c.b16 %v980_v17, %v11854_v57  ;;  %v11857_v57 = vld [vmem:[#allocation30_spill] sm:$0xff] }
 0x1e1   : > { %v2391_v22 = vpop.f32.mrf.mxu2  ;;  %v9440_v34 = vadd.f32 %v2485_v50, %v11849_v45  ;;  %v9444_v16 = vpop.f32.mrf.mxu0  ;;  %v7453_v45 = vld [vmem:[%s11449_s1 + $0x1f0] sm:$0xff] }
 0x1e2   : > { %v9442_v6 = vadd.f32 %v2391_v22, %v2248_v2  ;;  %3008 = vmatpush.bf16.msrb.mxu3 %v7453_v45 }
 0x1e3   : > { %11850 = vst [vmem:[#allocation20_spill] sm:$0xff] %v9440_v34  ;;  %v11855_v34 = vld [vmem:[#allocation45_spill] sm:$0xff] }
 0x1e4   : > { %v9446_v28 = vpop.f32.mrf.mxu1 }
 0x1e8   : > { %v2487_v47 = vpop.f32.mrf.mxu3 }
 0x1e9   : > { %v9449_v44 = vpop.f32.mrf.mxu2  ;;  %v9452_v52 = vadd.f32 %v2487_v47, %v9104_v43  ;;  %v2108_v50 = vpop.f32.mrf.mxu0  ;;  %v2061_v47 = vadd.f32 %v9237_v42, %v9125_v11  ;;  %v7461_v11 = vld [vmem:[%s11449_s1 + $0x230] sm:$0xff] }
 0x1ea   : > { %v2109_v12 = vadd.f32 %v9237_v42, %v2108_v50  ;;  %2886 = vmatmul.bf16.gmra.mxu2 %v11855_v34  ;;  %v986_v34 = vunpack.c.h.b16 %v11851_v40  ;;  %3152 = vmatpush.bf16.msra.mxu0 %v7461_v11 }
 0x1eb   : > { %11852 = vst [vmem:[#allocation126_spill] sm:$0xff] %v9452_v52 }
 0x1ec   : > { %v2252_v2 = vpop.f32.mrf.mxu1  ;;  %2588 = vmatmul.bf16.gmra.mxu0 %v1254_v31  ;;  %2742 = vmatmul.bf16.gmra.mxu1 %v11857_v57 }
 0x1ed   : > { %v2253_v22 = vadd.f32 %v2252_v2, %v2109_v12  ;;  %2529 = vmatmul.bf16.gmra.mxu3 %v9091_v59  ;;  %v2205_v12 = vadd.f32 %v9132_v25, %v2061_v47 }
 0x1ef   : > { %v2349_v2 = vadd.f32 %v9145_v14, %v2205_v12  ;;  %v11864_v14 = vld [vmem:[#allocation54_spill] sm:$0xff]  ;;  %v11865_v12 = vld [vmem:[#allocation39_spill] sm:$0xff] }
 0x1f0   : > { %v2490_v43 = vpop.f32.mrf.mxu3 }
 0x1f1   : > { %v2396_v17 = vpop.f32.mrf.mxu2  ;;  %v9465_v62 = vadd.f32 %v2490_v43, %v9123_v56  ;;  %v9470_v59 = vpop.f32.mrf.mxu0  ;;  %v1352_v43 = vpack.c.b16 %v9185_v53, %v9093_v35  ;;  %v2066_v35 = vadd.f32 %v9237_v42, %v9174_v55 }
 0x1f2   : > { %v9468_v50 = vadd.f32 %v2396_v17, %v2253_v22  ;;  %11859 = vst [vmem:[#allocation9_spill] sm:$0xff] %v9470_v59  ;;  %v11861_v17 = vld [vmem:[#allocation29_spill] sm:$0xff] }
 0x1f3   : > { %11856 = vst [vmem:[#allocation134_spill] sm:$0xff] %v9465_v62  ;;  %v11862_v57 = vunpack.c.l.b16 %v11861_v17 }
 0x1f4   : > { %11858 = vst [vmem:[#allocation129_spill] sm:$0xff] %v9468_v50  ;;  %v9472_v31 = vpop.f32.mrf.mxu1 }
 0x1f5   : > { %11860 = vst [vmem:[#allocation41_spill] sm:$0xff] %v9472_v31  ;;  %v1263_v25 = vpack.c.b16 %v11862_v57, %v986_v34  ;;  %v11863_v31 = vld [vmem:[#allocation48_spill] sm:$0xff] }
 0x1f6   : > { %v1001_v50 = vunpack.c.l.b16 %v11863_v31 }
 0x1f8   : > { %v2492_v56 = vpop.f32.mrf.mxu3  ;;  %v1274_v11 = vpack.c.b16 %v1001_v50, %v11865_v12  ;;  %v1358_v50 = vpack.c.b16 %v8144_v32, %v9187_v0 }
 0x1f9   : > { %v9480_v45 = vpop.f32.mrf.mxu2  ;;  %v9482_v22 = vadd.f32 %v2492_v56, %v2349_v2  ;;  %v2113_v47 = vpop.f32.mrf.mxu0 }
 0x1fa   : > { %v2114_v62 = vadd.f32 %v9237_v42, %v2113_v47  ;;  %2891 = vmatmul.bf16.gmra.mxu2 %v11864_v14  ;;  %v11868_v47 = vld [vmem:[#allocation53_spill] sm:$0xff] }
 0x1fc   : > { %v2257_v52 = vpop.f32.mrf.mxu1  ;;  %2593 = vmatmul.bf16.gmra.mxu0 %v1263_v25  ;;  %2747 = vmatmul.bf16.gmra.mxu1 %v1274_v11  ;;  %v11866_v25 = vld [vmem:[#allocation31_spill] sm:$0xff]  ;;  %v11869_v11 = vld [vmem:[#allocation49_spill] sm:$0xff] }
 0x1fd   : > { %v2258_v59 = vadd.f32 %v2257_v52, %v2114_v62  ;;  %2534 = vmatmul.bf16.gmra.mxu3 %v1352_v43  ;;  %v2210_v52 = vadd.f32 %v9178_v4, %v2066_v35 }
 0x1ff   : > { %v2354_v62 = vadd.f32 %v9189_v21, %v2210_v52  ;;  %v2071_v21 = vadd.f32 %v9237_v42, %v9221_v63  ;;  %v11872_v63 = vld [vmem:[#allocation3_spill] sm:$0xff] }
 0x200   : > { %v2495_v2 = vpop.f32.mrf.mxu3 }
 0x201   : > { %v2401_v53 = vpop.f32.mrf.mxu2  ;;  %v9495_v34 = vadd.f32 %v2495_v2, %v9172_v18  ;;  %v9499_v17 = vpop.f32.mrf.mxu0  ;;  %v1003_v18 = vunpack.c.h.b16 %v11863_v31  ;;  %v2215_v0 = vadd.f32 %v9223_v10, %v2071_v21  ;;  %v1000_v2 = vunpack.c.l.b16 %v11869_v11 }
 0x202   : > { %v9497_v56 = vadd.f32 %v2401_v53, %v2258_v59  ;;  %v11867_v59 = vld [vmem:[#allocation62_spill] sm:$0xff]  ;;  %v2076_v10 = vadd.f32 %v9237_v42, %v9257_v58  ;;  %v1002_v21 = vunpack.c.h.b16 %v11869_v11 }
 0x203   : > { %v1280_v14 = vpack.c.b16 %v11868_v47, %v1003_v18  ;;  %v2359_v35 = vadd.f32 %v9227_v38, %v2215_v0  ;;  %v11874_v38 = vld [vmem:[#allocation50_spill] sm:$0xff]  ;;  %v7452_v47 = vld [vmem:[%s11449_s1 + $0x1e8] sm:$0xff] }
 0x204   : > { %3009 = vmatpush.bf16.msrb.mxu3 %v7452_v47 }
 0x208   : > { %v2497_v43 = vpop.f32.mrf.mxu3 }
 0x209   : > { %v9503_v57 = vadd.f32 %v2497_v43, %v2354_v62  ;;  %v9507_v55 = vpop.f32.mrf.mxu0  ;;  %v11870_v62 = vld [vmem:[#allocation37_spill] sm:$0xff] }
 0x20a   : > { %2896 = vmatmul.bf16.gmra.mxu2 %v11867_v59  ;;  %v11871_v43 = vunpack.c.l.b16 %v11870_v62 }
 0x20c   : > { %2598 = vmatmul.bf16.gmra.mxu0 %v11866_v25  ;;  %2752 = vmatmul.bf16.gmra.mxu1 %v1280_v14 }
 0x20d   : > { %2539 = vmatmul.bf16.gmra.mxu3 %v1358_v50  ;;  %v1273_v50 = vpack.c.b16 %v1000_v2, %v11871_v43 }
 0x210   : > { %v2500_v4 = vpop.f32.mrf.mxu3 }
 0x211   : > { %v9516_v12 = vadd.f32 %v2500_v4, %v9219_v7  ;;  %v9518_v32 = vpop.f32.mrf.mxu0  ;;  %v11873_v7 = vld [vmem:[#allocation66_spill] sm:$0xff]  ;;  %v2220_v4 = vadd.f32 %v9259_v54, %v2076_v10  ;;  %v11878_v54 = vld [vmem:[#allocation71_spill] sm:$0xff] }
 0x213   : > { %v2364_v0 = vadd.f32 %v9270_v8, %v2220_v4  ;;  %v11879_v8 = vld [vmem:[#allocation79_spill] sm:$0xff] }
 0x218   : > { %v2502_v53 = vpop.f32.mrf.mxu3 }
 0x219   : > { %v9523_v52 = vadd.f32 %v2502_v53, %v2359_v35  ;;  %v9527_v18 = vpop.f32.mrf.mxu0  ;;  %v11876_v53 = vld [vmem:[#allocation51_spill] sm:$0xff] }
 0x21a   : > { %2901 = vmatmul.bf16.gmra.mxu2 %v11873_v7  ;;  %v11877_v62 = vunpack.c.l.b16 %v11876_v53  ;;  %v1013_v7 = vunpack.c.l.b16 %v11878_v54 }
 0x21c   : > { %2603 = vmatmul.bf16.gmra.mxu0 %v1273_v50  ;;  %2757 = vmatmul.bf16.gmra.mxu1 %v11874_v38  ;;  %v1279_v43 = vpack.c.b16 %v11877_v62, %v1002_v21  ;;  %v7460_v50 = vld [vmem:[%s11449_s1 + $0x228] sm:$0xff]  ;;  %v11883_v62 = vld [vmem:[#allocation11_spill] sm:$0xff] }
 0x21d   : > { %2544 = vmatmul.bf16.gmra.mxu3 %v11872_v63  ;;  %3153 = vmatpush.bf16.msra.mxu0 %v7460_v50  ;;  %v11884_v50 = vld [vmem:[#allocation52_spill] sm:$0xff] }
 0x220   : > { %v2505_v25 = vpop.f32.mrf.mxu3 }
 0x221   : > { %v9534_v59 = vadd.f32 %v2505_v25, %v9255_v41  ;;  %v9540_v14 = vpop.f32.mrf.mxu0  ;;  %v11875_v41 = vld [vmem:[#allocation10_spill] sm:$0xff]  ;;  %v11880_v25 = vld [vmem:[#allocation60_spill] sm:$0xff] }
 0x222   : > { %v1368_v35 = vpack.c.b16 %v11875_v41, %v8150_v36  ;;  %v1290_v10 = vpack.c.b16 %v1013_v7, %v11880_v25  ;;  %v2081_v36 = vadd.f32 %v9237_v42, %v9287_v20  ;;  %v1374_v20 = vpack.c.b16 %v11825_v37, %v11883_v62 }
 0x224   : > { %v2225_v21 = vadd.f32 %v9289_v33, %v2081_v36  ;;  %v11885_v33 = vld [vmem:[#allocation86_spill] sm:$0xff] }
 0x228   : > { %v2507_v2 = vpop.f32.mrf.mxu3 }
 0x229   : > { %v9545_v58 = vadd.f32 %v2507_v2, %v2364_v0  ;;  %v9554_v63 = vpop.f32.mrf.mxu0  ;;  %v9567_v0 = vpop.f32.mrf.mxu1  ;;  %v2369_v2 = vadd.f32 %v9291_v9, %v2225_v21 }
 0x22a   : > { %2906 = vmatmul.bf16.gmra.mxu2 %v11879_v8  ;;  %v11886_v8 = vld [vmem:[#allocation77_spill] sm:$0xff] }
 0x22c   : > { %2608 = vmatmul.bf16.gmra.mxu0 %v1279_v43  ;;  %2762 = vmatmul.bf16.gmra.mxu1 %v1290_v10  ;;  %v2086_v10 = vadd.f32 %v9237_v42, %v9312_v3  ;;  %v11890_v3 = vld [vmem:[#allocation58_spill] sm:$0xff] }
 0x22d   : > { %2549 = vmatmul.bf16.gmra.mxu3 %v1368_v35  ;;  %v9570_v35 = vpop.f32.mrf.mxu2 }
 0x22e   : > { %v2230_v21 = vadd.f32 %v9314_v30, %v2086_v10  ;;  %v11892_v30 = vld [vmem:[#allocation19_spill] sm:$0xff]  ;;  %v326_v10 = vld [vmem:[%s8114_s16 + $0x240] sm:$0xff] }
 0x230   : > { %v2510_v38 = vpop.f32.mrf.mxu3 }
 0x231   : > { %v9562_v47 = vadd.f32 %v2510_v38, %v9285_v46  ;;  %v9564_v4 = vpop.f32.mrf.mxu0  ;;  %v1015_v46 = vunpack.c.h.b16 %v11878_v54 }
 0x233   : > { %11881 = vst [vmem:[#allocation32_spill] sm:$0xff] %v9562_v47  ;;  %v1296_v9 = vpack.c.b16 %v11886_v8, %v1015_v46 }
 0x238   : > { %v2512_v41 = vpop.f32.mrf.mxu3  ;;  %v2728_v7 = vpop.f32.mrf.mxu1 }
 0x239   : > { %v9572_v53 = vadd.f32 %v2512_v41, %v2369_v2  ;;  %v9576_v43 = vpop.f32.mrf.mxu0  ;;  %v11888_v2 = vld [vmem:[#allocation72_spill] sm:$0xff] }
 0x23a   : > { %2911 = vmatmul.bf16.gmra.mxu2 %v11885_v33  ;;  %v1012_v41 = vunpack.c.l.b16 %v11888_v2  ;;  %v11891_v33 = vunpack.c.l.b16 %v11890_v3 }
 0x23b   : > { %11882 = vst [vmem:[#allocation137_spill] sm:$0xff] %v9572_v53  ;;  %v11900_v53 = vld [vmem:[#allocation141_spill] sm:$0xff] }
 0x23c   : > { %2613 = vmatmul.bf16.gmra.mxu0 %v11884_v50  ;;  %2767 = vmatmul.bf16.gmra.mxu1 %v1296_v9  ;;  %v7451_v9 = vld [vmem:[%s11449_s1 + $0x1e0] sm:$0xff] }
 0x23d   : > { %2554 = vmatmul.bf16.gmra.mxu3 %v1374_v20  ;;  %v2872_v37 = vpop.f32.mrf.mxu2  ;;  %v2374_v20 = vadd.f32 %v9328_v26, %v2230_v21  ;;  %v7450_v26 = vld [vmem:[%s11449_s1 + $0x1d8] sm:$0xff]  ;;  %v11893_v21 = vld [vmem:[#allocation89_spill] sm:$0xff] }
 0x23e   : > { %3010 = vmatpush.bf16.msrb.mxu3 %v7451_v9 }
 0x240   : > { %v2515_v25 = vpop.f32.mrf.mxu3  ;;  %v9591_v62 = vpop.f32.mrf.mxu1 }
 0x241   : > { %v9585_v38 = vadd.f32 %v2515_v25, %v9310_v13  ;;  %v9587_v36 = vpop.f32.mrf.mxu0  ;;  %v1289_v13 = vpack.c.b16 %v1012_v41, %v11891_v33  ;;  %v406_v33 = vpack.c.bf16 %v326_v10, %v326_v10 }
 0x242   : > { %3011 = vmatpush.bf16.msrb.mxu3 %v7450_v26 }
 0x243   : > { %11887 = vst [vmem:[#allocation27_spill] sm:$0xff] %v9585_v38 }
 0x245   : > { %v9598_v8 = vpop.f32.mrf.mxu2 }
 0x248   : > { %v2517_v46 = vpop.f32.mrf.mxu3 }
 0x249   : > { %v9594_v50 = vadd.f32 %v2517_v46, %v2374_v20  ;;  %v9603_v25 = vpop.f32.mrf.mxu0  ;;  %v2733_v41 = vpop.f32.mrf.mxu1  ;;  %v2091_v46 = vadd.f32 %v9237_v42, %v9354_v19  ;;  %v1014_v19 = vunpack.c.h.b16 %v11888_v2 }
 0x24a   : > { %2916 = vmatmul.bf16.gmra.mxu2 %v11893_v21  ;;  %v9623_v21 = vunpack.c.l.b16 %v406_v33 }
 0x24b   : > { %11889 = vst [vmem:[#allocation17_spill] sm:$0xff] %v9594_v50  ;;  %v2235_v26 = vadd.f32 %v9356_v49, %v2091_v46  ;;  %v11898_v46 = vld [vmem:[#allocation74_spill] sm:$0xff]  ;;  %v7447_v50 = vld [vmem:[%s11449_s1 + $0x1c0] sm:$0xff] }
 0x24c   : > { %2618 = vmatmul.bf16.gmra.mxu0 %v1289_v13  ;;  %v7449_v13 = vld [vmem:[%s11449_s1 + $0x1d0] sm:$0xff]  ;;  %11896 = vst [vmem:[#allocation30_spill] sm:$0xff] %v9623_v21  ;;  %v1384_v49 = vpack.c.b16 %v9623_v21, %v11833_v27  ;;  %v11899_v33 = vunpack.c.l.b16 %v11898_v46  ;;  %v11902_v27 = vld [vmem:[#allocation100_spill] sm:$0xff] }
 0x24d   : > { %2559 = vmatmul.bf16.gmra.mxu3 %v11892_v30  ;;  %v2877_v9 = vpop.f32.mrf.mxu2  ;;  %v11895_v30 = vld [vmem:[#allocation75_spill] sm:$0xff]  ;;  %v7459_v21 = vld [vmem:[%s11449_s1 + $0x220] sm:$0xff] }
 0x24e   : > { %2772 = vmatmul.bf16.gmra.mxu1 %v11895_v30  ;;  %3012 = vmatpush.bf16.msrb.mxu3 %v7449_v13  ;;  %v1295_v13 = vpack.c.b16 %v11899_v33, %v1014_v19  ;;  %v11903_v19 = vld [vmem:[#allocation84_spill] sm:$0xff] }
 0x24f   : > { %3154 = vmatpush.bf16.msra.mxu0 %v7459_v21 }
 0x250   : > { %v2520_v20 = vpop.f32.mrf.mxu3 }
 0x251   : > { %v9614_v3 = vadd.f32 %v2520_v20, %v9352_v60  ;;  %v9620_v54 = vpop.f32.mrf.mxu0  ;;  %v7448_v60 = vld [vmem:[%s11449_s1 + $0x1c8] sm:$0xff]  ;;  %v2735_v10 = vpop.f32.mrf.mxu1  ;;  %v2379_v20 = vadd.f32 %v9373_v39, %v2235_v26  ;;  %v11901_v39 = vld [vmem:[#allocation92_spill] sm:$0xff] }
 0x252   : > { %3013 = vmatpush.bf16.msrb.mxu3 %v7448_v60  ;;  %v1025_v26 = vunpack.c.l.b16 %v11901_v39 }
 0x253   : > { %11894 = vst [vmem:[#allocation45_spill] sm:$0xff] %v9614_v3 }
 0x254   : > { %v1306_v33 = vpack.c.b16 %v1025_v26, %v11903_v19 }
 0x255   : > { %v2879_v3 = vpop.f32.mrf.mxu2 }
 0x256   : > { %3014 = vmatpush.bf16.msrb.mxu3 %v7447_v50 }
 0x258   : > { %v2522_v30 = vpop.f32.mrf.mxu3 }
 0x259   : > { %v9630_v31 = vadd.f32 %v2522_v30, %v2379_v20  ;;  %v2584_v38 = vpop.f32.mrf.mxu0  ;;  %v327_v20 = vld [vmem:[%s8114_s16 + $0x248] sm:$0xff]  ;;  %v328_v30 = vld [vmem:[%s8114_s16 + $0x250] sm:$0xff]  ;;  %v2738_v46 = vpop.f32.mrf.mxu1 }
 0x25a   : > { %v2585_v47 = vadd.f32 %v2584_v38, %v11900_v53  ;;  %2921 = vmatmul.bf16.gmra.mxu2 %v11902_v27  ;;  %v2096_v53 = vadd.f32 %v9237_v42, %v9398_v15  ;;  %v408_v50 = vpack.c.bf16 %v328_v30, %v328_v30 }
 0x25b   : > { %11897 = vst [vmem:[#allocation29_spill] sm:$0xff] %v9630_v31 }
 0x25c   : > { %v2729_v60 = vadd.f32 %v2728_v7, %v2585_v47  ;;  %2623 = vmatmul.bf16.gmra.mxu0 %v1295_v13  ;;  %v407_v7 = vpack.c.bf16 %v327_v20, %v327_v20  ;;  %v2240_v26 = vadd.f32 %v9400_v51, %v2096_v53  ;;  %v9660_v19 = vunpack.c.l.b16 %v408_v50  ;;  %v11908_v50 = vld [vmem:[#allocation98_spill] sm:$0xff] }
 0x25d   : > { %2564 = vmatmul.bf16.gmra.mxu3 %v1384_v49  ;;  %v2882_v49 = vpop.f32.mrf.mxu2  ;;  %v1027_v53 = vunpack.c.h.b16 %v11901_v39 }
 0x25e   : > { %v9645_v31 = vadd.f32 %v2872_v37, %v2729_v60  ;;  %2777 = vmatmul.bf16.gmra.mxu1 %v1306_v33  ;;  %v9658_v27 = vunpack.c.l.b16 %v407_v7  ;;  %v11906_v7 = vld [vmem:[#allocation76_spill] sm:$0xff] }
 0x260   : > { %v2525_v38 = vpop.f32.mrf.mxu3 }
 0x261   : > { %v9653_v47 = vadd.f32 %v2525_v38, %v9396_v24  ;;  %v2586_v13 = vpop.f32.mrf.mxu0  ;;  %v2740_v15 = vpop.f32.mrf.mxu1  ;;  %v2384_v24 = vadd.f32 %v9402_v5, %v2240_v26  ;;  %v11907_v5 = vld [vmem:[#allocation107_spill] sm:$0xff] }
 0x262   : > { %v2587_v37 = vadd.f32 %v2586_v13, %v9148_v61  ;;  %v1390_v61 = vpack.c.b16 %v9660_v19, %v9658_v27  ;;  %v1312_v13 = vpack.c.b16 %v11908_v50, %v1027_v53 }
 0x263   : > { %11904 = vst [vmem:[#allocation54_spill] sm:$0xff] %v9653_v47  ;;  %v11915_v47 = vld [vmem:[#allocation155_spill] sm:$0xff] }
 0x264   : > { %v2731_v60 = vadd.f32 %v9591_v62, %v2587_v37 }
 0x265   : > { %v2884_v21 = vpop.f32.mrf.mxu2 }
 0x266   : > { %v9664_v20 = vadd.f32 %v9598_v8, %v2731_v60  ;;  %v2101_v60 = vadd.f32 %v9237_v42, %v9423_v29 }
 0x268   : > { %v2527_v30 = vpop.f32.mrf.mxu3 }
 0x269   : > { %v9666_v33 = vadd.f32 %v2527_v30, %v2384_v24  ;;  %v2589_v51 = vpop.f32.mrf.mxu0  ;;  %v2743_v8 = vpop.f32.mrf.mxu1 }
 0x26a   : > { %v2590_v62 = vadd.f32 %v2589_v51, %v9170_v23  ;;  %2926 = vmatmul.bf16.gmra.mxu2 %v11907_v5 }
 0x26b   : > { %11905 = vst [vmem:[#allocation39_spill] sm:$0xff] %v9666_v33 }
 0x26c   : > { %v2734_v38 = vadd.f32 %v2733_v41, %v2590_v62  ;;  %2628 = vmatmul.bf16.gmra.mxu0 %v11906_v7  ;;  %v11911_v7 = vld [vmem:[#allocation93_spill] sm:$0xff] }
 0x26d   : > { %2569 = vmatmul.bf16.gmra.mxu3 %v1390_v61  ;;  %v2887_v23 = vpop.f32.mrf.mxu2  ;;  %v11910_v61 = vld [vmem:[#allocation18_spill] sm:$0xff]  ;;  %v1024_v5 = vunpack.c.l.b16 %v11911_v7 }
 0x26e   : > { %v9675_v37 = vadd.f32 %v2877_v9, %v2734_v38  ;;  %2782 = vmatmul.bf16.gmra.mxu1 %v1312_v13  ;;  %v2245_v51 = vadd.f32 %v11910_v61, %v2101_v60  ;;  %v11912_v9 = vld [vmem:[#allocation128_spill] sm:$0xff] }
 0x270   : > { %v2530_v26 = vpop.f32.mrf.mxu3  ;;  %v2389_v38 = vadd.f32 %v11912_v9, %v2245_v51 }
 0x271   : > { %v9680_v24 = vadd.f32 %v2530_v26, %v9421_v1  ;;  %v2591_v41 = vpop.f32.mrf.mxu0  ;;  %v2745_v53 = vpop.f32.mrf.mxu1  ;;  %v11913_v1 = vld [vmem:[#allocation83_spill] sm:$0xff] }
 0x272   : > { %v2592_v30 = vadd.f32 %v2591_v41, %v9192_v48  ;;  %v11914_v26 = vunpack.c.l.b16 %v11913_v1 }
 0x273   : > { %11909 = vst [vmem:[#allocation31_spill] sm:$0xff] %v9680_v24 }
 0x274   : > { %v2736_v62 = vadd.f32 %v2735_v10, %v2592_v30  ;;  %v1305_v24 = vpack.c.b16 %v1024_v5, %v11914_v26  ;;  %v11916_v10 = vld [vmem:[#allocation110_spill] sm:$0xff]  ;;  %v1026_v5 = vunpack.c.h.b16 %v11911_v7 }
 0x275   : > { %v2889_v13 = vpop.f32.mrf.mxu2 }
 0x276   : > { %v9686_v50 = vadd.f32 %v2879_v3, %v2736_v62  ;;  %v11917_v62 = vld [vmem:[#allocation96_spill] sm:$0xff] }
 0x278   : > { %v2532_v39 = vpop.f32.mrf.mxu3 }
 0x279   : > { %v9688_v29 = vadd.f32 %v2532_v39, %v2389_v38  ;;  %v2594_v33 = vpop.f32.mrf.mxu0  ;;  %v2748_v60 = vpop.f32.mrf.mxu1  ;;  %v2106_v39 = vadd.f32 %v9237_v42, %v9444_v16 }
 0x27a   : > { %v2595_v48 = vadd.f32 %v2594_v33, %v11915_v47  ;;  %2931 = vmatmul.bf16.gmra.mxu2 %v11916_v10 }
 0x27c   : > { %v2739_v41 = vadd.f32 %v2738_v46, %v2595_v48  ;;  %2633 = vmatmul.bf16.gmra.mxu0 %v1305_v24  ;;  %v11918_v46 = vld [vmem:[#allocation156_spill] sm:$0xff] }
 0x27d   : > { %3015 = vmatmul.bf16.vlgmr.msrb.gmra.mxu3 %v11851_v40  ;;  %v2892_v51 = vpop.f32.mrf.mxu2  ;;  %v2250_v40 = vadd.f32 %v9446_v28, %v2106_v39  ;;  %v11923_v39 = vld [vmem:[#allocation36_spill] sm:$0xff] }
 0x27e   : > { %v9695_v30 = vadd.f32 %v2882_v49, %v2739_v41  ;;  %2787 = vmatmul.bf16.gmra.mxu1 %v11917_v62 }
 0x27f   : > { %v2394_v9 = vadd.f32 %v9449_v44, %v2250_v40 }
 0x280   : > { %v2535_v3 = vpop.f32.mrf.mxu3 }
 0x281   : > { %v9700_v61 = vadd.f32 %v2535_v3, %v9442_v6  ;;  %v2596_v47 = vpop.f32.mrf.mxu0  ;;  %v2750_v49 = vpop.f32.mrf.mxu1  ;;  %v11919_v6 = vld [vmem:[#allocation95_spill] sm:$0xff] }
 0x282   : > { %v2597_v33 = vadd.f32 %v2596_v47, %v11918_v46  ;;  %v11920_v26 = vunpack.c.l.b16 %v11919_v6  ;;  %v11921_v3 = vld [vmem:[#allocation159_spill] sm:$0xff]  ;;  %v11922_v47 = vld [vmem:[#allocation113_spill] sm:$0xff] }
 0x283   : > { %v1037_v28 = vunpack.c.l.b16 %v11922_v47  ;;  %v11924_v46 = vld [vmem:[#allocation121_spill] sm:$0xff] }
 0x284   : > { %v2741_v24 = vadd.f32 %v2740_v15, %v2597_v33  ;;  %v1311_v48 = vpack.c.b16 %v11920_v26, %v1026_v5 }
 0x285   : > { %v2894_v41 = vpop.f32.mrf.mxu2 }
 0x286   : > { %v9707_v38 = vadd.f32 %v2884_v21, %v2741_v24  ;;  %v11925_v21 = vld [vmem:[#allocation105_spill] sm:$0xff] }
 0x287   : > { %v1322_v33 = vpack.c.b16 %v1037_v28, %v11925_v21 }
 0x288   : > { %v2537_v16 = vpop.f32.mrf.mxu3 }
 0x289   : > { %v9709_v1 = vadd.f32 %v2537_v16, %v2394_v9  ;;  %v2599_v10 = vpop.f32.mrf.mxu0  ;;  %v2753_v44 = vpop.f32.mrf.mxu1  ;;  %v11926_v9 = vld [vmem:[#allocation9_spill] sm:$0xff] }
 0x28a   : > { %v2600_v62 = vadd.f32 %v2599_v10, %v11921_v3  ;;  %2936 = vmatmul.bf16.gmra.mxu2 %v11924_v46  ;;  %v2111_v5 = vadd.f32 %v9237_v42, %v11926_v9  ;;  %v11927_v16 = vld [vmem:[#allocation129_spill] sm:$0xff] }
 0x28b   : > { %v11930_v3 = vld [vmem:[#allocation41_spill] sm:$0xff] }
 0x28c   : > { %v2744_v15 = vadd.f32 %v2743_v8, %v2600_v62  ;;  %2638 = vmatmul.bf16.gmra.mxu0 %v1311_v48  ;;  %v11929_v48 = vld [vmem:[#allocation160_spill] sm:$0xff]  ;;  %v2255_v62 = vadd.f32 %v11930_v3, %v2111_v5  ;;  %v1039_v5 = vunpack.c.h.b16 %v11922_v47  ;;  %v11935_v3 = vld [vmem:[#allocation131_spill] sm:$0xff] }
 0x28d   : > { %3020 = vmatmul.bf16.gmra.mxu3 %v11923_v39  ;;  %v2897_v26 = vpop.f32.mrf.mxu2 }
 0x28e   : > { %v9718_v40 = vadd.f32 %v2887_v23, %v2744_v15  ;;  %2792 = vmatmul.bf16.gmra.mxu1 %v1322_v33  ;;  %v7458_v23 = vld [vmem:[%s11449_s1 + $0x218] sm:$0xff]  ;;  %v2399_v15 = vadd.f32 %v9480_v45, %v2255_v62 }
 0x28f   : > { %3155 = vmatpush.bf16.msra.mxu0 %v7458_v23 }
 0x290   : > { %v2540_v24 = vpop.f32.mrf.mxu3 }
 0x291   : > { %v9723_v6 = vadd.f32 %v2540_v24, %v11927_v16  ;;  %v2601_v8 = vpop.f32.mrf.mxu0  ;;  %v2755_v28 = vpop.f32.mrf.mxu1  ;;  %v11932_v16 = vld [vmem:[#allocation162_spill] sm:$0xff] }
 0x292   : > { %v2602_v10 = vadd.f32 %v2601_v8, %v11929_v48  ;;  %v11933_v48 = vld [vmem:[#allocation97_spill] sm:$0xff] }
 0x293   : > { %11928 = vst [vmem:[#allocation62_spill] sm:$0xff] %v9723_v6 }
 0x294   : > { %v2746_v39 = vadd.f32 %v2745_v53, %v2602_v10  ;;  %v11934_v10 = vld [vmem:[#allocation44_spill] sm:$0xff] }
 0x295   : > { %v2899_v33 = vpop.f32.mrf.mxu2 }
 0x296   : > { %v9731_v46 = vadd.f32 %v2889_v13, %v2746_v39  ;;  %v11936_v13 = vld [vmem:[#allocation119_spill] sm:$0xff] }
 0x297   : > { %v1328_v62 = vpack.c.b16 %v11936_v13, %v1039_v5 }
 0x298   : > { %v2542_v21 = vpop.f32.mrf.mxu3 }
 0x299   : > { %v9733_v24 = vadd.f32 %v2542_v21, %v2399_v15  ;;  %v2604_v9 = vpop.f32.mrf.mxu0  ;;  %v2758_v45 = vpop.f32.mrf.mxu1  ;;  %v2116_v15 = vadd.f32 %v9237_v42, %v9499_v17 }
 0x29a   : > { %v2605_v8 = vadd.f32 %v2604_v9, %v11932_v16  ;;  %2941 = vmatmul.bf16.gmra.mxu2 %v11935_v3  ;;  %v11938_v16 = vld [vmem:[#allocation163_spill] sm:$0xff]  ;;  %v11939_v3 = vld [vmem:[#allocation114_spill] sm:$0xff] }
 0x29b   : > { %11931 = vst [vmem:[#allocation53_spill] sm:$0xff] %v9733_v24  ;;  %v1036_v47 = vunpack.c.l.b16 %v11939_v3 }
 0x29c   : > { %v2749_v53 = vadd.f32 %v2748_v60, %v2605_v8  ;;  %2643 = vmatmul.bf16.gmra.mxu0 %v11933_v48  ;;  %v2260_v48 = vadd.f32 %v9567_v0, %v2116_v15  ;;  %v11943_v0 = vld [vmem:[#allocation67_spill] sm:$0xff]  ;;  %v11944_v15 = vld [vmem:[#allocation165_spill] sm:$0xff] }
 0x29d   : > { %3025 = vmatmul.bf16.gmra.mxu3 %v11934_v10  ;;  %v2902_v9 = vpop.f32.mrf.mxu2 }
 0x29e   : > { %v9741_v39 = vadd.f32 %v2892_v51, %v2749_v53  ;;  %2797 = vmatmul.bf16.gmra.mxu1 %v1328_v62  ;;  %v2404_v51 = vadd.f32 %v9570_v35, %v2260_v48  ;;  %v2119_v53 = vadd.f32 %v9237_v42, %v9507_v55  ;;  %v11941_v62 = vld [vmem:[#allocation104_spill] sm:$0xff]  ;;  %v11945_v35 = vld [vmem:[#allocation135_spill] sm:$0xff] }
 0x2a0   : > { %v2545_v23 = vpop.f32.mrf.mxu3 }
 0x2a1   : > { %v9746_v21 = vadd.f32 %v2545_v23, %v9497_v56  ;;  %v2606_v60 = vpop.f32.mrf.mxu0  ;;  %v2760_v5 = vpop.f32.mrf.mxu1  ;;  %v11942_v23 = vunpack.c.l.b16 %v11941_v62  ;;  %v11948_v62 = vld [vmem:[#allocation117_spill] sm:$0xff] }
 0x2a2   : > { %v2607_v8 = vadd.f32 %v2606_v60, %v11938_v16 }
 0x2a3   : > { %11937 = vst [vmem:[#allocation49_spill] sm:$0xff] %v9746_v21  ;;  %v1321_v21 = vpack.c.b16 %v1036_v47, %v11942_v23 }
 0x2a4   : > { %v2751_v10 = vadd.f32 %v2750_v49, %v2607_v8  ;;  %v2263_v49 = vadd.f32 %v11943_v0, %v2119_v53 }
 0x2a5   : > { %v2904_v60 = vpop.f32.mrf.mxu2 }
 0x2a6   : > { %v9754_v17 = vadd.f32 %v2894_v41, %v2751_v10  ;;  %v2121_v41 = vadd.f32 %v9237_v42, %v9518_v32  ;;  %v11946_v10 = vld [vmem:[#allocation103_spill] sm:$0xff]  ;;  %v2124_v32 = vadd.f32 %v9237_v42, %v9527_v18  ;;  %v11957_v18 = vld [vmem:[#allocation57_spill] sm:$0xff] }
 0x2a7   : > { %v2407_v47 = vadd.f32 %v11946_v10, %v2263_v49 }
 0x2a8   : > { %v2547_v56 = vpop.f32.mrf.mxu3 }
 0x2a9   : > { %v9756_v13 = vadd.f32 %v2547_v56, %v2404_v51  ;;  %v2609_v16 = vpop.f32.mrf.mxu0  ;;  %v2763_v55 = vpop.f32.mrf.mxu1 }
 0x2aa   : > { %v2610_v8 = vadd.f32 %v2609_v16, %v11944_v15  ;;  %2946 = vmatmul.bf16.gmra.mxu2 %v11945_v35  ;;  %v1038_v15 = vunpack.c.h.b16 %v11939_v3 }
 0x2ab   : > { %11940 = vst [vmem:[#allocation37_spill] sm:$0xff] %v9756_v13 }
 0x2ac   : > { %v2754_v24 = vadd.f32 %v2753_v44, %v2610_v8  ;;  %2648 = vmatmul.bf16.gmra.mxu0 %v1321_v21  ;;  %v11949_v21 = vld [vmem:[#allocation69_spill] sm:$0xff] }
 0x2ad   : > { %3030 = vmatmul.bf16.gmra.mxu3 %v11869_v11  ;;  %v2907_v53 = vpop.f32.mrf.mxu2  ;;  %v2265_v23 = vadd.f32 %v11949_v21, %v2121_v41  ;;  %v11950_v11 = vld [vmem:[#allocation166_spill] sm:$0xff] }
 0x2ae   : > { %v9766_v48 = vadd.f32 %v2897_v26, %v2754_v24  ;;  %2802 = vmatmul.bf16.gmra.mxu1 %v11948_v62  ;;  %v11951_v24 = vld [vmem:[#allocation106_spill] sm:$0xff] }
 0x2af   : > { %v2409_v49 = vadd.f32 %v11951_v24, %v2265_v23 }
 0x2b0   : > { %v2550_v51 = vpop.f32.mrf.mxu3 }
 0x2b1   : > { %v9769_v56 = vadd.f32 %v2550_v51, %v2407_v47  ;;  %v2611_v44 = vpop.f32.mrf.mxu0  ;;  %v2765_v8 = vpop.f32.mrf.mxu1  ;;  %v11952_v47 = vld [vmem:[#allocation116_spill] sm:$0xff] }
 0x2b2   : > { %v2612_v16 = vadd.f32 %v2611_v44, %v11950_v11  ;;  %v11953_v51 = vunpack.c.l.b16 %v11952_v47  ;;  %v11954_v44 = vld [vmem:[#allocation73_spill] sm:$0xff]  ;;  %v11955_v11 = vld [vmem:[#allocation167_spill] sm:$0xff] }
 0x2b3   : > { %11947 = vst [vmem:[#allocation3_spill] sm:$0xff] %v9769_v56  ;;  %v11956_v56 = vld [vmem:[#allocation139_spill] sm:$0xff] }
 0x2b4   : > { %v2756_v0 = vadd.f32 %v2755_v28, %v2612_v16  ;;  %v1327_v62 = vpack.c.b16 %v11953_v51, %v1038_v15  ;;  %v2268_v28 = vadd.f32 %v11954_v44, %v2124_v32  ;;  %v1049_v13 = vunpack.c.l.b16 %v11956_v56 }
 0x2b5   : > { %v2909_v41 = vpop.f32.mrf.mxu2  ;;  %v2126_v15 = vadd.f32 %v9237_v42, %v9540_v14  ;;  %v9802_v42 = vld [vmem:[%s11450_s2] ss:$0 sm:$0xff] }
 0x2b6   : > { %v9777_v26 = vadd.f32 %v2899_v33, %v2756_v0  ;;  %v11958_v33 = vld [vmem:[#allocation146_spill] sm:$0xff]  ;;  %v11959_v0 = vld [vmem:[#allocation127_spill] sm:$0xff]  ;;  %v2129_v14 = vadd.f32 %v9802_v42, %v9554_v63 }
 0x2b7   : > { %v1338_v24 = vpack.c.b16 %v1049_v13, %v11959_v0 }
 0x2b8   : > { %v2552_v35 = vpop.f32.mrf.mxu3 }
 0x2b9   : > { %v9780_v10 = vadd.f32 %v2552_v35, %v2409_v49  ;;  %v2614_v21 = vpop.f32.mrf.mxu0  ;;  %v2768_v23 = vpop.f32.mrf.mxu1  ;;  %v11960_v35 = vld [vmem:[#allocation111_spill] sm:$0xff] }
 0x2ba   : > { %v2615_v16 = vadd.f32 %v2614_v21, %v11955_v11  ;;  %2951 = vmatmul.bf16.gmra.mxu2 %v11958_v33  ;;  %v2412_v32 = vadd.f32 %v11960_v35, %v2268_v28  ;;  %v11963_v11 = vld [vmem:[#allocation168_spill] sm:$0xff]  ;;  %v11966_v35 = vld [vmem:[#allocation82_spill] sm:$0xff] }
 0x2bc   : > { %v2759_v6 = vadd.f32 %v2758_v45, %v2615_v16  ;;  %2653 = vmatmul.bf16.gmra.mxu0 %v1327_v62  ;;  %v11962_v62 = vld [vmem:[#allocation78_spill] sm:$0xff] }
 0x2bd   : > { %3035 = vmatmul.bf16.gmra.mxu3 %v11957_v18  ;;  %v2912_v21 = vpop.f32.mrf.mxu2  ;;  %v2270_v44 = vadd.f32 %v11962_v62, %v2126_v15  ;;  %v1051_v62 = vunpack.c.h.b16 %v11956_v56 }
 0x2be   : > { %v9792_v49 = vadd.f32 %v2902_v9, %v2759_v6  ;;  %2807 = vmatmul.bf16.gmra.mxu1 %v1338_v24  ;;  %v11964_v9 = vld [vmem:[#allocation112_spill] sm:$0xff] }
 0x2bf   : > { %v2414_v13 = vadd.f32 %v11964_v9, %v2270_v44  ;;  %v11970_v44 = vld [vmem:[#allocation151_spill] sm:$0xff] }
 0x2c0   : > { %v2555_v47 = vpop.f32.mrf.mxu3 }
 0x2c1   : > { %v9795_v51 = vadd.f32 %v2555_v47, %v2412_v32  ;;  %v2616_v45 = vpop.f32.mrf.mxu0  ;;  %v2770_v33 = vpop.f32.mrf.mxu1  ;;  %v11967_v32 = vld [vmem:[#allocation15_spill] sm:$0xff] }
 0x2c2   : > { %v2617_v16 = vadd.f32 %v2616_v45, %v11963_v11  ;;  %v7457_v45 = vld [vmem:[%s11449_s1 + $0x210] sm:$0xff]  ;;  %v11969_v11 = vld [vmem:[#allocation65_spill] sm:$0xff] }
 0x2c3   : > { %11961 = vst [vmem:[#allocation66_spill] sm:$0xff] %v9795_v51  ;;  %3156 = vmatpush.bf16.msra.mxu0 %v7457_v45 }
 0x2c4   : > { %v2761_v18 = vadd.f32 %v2760_v5, %v2617_v16  ;;  %v2273_v5 = vadd.f32 %v11966_v35, %v2129_v14  ;;  %v2131_v14 = vadd.f32 %v9802_v42, %v9564_v4  ;;  %v2134_v4 = vadd.f32 %v9802_v42, %v9576_v43  ;;  %v11983_v43 = vld [vmem:[#allocation154_spill] sm:$0xff] }
 0x2c5   : > { %v2914_v24 = vpop.f32.mrf.mxu2 }
 0x2c6   : > { %v9806_v6 = vadd.f32 %v2904_v60, %v2761_v18  ;;  %v11968_v60 = vld [vmem:[#allocation118_spill] sm:$0xff]  ;;  %v11971_v18 = vld [vmem:[#allocation145_spill] sm:$0xff] }
 0x2c7   : > { %v1344_v9 = vpack.c.b16 %v11971_v18, %v1051_v62 }
 0x2c8   : > { %v2557_v28 = vpop.f32.mrf.mxu3 }
 0x2c9   : > { %v9809_v0 = vadd.f32 %v2557_v28, %v2414_v13  ;;  %v2619_v15 = vpop.f32.mrf.mxu0  ;;  %v11972_v28 = vld [vmem:[#allocation115_spill] sm:$0xff] }
 0x2ca   : > { %v2620_v47 = vadd.f32 %v2619_v15, %v11967_v32  ;;  %2956 = vmatmul.bf16.gmra.mxu2 %v11970_v44  ;;  %v2417_v15 = vadd.f32 %v11972_v28, %v2273_v5  ;;  %v11975_v44 = vld [vmem:[#allocation22_spill] sm:$0xff]  ;;  %v11977_v5 = vld [vmem:[#allocation120_spill] sm:$0xff] }
 0x2cb   : > { %11965 = vst [vmem:[#allocation50_spill] sm:$0xff] %v9809_v0  ;;  %v2773_v16 = vpop.f32.mrf.mxu1  ;;  %v11976_v0 = vld [vmem:[#allocation140_spill] sm:$0xff] }
 0x2cc   : > { %v2764_v63 = vadd.f32 %v2763_v55, %v2620_v47  ;;  %2658 = vmatmul.bf16.gmra.mxu0 %v11968_v60  ;;  %v11974_v60 = vld [vmem:[#allocation85_spill] sm:$0xff]  ;;  %v1048_v62 = vunpack.c.l.b16 %v11976_v0 }
 0x2cd   : > { %3040 = vmatmul.bf16.gmra.mxu3 %v11969_v11  ;;  %v2917_v55 = vpop.f32.mrf.mxu2  ;;  %v2275_v11 = vadd.f32 %v11974_v60, %v2131_v14 }
 0x2ce   : > { %v9823_v13 = vadd.f32 %v2907_v53, %v2764_v63  ;;  %2812 = vmatmul.bf16.gmra.mxu1 %v1344_v9  ;;  %v11979_v9 = vld [vmem:[#allocation125_spill] sm:$0xff] }
 0x2cf   : > { %v2419_v63 = vadd.f32 %v11977_v5, %v2275_v11  ;;  %v11984_v5 = vld [vmem:[#allocation124_spill] sm:$0xff] }
 0x2d0   : > { %v2560_v35 = vpop.f32.mrf.mxu3 }
 0x2d1   : > { %v9826_v32 = vadd.f32 %v2560_v35, %v2417_v15  ;;  %v2621_v47 = vpop.f32.mrf.mxu0  ;;  %v11980_v35 = vunpack.c.l.b16 %v11979_v9  ;;  %v11986_v9 = vld [vmem:[#allocation143_spill] sm:$0xff] }
 0x2d2   : > { %v2622_v45 = vadd.f32 %v2621_v47, %v11975_v44  ;;  %v11981_v47 = vld [vmem:[#allocation90_spill] sm:$0xff]  ;;  %v11982_v44 = vld [vmem:[#allocation16_spill] sm:$0xff] }
 0x2d3   : > { %11973 = vst [vmem:[#allocation10_spill] sm:$0xff] %v9826_v32  ;;  %v2775_v18 = vpop.f32.mrf.mxu1  ;;  %v1337_v32 = vpack.c.b16 %v1048_v62, %v11980_v35 }
 0x2d4   : > { %v2766_v56 = vadd.f32 %v2765_v8, %v2622_v45  ;;  %v2278_v8 = vadd.f32 %v11981_v47, %v2134_v4  ;;  %v7478_v47 = vld [vmem:[%s11451_s3 + $0x78] sm:$0xff] }
 0x2d5   : > { %v2919_v14 = vpop.f32.mrf.mxu2  ;;  %5871 = vmatpush.bf16.msra.mxu2 %v7478_v47  ;;  %v11995_v47 = vld [vmem:[#allocation157_spill] sm:$0xff] }
 0x2d6   : > { %v9833_v53 = vadd.f32 %v2909_v41, %v2766_v56  ;;  %v2136_v41 = vadd.f32 %v9802_v42, %v9587_v36  ;;  %v2422_v62 = vadd.f32 %v11984_v5, %v2278_v8  ;;  %v2139_v8 = vadd.f32 %v9802_v42, %v9603_v25  ;;  %v11994_v25 = vld [vmem:[#allocation20_spill] sm:$0xff] }
 0x2d8   : > { %v2562_v28 = vpop.f32.mrf.mxu3 }
 0x2d9   : > { %v9836_v15 = vadd.f32 %v2562_v28, %v2419_v63  ;;  %v2624_v60 = vpop.f32.mrf.mxu0 }
 0x2da   : > { %v2625_v45 = vadd.f32 %v2624_v60, %v11982_v44  ;;  %2961 = vmatmul.bf16.gmra.mxu2 %v11983_v43 }
 0x2db   : > { %11978 = vst [vmem:[#allocation51_spill] sm:$0xff] %v9836_v15  ;;  %v2778_v56 = vpop.f32.mrf.mxu1 }
 0x2dc   : > { %v2769_v51 = vadd.f32 %v2768_v23, %v2625_v45  ;;  %2663 = vmatmul.bf16.gmra.mxu0 %v1337_v32  ;;  %v11987_v32 = vld [vmem:[#allocation91_spill] sm:$0xff]  ;;  %v11989_v45 = vld [vmem:[#allocation130_spill] sm:$0xff] }
 0x2dd   : > { %3045 = vmatmul.bf16.gmra.mxu3 %v11888_v2  ;;  %v2922_v4 = vpop.f32.mrf.mxu2  ;;  %v2280_v35 = vadd.f32 %v11987_v32, %v2136_v41  ;;  %v11988_v2 = vld [vmem:[#allocation33_spill] sm:$0xff]  ;;  %v7470_v41 = vld [vmem:[%s11451_s3 + $0x38] sm:$0xff] }
 0x2de   : > { %v9846_v11 = vadd.f32 %v2912_v21, %v2769_v51  ;;  %2817 = vmatmul.bf16.gmra.mxu1 %v11986_v9  ;;  %v1050_v51 = vunpack.c.h.b16 %v11976_v0 }
 0x2df   : > { %v2424_v43 = vadd.f32 %v11989_v45, %v2280_v35  ;;  %5782 = vmatpush.bf16.msra.mxu1 %v7470_v41  ;;  %v11996_v45 = vld [vmem:[#allocation81_spill] sm:$0xff] }
 0x2e0   : > { %v2565_v63 = vpop.f32.mrf.mxu3 }
 0x2e1   : > { %v9849_v28 = vadd.f32 %v2565_v63, %v2422_v62  ;;  %v2626_v23 = vpop.f32.mrf.mxu0  ;;  %v11991_v63 = vld [vmem:[#allocation142_spill] sm:$0xff] }
 0x2e2   : > { %v2627_v60 = vadd.f32 %v2626_v23, %v11988_v2  ;;  %v11993_v2 = vld [vmem:[#allocation94_spill] sm:$0xff] }
 0x2e3   : > { %11985 = vst [vmem:[#allocation79_spill] sm:$0xff] %v9849_v28  ;;  %v2780_v21 = vpop.f32.mrf.mxu1  ;;  %v11997_v28 = vld [vmem:[#allocation161_spill] sm:$0xff] }
 0x2e4   : > { %v2771_v36 = vadd.f32 %v2770_v33, %v2627_v60  ;;  %v11992_v33 = vunpack.c.l.b16 %v11991_v63  ;;  %v2283_v60 = vadd.f32 %v11993_v2, %v2139_v8  ;;  %v11999_v63 = vld [vmem:[#allocation136_spill] sm:$0xff] }
 0x2e5   : > { %v2924_v23 = vpop.f32.mrf.mxu2 }
 0x2e6   : > { %v9860_v44 = vadd.f32 %v2914_v24, %v2771_v36  ;;  %v1343_v9 = vpack.c.b16 %v11992_v33, %v1050_v51  ;;  %v1061_v36 = vunpack.c.l.b16 %v11995_v47  ;;  %v2141_v51 = vadd.f32 %v9802_v42, %v9620_v54 }
 0x2e7   : > { %v2427_v8 = vadd.f32 %v11999_v63, %v2283_v60  ;;  %v12004_v63 = vld [vmem:[#allocation134_spill] sm:$0xff] }
 0x2e8   : > { %v2567_v5 = vpop.f32.mrf.mxu3 }
 0x2e9   : > { %v9866_v62 = vadd.f32 %v2567_v5, %v2424_v43  ;;  %v2629_v32 = vpop.f32.mrf.mxu0  ;;  %v11998_v5 = vld [vmem:[#allocation150_spill] sm:$0xff] }
 0x2ea   : > { %v2630_v24 = vadd.f32 %v2629_v32, %v11994_v25  ;;  %2966 = vmatmul.bf16.gmra.mxu2 %v11997_v28 }
 0x2eb   : > { %11990 = vst [vmem:[#allocation60_spill] sm:$0xff] %v9866_v62  ;;  %v2783_v43 = vpop.f32.mrf.mxu1  ;;  %v1354_v62 = vpack.c.b16 %v1061_v36, %v11998_v5  ;;  %v12003_v5 = vld [vmem:[#allocation138_spill] sm:$0xff] }
 0x2ec   : > { %v2774_v35 = vadd.f32 %v2773_v16, %v2630_v24  ;;  %2668 = vmatmul.bf16.gmra.mxu0 %v1343_v9  ;;  %v12001_v9 = vld [vmem:[#allocation99_spill] sm:$0xff]  ;;  %v12002_v24 = vld [vmem:[#allocation126_spill] sm:$0xff] }
 0x2ed   : > { %3050 = vmatmul.bf16.gmra.mxu3 %v11996_v45  ;;  %v2927_v2 = vpop.f32.mrf.mxu2  ;;  %v2285_v25 = vadd.f32 %v12001_v9, %v2141_v51  ;;  %v12006_v51 = vld [vmem:[#allocation88_spill] sm:$0xff] }
 0x2ee   : > { %v9878_v41 = vadd.f32 %v2917_v55, %v2774_v35  ;;  %2822 = vmatmul.bf16.gmra.mxu1 %v1354_v62  ;;  %v1063_v62 = vunpack.c.h.b16 %v11995_v47 }
 0x2ef   : > { %v2429_v54 = vadd.f32 %v12003_v5, %v2285_v25 }
 0x2f0   : > { %v2570_v33 = vpop.f32.mrf.mxu3 }
 0x2f1   : > { %v9881_v32 = vadd.f32 %v2570_v33, %v2427_v8  ;;  %v2631_v16 = vpop.f32.mrf.mxu0 }
 0x2f2   : > { %v2632_v28 = vadd.f32 %v2631_v16, %v12002_v24  ;;  %v12008_v16 = vld [vmem:[#allocation40_spill] sm:$0xff] }
 0x2f3   : > { %12000 = vst [vmem:[#allocation11_spill] sm:$0xff] %v9881_v32  ;;  %v2785_v15 = vpop.f32.mrf.mxu1  ;;  %v12005_v32 = vld [vmem:[#allocation144_spill] sm:$0xff]  ;;  %v1360_v9 = vpack.c.b16 %v12008_v16, %v1063_v62  ;;  %v12010_v62 = vld [vmem:[#allocation149_spill] sm:$0xff] }
 0x2f4   : > { %v2776_v45 = vadd.f32 %v2775_v18, %v2632_v28  ;;  %v12007_v18 = vld [vmem:[#allocation164_spill] sm:$0xff] }
 0x2f5   : > { %v2929_v60 = vpop.f32.mrf.mxu2 }
 0x2f6   : > { %v9885_v36 = vadd.f32 %v2919_v14, %v2776_v45 }
 0x2f8   : > { %v2572_v42 = vpop.f32.mrf.mxu3 }
 0x2f9   : > { %v9888_v55 = vadd.f32 %v2572_v42, %v2429_v54  ;;  %v2634_v35 = vpop.f32.mrf.mxu0  ;;  %v12009_v42 = vld [vmem:[#allocation158_spill] sm:$0xff] }
 0x2fa   : > { %v2635_v8 = vadd.f32 %v2634_v35, %v12004_v63  ;;  %2971 = vmatmul.bf16.gmra.mxu2 %v12007_v18  ;;  %v1060_v35 = vunpack.c.l.b16 %v12009_v42 }
 0x2fb   : > { %v2788_v14 = vpop.f32.mrf.mxu1 }
 0x2fc   : > { %v2779_v33 = vadd.f32 %v2778_v56, %v2635_v8  ;;  %2673 = vmatmul.bf16.gmra.mxu0 %v12005_v32  ;;  %v7456_v56 = vld [vmem:[%s11449_s1 + $0x208] sm:$0xff] }
 0x2fd   : > { %3055 = vmatmul.bf16.gmra.mxu3 %v12006_v51  ;;  %v2932_v45 = vpop.f32.mrf.mxu2  ;;  %3157 = vmatpush.bf16.msra.mxu0 %v7456_v56 }
 0x2fe   : > { %v9896_v25 = vadd.f32 %v2922_v4, %v2779_v33  ;;  %2827 = vmatmul.bf16.gmra.mxu1 %v1360_v9  ;;  %v12011_v33 = vunpack.c.l.b16 %v12010_v62 }
 0x300   : > { %v3016_v24 = vpop.f32.mrf.mxu3  ;;  %v1353_v51 = vpack.c.b16 %v1060_v35, %v12011_v33  ;;  %v12014_v33 = vld [vmem:[#allocation4_spill] sm:$0xff] }
 0x301   : > { %v9899_v28 = vadd.f32 %v3016_v24, %v9645_v31  ;;  %v2636_v32 = vpop.f32.mrf.mxu0 }
 0x302   : > { %v2637_v5 = vadd.f32 %v2636_v32, %v9482_v22  ;;  %v12012_v22 = vld [vmem:[#allocation14_spill] sm:$0xff] }
 0x303   : > { %v2790_v63 = vpop.f32.mrf.mxu1 }
 0x304   : > { %v2781_v54 = vadd.f32 %v2780_v21, %v2637_v5  ;;  %v12013_v5 = vld [vmem:[#allocation38_spill] sm:$0xff] }
 0x305   : > { %v2934_v18 = vpop.f32.mrf.mxu2 }
 0x306   : > { %v9906_v4 = vadd.f32 %v2924_v23, %v2781_v54 }
 0x308   : > { %v3018_v8 = vpop.f32.mrf.mxu3 }
 0x309   : > { %v9909_v31 = vadd.f32 %v3018_v8, %v9664_v20  ;;  %v2639_v16 = vpop.f32.mrf.mxu0 }
 0x30a   : > { %v2640_v9 = vadd.f32 %v2639_v16, %v9495_v34  ;;  %2976 = vmatmul.bf16.gmra.mxu2 %v12012_v22 }
 0x30b   : > { %v2793_v21 = vpop.f32.mrf.mxu1 }
 0x30c   : > { %v2784_v24 = vadd.f32 %v2783_v43, %v2640_v9  ;;  %2678 = vmatmul.bf16.gmra.mxu0 %v1353_v51  ;;  %v1062_v43 = vunpack.c.h.b16 %v12009_v42  ;;  %v12015_v51 = vunpack.c.l.b16 %v12014_v33  ;;  %v7477_v9 = vld [vmem:[%s11451_s3 + $0x70] sm:$0xff] }
 0x30d   : > { %3060 = vmatmul.bf16.gmra.mxu3 %v11911_v7  ;;  %v2937_v32 = vpop.f32.mrf.mxu2  ;;  %5872 = vmatpush.bf16.msra.mxu2 %v7477_v9 }
 0x30e   : > { %v9916_v23 = vadd.f32 %v2927_v2, %v2784_v24  ;;  %2832 = vmatmul.bf16.gmra.mxu1 %v12013_v5  ;;  %v12018_v5 = vld [vmem:[#allocation13_spill] sm:$0xff] }
 0x310   : > { %v3021_v56 = vpop.f32.mrf.mxu3 }
 0x311   : > { %v9919_v20 = vadd.f32 %v3021_v56, %v9675_v37  ;;  %v2641_v54 = vpop.f32.mrf.mxu0  ;;  %v1359_v37 = vpack.c.b16 %v12015_v51, %v1062_v43  ;;  %v12017_v56 = vld [vmem:[#allocation102_spill] sm:$0xff] }
 0x312   : > { %v2642_v35 = vadd.f32 %v2641_v54, %v9503_v57 }
 0x313   : > { %v2795_v8 = vpop.f32.mrf.mxu1 }
 0x314   : > { %v2786_v34 = vadd.f32 %v2785_v15, %v2642_v35  ;;  %v12016_v15 = vld [vmem:[#allocation56_spill] sm:$0xff]  ;;  %v12019_v35 = vld [vmem:[#allocation46_spill] sm:$0xff] }
 0x315   : > { %v2939_v16 = vpop.f32.mrf.mxu2  ;;  %v1073_v22 = vunpack.c.l.b16 %v12016_v15 }
 0x316   : > { %v9924_v7 = vadd.f32 %v2929_v60, %v2786_v34 }
 0x317   : > { %v1370_v34 = vpack.c.b16 %v1073_v22, %v12019_v35  ;;  %v12021_v35 = vld [vmem:[#allocation109_spill] sm:$0xff] }
 0x318   : > { %v3023_v62 = vpop.f32.mrf.mxu3 }
 0x319   : > { %v9927_v2 = vadd.f32 %v3023_v62, %v9686_v50  ;;  %v2644_v24 = vpop.f32.mrf.mxu0  ;;  %v7469_v50 = vld [vmem:[%s11451_s3 + $0x30] sm:$0xff] }
 0x31a   : > { %v2645_v57 = vadd.f32 %v2644_v24, %v9516_v12  ;;  %2981 = vmatmul.bf16.gmra.mxu2 %v12018_v5  ;;  %5783 = vmatpush.bf16.msra.mxu1 %v7469_v50  ;;  %v12020_v5 = vld [vmem:[#allocation5_spill] sm:$0xff] }
 0x31b   : > { %v2798_v54 = vpop.f32.mrf.mxu1 }
 0x31c   : > { %v2789_v60 = vadd.f32 %v2788_v14, %v2645_v57  ;;  %2683 = vmatmul.bf16.gmra.mxu0 %v1359_v37 }
 0x31d   : > { %3065 = vmatmul.bf16.gmra.mxu3 %v12017_v56  ;;  %v2942_v14 = vpop.f32.mrf.mxu2 }
 0x31e   : > { %v9942_v43 = vadd.f32 %v2932_v45, %v2789_v60  ;;  %2837 = vmatmul.bf16.gmra.mxu1 %v1370_v34 }
 0x320   : > { %v3026_v12 = vpop.f32.mrf.mxu3 }
 0x321   : > { %v9945_v62 = vadd.f32 %v3026_v12, %v9695_v30  ;;  %v2646_v33 = vpop.f32.mrf.mxu0  ;;  %v1075_v30 = vunpack.c.h.b16 %v12016_v15 }
 0x322   : > { %v2647_v51 = vadd.f32 %v2646_v33, %v9523_v52  ;;  %v12022_v52 = vld [vmem:[#allocation8_spill] sm:$0xff] }
 0x323   : > { %v2800_v9 = vpop.f32.mrf.mxu1 }
 0x324   : > { %v2791_v37 = vadd.f32 %v2790_v63, %v2647_v51 }
 0x325   : > { %v2944_v45 = vpop.f32.mrf.mxu2 }
 0x326   : > { %v9948_v24 = vadd.f32 %v2934_v18, %v2791_v37  ;;  %v12023_v18 = vld [vmem:[#allocation61_spill] sm:$0xff] }
 0x327   : > { %v1376_v34 = vpack.c.b16 %v12023_v18, %v1075_v30 }
 0x328   : > { %v3028_v57 = vpop.f32.mrf.mxu3 }
 0x329   : > { %v9951_v56 = vadd.f32 %v3028_v57, %v9707_v38  ;;  %v2649_v22 = vpop.f32.mrf.mxu0  ;;  %v12024_v57 = vld [vmem:[#allocation21_spill] sm:$0xff] }
 0x32a   : > { %v2650_v60 = vadd.f32 %v2649_v22, %v9534_v59  ;;  %2986 = vmatmul.bf16.gmra.mxu2 %v12022_v52  ;;  %v1072_v22 = vunpack.c.l.b16 %v12024_v57 }
 0x32b   : > { %v2803_v63 = vpop.f32.mrf.mxu1 }
 0x32c   : > { %v2794_v50 = vadd.f32 %v2793_v21, %v2650_v60  ;;  %2688 = vmatmul.bf16.gmra.mxu0 %v12020_v5 }
 0x32d   : > { %3070 = vmatmul.bf16.gmra.mxu3 %v12021_v35  ;;  %v2947_v51 = vpop.f32.mrf.mxu2 }
 0x32e   : > { %v9959_v12 = vadd.f32 %v2937_v32, %v2794_v50  ;;  %2842 = vmatmul.bf16.gmra.mxu1 %v1376_v34  ;;  %v7455_v32 = vld [vmem:[%s11449_s1 + $0x200] sm:$0xff]  ;;  %v12026_v50 = vld [vmem:[#allocation7_spill] sm:$0xff] }
 0x32f   : > { %v12027_v35 = vunpack.c.l.b16 %v12026_v50  ;;  %3158 = vmatpush.bf16.msra.mxu0 %v7455_v32  ;;  %v12031_v50 = vld [vmem:[#allocation59_spill] sm:$0xff] }
 0x330   : > { %v3031_v38 = vpop.f32.mrf.mxu3 }
 0x331   : > { %v9962_v33 = vadd.f32 %v3031_v38, %v9718_v40  ;;  %v2651_v59 = vpop.f32.mrf.mxu0  ;;  %v1369_v52 = vpack.c.b16 %v1072_v22, %v12027_v35 }
 0x332   : > { %v2652_v21 = vadd.f32 %v2651_v59, %v9545_v58  ;;  %v329_v59 = vld [vmem:[%s8114_s16 + $0x258] sm:$0xff] }
 0x333   : > { %v9966_v60 = vpop.f32.mrf.mxu1 }
 0x334   : > { %v2796_v37 = vadd.f32 %v2795_v8, %v2652_v21  ;;  %12025 = vst [vmem:[#allocation52_spill] sm:$0xff] %v9966_v60  ;;  %v12029_v8 = vld [vmem:[#allocation30_spill] sm:$0xff] }
 0x335   : > { %v9978_v18 = vpop.f32.mrf.mxu2  ;;  %v9982_v34 = vpack.c.b16 %v9658_v27, %v12029_v8  ;;  %v1074_v8 = vunpack.c.h.b16 %v12024_v57 }
 0x336   : > { %v9968_v5 = vadd.f32 %v2939_v16, %v2796_v37  ;;  %12028 = vst [vmem:[#allocation86_spill] sm:$0xff] %v9978_v18  ;;  %v12030_v16 = vld [vmem:[#allocation32_spill] sm:$0xff]  ;;  %v409_v37 = vpack.c.bf16 %v329_v59, %v329_v59 }
 0x338   : > { %v3033_v30 = vpop.f32.mrf.mxu3  ;;  %v927_v35 = vunpack.c.l.b16 %v409_v37  ;;  %v12034_v37 = vld [vmem:[#allocation23_spill] sm:$0xff] }
 0x339   : > { %v9974_v40 = vadd.f32 %v3033_v30, %v9731_v46  ;;  %v2654_v58 = vpop.f32.mrf.mxu0  ;;  %v12035_v18 = vunpack.c.l.b16 %v12034_v37 }
 0x33a   : > { %v2655_v38 = vadd.f32 %v2654_v58, %v12030_v16  ;;  %2991 = vmatmul.bf16.gmra.mxu2 %v9982_v34  ;;  %v330_v16 = vld [vmem:[%s8114_s16 + $0x260] sm:$0xff]  ;;  %v10004_v59 = vpack.c.b16 %v927_v35, %v9660_v19 }
 0x33b   : > { %v9988_v46 = vpop.f32.mrf.mxu1 }
 0x33c   : > { %v2799_v21 = vadd.f32 %v2798_v54, %v2655_v38  ;;  %2693 = vmatmul.bf16.gmra.mxu0 %v1369_v52  ;;  %v12032_v52 = vld [vmem:[#allocation137_spill] sm:$0xff]  ;;  %v938_v15 = vshll.u32 %v10004_v59, 16 }
 0x33d   : > { %3075 = vmatmul.bf16.gmra.mxu3 %v11939_v3  ;;  %v9995_v27 = vpop.f32.mrf.mxu2 }
 0x33e   : > { %v9990_v22 = vadd.f32 %v2942_v14, %v2799_v21  ;;  %2847 = vmatmul.bf16.gmra.mxu1 %v12031_v50  ;;  %v410_v14 = vpack.c.bf16 %v330_v16, %v330_v16 }
 0x340   : > { %v3036_v32 = vpop.f32.mrf.mxu3 }
 0x341   : > { %v9993_v30 = vadd.f32 %v3036_v32, %v9741_v39  ;;  %v2656_v54 = vpop.f32.mrf.mxu0  ;;  %v951_v32 = vunpack.c.l.b16 %v410_v14 }
 0x342   : > { %v2657_v58 = vadd.f32 %v2656_v54, %v12032_v52  ;;  %v1375_v54 = vpack.c.b16 %v12035_v18, %v1074_v8  ;;  %v945_v52 = vrot.slane %v9982_v34, 1  ;;  %v12039_v8 = vld [vmem:[#allocation68_spill] sm:$0xff] }
 0x343   : > { %v10001_v38 = vpop.f32.mrf.mxu1  ;;  %v1387_v35 = vpack.c.b16 %v951_v32, %v9660_v19  ;;  %v7476_v19 = vld [vmem:[%s11451_s3 + $0x68] sm:$0xff] }
 0x344   : > { %v2801_v3 = vadd.f32 %v2800_v9, %v2657_v58  ;;  %12033 = vst [vmem:[#allocation77_spill] sm:$0xff] %v10001_v38  ;;  %v946_v58 = vrot.slane %v10004_v59, 1  ;;  %v12037_v38 = vld [vmem:[#allocation27_spill] sm:$0xff]  ;;  %5873 = vmatpush.bf16.msra.mxu2 %v7476_v19 }
 0x345   : > { %v10013_v9 = vpop.f32.mrf.mxu2 }
 0x346   : > { %v10006_v39 = vadd.f32 %v2944_v45, %v2801_v3  ;;  %12036 = vst [vmem:[#allocation72_spill] sm:$0xff] %v10013_v9  ;;  %v10020_v3 = vsel %vm865_vm1, %v945_v52, %v946_v58 }
 0x348   : > { %v3038_v21 = vpop.f32.mrf.mxu3 }
 0x349   : > { %v10009_v50 = vadd.f32 %v3038_v21, %v9754_v17  ;;  %v2659_v16 = vpop.f32.mrf.mxu0  ;;  %v1085_v17 = vunpack.c.l.b16 %v10020_v3  ;;  %v12038_v21 = vld [vmem:[#allocation123_spill] sm:$0xff] }
 0x34a   : > { %v2660_v45 = vadd.f32 %v2659_v16, %v12037_v38  ;;  %2996 = vmatmul.bf16.gmra.mxu2 %v1387_v35  ;;  %v12041_v16 = vld [vmem:[#allocation17_spill] sm:$0xff] }
 0x34b   : > { %v2813_v18 = vpop.f32.mrf.mxu1  ;;  %v1386_v37 = vpack.c.b16 %v1085_v17, %v12039_v8  ;;  %v331_v35 = vld [vmem:[%s8114_s16 + $0x268] sm:$0xff]  ;;  %v332_v17 = vld [vmem:[%s8114_s16 + $0x270] sm:$0xff] }
 0x34c   : > { %v2804_v14 = vadd.f32 %v2803_v63, %v2660_v45  ;;  %2698 = vmatmul.bf16.gmra.mxu0 %v1375_v54  ;;  %v412_v8 = vpack.c.bf16 %v332_v17, %v332_v17 }
 0x34d   : > { %3080 = vmatmul.bf16.gmra.mxu3 %v12038_v21  ;;  %v2957_v63 = vpop.f32.mrf.mxu2 }
 0x34e   : > { %v10025_v9 = vadd.f32 %v2947_v51, %v2804_v14  ;;  %2852 = vmatmul.bf16.gmra.mxu1 %v1386_v37  ;;  %v7468_v51 = vld [vmem:[%s11451_s3 + $0x28] sm:$0xff]  ;;  %v933_v14 = vshll.u32 %v9982_v34, 16  ;;  %v10044_v19 = vunpack.c.l.b16 %v412_v8  ;;  %v10058_v8 = vunpack.c.l.b16 %v946_v58 }
 0x34f   : > { %5784 = vmatpush.bf16.msra.mxu1 %v7468_v51  ;;  %v931_v51 = vshrl.u32 %v9982_v34, 16 }
 0x350   : > { %v3041_v38 = vpop.f32.mrf.mxu3  ;;  %12048 = vst [vmem:[#allocation100_spill] sm:$0xff] %v10058_v8 }
 0x351   : > { %v10031_v52 = vadd.f32 %v3041_v38, %v9766_v48  ;;  %v2661_v54 = vpop.f32.mrf.mxu0  ;;  %v411_v48 = vpack.c.bf16 %v331_v35, %v331_v35 }
 0x352   : > { %v10034_v45 = vadd.f32 %v2661_v54, %v12041_v16 }
 0x353   : > { %12040 = vst [vmem:[#allocation58_spill] sm:$0xff] %v10031_v52  ;;  %v10042_v21 = vpop.f32.mrf.mxu1  ;;  %v952_v37 = vunpack.c.l.b16 %v411_v48  ;;  %v1087_v48 = vunpack.c.h.b16 %v10020_v3 }
 0x354   : > { %12042 = vst [vmem:[#allocation19_spill] sm:$0xff] %v10034_v45  ;;  %v935_v45 = vrot.slane %v933_v14, 1  ;;  %v940_v14 = vrot.slane %v938_v15, 1 }
 0x355   : > { %12043 = vst [vmem:[#allocation89_spill] sm:$0xff] %v10042_v21  ;;  %v10049_v16 = vpop.f32.mrf.mxu2  ;;  %v1393_v47 = vpack.c.b16 %v10044_v19, %v952_v37  ;;  %v12046_v21 = vld [vmem:[#allocation45_spill] sm:$0xff]  ;;  %v10055_v17 = vpack.c.b16 %v952_v37, %v951_v32  ;;  %v1392_v52 = vpack.c.b16 %v10058_v8, %v1087_v48 }
 0x356   : > { %12045 = vst [vmem:[#allocation74_spill] sm:$0xff] %v10049_v16  ;;  %v12050_v16 = vld [vmem:[#allocation133_spill] sm:$0xff]  ;;  %v936_v34 = vor.u32 %v935_v45, %v931_v51 }
 0x357   : > { %12047 = vst [vmem:[#allocation141_spill] sm:$0xff] %v10055_v17 }
 0x358   : > { %v3043_v38 = vpop.f32.mrf.mxu3  ;;  %v10071_v37 = vsel %vm594_vm0, %v936_v34, %v940_v14 }
 0x359   : > { %v10047_v54 = vadd.f32 %v3043_v38, %v9777_v26  ;;  %v2664_v60 = vpop.f32.mrf.mxu0  ;;  %v12049_v38 = vld [vmem:[#allocation24_spill] sm:$0xff] }
 0x35a   : > { %v2665_v35 = vadd.f32 %v2664_v60, %v12046_v21  ;;  %3001 = vmatmul.bf16.gmra.mxu2 %v1393_v47  ;;  %v1084_v47 = vunpack.c.l.b16 %v10071_v37 }
 0x35b   : > { %12044 = vst [vmem:[#allocation75_spill] sm:$0xff] %v10047_v54  ;;  %v2818_v54 = vpop.f32.mrf.mxu1 }
 0x35c   : > { %v2809_v26 = vadd.f32 %v9988_v46, %v2665_v35  ;;  %2703 = vmatmul.bf16.gmra.mxu0 %v12049_v38  ;;  %v12053_v35 = vld [vmem:[#allocation28_spill] sm:$0xff]  ;;  %v12056_v38 = vld [vmem:[#allocation54_spill] sm:$0xff] }
 0x35d   : > { %3085 = vmatmul.bf16.gmra.mxu3 %v12050_v16  ;;  %v2962_v58 = vpop.f32.mrf.mxu2  ;;  %v12051_v16 = vld [vmem:[#allocation29_spill] sm:$0xff] }
 0x35e   : > { %v10065_v60 = vadd.f32 %v9995_v27, %v2809_v26  ;;  %2857 = vmatmul.bf16.gmra.mxu1 %v1392_v52 }
 0x360   : > { %v3046_v32 = vpop.f32.mrf.mxu3 }
 0x361   : > { %v10068_v21 = vadd.f32 %v3046_v32, %v9792_v49  ;;  %v2666_v46 = vpop.f32.mrf.mxu0  ;;  %v12054_v49 = vunpack.c.l.b16 %v12053_v35 }
 0x362   : > { %v10074_v45 = vadd.f32 %v2666_v46, %v12051_v16  ;;  %v942_v46 = vshrl.u32 %v10004_v59, 16 }
 0x363   : > { %v10077_v15 = vpop.f32.mrf.mxu1  ;;  %v1385_v48 = vpack.c.b16 %v1084_v47, %v12054_v49  ;;  %v12057_v49 = vld [vmem:[#allocation39_spill] sm:$0xff] }
 0x364   : > { %12052 = vst [vmem:[#allocation84_spill] sm:$0xff] %v10077_v15 }
 0x365   : > { %v10084_v26 = vpop.f32.mrf.mxu2 }
 0x366   : > { %12055 = vst [vmem:[#allocation76_spill] sm:$0xff] %v10084_v26 }
 0x368   : > { %v3048_v51 = vpop.f32.mrf.mxu3 }
 0x369   : > { %v10080_v27 = vadd.f32 %v3048_v51, %v9806_v6  ;;  %v2669_v52 = vpop.f32.mrf.mxu0  ;;  %v10094_v51 = vor.u32 %v942_v46, %v940_v14 }
 0x36a   : > { %v2670_v34 = vadd.f32 %v2669_v52, %v12056_v38  ;;  %v12061_v52 = vld [vmem:[#allocation31_spill] sm:$0xff] }
 0x36b   : > { %v2823_v16 = vpop.f32.mrf.mxu1 }
 0x36c   : > { %v2814_v32 = vadd.f32 %v2813_v18, %v2670_v34  ;;  %2708 = vmatmul.bf16.gmra.mxu0 %v1385_v48  ;;  %v1086_v18 = vunpack.c.h.b16 %v10071_v37 }
 0x36d   : > { %3090 = vmatmul.bf16.gmra.mxu3 %v11976_v0  ;;  %v2967_v47 = vpop.f32.mrf.mxu2  ;;  %v11634_v0 = vunpack.c.l.b16 %v10094_v51 }
 0x36e   : > { %v10089_v15 = vadd.f32 %v2957_v63, %v2814_v32  ;;  %v12062_v32 = vld [vmem:[#allocation148_spill] sm:$0xff] }
 0x370   : > { %v3051_v8 = vpop.f32.mrf.mxu3 }
 0x371   : > { %v10092_v6 = vadd.f32 %v3051_v8, %v9823_v13  ;;  %v2671_v35 = vpop.f32.mrf.mxu0  ;;  %v1391_v13 = vpack.c.b16 %v11634_v0, %v1086_v18 }
 0x372   : > { %v10097_v26 = vadd.f32 %v2671_v35, %v12057_v49 }
 0x373   : > { %v10101_v59 = vpop.f32.mrf.mxu1 }
 0x374   : > { %12058 = vst [vmem:[#allocation107_spill] sm:$0xff] %v10097_v26 }
 0x375   : > { %12059 = vst [vmem:[#allocation98_spill] sm:$0xff] %v10101_v59  ;;  %v10108_v14 = vpop.f32.mrf.mxu2 }
 0x376   : > { %12060 = vst [vmem:[#allocation18_spill] sm:$0xff] %v10108_v14 }
 0x378   : > { %v3053_v48 = vpop.f32.mrf.mxu3 }
 0x379   : > { %v10104_v63 = vadd.f32 %v3053_v48, %v9833_v53  ;;  %v2674_v8 = vpop.f32.mrf.mxu0 }
 0x37a   : > { %v2675_v38 = vadd.f32 %v2674_v8, %v12061_v52  ;;  %v7475_v8 = vld [vmem:[%s11451_s3 + $0x60] sm:$0xff] }
 0x37b   : > { %v2828_v48 = vpop.f32.mrf.mxu1  ;;  %5874 = vmatpush.bf16.msra.mxu2 %v7475_v8 }
 0x37c   : > { %v2819_v34 = vadd.f32 %v2818_v54, %v2675_v38  ;;  %2713 = vmatmul.bf16.gmra.mxu0 %v1391_v13 }
 0x37d   : > { %3095 = vmatmul.bf16.gmra.mxu3 %v12062_v32  ;;  %v2972_v18 = vpop.f32.mrf.mxu2  ;;  %v12066_v32 = vld [vmem:[#allocation26_spill] sm:$0xff] }
 0x37e   : > { %v10112_v46 = vadd.f32 %v2962_v58, %v2819_v34  ;;  %v12065_v34 = vld [vmem:[#allocation153_spill] sm:$0xff] }
 0x380   : > { %v3056_v35 = vpop.f32.mrf.mxu3 }
 0x381   : > { %v10115_v49 = vadd.f32 %v3056_v35, %v9846_v11  ;;  %v2676_v53 = vpop.f32.mrf.mxu0  ;;  %v7467_v11 = vld [vmem:[%s11451_s3 + $0x20] sm:$0xff] }
 0x382   : > { %v10118_v59 = vadd.f32 %v2676_v53, %v9688_v29  ;;  %5785 = vmatpush.bf16.msra.mxu1 %v7467_v11 }
 0x383   : > { %v10130_v29 = vpop.f32.mrf.mxu1 }
 0x384   : > { %12063 = vst [vmem:[#allocation93_spill] sm:$0xff] %v10118_v59 }
 0x385   : > { %12064 = vst [vmem:[#allocation128_spill] sm:$0xff] %v10130_v29  ;;  %v10134_v35 = vpop.f32.mrf.mxu2 }
 0x386   : > { %12067 = vst [vmem:[#allocation83_spill] sm:$0xff] %v10134_v35 }
 0x388   : > { %v3058_v54 = vpop.f32.mrf.mxu3 }
 0x389   : > { %v10124_v13 = vadd.f32 %v3058_v54, %v9860_v44  ;;  %v2679_v58 = vpop.f32.mrf.mxu0 }
 0x38a   : > { %v2680_v52 = vadd.f32 %v2679_v58, %v9700_v61 }
 0x38b   : > { %v2833_v61 = vpop.f32.mrf.mxu1 }
 0x38c   : > { %v2824_v38 = vadd.f32 %v2823_v16, %v2680_v52  ;;  %3159 = vmatmul.bf16.vlgmr.msra.gmra.mxu0 %v12066_v32 }
 0x38d   : > { %3100 = vmatmul.bf16.gmra.mxu3 %v12065_v34  ;;  %v2977_v58 = vpop.f32.mrf.mxu2  ;;  %v12069_v34 = vld [vmem:[#allocation62_spill] sm:$0xff] }
 0x38e   : > { %v10136_v53 = vadd.f32 %v2967_v47, %v2824_v38  ;;  %v12070_v47 = vld [vmem:[#allocation35_spill] sm:$0xff] }
 0x390   : > { %v3061_v44 = vpop.f32.mrf.mxu3 }
 0x391   : > { %v10139_v8 = vadd.f32 %v3061_v44, %v9878_v41  ;;  %v2681_v54 = vpop.f32.mrf.mxu0 }
 0x392   : > { %v10142_v0 = vadd.f32 %v2681_v54, %v9709_v1 }
 0x393   : > { %v10152_v44 = vpop.f32.mrf.mxu1 }
 0x394   : > { %12068 = vst [vmem:[#allocation155_spill] sm:$0xff] %v10142_v0 }
 0x395   : > { %12071 = vst [vmem:[#allocation110_spill] sm:$0xff] %v10152_v44  ;;  %v10157_v29 = vpop.f32.mrf.mxu2  ;;  %v12076_v44 = vld [vmem:[#allocation6_spill] sm:$0xff] }
 0x396   : > { %12072 = vst [vmem:[#allocation96_spill] sm:$0xff] %v10157_v29 }
 0x398   : > { %v3063_v11 = vpop.f32.mrf.mxu3 }
 0x399   : > { %v10145_v16 = vadd.f32 %v3063_v11, %v9885_v36  ;;  %v2684_v52 = vpop.f32.mrf.mxu0  ;;  %v12073_v36 = vld [vmem:[#allocation53_spill] sm:$0xff] }
 0x39a   : > { %v2685_v32 = vadd.f32 %v2684_v52, %v12069_v34 }
 0x39b   : > { %v2838_v34 = vpop.f32.mrf.mxu1 }
 0x39c   : > { %v2829_v35 = vadd.f32 %v2828_v48, %v2685_v32  ;;  %3164 = vmatmul.bf16.gmra.mxu0 %v12070_v47 }
 0x39d   : > { %3105 = vmatmul.bf16.gmra.mxu3 %v12009_v42  ;;  %v2982_v32 = vpop.f32.mrf.mxu2 }
 0x39e   : > { %v10150_v41 = vadd.f32 %v2972_v18, %v2829_v35  ;;  %v12075_v18 = vld [vmem:[#allocation49_spill] sm:$0xff] }
 0x3a0   : > { %v3066_v38 = vpop.f32.mrf.mxu3 }
 0x3a1   : > { %v10155_v1 = vadd.f32 %v3066_v38, %v9896_v25  ;;  %v2686_v54 = vpop.f32.mrf.mxu0  ;;  %v12077_v25 = vld [vmem:[#allocation42_spill] sm:$0xff] }
 0x3a2   : > { %v10160_v11 = vadd.f32 %v2686_v54, %v12073_v36 }
 0x3a4   : > { %12074 = vst [vmem:[#allocation156_spill] sm:$0xff] %v10160_v11  ;;  %v12078_v11 = vld [vmem:[#allocation37_spill] sm:$0xff] }
 0x3a5   : > { %v10178_v14 = vpop.f32.mrf.mxu2 }
 0x3a6   : > { %12081 = vst [vmem:[#allocation36_spill] sm:$0xff] %v10178_v14 }
 0x3a8   : > { %v3068_v52 = vpop.f32.mrf.mxu3 }
 0x3a9   : > { %v10163_v48 = vadd.f32 %v3068_v52, %v9906_v4  ;;  %v2689_v42 = vpop.f32.mrf.mxu0  ;;  %v10176_v52 = vpop.f32.mrf.mxu1 }
 0x3aa   : > { %v2690_v35 = vadd.f32 %v2689_v42, %v12075_v18  ;;  %12080 = vst [vmem:[#allocation159_spill] sm:$0xff] %v10176_v52  ;;  %v12082_v18 = vld [vmem:[#allocation3_spill] sm:$0xff] }
 0x3ac   : > { %v2834_v47 = vadd.f32 %v2833_v61, %v2690_v35  ;;  %3169 = vmatmul.bf16.gmra.mxu0 %v12077_v25  ;;  %v12083_v35 = vld [vmem:[#allocation12_spill] sm:$0xff] }
 0x3ad   : > { %3110 = vmatmul.bf16.gmra.mxu3 %v12076_v44 }
 0x3ae   : > { %v10168_v38 = vadd.f32 %v2977_v58, %v2834_v47 }
 0x3b0   : > { %v3071_v29 = vpop.f32.mrf.mxu3 }
 0x3b1   : > { %v10171_v54 = vadd.f32 %v3071_v29, %v9916_v23  ;;  %v2691_v36 = vpop.f32.mrf.mxu0  ;;  %v7474_v23 = vld [vmem:[%s11451_s3 + $0x58] sm:$0xff]  ;;  %v2843_v47 = vpop.f32.mrf.mxu1 }
 0x3b2   : > { %v10174_v4 = vadd.f32 %v2691_v36, %v12078_v11  ;;  %v12084_v11 = vld [vmem:[#allocation48_spill] sm:$0xff]  ;;  %5875 = vmatpush.bf16.msra.mxu2 %v7474_v23 }
 0x3b4   : > { %12079 = vst [vmem:[#allocation95_spill] sm:$0xff] %v10174_v4  ;;  %v12101_v4 = vld [vmem:[#allocation71_spill] sm:$0xff] }
 0x3b8   : > { %v3073_v42 = vpop.f32.mrf.mxu3 }
 0x3b9   : > { %v10181_v61 = vadd.f32 %v3073_v42, %v9924_v7  ;;  %v2694_v44 = vpop.f32.mrf.mxu0  ;;  %v7466_v7 = vld [vmem:[%s11451_s3 + $0x18] sm:$0xff]  ;;  %v2987_v42 = vpop.f32.mrf.mxu2 }
 0x3ba   : > { %v2695_v58 = vadd.f32 %v2694_v44, %v12082_v18  ;;  %5786 = vmatpush.bf16.msra.mxu1 %v7466_v7 }
 0x3bc   : > { %v2839_v29 = vadd.f32 %v2838_v34, %v2695_v58  ;;  %3174 = vmatmul.bf16.gmra.mxu0 %v12084_v11  ;;  %v12088_v11 = vld [vmem:[#allocation66_spill] sm:$0xff] }
 0x3bd   : > { %3115 = vmatmul.bf16.gmra.mxu3 %v12083_v35  ;;  %v10200_v35 = vpop.f32.mrf.mxu1 }
 0x3be   : > { %v10189_v25 = vadd.f32 %v2982_v32, %v2839_v29  ;;  %12086 = vst [vmem:[#allocation105_spill] sm:$0xff] %v10200_v35 }
 0x3c0   : > { %v3076_v36 = vpop.f32.mrf.mxu3 }
 0x3c1   : > { %v10195_v44 = vadd.f32 %v3076_v36, %v9942_v43  ;;  %v2696_v18 = vpop.f32.mrf.mxu0  ;;  %v10205_v29 = vpop.f32.mrf.mxu2  ;;  %v12089_v43 = vld [vmem:[#allocation55_spill] sm:$0xff] }
 0x3c2   : > { %v10198_v34 = vadd.f32 %v2696_v18, %v9780_v10  ;;  %12087 = vst [vmem:[#allocation9_spill] sm:$0xff] %v10205_v29 }
 0x3c4   : > { %12085 = vst [vmem:[#allocation121_spill] sm:$0xff] %v10198_v34 }
 0x3c5   : > { %v2848_v35 = vpop.f32.mrf.mxu1 }
 0x3c8   : > { %v3078_v58 = vpop.f32.mrf.mxu3 }
 0x3c9   : > { %v10203_v32 = vadd.f32 %v3078_v58, %v9948_v24  ;;  %v2699_v23 = vpop.f32.mrf.mxu0  ;;  %v12090_v24 = vld [vmem:[#allocation50_spill] sm:$0xff]  ;;  %v2992_v34 = vpop.f32.mrf.mxu2 }
 0x3ca   : > { %v2700_v14 = vadd.f32 %v2699_v23, %v12088_v11 }
 0x3cc   : > { %v2844_v52 = vadd.f32 %v2843_v47, %v2700_v14  ;;  %3179 = vmatmul.bf16.gmra.mxu0 %v12089_v43  ;;  %v7486_v43 = vld [vmem:[%s11451_s3 + $0xb8] sm:$0xff] }
 0x3cd   : > { %3120 = vmatmul.bf16.gmra.mxu3 %v12024_v57  ;;  %v12092_v57 = vld [vmem:[#allocation10_spill] sm:$0xff]  ;;  %v10222_v11 = vpop.f32.mrf.mxu1 }
 0x3ce   : > { %v10210_v7 = vadd.f32 %v2987_v42, %v2844_v52  ;;  %12093 = vst [vmem:[#allocation160_spill] sm:$0xff] %v10222_v11  ;;  %v12094_v42 = vld [vmem:[#allocation25_spill] sm:$0xff]  ;;  %5960 = vmatpush.bf16.msra.mxu3 %v7486_v43  ;;  %v12100_v43 = vld [vmem:[#allocation34_spill] sm:$0xff] }
 0x3d0   : > { %v3081_v10 = vpop.f32.mrf.mxu3 }
 0x3d1   : > { %v10213_v36 = vadd.f32 %v3081_v10, %v9959_v12  ;;  %v2701_v18 = vpop.f32.mrf.mxu0  ;;  %v12095_v12 = vld [vmem:[#allocation63_spill] sm:$0xff]  ;;  %v10229_v10 = vpop.f32.mrf.mxu2 }
 0x3d2   : > { %v10216_v58 = vadd.f32 %v2701_v18, %v12090_v24  ;;  %12096 = vst [vmem:[#allocation41_spill] sm:$0xff] %v10229_v10  ;;  %v12099_v10 = vld [vmem:[#allocation79_spill] sm:$0xff] }
 0x3d4   : > { %12091 = vst [vmem:[#allocation129_spill] sm:$0xff] %v10216_v58  ;;  %v333_v58 = vld [vmem:[%s8114_s16 + $0x278] sm:$0xff] }
 0x3d8   : > { %v3083_v29 = vpop.f32.mrf.mxu3 }
 0x3d9   : > { %v10219_v23 = vadd.f32 %v3083_v29, %v9968_v5  ;;  %v2704_v14 = vpop.f32.mrf.mxu0 }
 0x3da   : > { %v2705_v47 = vadd.f32 %v2704_v14, %v12092_v57  ;;  %v2853_v57 = vpop.f32.mrf.mxu1 }
 0x3dc   : > { %v2849_v52 = vadd.f32 %v2848_v35, %v2705_v47  ;;  %3184 = vmatmul.bf16.gmra.mxu0 %v12095_v12  ;;  %v12097_v35 = vld [vmem:[#allocation51_spill] sm:$0xff] }
 0x3dd   : > { %3125 = vmatmul.bf16.gmra.mxu3 %v12094_v42  ;;  %v2997_v42 = vpop.f32.mrf.mxu2 }
 0x3de   : > { %v10231_v18 = vadd.f32 %v2992_v34, %v2849_v52 }
 0x3e0   : > { %v3086_v5 = vpop.f32.mrf.mxu3 }
 0x3e1   : > { %v10234_v29 = vadd.f32 %v3086_v5, %v9990_v22  ;;  %v2706_v24 = vpop.f32.mrf.mxu0  ;;  %v413_v22 = vpack.c.bf16 %v333_v58, %v333_v58  ;;  %v961_v58 = vshll.u32 %v10055_v17, 16 }
 0x3e2   : > { %v10237_v14 = vadd.f32 %v2706_v24, %v12097_v35  ;;  %v10248_v35 = vpop.f32.mrf.mxu1 }
 0x3e3   : > { %12102 = vst [vmem:[#allocation97_spill] sm:$0xff] %v10248_v35  ;;  %v12106_v35 = vld [vmem:[#allocation11_spill] sm:$0xff] }
 0x3e4   : > { %12098 = vst [vmem:[#allocation162_spill] sm:$0xff] %v10237_v14 }
 0x3e8   : > { %v3088_v47 = vpop.f32.mrf.mxu3 }
 0x3e9   : > { %v10240_v12 = vadd.f32 %v3088_v47, %v10006_v39  ;;  %v2709_v11 = vpop.f32.mrf.mxu0  ;;  %v7473_v39 = vld [vmem:[%s11451_s3 + $0x50] sm:$0xff]  ;;  %v955_v47 = vunpack.c.l.b16 %v413_v22 }
 0x3ea   : > { %v2710_v34 = vadd.f32 %v2709_v11, %v12099_v10  ;;  %v10256_v10 = vpop.f32.mrf.mxu2  ;;  %5876 = vmatpush.bf16.msra.mxu2 %v7473_v39  ;;  %v12107_v39 = vld [vmem:[#allocation80_spill] sm:$0xff] }
 0x3eb   : > { %12103 = vst [vmem:[#allocation44_spill] sm:$0xff] %v10256_v10 }
 0x3ec   : > { %v2854_v52 = vadd.f32 %v2853_v57, %v2710_v34  ;;  %3189 = vmatmul.bf16.gmra.mxu0 %v12101_v4  ;;  %v12104_v57 = vld [vmem:[#allocation60_spill] sm:$0xff]  ;;  %v10262_v4 = vpack.c.b16 %v955_v47, %v10044_v19 }
 0x3ed   : > { %3130 = vmatmul.bf16.gmra.mxu3 %v12100_v43 }
 0x3ee   : > { %v10246_v5 = vadd.f32 %v2997_v42, %v2854_v52  ;;  %v963_v52 = vrot.slane %v961_v58, 1  ;;  %v966_v22 = vshll.u32 %v10262_v4, 16 }
 0x3f0   : > { %v3091_v24 = vpop.f32.mrf.mxu3  ;;  %v968_v47 = vrot.slane %v966_v22, 1 }
 0x3f1   : > { %v10251_v14 = vadd.f32 %v3091_v24, %v10025_v9  ;;  %v2711_v11 = vpop.f32.mrf.mxu0  ;;  %v959_v9 = vshrl.u32 %v10055_v17, 16  ;;  %v2858_v24 = vpop.f32.mrf.mxu1 }
 0x3f2   : > { %v10259_v34 = vadd.f32 %v2711_v11, %v12104_v57  ;;  %v3002_v0 = vpop.f32.mrf.mxu2 }
 0x3f3   : > { %v964_v19 = vor.u32 %v963_v52, %v959_v9  ;;  %v12110_v52 = vld [vmem:[#allocation87_spill] sm:$0xff] }
 0x3f4   : > { %12105 = vst [vmem:[#allocation131_spill] sm:$0xff] %v10259_v34 }
 0x3f5   : > { %v969_v26 = vsel %vm594_vm0, %v964_v19, %v968_v47 }
 0x3f8   : > { %v10265_v42 = vpop.f32.mrf.mxu3 }
 0x3f9   : > { %v2714_v43 = vpop.f32.mrf.mxu0 }
 0x3fa   : > { %v2715_v10 = vadd.f32 %v2714_v43, %v12106_v35  ;;  %v1090_v35 = vunpack.c.l.b16 %v969_v26  ;;  %v970_v43 = vshrl.u32 %v10262_v4, 16 }
 0x3fc   : > { %v2859_v11 = vadd.f32 %v2858_v24, %v2715_v10  ;;  %3194 = vmatmul.bf16.gmra.mxu0 %v12107_v39  ;;  %v7464_v24 = vld [vmem:[%s11451_s3 + $0x8] sm:$0xff]  ;;  %v972_v19 = vor.u32 %v970_v43, %v968_v47  ;;  %v11636_v43 = vmov 0  }
 0x3fd   : > { %3135 = vmatmul.bf16.gmra.mxu3 %v10071_v37  ;;  %v7465_v37 = vld [vmem:[%s11451_s3 + $0x10] sm:$0xff] }
 0x3fe   : > { %v10272_v57 = vadd.f32 %v3002_v0, %v2859_v11  ;;  %5787 = vmatpush.bf16.msra.mxu1 %v7465_v37  ;;  %v7485_v0 = vld [vmem:[%s11451_s3 + $0xb0] sm:$0xff] }
 0x3ff   : > { %5961 = vmatpush.bf16.msra.mxu3 %v7485_v0 }
 0x400   : > { %v3096_v34 = vpop.f32.mrf.mxu3 }
 0x401   : > { %v10275_v59 = vadd.f32 %v3096_v34, %v10065_v60  ;;  %v2716_v58 = vpop.f32.mrf.mxu0  ;;  %v12109_v60 = vunpack.c.l.b16 %v10094_v51  ;;  %v7483_v51 = vld [vmem:[%s11451_s3 + $0xa0] sm:$0xff] }
 0x402   : > { %v10279_v17 = vadd.f32 %v2716_v58, %v9888_v55  ;;  %v7484_v55 = vld [vmem:[%s11451_s3 + $0xa8] sm:$0xff]  ;;  %5788 = vmatpush.bf16.msra.mxu1 %v7464_v24  ;;  %v7463_v58 = vld [vmem:[%s11451_s3] sm:$0xff] }
 0x403   : > { %v1388_v34 = vpack.c.b16 %v1090_v35, %v12109_v60  ;;  %5962 = vmatpush.bf16.msra.mxu3 %v7484_v55  ;;  %v7482_v35 = vld [vmem:[%s11451_s3 + $0x98] sm:$0xff]  ;;  %v7480_v24 = vld [vmem:[%s11451_s3 + $0x88] sm:$0xff] }
 0x404   : > { %12108 = vst [vmem:[#allocation119_spill] sm:$0xff] %v10279_v17 }
 0x406   : > { %5789 = vmatpush.bf16.msra.mxu1 %v7463_v58 }
 0x407   : > { %5963 = vmatpush.bf16.msra.mxu3 %v7483_v51  ;;  %v12111_v51 = vld [vmem:[#allocation92_spill] sm:$0xff] }
 0x408   : > { %v10287_v10 = vpop.f32.mrf.mxu3 }
 0x409   : > { %v3160_v9 = vpop.f32.mrf.mxu0 }
 0x40a   : > { %v3161_v11 = vadd.f32 %v3160_v9, %v9899_v28  ;;  %v1092_v28 = vunpack.c.h.b16 %v969_v26  ;;  %v1094_v9 = vunpack.c.l.b16 %v972_v19  ;;  %v7472_v26 = vld [vmem:[%s11451_s3 + $0x48] sm:$0xff] }
 0x40b   : > { %5964 = vmatpush.bf16.msra.mxu3 %v7482_v35  ;;  %5877 = vmatpush.bf16.msra.mxu2 %v7472_v26 }
 0x40c   : > { %3199 = vmatmul.bf16.gmra.mxu0 %v12110_v52  ;;  %v3295_v60 = vmax.f32 %v3161_v11, 0.0  ;;  %v1394_v52 = vpack.c.b16 %v1094_v9, %v1092_v28  ;;  %v7479_v11 = vld [vmem:[%s11451_s3 + $0x80] sm:$0xff] }
 0x40d   : > { %3140 = vmatmul.bf16.gmra.mxu3 %v1388_v34 }
 0x410   : > { %v3101_v22 = vpop.f32.mrf.mxu3 }
 0x411   : > { %v10304_v39 = vadd.f32 %v3101_v22, %v10089_v15  ;;  %v3162_v37 = vpop.f32.mrf.mxu0  ;;  %v7481_v15 = vld [vmem:[%s11451_s3 + $0x90] sm:$0xff] }
 0x412   : > { %v3163_v0 = vadd.f32 %v3162_v37, %v9909_v31  ;;  %5965 = vmatpush.bf16.msra.mxu3 %v7481_v15  ;;  %v7471_v37 = vld [vmem:[%s11451_s3 + $0x40] sm:$0xff]  ;;  %v7533_v22 = vld [vmem:[%s11451_s3 + $0x230] sm:$0xff] }
 0x413   : > { %5878 = vmatpush.bf16.msra.mxu2 %v7471_v37 }
 0x414   : > { %v3296_v34 = vmax.f32 %v3163_v0, 0.0 }
 0x416   : > { %v7538_v47 = vpack.c.bf16 %v3296_v34, %v3295_v60  ;;  %5966 = vmatpush.bf16.msra.mxu3 %v7480_v24 }
 0x418   : > { %v10316_v55 = vpop.f32.mrf.mxu3  ;;  %7539 = vst [vmem:[#allocation2] sm:$0xff] %v7538_v47  }
 0x419   : > { %3575 = vst [vmem:[#allocation2 + $0x4] sm:$0xf] %v11636_v43  ;;  %v3165_v31 = vpop.f32.mrf.mxu0 }
 0x41a   : > { %5967 = vmatpush.bf16.msra.mxu3 %v7479_v11  ;;  %v3166_v0 = vadd.f32 %v3165_v31, %v9919_v20  ;;  %v12114_v20 = vld [vmem:[#allocation101_spill] sm:$0xff] }
 0x41c   : > { %3204 = vmatmul.bf16.gmra.mxu0 %v12111_v51  ;;  %v3297_v9 = vmax.f32 %v3166_v0, 0.0 }
 0x41d   : > { %3145 = vmatmul.bf16.gmra.mxu3 %v1394_v52 }
 0x41f   : > { %v3460_v19 = vld [vmem:[#allocation2] sm:$0x1] }
 0x420   : > { %v3106_v58 = vpop.f32.mrf.mxu3  ;;  %v3461_v35 = vsel %vm10327_vm4, 0, %v3460_v19 }
 0x421   : > { %v10341_v60 = vadd.f32 %v3106_v58, %v10112_v46  ;;  %3462 = vst [vmem:[#allocation2] sm:$0x1] %v3461_v35  ;;  %v3167_v34 = vpop.f32.mrf.mxu0 }
 0x422   : > { %3574 = vst [vmem:[#allocation2] sm:$0xf] %v11636_v43  ;;  %v3168_v28 = vadd.f32 %v3167_v34, %v9927_v2 }
 0x424   : > { %v3298_v15 = vmax.f32 %v3168_v28, 0.0 }
 0x426   : > { %v7543_v47 = vpack.c.bf16 %v3298_v15, %v3297_v9  ;;  %v7814_v15 = vld [vmem:[#allocation2] sm:$0xf0] }
 0x428   : > { %v10345_v52 = vpop.f32.mrf.mxu3  ;;  %7766 = vst [vmem:[#allocation2 + $0x8] sm:$0xff] %v7543_v47  }
 0x429   : > { %v3170_v24 = vpop.f32.mrf.mxu0  ;;  %v7671_v26 = vld [vmem:[#allocation2] sm:$0xff]  }
 0x42a   : > { %5790 = vmatmul.bf16.vlgmr.msra.gmra.mxu1 %v7671_v26  ;;  %v3171_v58 = vadd.f32 %v3170_v24, %v9945_v62  ;;  %v7815_v47 = vld [vmem:[#allocation2] sm:$0xe] }
 0x42b   : > { %v7816_v24 = vor.u32 %v7815_v47, %v7814_v15 }
 0x42c   : > { %3209 = vmatmul.bf16.gmra.mxu0 %v12114_v20  ;;  %v3299_v34 = vmax.f32 %v3171_v58, 0.0  ;;  %v3922_v20 = vshll.u32 %v7671_v26, 16 }
 0x42f   : > { %v3463_v31 = vld [vmem:[#allocation2 + $0xc] sm:$0x1]  ;;  %v3516_v51 = vld [vmem:[#allocation2 + $0x8] sm:$0x1] }
 0x430   : > { %v3111_v2 = vpop.f32.mrf.mxu3  ;;  %v3464_v11 = vsel %vm10327_vm4, 0, %v3463_v31  ;;  %v3517_v19 = vsel %vm10349_vm6, 0, %v3516_v51  ;;  %v3920_v51 = vshrl.u32 %v7671_v26, 16 }
 0x431   : > { %v10359_v37 = vadd.f32 %v3111_v2, %v10136_v53  ;;  %3465 = vst [vmem:[#allocation2 + $0xc] sm:$0x1] %v3464_v11  ;;  %v3172_v35 = vpop.f32.mrf.mxu0  ;;  %v3924_v2 = vrot.slane %v3922_v20, 1 }
 0x432   : > { %3518 = vst [vmem:[#allocation2 + $0x8] sm:$0x1] %v3517_v19  ;;  %v3173_v0 = vadd.f32 %v3172_v35, %v9951_v56  ;;  %v12119_v19 = vld [vmem:[#allocation108_spill] sm:$0xff]  ;;  %v4175_v35 = vrot.slane %v7816_v24, 1 }
 0x433   : > { %12117 = vst [vmem:[#allocation163_spill] sm:$0xff] %v10359_v37  ;;  %v3925_v58 = vor.u32 %v3924_v2, %v3920_v51  ;;  %v7935_v51 = vld [vmem:[#allocation2 + $0xc] sm:$0xe] }
 0x434   : > { %3576 = vst [vmem:[#allocation2 + $0x8] sm:$0xf] %v11636_v43  ;;  %v3300_v28 = vmax.f32 %v3173_v0, 0.0 }
 0x436   : > { %v7548_v9 = vpack.c.bf16 %v3300_v28, %v3299_v34 }
 0x438   : > { %v10363_v31 = vpop.f32.mrf.mxu3  ;;  %7767 = vst [vmem:[#allocation2 + $0x10] sm:$0xff] %v7548_v9  }
 0x439   : > { %12118 = vst [vmem:[#allocation114_spill] sm:$0xff] %v10363_v31  ;;  %v3175_v62 = vpop.f32.mrf.mxu0 }
 0x43a   : > { %v3176_v0 = vadd.f32 %v3175_v62, %v9962_v33 }
 0x43b   : > { %v3613_v53 = vld [vmem:[#allocation2 + $0x8] sm:$0x1] }
 0x43c   : > { %v3887_v11 = vunpack.c.l.b16 %v3613_v53  ;;  %3214 = vmatmul.bf16.gmra.mxu0 %v12119_v19  ;;  %v3301_v62 = vmax.f32 %v3176_v0, 0.0 }
 0x43e   : > { %v3903_v56 = vpack.c.b16 %v3887_v11, %v3887_v11 }
 0x43f   : > { %v3519_v43 = vld [vmem:[#allocation2 + $0x14] sm:$0x1]  ;;  %v3583_v37 = vld [vmem:[#allocation2 + $0xc] sm:$0xff]  }
 0x440   : > { %v3116_v34 = vpop.f32.mrf.mxu3  ;;  %v4176_v28 = vrot.slane %v3903_v56, 1  ;;  %v3927_v17 = vshll.u32 %v3903_v56, 16  ;;  %v7934_v31 = vld [vmem:[#allocation2 + $0xc] sm:$0xf0]  ;;  %v3520_v9 = vsel %vm10349_vm6, 0, %v3519_v43  ;;  %5795 = vmatmul.bf16.gmra.mxu1 %v3583_v37  ;;  %v3934_v43 = vshll.u32 %v3583_v37, 16 }
 0x441   : > { %v10370_v26 = vadd.f32 %v3116_v34, %v10150_v41  ;;  %3521 = vst [vmem:[#allocation2 + $0x14] sm:$0x1] %v3520_v9  ;;  %v3177_v15 = vpop.f32.mrf.mxu0  ;;  %v3932_v0 = vshrl.u32 %v3583_v37, 16 }
 0x442   : > { %v4177_v47 = vsel %vm865_vm1, %v4175_v35, %v4176_v28  ;;  %v3929_v20 = vrot.slane %v3927_v17, 1  ;;  %v3178_v24 = vadd.f32 %v3177_v15, %v9974_v40  ;;  %v7936_v35 = vor.u32 %v7935_v51, %v7934_v31  ;;  %v12120_v40 = vld [vmem:[#allocation113_spill] sm:$0xff] }
 0x443   : > { %5968 = vmatmul.bf16.vlgmr.msra.gmra.mxu3 %v4177_v47  ;;  %v3936_v34 = vrot.slane %v3934_v43, 1 }
 0x444   : > { %v3930_v33 = vsel %vm594_vm0, %v3925_v58, %v3929_v20  ;;  %v3302_v53 = vmax.f32 %v3178_v24, 0.0  ;;  %v4178_v28 = vrot.slane %v7936_v35, 1 }
 0x445   : > { %5879 = vmatmul.bf16.vlgmr.msra.gmra.mxu2 %v3930_v33  ;;  %v3937_v20 = vor.u32 %v3936_v34, %v3932_v0 }
 0x446   : > { %v7553_v2 = vpack.c.bf16 %v3302_v53, %v3301_v62 }
 0x448   : > { %v10375_v11 = vpop.f32.mrf.mxu3  ;;  %7768 = vst [vmem:[#allocation2 + $0x18] sm:$0xff] %v7553_v2   ;;  %v3614_v41 = vld [vmem:[#allocation2 + $0x14] sm:$0x1] }
 0x449   : > { %v3180_v19 = vpop.f32.mrf.mxu0  ;;  %v3888_v56 = vunpack.c.l.b16 %v3614_v41 }
 0x44a   : > { %v3181_v62 = vadd.f32 %v3180_v19, %v9993_v30  ;;  %v12121_v19 = vld [vmem:[#allocation122_spill] sm:$0xff] }
 0x44b   : > { %v3904_v17 = vpack.c.b16 %v3888_v56, %v3888_v56 }
 0x44c   : > { %3219 = vmatmul.bf16.gmra.mxu0 %v12120_v40  ;;  %v3303_v43 = vmax.f32 %v3181_v62, 0.0 }
 0x44d   : > { %v4179_v58 = vrot.slane %v3904_v17, 1  ;;  %v3939_v9 = vshll.u32 %v3904_v17, 16 }
 0x44f   : > { %v4180_v47 = vsel %vm865_vm1, %v4178_v28, %v4179_v58  ;;  %v3941_v24 = vrot.slane %v3939_v9, 1  ;;  %v3466_v33 = vld [vmem:[#allocation2 + $0x18] sm:$0x1]  ;;  %v12122_v58 = vld [vmem:[#allocation58_spill] sm:$0xff] }
 0x450   : > { %v3121_v15 = vpop.f32.mrf.mxu3  ;;  %v3467_v31 = vsel %vm10327_vm4, 0, %v3466_v33 }
 0x451   : > { %v10381_v53 = vadd.f32 %v3121_v15, %v10168_v38  ;;  %v3182_v51 = vpop.f32.mrf.mxu0  ;;  %v3942_v2 = vsel %vm594_vm0, %v3937_v20, %v3941_v24  ;;  %3468 = vst [vmem:[#allocation2 + $0x18] sm:$0x1] %v3467_v31 }
 0x452   : > { %v3183_v37 = vadd.f32 %v3182_v51, %v10009_v50 }
 0x453   : > { %5973 = vmatmul.bf16.gmra.mxu3 %v4180_v47  ;;  %v12123_v47 = vld [vmem:[#allocation75_spill] sm:$0xff] }
 0x454   : > { %v3304_v41 = vmax.f32 %v3183_v37, 0.0  ;;  %v7818_v37 = vld [vmem:[#allocation2 + $0x18] sm:$0xe] }
 0x455   : > { %5884 = vmatmul.bf16.gmra.mxu2 %v3942_v2  ;;  %v7817_v2 = vld [vmem:[#allocation2 + $0x18] sm:$0xf0] }
 0x456   : > { %v7558_v56 = vpack.c.bf16 %v3304_v41, %v3303_v43 }
 0x458   : > { %v10387_v35 = vpop.f32.mrf.mxu3  ;;  %7769 = vst [vmem:[#allocation2 + $0x20] sm:$0xff] %v7558_v56   ;;  %v7792_v30 = vld [vmem:[#allocation2 + $0x18] sm:$0xff]  }
 0x459   : > { %v3185_v38 = vpop.f32.mrf.mxu0  ;;  %5800 = vmatmul.bf16.gmra.mxu1 %v7792_v30  ;;  %v3946_v31 = vshll.u32 %v7792_v30, 16 }
 0x45a   : > { %v3186_v0 = vadd.f32 %v3185_v38, %v12122_v58  ;;  %v7819_v38 = vor.u32 %v7818_v37, %v7817_v2 }
 0x45c   : > { %3224 = vmatmul.bf16.gmra.mxu0 %v12121_v19  ;;  %v3305_v24 = vmax.f32 %v3186_v0, 0.0  ;;  %v12124_v19 = vld [vmem:[#allocation132_spill] sm:$0xff] }
 0x45f   : > { %v3469_v17 = vld [vmem:[#allocation2 + $0x24] sm:$0x1]  ;;  %v3522_v34 = vld [vmem:[#allocation2 + $0x20] sm:$0x1]  ;;  %v7962_v46 = vld [vmem:[#allocation2 + $0x24] sm:$0xe] }
 0x460   : > { %v3126_v40 = vpop.f32.mrf.mxu3  ;;  %v3470_v28 = vsel %vm10327_vm4, 0, %v3469_v17  ;;  %v3523_v50 = vsel %vm10349_vm6, 0, %v3522_v34  ;;  %v3944_v34 = vshrl.u32 %v7792_v30, 16 }
 0x461   : > { %v10396_v9 = vadd.f32 %v3126_v40, %v10189_v25  ;;  %3471 = vst [vmem:[#allocation2 + $0x24] sm:$0x1] %v3470_v28  ;;  %v3187_v15 = vpop.f32.mrf.mxu0  ;;  %v3948_v25 = vrot.slane %v3946_v31, 1  ;;  %v4181_v40 = vrot.slane %v7819_v38, 1 }
 0x462   : > { %3524 = vst [vmem:[#allocation2 + $0x20] sm:$0x1] %v3523_v50  ;;  %v3188_v20 = vadd.f32 %v3187_v15, %v12123_v47 }
 0x463   : > { %v3949_v58 = vor.u32 %v3948_v25, %v3944_v34 }
 0x464   : > { %v3306_v33 = vmax.f32 %v3188_v20, 0.0 }
 0x466   : > { %v7563_v62 = vpack.c.bf16 %v3306_v33, %v3305_v24 }
 0x468   : > { %v10399_v51 = vpop.f32.mrf.mxu3  ;;  %7770 = vst [vmem:[#allocation2 + $0x28] sm:$0xff] %v7563_v62  }
 0x469   : > { %v3190_v43 = vpop.f32.mrf.mxu0  ;;  %v3615_v41 = vld [vmem:[#allocation2 + $0x20] sm:$0x1] }
 0x46a   : > { %v3889_v56 = vunpack.c.l.b16 %v3615_v41  ;;  %v3191_v15 = vadd.f32 %v3190_v43, %v10068_v21 }
 0x46c   : > { %3229 = vmatmul.bf16.gmra.mxu0 %v12124_v19  ;;  %v3905_v17 = vpack.c.b16 %v3889_v56, %v3889_v56  ;;  %v3307_v21 = vmax.f32 %v3191_v15, 0.0  ;;  %v7938_v56 = vld [vmem:[#allocation2 + $0x24] sm:$0xe] }
 0x46e   : > { %v4182_v28 = vrot.slane %v3905_v17, 1  ;;  %v3951_v50 = vshll.u32 %v3905_v17, 16 }
 0x46f   : > { %v3525_v0 = vld [vmem:[#allocation2 + $0x2c] sm:$0x1]  ;;  %v3587_v20 = vld [vmem:[#allocation2 + $0x24] sm:$0xff]  }
 0x470   : > { %v3131_v47 = vpop.f32.mrf.mxu3  ;;  %v7937_v24 = vld [vmem:[#allocation2 + $0x24] sm:$0xf0]  ;;  %v3526_v33 = vsel %vm10349_vm6, 0, %v3525_v0  ;;  %v4183_v31 = vsel %vm865_vm1, %v4181_v40, %v4182_v28  ;;  %v3953_v2 = vrot.slane %v3951_v50, 1  ;;  %5805 = vmatmul.bf16.gmra.mxu1 %v3587_v20  ;;  %v3958_v25 = vshll.u32 %v3587_v20, 16  ;;  %v12125_v0 = vld [vmem:[#allocation139_spill] sm:$0xff] }
 0x471   : > { %v10406_v62 = vadd.f32 %v3131_v47, %v10210_v7  ;;  %3527 = vst [vmem:[#allocation2 + $0x2c] sm:$0x1] %v3526_v33  ;;  %5978 = vmatmul.bf16.gmra.mxu3 %v4183_v31  ;;  %v3192_v30 = vpop.f32.mrf.mxu0  ;;  %v7939_v40 = vor.u32 %v7938_v56, %v7937_v24  ;;  %v3956_v47 = vshrl.u32 %v3587_v20, 16 }
 0x472   : > { %v3193_v37 = vadd.f32 %v3192_v30, %v10080_v27  ;;  %v3954_v41 = vsel %vm594_vm0, %v3949_v58, %v3953_v2  ;;  %v3960_v50 = vrot.slane %v3958_v25, 1 }
 0x473   : > { %5889 = vmatmul.bf16.gmra.mxu2 %v3954_v41  ;;  %v4184_v27 = vrot.slane %v7939_v40, 1 }
 0x474   : > { %v3308_v43 = vmax.f32 %v3193_v37, 0.0  ;;  %v3961_v2 = vor.u32 %v3960_v50, %v3956_v47 }
 0x476   : > { %v7568_v38 = vpack.c.bf16 %v3308_v43, %v3307_v21 }
 0x478   : > { %v10411_v19 = vpop.f32.mrf.mxu3  ;;  %7771 = vst [vmem:[#allocation2 + $0x30] sm:$0xff] %v7568_v38   ;;  %v3616_v7 = vld [vmem:[#allocation2 + $0x2c] sm:$0x1] }
 0x479   : > { %v3195_v17 = vpop.f32.mrf.mxu0  ;;  %v3890_v34 = vunpack.c.l.b16 %v3616_v7 }
 0x47a   : > { %v3196_v41 = vadd.f32 %v3195_v17, %v10092_v6  ;;  %v12126_v17 = vld [vmem:[#allocation147_spill] sm:$0xff] }
 0x47b   : > { %v3906_v28 = vpack.c.b16 %v3890_v34, %v3890_v34 }
 0x47c   : > { %3234 = vmatmul.bf16.gmra.mxu0 %v12125_v0  ;;  %v3309_v38 = vmax.f32 %v3196_v41, 0.0 }
 0x47d   : > { %v4185_v58 = vrot.slane %v3906_v28, 1  ;;  %v3963_v15 = vshll.u32 %v3906_v28, 16 }
 0x47f   : > { %v4186_v31 = vsel %vm865_vm1, %v4184_v27, %v4185_v58  ;;  %v3965_v30 = vrot.slane %v3963_v15, 1  ;;  %v3472_v37 = vld [vmem:[#allocation2 + $0x30] sm:$0x1]  ;;  %v7820_v41 = vld [vmem:[#allocation2 + $0x30] sm:$0xf0] }
 0x480   : > { %v3136_v33 = vpop.f32.mrf.mxu3  ;;  %v3473_v24 = vsel %vm10327_vm4, 0, %v3472_v37 }
 0x481   : > { %v10417_v21 = vadd.f32 %v3136_v33, %v10231_v18  ;;  %5983 = vmatmul.bf16.gmra.mxu3 %v4186_v31  ;;  %v3197_v43 = vpop.f32.mrf.mxu0  ;;  %v3966_v56 = vsel %vm594_vm0, %v3961_v2, %v3965_v30  ;;  %3474 = vst [vmem:[#allocation2 + $0x30] sm:$0x1] %v3473_v24  ;;  %v7821_v24 = vld [vmem:[#allocation2 + $0x30] sm:$0xe] }
 0x482   : > { %v3198_v20 = vadd.f32 %v3197_v43, %v10104_v63 }
 0x483   : > { %5894 = vmatmul.bf16.gmra.mxu2 %v3966_v56 }
 0x484   : > { %v3310_v25 = vmax.f32 %v3198_v20, 0.0  ;;  %v7822_v20 = vor.u32 %v7821_v24, %v7820_v41  ;;  %v7494_v41 = vld [vmem:[%s11451_s3 + $0xf8] sm:$0xff] }
 0x485   : > { %6049 = vmatpush.bf16.msrb.mxu1 %v7494_v41 }
 0x486   : > { %v7573_v7 = vpack.c.bf16 %v3310_v25, %v3309_v38  ;;  %v12127_v38 = vld [vmem:[#allocation152_spill] sm:$0xff] }
 0x488   : > { %v10423_v34 = vpop.f32.mrf.mxu3  ;;  %7772 = vst [vmem:[#allocation2 + $0x38] sm:$0xff] %v7573_v7   ;;  %v7793_v6 = vld [vmem:[#allocation2 + $0x30] sm:$0xff]  }
 0x489   : > { %v3200_v18 = vpop.f32.mrf.mxu0  ;;  %5810 = vmatmul.bf16.gmra.mxu1 %v7793_v6  ;;  %v3970_v30 = vshll.u32 %v7793_v6, 16  ;;  %v3968_v7 = vshrl.u32 %v7793_v6, 16 }
 0x48a   : > { %v3201_v27 = vadd.f32 %v3200_v18, %v10115_v49  ;;  %v4187_v18 = vrot.slane %v7822_v20, 1 }
 0x48c   : > { %3239 = vmatmul.bf16.gmra.mxu0 %v12126_v17  ;;  %v3311_v33 = vmax.f32 %v3201_v27, 0.0 }
 0x48f   : > { %v3475_v40 = vld [vmem:[#allocation2 + $0x3c] sm:$0x1]  ;;  %v3528_v28 = vld [vmem:[#allocation2 + $0x38] sm:$0x1] }
 0x490   : > { %v3141_v50 = vpop.f32.mrf.mxu3  ;;  %v3476_v0 = vsel %vm10327_vm4, 0, %v3475_v40  ;;  %v3529_v63 = vsel %vm10349_vm6, 0, %v3528_v28 }
 0x491   : > { %v10432_v58 = vadd.f32 %v3141_v50, %v10246_v5  ;;  %3477 = vst [vmem:[#allocation2 + $0x3c] sm:$0x1] %v3476_v0  ;;  %v3202_v47 = vpop.f32.mrf.mxu0  ;;  %v3972_v5 = vrot.slane %v3970_v30, 1 }
 0x492   : > { %3530 = vst [vmem:[#allocation2 + $0x38] sm:$0x1] %v3529_v63  ;;  %v3203_v15 = vadd.f32 %v3202_v47, %v10124_v13 }
 0x493   : > { %v3973_v40 = vor.u32 %v3972_v5, %v3968_v7 }
 0x494   : > { %v3312_v31 = vmax.f32 %v3203_v15, 0.0 }
 0x496   : > { %v7578_v2 = vpack.c.bf16 %v3312_v31, %v3311_v33 }
 0x498   : > { %v10435_v37 = vpop.f32.mrf.mxu3  ;;  %7773 = vst [vmem:[#allocation2 + $0x40] sm:$0xff] %v7578_v2  }
 0x499   : > { %v3205_v43 = vpop.f32.mrf.mxu0  ;;  %v3617_v56 = vld [vmem:[#allocation2 + $0x38] sm:$0x1] }
 0x49a   : > { %v3891_v49 = vunpack.c.l.b16 %v3617_v56  ;;  %v3206_v50 = vadd.f32 %v3205_v43, %v10139_v8  ;;  %v7502_v8 = vld [vmem:[%s11451_s3 + $0x138] sm:$0xff] }
 0x49b   : > { %v7941_v43 = vld [vmem:[#allocation2 + $0x3c] sm:$0xe]  ;;  %6138 = vmatpush.bf16.msrb.mxu2 %v7502_v8 }
 0x49c   : > { %3244 = vmatmul.bf16.gmra.mxu0 %v12127_v38  ;;  %v3907_v25 = vpack.c.b16 %v3891_v49, %v3891_v49 }
 0x49e   : > { %v4188_v13 = vrot.slane %v3907_v25, 1  ;;  %v3975_v17 = vshll.u32 %v3907_v25, 16 }
 0x49f   : > { %v3531_v28 = vld [vmem:[#allocation2 + $0x44] sm:$0x1]  ;;  %v3591_v63 = vld [vmem:[#allocation2 + $0x3c] sm:$0xff]  }
 0x4a0   : > { %v3146_v0 = vpop.f32.mrf.mxu3  ;;  %v7940_v27 = vld [vmem:[#allocation2 + $0x3c] sm:$0xf0]  ;;  %v3532_v47 = vsel %vm10349_vm6, 0, %v3531_v28  ;;  %v4189_v33 = vsel %vm865_vm1, %v4187_v18, %v4188_v13  ;;  %v3977_v31 = vrot.slane %v3975_v17, 1  ;;  %5815 = vmatmul.bf16.gmra.mxu1 %v3591_v63  ;;  %v3982_v49 = vshll.u32 %v3591_v63, 16  ;;  %v12128_v18 = vld [vmem:[#allocation157_spill] sm:$0xff] }
 0x4a1   : > { %v10442_v15 = vadd.f32 %v3146_v0, %v10272_v57  ;;  %3533 = vst [vmem:[#allocation2 + $0x44] sm:$0x1] %v3532_v47  ;;  %5988 = vmatmul.bf16.gmra.mxu3 %v4189_v33  ;;  %v3207_v6 = vpop.f32.mrf.mxu0  ;;  %v3313_v57 = vmax.f32 %v3206_v50, 0.0  ;;  %v7942_v38 = vor.u32 %v7941_v43, %v7940_v27  ;;  %v7493_v43 = vld [vmem:[%s11451_s3 + $0xf0] sm:$0xff] }
 0x4a2   : > { %v3208_v2 = vadd.f32 %v3207_v6, %v10145_v16  ;;  %v3978_v30 = vsel %vm594_vm0, %v3973_v40, %v3977_v31  ;;  %v3984_v7 = vrot.slane %v3982_v49, 1  ;;  %v3980_v40 = vshrl.u32 %v3591_v63, 16  ;;  %6050 = vmatpush.bf16.msrb.mxu1 %v7493_v43  ;;  %v12130_v43 = vld [vmem:[#allocation47_spill] sm:$0xff] }
 0x4a3   : > { %5899 = vmatmul.bf16.gmra.mxu2 %v3978_v30  ;;  %v4190_v13 = vrot.slane %v7942_v38, 1 }
 0x4a4   : > { %v3314_v24 = vmax.f32 %v3208_v2, 0.0  ;;  %v3985_v0 = vor.u32 %v3984_v7, %v3980_v40 }
 0x4a6   : > { %v7583_v56 = vpack.c.bf16 %v3314_v24, %v3313_v57  ;;  %v10460_v57 = vpop.f32.mrf.mxu1 }
 0x4a8   : > { %7774 = vst [vmem:[#allocation2 + $0x48] sm:$0xff] %v7583_v56   ;;  %v3618_v16 = vld [vmem:[#allocation2 + $0x44] sm:$0x1]  ;;  %v10469_v49 = vpop.f32.mrf.mxu3 }
 0x4a9   : > { %v3210_v20 = vpop.f32.mrf.mxu0  ;;  %v3892_v5 = vunpack.c.l.b16 %v3618_v16  ;;  %v10471_v16 = vpop.f32.mrf.mxu2 }
 0x4aa   : > { %v3211_v31 = vadd.f32 %v3210_v20, %v10155_v1  ;;  %v7501_v1 = vld [vmem:[%s11451_s3 + $0x130] sm:$0xff] }
 0x4ab   : > { %v3908_v25 = vpack.c.b16 %v3892_v5, %v3892_v5  ;;  %6139 = vmatpush.bf16.msrb.mxu2 %v7501_v1 }
 0x4ac   : > { %3249 = vmatmul.bf16.gmra.mxu0 %v12128_v18  ;;  %v3315_v63 = vmax.f32 %v3211_v31, 0.0 }
 0x4ad   : > { %v4191_v17 = vrot.slane %v3908_v25, 1  ;;  %v3987_v28 = vshll.u32 %v3908_v25, 16 }
 0x4ae   : > { %v5791_v38 = vpop.f32.mrf.mxu1 }
 0x4af   : > { %v4192_v50 = vsel %vm865_vm1, %v4190_v13, %v4191_v17  ;;  %v3989_v47 = vrot.slane %v3987_v28, 1  ;;  %v3478_v33 = vld [vmem:[#allocation2 + $0x48] sm:$0x1]  ;;  %v10481_v17 = vld [vmem:[%s11452_s4] ss:$0 sm:$0xff] }
 0x4b0   : > { %v3479_v6 = vsel %vm10327_vm4, 0, %v3478_v33  ;;  %v5792_v28 = vadd.f32 %v10481_v17, %v5791_v38 }
 0x4b1   : > { %5993 = vmatmul.bf16.gmra.mxu3 %v4192_v50  ;;  %v3212_v27 = vpop.f32.mrf.mxu0  ;;  %v3990_v2 = vsel %vm594_vm0, %v3985_v0, %v3989_v47  ;;  %3480 = vst [vmem:[#allocation2 + $0x48] sm:$0x1] %v3479_v6 }
 0x4b2   : > { %v3213_v30 = vadd.f32 %v3212_v27, %v10163_v48  ;;  %v12129_v48 = vld [vmem:[#allocation43_spill] sm:$0xff]  ;;  %v7824_v27 = vld [vmem:[#allocation2 + $0x48] sm:$0xe] }
 0x4b3   : > { %5904 = vmatmul.bf16.gmra.mxu2 %v3990_v2 }
 0x4b4   : > { %v3316_v8 = vmax.f32 %v3213_v30, 0.0 }
 0x4b6   : > { %v7588_v41 = vpack.c.bf16 %v3316_v8, %v3315_v63  ;;  %v10489_v30 = vpop.f32.mrf.mxu1 }
 0x4b8   : > { %7775 = vst [vmem:[#allocation2 + $0x50] sm:$0xff] %v7588_v41   ;;  %v7794_v24 = vld [vmem:[#allocation2 + $0x48] sm:$0xff]  }
 0x4b9   : > { %v3215_v56 = vpop.f32.mrf.mxu0  ;;  %5820 = vmatmul.bf16.gmra.mxu1 %v7794_v24  ;;  %v3994_v31 = vshll.u32 %v7794_v24, 16 }
 0x4ba   : > { %v3216_v18 = vadd.f32 %v3215_v56, %v10171_v54  ;;  %v7823_v54 = vld [vmem:[#allocation2 + $0x48] sm:$0xf0] }
 0x4bb   : > { %v3996_v1 = vrot.slane %v3994_v31, 1 }
 0x4bc   : > { %3254 = vmatmul.bf16.gmra.mxu0 %v12129_v48  ;;  %v3317_v50 = vmax.f32 %v3216_v18, 0.0  ;;  %v3992_v48 = vshrl.u32 %v7794_v24, 16 }
 0x4bf   : > { %v3481_v20 = vld [vmem:[#allocation2 + $0x54] sm:$0x1]  ;;  %v3534_v5 = vld [vmem:[#allocation2 + $0x50] sm:$0x1] }
 0x4c0   : > { %v3482_v25 = vsel %vm10327_vm4, 0, %v3481_v20  ;;  %v3535_v7 = vsel %vm10349_vm6, 0, %v3534_v5 }
 0x4c1   : > { %3483 = vst [vmem:[#allocation2 + $0x54] sm:$0x1] %v3482_v25  ;;  %v3217_v13 = vpop.f32.mrf.mxu0  ;;  %v3997_v25 = vor.u32 %v3996_v1, %v3992_v48 }
 0x4c2   : > { %3536 = vst [vmem:[#allocation2 + $0x50] sm:$0x1] %v3535_v7  ;;  %v3218_v40 = vadd.f32 %v3217_v13, %v10181_v61  ;;  %v7825_v61 = vor.u32 %v7824_v27, %v7823_v54  ;;  %v5796_v27 = vpop.f32.mrf.mxu1 }
 0x4c3   : > { %v5797_v1 = vadd.f32 %v10481_v17, %v5796_v27 }
 0x4c4   : > { %v3318_v0 = vmax.f32 %v3218_v40, 0.0  ;;  %v4193_v20 = vrot.slane %v7825_v61, 1  ;;  %v7944_v61 = vld [vmem:[#allocation2 + $0x54] sm:$0xe] }
 0x4c6   : > { %v10485_v47 = vpop.f32.mrf.mxu3  ;;  %v7593_v33 = vpack.c.bf16 %v3318_v0, %v3317_v50 }
 0x4c8   : > { %v5880_v6 = vpop.f32.mrf.mxu2  ;;  %7776 = vst [vmem:[#allocation2 + $0x58] sm:$0xff] %v7593_v33  }
 0x4c9   : > { %v10487_v2 = vadd.f32 %v5880_v6, %v5792_v28  ;;  %v3220_v63 = vpop.f32.mrf.mxu0  ;;  %v3619_v8 = vld [vmem:[#allocation2 + $0x50] sm:$0x1] }
 0x4ca   : > { %v3893_v41 = vunpack.c.l.b16 %v3619_v8  ;;  %v3221_v0 = vadd.f32 %v3220_v63, %v10195_v44 }
 0x4cc   : > { %3259 = vmatmul.bf16.gmra.mxu0 %v12130_v43  ;;  %v3909_v56 = vpack.c.b16 %v3893_v41, %v3893_v41  ;;  %v3319_v8 = vmax.f32 %v3221_v0, 0.0  ;;  %v12131_v0 = vld [vmem:[#allocation56_spill] sm:$0xff] }
 0x4ce   : > { %v4194_v5 = vrot.slane %v3909_v56, 1  ;;  %v3999_v38 = vshll.u32 %v3909_v56, 16  ;;  %v10492_v18 = vpop.f32.mrf.mxu3 }
 0x4cf   : > { %v3537_v7 = vld [vmem:[#allocation2 + $0x5c] sm:$0x1]  ;;  %v3595_v40 = vld [vmem:[#allocation2 + $0x54] sm:$0xff]  }
 0x4d0   : > { %v10494_v13 = vpop.f32.mrf.mxu2  ;;  %v7943_v28 = vld [vmem:[#allocation2 + $0x54] sm:$0xf0]  ;;  %v3538_v50 = vsel %vm10349_vm6, 0, %v3537_v7  ;;  %v4195_v33 = vsel %vm865_vm1, %v4193_v20, %v4194_v5  ;;  %v4001_v31 = vrot.slane %v3999_v38, 1  ;;  %5825 = vmatmul.bf16.gmra.mxu1 %v3595_v40  ;;  %v4006_v44 = vshll.u32 %v3595_v40, 16 }
 0x4d1   : > { %3539 = vst [vmem:[#allocation2 + $0x5c] sm:$0x1] %v3538_v50  ;;  %5998 = vmatmul.bf16.gmra.mxu3 %v4195_v33  ;;  %v3222_v24 = vpop.f32.mrf.mxu0 }
 0x4d2   : > { %v3223_v6 = vadd.f32 %v3222_v24, %v10203_v32  ;;  %v4002_v54 = vsel %vm594_vm0, %v3997_v25, %v4001_v31  ;;  %v7945_v32 = vor.u32 %v7944_v61, %v7943_v28  ;;  %v4008_v50 = vrot.slane %v4006_v44, 1  ;;  %v7492_v44 = vld [vmem:[%s11451_s3 + $0xe8] sm:$0xff] }
 0x4d3   : > { %5909 = vmatmul.bf16.gmra.mxu2 %v4002_v54  ;;  %v4004_v24 = vshrl.u32 %v3595_v40, 16  ;;  %v7500_v40 = vld [vmem:[%s11451_s3 + $0x128] sm:$0xff]  ;;  %6051 = vmatpush.bf16.msrb.mxu1 %v7492_v44 }
 0x4d4   : > { %v3320_v41 = vmax.f32 %v3223_v6, 0.0  ;;  %v4196_v33 = vrot.slane %v7945_v32, 1  ;;  %6140 = vmatpush.bf16.msrb.mxu2 %v7500_v40 }
 0x4d5   : > { %v4009_v27 = vor.u32 %v4008_v50, %v4004_v24 }
 0x4d6   : > { %v7598_v43 = vpack.c.bf16 %v3320_v41, %v3319_v8  ;;  %v5974_v20 = vpop.f32.mrf.mxu3 }
 0x4d8   : > { %v5885_v63 = vpop.f32.mrf.mxu2  ;;  %7777 = vst [vmem:[#allocation2 + $0x60] sm:$0xff] %v7598_v43   ;;  %v3620_v48 = vld [vmem:[#allocation2 + $0x5c] sm:$0x1] }
 0x4d9   : > { %v5886_v56 = vadd.f32 %v5885_v63, %v5797_v1  ;;  %v3225_v5 = vpop.f32.mrf.mxu0  ;;  %v3894_v38 = vunpack.c.l.b16 %v3620_v48 }
 0x4da   : > { %v3226_v1 = vadd.f32 %v3225_v5, %v10213_v36 }
 0x4db   : > { %v10503_v7 = vadd.f32 %v5974_v20, %v5886_v56  ;;  %v3910_v25 = vpack.c.b16 %v3894_v38, %v3894_v38  ;;  %v10518_v20 = vpop.f32.mrf.mxu1  ;;  %v7518_v38 = vld [vmem:[%s11451_s3 + $0x1b8] sm:$0xff] }
 0x4dc   : > { %3264 = vmatmul.bf16.gmra.mxu0 %v12131_v0  ;;  %v3321_v36 = vmax.f32 %v3226_v1, 0.0 }
 0x4dd   : > { %v4197_v31 = vrot.slane %v3910_v25, 1  ;;  %v4011_v6 = vshll.u32 %v3910_v25, 16  ;;  %6316 = vmatpush.bf16.msrb.mxu0 %v7518_v38 }
 0x4de   : > { %v10527_v25 = vpop.f32.mrf.mxu3 }
 0x4df   : > { %v4198_v54 = vsel %vm865_vm1, %v4196_v33, %v4197_v31  ;;  %v4013_v8 = vrot.slane %v4011_v6, 1  ;;  %v3484_v41 = vld [vmem:[#allocation2 + $0x60] sm:$0x1] }
 0x4e0   : > { %v3485_v28 = vsel %vm10327_vm4, 0, %v3484_v41  ;;  %v10529_v50 = vpop.f32.mrf.mxu2 }
 0x4e1   : > { %6003 = vmatmul.bf16.gmra.mxu3 %v4198_v54  ;;  %v3227_v61 = vpop.f32.mrf.mxu0  ;;  %v4014_v43 = vsel %vm594_vm0, %v4009_v27, %v4013_v8  ;;  %3486 = vst [vmem:[#allocation2 + $0x60] sm:$0x1] %v3485_v28 }
 0x4e2   : > { %v3228_v63 = vadd.f32 %v3227_v61, %v10219_v23  ;;  %v12132_v23 = vld [vmem:[#allocation64_spill] sm:$0xff] }
 0x4e3   : > { %5914 = vmatmul.bf16.gmra.mxu2 %v4014_v43  ;;  %v5801_v31 = vpop.f32.mrf.mxu1 }
 0x4e4   : > { %v3322_v56 = vmax.f32 %v3228_v63, 0.0  ;;  %v5802_v28 = vadd.f32 %v10481_v17, %v5801_v31 }
 0x4e6   : > { %v7603_v48 = vpack.c.bf16 %v3322_v56, %v3321_v36  ;;  %v7826_v36 = vld [vmem:[#allocation2 + $0x60] sm:$0xf0]  ;;  %v7827_v56 = vld [vmem:[#allocation2 + $0x60] sm:$0xe] }
 0x4e7   : > { %v7828_v31 = vor.u32 %v7827_v56, %v7826_v36 }
 0x4e8   : > { %7778 = vst [vmem:[#allocation2 + $0x68] sm:$0xff] %v7603_v48   ;;  %v10520_v5 = vld [vmem:[#allocation2 + $0x60] sm:$0xff]   ;;  %v12133_v48 = vld [vmem:[#allocation19_spill] sm:$0xff] }
 0x4e9   : > { %v3230_v32 = vpop.f32.mrf.mxu0  ;;  %5830 = vmatmul.bf16.gmra.mxu1 %v10520_v5  ;;  %v4018_v44 = vshll.u32 %v10520_v5, 16 }
 0x4ea   : > { %v3231_v54 = vadd.f32 %v3230_v32, %v10234_v29  ;;  %v12134_v29 = vld [vmem:[#allocation52_spill] sm:$0xff] }
 0x4eb   : > { %v2806_v38 = vadd.f32 %v12134_v29, %v12133_v48 }
 0x4ec   : > { %3269 = vmatmul.bf16.gmra.mxu0 %v12132_v23  ;;  %v3323_v41 = vmax.f32 %v3231_v54, 0.0 }
 0x4ef   : > { %v3487_v0 = vld [vmem:[#allocation2 + $0x6c] sm:$0x1]  ;;  %v3540_v33 = vld [vmem:[#allocation2 + $0x68] sm:$0x1] }
 0x4f0   : > { %v3488_v24 = vsel %vm10327_vm4, 0, %v3487_v0  ;;  %v3541_v6 = vsel %vm10349_vm6, 0, %v3540_v33 }
 0x4f1   : > { %3489 = vst [vmem:[#allocation2 + $0x6c] sm:$0x1] %v3488_v24  ;;  %v3232_v27 = vpop.f32.mrf.mxu0  ;;  %v4020_v24 = vrot.slane %v4018_v44, 1 }
 0x4f2   : > { %3542 = vst [vmem:[#allocation2 + $0x68] sm:$0x1] %v3541_v6  ;;  %v3233_v8 = vadd.f32 %v3232_v27, %v10240_v12  ;;  %v10543_v12 = vpop.f32.mrf.mxu1  ;;  %v12135_v6 = vld [vmem:[#allocation70_spill] sm:$0xff] }
 0x4f3   : > { %v12136_v27 = vld [vmem:[#allocation86_spill] sm:$0xff] }
 0x4f4   : > { %v3324_v1 = vmax.f32 %v3233_v8, 0.0  ;;  %v5979_v43 = vpop.f32.mrf.mxu3  ;;  %v2950_v8 = vadd.f32 %v12136_v27, %v2806_v38 }
 0x4f6   : > { %v7608_v61 = vpack.c.bf16 %v3324_v1, %v3323_v41  ;;  %v5890_v40 = vpop.f32.mrf.mxu2  ;;  %v4016_v41 = vshrl.u32 %v10520_v5, 16 }
 0x4f7   : > { %v5891_v63 = vadd.f32 %v5890_v40, %v5802_v28  ;;  %v4199_v28 = vrot.slane %v7828_v31, 1  ;;  %v7517_v31 = vld [vmem:[%s11451_s3 + $0x1b0] sm:$0xff] }
 0x4f8   : > { %7779 = vst [vmem:[#allocation2 + $0x70] sm:$0xff] %v7608_v61   ;;  %6317 = vmatpush.bf16.msrb.mxu0 %v7517_v31 }
 0x4f9   : > { %v3235_v32 = vpop.f32.mrf.mxu0  ;;  %v3621_v23 = vld [vmem:[#allocation2 + $0x68] sm:$0x1]  ;;  %v10541_v0 = vadd.f32 %v5979_v43, %v5891_v63  ;;  %v3094_v43 = vadd.f32 %v10265_v42, %v2950_v8  ;;  %v10551_v63 = vor.u32 %v4020_v24, %v4016_v41  ;;  %v7947_v41 = vld [vmem:[#allocation2 + $0x6c] sm:$0xe] }
 0x4fa   : > { %v3895_v33 = vunpack.c.l.b16 %v3621_v23  ;;  %v3236_v36 = vadd.f32 %v3235_v32, %v10251_v14  ;;  %v5806_v24 = vpop.f32.mrf.mxu1  ;;  %v7499_v32 = vld [vmem:[%s11451_s3 + $0x120] sm:$0xff] }
 0x4fb   : > { %12137 = vst [vmem:[#allocation104_spill] sm:$0xff] %v10551_v63  ;;  %6141 = vmatpush.bf16.msrb.mxu2 %v7499_v32 }
 0x4fc   : > { %3274 = vmatmul.bf16.gmra.mxu0 %v12135_v6  ;;  %v3911_v54 = vpack.c.b16 %v3895_v33, %v3895_v33  ;;  %v10556_v38 = vpop.f32.mrf.mxu3  ;;  %v3325_v27 = vmax.f32 %v3236_v36, 0.0  ;;  %v7515_v36 = vld [vmem:[%s11451_s3 + $0x1a0] sm:$0xff] }
 0x4fe   : > { %v10548_v1 = vpop.f32.mrf.mxu2  ;;  %v4200_v61 = vrot.slane %v3911_v54, 1  ;;  %v4023_v40 = vshll.u32 %v3911_v54, 16  ;;  %v7491_v54 = vld [vmem:[%s11451_s3 + $0xe0] sm:$0xff] }
 0x4ff   : > { %v3543_v48 = vld [vmem:[#allocation2 + $0x74] sm:$0x1]  ;;  %v3599_v44 = vld [vmem:[#allocation2 + $0x6c] sm:$0xff]   ;;  %6052 = vmatpush.bf16.msrb.mxu1 %v7491_v54 }
 0x500   : > { %v7946_v56 = vld [vmem:[#allocation2 + $0x6c] sm:$0xf0]  ;;  %v3544_v29 = vsel %vm10349_vm6, 0, %v3543_v48  ;;  %v4201_v23 = vsel %vm865_vm1, %v4199_v28, %v4200_v61  ;;  %v4025_v33 = vrot.slane %v4023_v40, 1  ;;  %v7516_v28 = vld [vmem:[%s11451_s3 + $0x1a8] sm:$0xff]  ;;  %v5807_v61 = vadd.f32 %v10481_v17, %v5806_v24  ;;  %5835 = vmatmul.bf16.gmra.mxu1 %v3599_v44 }
 0x501   : > { %3545 = vst [vmem:[#allocation2 + $0x74] sm:$0x1] %v3544_v29  ;;  %6008 = vmatmul.bf16.gmra.mxu3 %v4201_v23  ;;  %v3237_v42 = vpop.f32.mrf.mxu0  ;;  %6318 = vmatpush.bf16.msrb.mxu0 %v7516_v28  ;;  %v4030_v48 = vshll.u32 %v3599_v44, 16 }
 0x502   : > { %v3238_v6 = vadd.f32 %v3237_v42, %v3094_v43  ;;  %v4026_v14 = vsel %vm594_vm0, %v10551_v63, %v4025_v33  ;;  %v7948_v42 = vor.u32 %v7947_v41, %v7946_v56 }
 0x503   : > { %5919 = vmatmul.bf16.gmra.mxu2 %v4026_v14  ;;  %v4032_v54 = vrot.slane %v4030_v48, 1 }
 0x504   : > { %v3326_v8 = vmax.f32 %v3238_v6, 0.0  ;;  %v12138_v6 = vld [vmem:[#allocation77_spill] sm:$0xff]  ;;  %v5984_v32 = vpop.f32.mrf.mxu3  ;;  %v4202_v56 = vrot.slane %v7948_v42, 1 }
 0x505   : > { %v2811_v14 = vadd.f32 %v12138_v6, %v10074_v45  ;;  %6319 = vmatpush.bf16.msrb.mxu0 %v7515_v36 }
 0x506   : > { %v7613_v40 = vpack.c.bf16 %v3326_v8, %v3325_v27  ;;  %v5895_v43 = vpop.f32.mrf.mxu2  ;;  %v12139_v8 = vld [vmem:[#allocation141_spill] sm:$0xff] }
 0x507   : > { %v5896_v29 = vadd.f32 %v5895_v43, %v5807_v61  ;;  %v973_v28 = vrot.slane %v12139_v8, 1  ;;  %v974_v61 = vrot.slane %v10262_v4, 1  ;;  %v4028_v43 = vshrl.u32 %v3599_v44, 16  ;;  %v7513_v44 = vld [vmem:[%s11451_s3 + $0x190] sm:$0xff] }
 0x508   : > { %7780 = vst [vmem:[#allocation2 + $0x78] sm:$0xff] %v7613_v40   ;;  %v3622_v23 = vld [vmem:[#allocation2 + $0x74] sm:$0x1]  ;;  %v7514_v40 = vld [vmem:[%s11451_s3 + $0x198] sm:$0xff] }
 0x509   : > { %v3240_v33 = vpop.f32.mrf.mxu0  ;;  %v3896_v31 = vunpack.c.l.b16 %v3622_v23  ;;  %v10579_v27 = vadd.f32 %v5984_v32, %v5896_v29  ;;  %v12140_v23 = vld [vmem:[#allocation72_spill] sm:$0xff]  ;;  %6320 = vmatpush.bf16.msrb.mxu0 %v7514_v40  ;;  %v4033_v29 = vor.u32 %v4032_v54, %v4028_v43 }
 0x50a   : > { %v2955_v36 = vadd.f32 %v12140_v23, %v2811_v14  ;;  %v3241_v4 = vadd.f32 %v3240_v33, %v10275_v59  ;;  %v7512_v33 = vld [vmem:[%s11451_s3 + $0x188] sm:$0xff]  ;;  %v12141_v43 = vld [vmem:[#allocation100_spill] sm:$0xff]  ;;  %v7490_v23 = vld [vmem:[%s11451_s3 + $0xd8] sm:$0xff] }
 0x50b   : > { %v3912_v24 = vpack.c.b16 %v3896_v31, %v3896_v31  ;;  %6053 = vmatpush.bf16.msrb.mxu1 %v7490_v23 }
 0x50c   : > { %3279 = vmatmul.bf16.gmra.mxu0 %v10020_v3  ;;  %v3099_v6 = vadd.f32 %v10287_v10, %v2955_v36  ;;  %v3327_v10 = vmax.f32 %v3241_v4, 0.0  ;;  %v12144_v4 = vld [vmem:[#allocation74_spill] sm:$0xff] }
 0x50d   : > { %v4203_v41 = vrot.slane %v3912_v24, 1  ;;  %v4035_v45 = vshll.u32 %v3912_v24, 16  ;;  %v975_v24 = vsel %vm865_vm1, %v973_v28, %v974_v61  ;;  %6321 = vmatpush.bf16.msrb.mxu0 %v7513_v44  ;;  %v7498_v28 = vld [vmem:[%s11451_s3 + $0x118] sm:$0xff] }
 0x50e   : > { %v1091_v59 = vunpack.c.l.b16 %v975_v24  ;;  %6142 = vmatpush.bf16.msrb.mxu2 %v7498_v28  ;;  %v10621_v44 = vpop.f32.mrf.mxu2  ;;  %v1093_v23 = vunpack.c.h.b16 %v975_v24 }
 0x50f   : > { %v4204_v48 = vsel %vm865_vm1, %v4202_v56, %v4203_v41  ;;  %v4037_v31 = vrot.slane %v4035_v45, 1  ;;  %v3490_v3 = vld [vmem:[#allocation2 + $0x78] sm:$0x1]  ;;  %v10601_v56 = vpop.f32.mrf.mxu1 }
 0x510   : > { %v3491_v32 = vsel %vm10327_vm4, 0, %v3490_v3  ;;  %v1389_v45 = vpack.c.b16 %v1091_v59, %v12141_v43 }
 0x511   : > { %6013 = vmatmul.bf16.gmra.mxu3 %v4204_v48  ;;  %v3242_v42 = vpop.f32.mrf.mxu0  ;;  %v4038_v14 = vsel %vm594_vm0, %v4033_v29, %v4037_v31  ;;  %3492 = vst [vmem:[#allocation2 + $0x78] sm:$0x1] %v3491_v32  ;;  %6322 = vmatpush.bf16.msrb.mxu0 %v7512_v33  ;;  %v7511_v48 = vld [vmem:[%s11451_s3 + $0x180] sm:$0xff]  ;;  %v12142_v29 = vld [vmem:[#allocation107_spill] sm:$0xff]  ;;  %v12143_v31 = vld [vmem:[#allocation89_spill] sm:$0xff] }
 0x512   : > { %v3243_v54 = vadd.f32 %v3242_v42, %v3099_v6  ;;  %v2816_v3 = vadd.f32 %v12143_v31, %v12142_v29  ;;  %v10618_v6 = vpop.f32.mrf.mxu3 }
 0x513   : > { %5924 = vmatmul.bf16.gmra.mxu2 %v4038_v14 }
 0x514   : > { %v3328_v8 = vmax.f32 %v3243_v54, 0.0  ;;  %v2960_v32 = vadd.f32 %v12144_v4, %v2816_v3 }
 0x515   : > { %6323 = vmatpush.bf16.msrb.mxu0 %v7511_v48  ;;  %v1095_v48 = vunpack.c.l.b16 %v974_v61 }
 0x516   : > { %v7618_v40 = vpack.c.bf16 %v3328_v8, %v3327_v10  ;;  %v3104_v54 = vadd.f32 %v10316_v55, %v2960_v32 }
 0x517   : > { %v5811_v10 = vpop.f32.mrf.mxu1 }
 0x518   : > { %7781 = vst [vmem:[#allocation2 + $0x80] sm:$0xff] %v7618_v40   ;;  %v10603_v41 = vld [vmem:[#allocation2 + $0x78] sm:$0xff]   ;;  %v5812_v29 = vadd.f32 %v10481_v17, %v5811_v10 }
 0x519   : > { %v3245_v36 = vpop.f32.mrf.mxu0  ;;  %5840 = vmatmul.bf16.gmra.mxu1 %v10603_v41  ;;  %v4042_v4 = vshll.u32 %v10603_v41, 16 }
 0x51a   : > { %v3246_v33 = vadd.f32 %v3245_v36, %v10304_v39  ;;  %v1395_v39 = vpack.c.b16 %v1095_v48, %v1093_v23  ;;  %v12145_v36 = vld [vmem:[#allocation93_spill] sm:$0xff] }
 0x51c   : > { %3284 = vmatmul.bf16.gmra.mxu0 %v1389_v45  ;;  %v3329_v45 = vmax.f32 %v3246_v33, 0.0 }
 0x51f   : > { %v3493_v42 = vld [vmem:[#allocation2 + $0x84] sm:$0x1]  ;;  %v3546_v14 = vld [vmem:[#allocation2 + $0x80] sm:$0x1]  ;;  %v10635_v61 = vpop.f32.mrf.mxu1 }
 0x520   : > { %v3494_v8 = vsel %vm10327_vm4, 0, %v3493_v42  ;;  %v3547_v59 = vsel %vm10349_vm6, 0, %v3546_v14  ;;  %v7829_v42 = vld [vmem:[#allocation2 + $0x78] sm:$0xf0]  ;;  %v7830_v14 = vld [vmem:[#allocation2 + $0x78] sm:$0xe] }
 0x521   : > { %3495 = vst [vmem:[#allocation2 + $0x84] sm:$0x1] %v3494_v8  ;;  %v3247_v40 = vpop.f32.mrf.mxu0  ;;  %v12146_v8 = vld [vmem:[#allocation84_spill] sm:$0xff]  ;;  %v7831_v10 = vor.u32 %v7830_v14, %v7829_v42 }
 0x522   : > { %3548 = vst [vmem:[#allocation2 + $0x80] sm:$0x1] %v3547_v59  ;;  %v3248_v43 = vadd.f32 %v3247_v40, %v3104_v54  ;;  %v2821_v59 = vadd.f32 %v12146_v8, %v12145_v36 }
 0x523   : > { %12147 = vst [vmem:[#allocation67_spill] sm:$0xff] %v10635_v61  ;;  %v4205_v23 = vrot.slane %v7831_v10, 1 }
 0x524   : > { %v3330_v28 = vmax.f32 %v3248_v43, 0.0  ;;  %v5989_v55 = vpop.f32.mrf.mxu3  ;;  %v4044_v43 = vrot.slane %v4042_v4, 1 }
 0x526   : > { %v7623_v31 = vpack.c.bf16 %v3330_v28, %v3329_v45  ;;  %v5900_v3 = vpop.f32.mrf.mxu2  ;;  %v12148_v28 = vld [vmem:[#allocation76_spill] sm:$0xff] }
 0x527   : > { %v5901_v32 = vadd.f32 %v5900_v3, %v5812_v29  ;;  %v2965_v29 = vadd.f32 %v12148_v28, %v2821_v59  ;;  %v4040_v3 = vshrl.u32 %v10603_v41, 16  ;;  %v7950_v28 = vld [vmem:[#allocation2 + $0x84] sm:$0xe] }
 0x528   : > { %7782 = vst [vmem:[#allocation2 + $0x88] sm:$0xff] %v7623_v31  }
 0x529   : > { %v3250_v54 = vpop.f32.mrf.mxu0  ;;  %v3623_v33 = vld [vmem:[#allocation2 + $0x80] sm:$0x1]  ;;  %v10633_v40 = vadd.f32 %v5989_v55, %v5901_v32  ;;  %v3109_v8 = vadd.f32 %v10345_v52, %v2965_v29  ;;  %v10642_v55 = vor.u32 %v4044_v43, %v4040_v3 }
 0x52a   : > { %v3897_v24 = vunpack.c.l.b16 %v3623_v33  ;;  %v3251_v33 = vadd.f32 %v3250_v54, %v10341_v60 }
 0x52b   : > { %12150 = vst [vmem:[#allocation135_spill] sm:$0xff] %v10642_v55 }
 0x52c   : > { %3289 = vmatmul.bf16.gmra.mxu0 %v1395_v39  ;;  %v3913_v45 = vpack.c.b16 %v3897_v24, %v3897_v24  ;;  %v10645_v42 = vpop.f32.mrf.mxu3  ;;  %v3331_v60 = vmax.f32 %v3251_v33, 0.0  ;;  %v10657_v33 = vld [vmem:[#allocation2 + $0x18] sm:$0xff]  }
 0x52d   : > { %12151 = vst [vmem:[#allocation103_spill] sm:$0xff] %v10645_v42  ;;  %v12153_v42 = vld [vmem:[#allocation98_spill] sm:$0xff] }
 0x52e   : > { %v10639_v31 = vpop.f32.mrf.mxu2  ;;  %v4206_v48 = vrot.slane %v3913_v45, 1  ;;  %v4047_v36 = vshll.u32 %v3913_v45, 16  ;;  %v5816_v45 = vpop.f32.mrf.mxu1 }
 0x52f   : > { %12149 = vst [vmem:[#allocation165_spill] sm:$0xff] %v10639_v31  ;;  %v3549_v32 = vld [vmem:[#allocation2 + $0x8c] sm:$0x1]  ;;  %v3603_v4 = vld [vmem:[#allocation2 + $0x84] sm:$0xff]   ;;  %v5817_v29 = vadd.f32 %v10481_v17, %v5816_v45 }
 0x530   : > { %v7949_v14 = vld [vmem:[#allocation2 + $0x84] sm:$0xf0]  ;;  %v3550_v39 = vsel %vm10349_vm6, 0, %v3549_v32  ;;  %v4207_v59 = vsel %vm865_vm1, %v4205_v23, %v4206_v48  ;;  %v4049_v24 = vrot.slane %v4047_v36, 1  ;;  %5845 = vmatmul.bf16.gmra.mxu1 %v3603_v4  ;;  %v4054_v63 = vshll.u32 %v3603_v4, 16 }
 0x531   : > { %3551 = vst [vmem:[#allocation2 + $0x8c] sm:$0x1] %v3550_v39  ;;  %6018 = vmatmul.bf16.gmra.mxu3 %v4207_v59  ;;  %v3252_v10 = vpop.f32.mrf.mxu0 }
 0x532   : > { %v3253_v52 = vadd.f32 %v3252_v10, %v3109_v8  ;;  %v4050_v43 = vsel %vm594_vm0, %v10642_v55, %v4049_v24  ;;  %v7951_v8 = vor.u32 %v7950_v28, %v7949_v14  ;;  %v12152_v10 = vld [vmem:[#allocation155_spill] sm:$0xff]  ;;  %v4056_v45 = vrot.slane %v4054_v63, 1 }
 0x533   : > { %5929 = vmatmul.bf16.gmra.mxu2 %v4050_v43  ;;  %v2826_v24 = vadd.f32 %v12153_v42, %v12152_v10  ;;  %v12155_v42 = vld [vmem:[#allocation114_spill] sm:$0xff] }
 0x534   : > { %v3332_v54 = vmax.f32 %v3253_v52, 0.0  ;;  %v5994_v36 = vpop.f32.mrf.mxu3 }
 0x536   : > { %v7628_v3 = vpack.c.bf16 %v3332_v54, %v3331_v60  ;;  %v5905_v32 = vpop.f32.mrf.mxu2  ;;  %v4208_v60 = vrot.slane %v7951_v8, 1 }
 0x537   : > { %v5906_v23 = vadd.f32 %v5905_v32, %v5817_v29  ;;  %v4052_v29 = vshrl.u32 %v3603_v4, 16  ;;  %v12154_v32 = vld [vmem:[#allocation18_spill] sm:$0xff] }
 0x538   : > { %7783 = vst [vmem:[#allocation2 + $0x90] sm:$0xff] %v7628_v3   ;;  %v3624_v48 = vld [vmem:[#allocation2 + $0x8c] sm:$0x1]  ;;  %v2970_v55 = vadd.f32 %v12154_v32, %v2826_v24  ;;  %v7497_v4 = vld [vmem:[%s11451_s3 + $0x110] sm:$0xff]  ;;  %v12160_v32 = vld [vmem:[#allocation156_spill] sm:$0xff] }
 0x539   : > { %v3255_v39 = vpop.f32.mrf.mxu0  ;;  %v3898_v59 = vunpack.c.l.b16 %v3624_v48  ;;  %v10655_v43 = vadd.f32 %v5994_v36, %v5906_v23  ;;  %v4057_v14 = vor.u32 %v4056_v45, %v4052_v29  ;;  %v12156_v36 = vld [vmem:[#allocation163_spill] sm:$0xff]  ;;  %v7489_v24 = vld [vmem:[%s11451_s3 + $0xd0] sm:$0xff]  ;;  %6143 = vmatpush.bf16.msrb.mxu2 %v7497_v4 }
 0x53a   : > { %v3114_v23 = vadd.f32 %v12155_v42, %v2970_v55  ;;  %v3256_v10 = vadd.f32 %v3255_v39, %v12156_v36  ;;  %v10673_v55 = vld [vmem:[#allocation2 + $0x24] sm:$0xff]   ;;  %6054 = vmatpush.bf16.msrb.mxu1 %v7489_v24  ;;  %v12163_v42 = vld [vmem:[#allocation83_spill] sm:$0xff] }
 0x53b   : > { %v3914_v52 = vpack.c.b16 %v3898_v59, %v3898_v59  ;;  %12157 = vst [vmem:[#allocation117_spill] sm:$0xff] %v10673_v55  ;;  %v10675_v39 = vld [vmem:[#allocation2 + $0x24] sm:$0xf0] }
 0x53c   : > { %6324 = vmatmul.bf16.vlgmr.msrb.gmra.mxu0 %v10657_v33  ;;  %12158 = vst [vmem:[#allocation69_spill] sm:$0xff] %v10675_v39 }
 0x53d   : > { %v4209_v54 = vrot.slane %v3914_v52, 1  ;;  %v4059_v3 = vshll.u32 %v3914_v52, 16 }
 0x53e   : > { %v10688_v36 = vpop.f32.mrf.mxu2 }
 0x53f   : > { %v4210_v48 = vsel %vm865_vm1, %v4208_v60, %v4209_v54  ;;  %v4061_v28 = vrot.slane %v4059_v3, 1  ;;  %v3496_v31 = vld [vmem:[#allocation2 + $0x90] sm:$0x1]  ;;  %v10677_v54 = vpop.f32.mrf.mxu1  ;;  %12164 = vst [vmem:[#allocation116_spill] sm:$0xff] %v10688_v36 }
 0x540   : > { %v3497_v63 = vsel %vm10327_vm4, 0, %v3496_v31  ;;  %v3333_v31 = vmax.f32 %v3256_v10, 0.0  ;;  %12159 = vst [vmem:[#allocation166_spill] sm:$0xff] %v10677_v54  ;;  %v12175_v54 = vld [vmem:[#allocation121_spill] sm:$0xff] }
 0x541   : > { %6023 = vmatmul.bf16.gmra.mxu3 %v4210_v48  ;;  %v3257_v59 = vpop.f32.mrf.mxu0  ;;  %v4062_v8 = vsel %vm594_vm0, %v4057_v14, %v4061_v28  ;;  %3498 = vst [vmem:[#allocation2 + $0x90] sm:$0x1] %v3497_v63  ;;  %v12161_v48 = vld [vmem:[#allocation128_spill] sm:$0xff]  ;;  %v10685_v28 = vpop.f32.mrf.mxu3 }
 0x542   : > { %v3258_v52 = vadd.f32 %v3257_v59, %v3114_v23  ;;  %v2831_v14 = vadd.f32 %v12161_v48, %v12160_v32  ;;  %12162 = vst [vmem:[#allocation106_spill] sm:$0xff] %v10685_v28  ;;  %v12166_v28 = vld [vmem:[#allocation110_spill] sm:$0xff] }
 0x543   : > { %5934 = vmatmul.bf16.gmra.mxu2 %v4062_v8 }
 0x544   : > { %v3334_v45 = vmax.f32 %v3258_v52, 0.0  ;;  %v2975_v23 = vadd.f32 %v12163_v42, %v2831_v14 }
 0x546   : > { %v7633_v60 = vpack.c.bf16 %v3334_v45, %v3333_v31  ;;  %v3119_v59 = vadd.f32 %v10375_v11, %v2975_v23 }
 0x547   : > { %v5821_v8 = vpop.f32.mrf.mxu1 }
 0x548   : > { %7784 = vst [vmem:[#allocation2 + $0x98] sm:$0xff] %v7633_v60   ;;  %v10679_v29 = vld [vmem:[#allocation2 + $0x90] sm:$0xff]   ;;  %v5822_v48 = vadd.f32 %v10481_v17, %v5821_v8 }
 0x549   : > { %v3260_v3 = vpop.f32.mrf.mxu0  ;;  %5850 = vmatmul.bf16.gmra.mxu1 %v10679_v29  ;;  %v4066_v23 = vshll.u32 %v10679_v29, 16 }
 0x54a   : > { %v3261_v52 = vadd.f32 %v3260_v3, %v10370_v26 }
 0x54c   : > { %6329 = vmatmul.bf16.gmra.mxu0 %v10673_v55  ;;  %v3335_v60 = vmax.f32 %v3261_v52, 0.0  ;;  %v7833_v55 = vld [vmem:[#allocation2 + $0x90] sm:$0xe] }
 0x54f   : > { %v3499_v10 = vld [vmem:[#allocation2 + $0x9c] sm:$0x1]  ;;  %v3552_v63 = vld [vmem:[#allocation2 + $0x98] sm:$0x1] }
 0x550   : > { %v3500_v4 = vsel %vm10327_vm4, 0, %v3499_v10  ;;  %v3553_v24 = vsel %vm10349_vm6, 0, %v3552_v63  ;;  %v7832_v10 = vld [vmem:[#allocation2 + $0x90] sm:$0xf0]  ;;  %v12165_v63 = vld [vmem:[#allocation95_spill] sm:$0xff] }
 0x551   : > { %3501 = vst [vmem:[#allocation2 + $0x9c] sm:$0x1] %v3500_v4  ;;  %v3262_v31 = vpop.f32.mrf.mxu0  ;;  %v2836_v26 = vadd.f32 %v12166_v28, %v12165_v63  ;;  %v7834_v8 = vor.u32 %v7833_v55, %v7832_v10 }
 0x552   : > { %3554 = vst [vmem:[#allocation2 + $0x98] sm:$0x1] %v3553_v24  ;;  %v3263_v45 = vadd.f32 %v3262_v31, %v3119_v59  ;;  %v10702_v59 = vpop.f32.mrf.mxu1  ;;  %v4068_v31 = vrot.slane %v4066_v23, 1 }
 0x553   : > { %12168 = vst [vmem:[#allocation167_spill] sm:$0xff] %v10702_v59  ;;  %v4211_v28 = vrot.slane %v7834_v8, 1 }
 0x554   : > { %v3336_v32 = vmax.f32 %v3263_v45, 0.0  ;;  %v5999_v14 = vpop.f32.mrf.mxu3  ;;  %v10704_v45 = vld [vmem:[#allocation2 + $0x30] sm:$0xff]  }
 0x556   : > { %v7638_v42 = vpack.c.bf16 %v3336_v32, %v3335_v60  ;;  %v5910_v11 = vpop.f32.mrf.mxu2  ;;  %v12169_v32 = vld [vmem:[#allocation96_spill] sm:$0xff] }
 0x557   : > { %v5911_v39 = vadd.f32 %v5910_v11, %v5822_v48  ;;  %v2980_v48 = vadd.f32 %v12169_v32, %v2836_v26 }
 0x558   : > { %7785 = vst [vmem:[#allocation2 + $0xa0] sm:$0xff] %v7638_v42   ;;  %v4064_v42 = vshrl.u32 %v10679_v29, 16 }
 0x559   : > { %v3265_v3 = vpop.f32.mrf.mxu0  ;;  %v3625_v4 = vld [vmem:[#allocation2 + $0x98] sm:$0x1]  ;;  %v10700_v24 = vadd.f32 %v5999_v14, %v5911_v39  ;;  %v3124_v14 = vadd.f32 %v10387_v35, %v2980_v48  ;;  %v10728_v48 = vld [vmem:[#allocation2 + $0x3c] sm:$0xff]  }
 0x55a   : > { %v3899_v52 = vunpack.c.l.b16 %v3625_v4  ;;  %v10712_v59 = vor.u32 %v4068_v31, %v4064_v42  ;;  %v3266_v23 = vadd.f32 %v3265_v3, %v10381_v53  ;;  %v7496_v53 = vld [vmem:[%s11451_s3 + $0x108] sm:$0xff]  ;;  %12173 = vst [vmem:[#allocation111_spill] sm:$0xff] %v10728_v48  ;;  %v10730_v42 = vld [vmem:[#allocation2 + $0x3c] sm:$0xf0] }
 0x55b   : > { %12167 = vst [vmem:[#allocation73_spill] sm:$0xff] %v10700_v24  ;;  %v7488_v3 = vld [vmem:[%s11451_s3 + $0xc8] sm:$0xff]  ;;  %6144 = vmatpush.bf16.msrb.mxu2 %v7496_v53 }
 0x55c   : > { %6334 = vmatmul.bf16.gmra.mxu0 %v10704_v45  ;;  %v3915_v60 = vpack.c.b16 %v3899_v52, %v3899_v52  ;;  %12171 = vst [vmem:[#allocation146_spill] sm:$0xff] %v10712_v59  ;;  %v10715_v10 = vpop.f32.mrf.mxu3  ;;  %6055 = vmatpush.bf16.msrb.mxu1 %v7488_v3 }
 0x55d   : > { %12172 = vst [vmem:[#allocation127_spill] sm:$0xff] %v10715_v10 }
 0x55e   : > { %v10709_v11 = vpop.f32.mrf.mxu2  ;;  %v4212_v63 = vrot.slane %v3915_v60, 1  ;;  %v4071_v39 = vshll.u32 %v3915_v60, 16  ;;  %v5826_v60 = vpop.f32.mrf.mxu1  ;;  %12174 = vst [vmem:[#allocation78_spill] sm:$0xff] %v10730_v42  ;;  %v12176_v42 = vld [vmem:[#allocation159_spill] sm:$0xff] }
 0x55f   : > { %12170 = vst [vmem:[#allocation57_spill] sm:$0xff] %v10709_v11  ;;  %v3555_v55 = vld [vmem:[#allocation2 + $0xa4] sm:$0x1]  ;;  %v3607_v4 = vld [vmem:[#allocation2 + $0x9c] sm:$0xff]  }
 0x560   : > { %v7952_v52 = vld [vmem:[#allocation2 + $0x9c] sm:$0xf0]  ;;  %v3556_v26 = vsel %vm10349_vm6, 0, %v3555_v55  ;;  %v4213_v32 = vsel %vm865_vm1, %v4211_v28, %v4212_v63  ;;  %v4073_v11 = vrot.slane %v4071_v39, 1  ;;  %v3337_v28 = vmax.f32 %v3266_v23, 0.0  ;;  %5855 = vmatmul.bf16.gmra.mxu1 %v3607_v4 }
 0x561   : > { %3557 = vst [vmem:[#allocation2 + $0xa4] sm:$0x1] %v3556_v26  ;;  %6028 = vmatmul.bf16.gmra.mxu3 %v4213_v32  ;;  %v3267_v8 = vpop.f32.mrf.mxu0  ;;  %v7953_v39 = vld [vmem:[#allocation2 + $0x9c] sm:$0xe]  ;;  %v4078_v26 = vshll.u32 %v3607_v4, 16  ;;  %v2841_v23 = vadd.f32 %v12176_v42, %v12175_v54 }
 0x562   : > { %v3268_v35 = vadd.f32 %v3267_v8, %v3124_v14  ;;  %v4074_v31 = vsel %vm594_vm0, %v10712_v59, %v4073_v11  ;;  %v5827_v11 = vadd.f32 %v10481_v17, %v5826_v60  ;;  %v7954_v36 = vor.u32 %v7953_v39, %v7952_v52 }
 0x563   : > { %5939 = vmatmul.bf16.gmra.mxu2 %v4074_v31  ;;  %v4080_v3 = vrot.slane %v4078_v26, 1 }
 0x564   : > { %v3338_v63 = vmax.f32 %v3268_v35, 0.0  ;;  %v6004_v59 = vpop.f32.mrf.mxu3  ;;  %v4214_v60 = vrot.slane %v7954_v36, 1  ;;  %v7510_v36 = vld [vmem:[%s11451_s3 + $0x178] sm:$0xff] }
 0x565   : > { %6227 = vmatpush.bf16.msrb.mxu3 %v7510_v36 }
 0x566   : > { %v7643_v14 = vpack.c.bf16 %v3338_v63, %v3337_v28  ;;  %v5915_v55 = vpop.f32.mrf.mxu2  ;;  %v4076_v63 = vshrl.u32 %v3607_v4, 16 }
 0x567   : > { %v5916_v32 = vadd.f32 %v5915_v55, %v5827_v11  ;;  %v12177_v11 = vld [vmem:[#allocation36_spill] sm:$0xff] }
 0x568   : > { %7786 = vst [vmem:[#allocation2 + $0xa8] sm:$0xff] %v7643_v14   ;;  %v3626_v8 = vld [vmem:[#allocation2 + $0xa4] sm:$0x1]  ;;  %v2985_v14 = vadd.f32 %v12177_v11, %v2841_v23  ;;  %v4081_v61 = vor.u32 %v4080_v3, %v4076_v63  ;;  %v12179_v3 = vld [vmem:[#allocation105_spill] sm:$0xff] }
 0x569   : > { %v3270_v31 = vpop.f32.mrf.mxu0  ;;  %v3900_v10 = vunpack.c.l.b16 %v3626_v8  ;;  %v10735_v35 = vadd.f32 %v6004_v59, %v5916_v32  ;;  %v10751_v32 = vpop.f32.mrf.mxu1  ;;  %v7507_v63 = vld [vmem:[%s11451_s3 + $0x160] sm:$0xff] }
 0x56a   : > { %v3129_v39 = vadd.f32 %v10399_v51, %v2985_v14  ;;  %v3271_v54 = vadd.f32 %v3270_v31, %v10396_v9  ;;  %v7509_v9 = vld [vmem:[%s11451_s3 + $0x170] sm:$0xff]  ;;  %v12181_v14 = vld [vmem:[#allocation9_spill] sm:$0xff] }
 0x56b   : > { %v3916_v53 = vpack.c.b16 %v3900_v10, %v3900_v10  ;;  %6228 = vmatpush.bf16.msrb.mxu3 %v7509_v9 }
 0x56c   : > { %6339 = vmatmul.bf16.gmra.mxu0 %v10728_v48  ;;  %v10767_v11 = vpop.f32.mrf.mxu3 }
 0x56d   : > { %v4215_v28 = vrot.slane %v3916_v53, 1  ;;  %v4083_v24 = vshll.u32 %v3916_v53, 16  ;;  %v12178_v53 = vld [vmem:[#allocation129_spill] sm:$0xff]  ;;  %12180 = vst [vmem:[#allocation168_spill] sm:$0xff] %v10767_v11 }
 0x56f   : > { %v4216_v55 = vsel %vm865_vm1, %v4214_v60, %v4215_v28  ;;  %v4085_v8 = vrot.slane %v4083_v24, 1  ;;  %v3502_v52 = vld [vmem:[#allocation2 + $0xa8] sm:$0x1]  ;;  %v3339_v24 = vmax.f32 %v3271_v54, 0.0  ;;  %v2846_v60 = vadd.f32 %v12179_v3, %v12178_v53  ;;  %v7505_v53 = vld [vmem:[%s11451_s3 + $0x150] sm:$0xff] }
 0x570   : > { %v3503_v59 = vsel %vm10327_vm4, 0, %v3502_v52  ;;  %v10761_v28 = vld [vmem:[#allocation2 + $0x48] sm:$0xff]  }
 0x571   : > { %6033 = vmatmul.bf16.gmra.mxu3 %v4216_v55  ;;  %v3272_v10 = vpop.f32.mrf.mxu0  ;;  %v4086_v4 = vsel %vm594_vm0, %v4081_v61, %v4085_v8  ;;  %3504 = vst [vmem:[#allocation2 + $0xa8] sm:$0x1] %v3503_v59  ;;  %v7508_v61 = vld [vmem:[%s11451_s3 + $0x168] sm:$0xff]  ;;  %v2990_v55 = vadd.f32 %v12181_v14, %v2846_v60  ;;  %v10770_v8 = vpop.f32.mrf.mxu2 }
 0x572   : > { %v3273_v42 = vadd.f32 %v3272_v10, %v3129_v39  ;;  %6229 = vmatpush.bf16.msrb.mxu3 %v7508_v61  ;;  %v5831_v59 = vpop.f32.mrf.mxu1 }
 0x573   : > { %5944 = vmatmul.bf16.gmra.mxu2 %v4086_v4  ;;  %v3134_v54 = vadd.f32 %v10411_v19, %v2990_v55  ;;  %v7495_v19 = vld [vmem:[%s11451_s3 + $0x100] sm:$0xff]  ;;  %v5832_v3 = vadd.f32 %v10481_v17, %v5831_v59 }
 0x574   : > { %v3340_v26 = vmax.f32 %v3273_v42, 0.0  ;;  %v7487_v42 = vld [vmem:[%s11451_s3 + $0xc0] sm:$0xff]  ;;  %6145 = vmatpush.bf16.msrb.mxu2 %v7495_v19 }
 0x575   : > { %6056 = vmatpush.bf16.msrb.mxu1 %v7487_v42 }
 0x576   : > { %v7648_v51 = vpack.c.bf16 %v3340_v26, %v3339_v24  ;;  %6230 = vmatpush.bf16.msrb.mxu3 %v7507_v63  ;;  %v7506_v24 = vld [vmem:[%s11451_s3 + $0x158] sm:$0xff] }
 0x578   : > { %7787 = vst [vmem:[#allocation2 + $0xb0] sm:$0xff] %v7648_v51   ;;  %v10753_v31 = vld [vmem:[#allocation2 + $0xa8] sm:$0xff]   ;;  %v10787_v51 = vld [vmem:[#allocation2 + $0x54] sm:$0xff]  }
 0x579   : > { %v3275_v23 = vpop.f32.mrf.mxu0  ;;  %5860 = vmatmul.bf16.gmra.mxu1 %v10753_v31  ;;  %12182 = vst [vmem:[#allocation112_spill] sm:$0xff] %v10787_v51  ;;  %v4090_v55 = vshll.u32 %v10753_v31, 16 }
 0x57a   : > { %v3276_v4 = vadd.f32 %v3275_v23, %v10406_v62  ;;  %6231 = vmatpush.bf16.msrb.mxu3 %v7506_v24  ;;  %v10789_v62 = vld [vmem:[#allocation2 + $0x54] sm:$0xf0]  ;;  %v10803_v59 = vpop.f32.mrf.mxu1 }
 0x57b   : > { %12183 = vst [vmem:[#allocation82_spill] sm:$0xff] %v10789_v62 }
 0x57c   : > { %6344 = vmatmul.bf16.gmra.mxu0 %v10761_v28  ;;  %v3341_v61 = vmax.f32 %v3276_v4, 0.0  ;;  %v12185_v4 = vld [vmem:[#allocation160_spill] sm:$0xff]  ;;  %12186 = vst [vmem:[#allocation15_spill] sm:$0xff] %v10803_v59 }
 0x57e   : > { %6232 = vmatpush.bf16.msrb.mxu3 %v7505_v53  ;;  %v7503_v53 = vld [vmem:[%s11451_s3 + $0x140] sm:$0xff] }
 0x57f   : > { %v3505_v52 = vld [vmem:[#allocation2 + $0xb4] sm:$0x1]  ;;  %v3558_v39 = vld [vmem:[#allocation2 + $0xb0] sm:$0x1] }
 0x580   : > { %v3506_v36 = vsel %vm10327_vm4, 0, %v3505_v52  ;;  %v3559_v10 = vsel %vm10349_vm6, 0, %v3558_v39  ;;  %v7835_v39 = vld [vmem:[#allocation2 + $0xa8] sm:$0xf0] }
 0x581   : > { %3507 = vst [vmem:[#allocation2 + $0xb4] sm:$0x1] %v3506_v36  ;;  %v3277_v26 = vpop.f32.mrf.mxu0  ;;  %v7504_v36 = vld [vmem:[%s11451_s3 + $0x148] sm:$0xff] }
 0x582   : > { %3560 = vst [vmem:[#allocation2 + $0xb0] sm:$0x1] %v3559_v10  ;;  %v3278_v9 = vadd.f32 %v3277_v26, %v3134_v54  ;;  %v7836_v54 = vld [vmem:[#allocation2 + $0xa8] sm:$0xe]  ;;  %v12184_v10 = vld [vmem:[#allocation162_spill] sm:$0xff]  ;;  %6233 = vmatpush.bf16.msrb.mxu3 %v7504_v36 }
 0x583   : > { %v2851_v42 = vadd.f32 %v12185_v4, %v12184_v10 }
 0x584   : > { %v3342_v23 = vmax.f32 %v3278_v9, 0.0  ;;  %v6009_v60 = vpop.f32.mrf.mxu3  ;;  %v7837_v9 = vor.u32 %v7836_v54, %v7835_v39 }
 0x586   : > { %v7653_v63 = vpack.c.bf16 %v3342_v23, %v3341_v61  ;;  %v5920_v14 = vpop.f32.mrf.mxu2  ;;  %v4092_v61 = vrot.slane %v4090_v55, 1  ;;  %6234 = vmatpush.bf16.msrb.mxu3 %v7503_v53  ;;  %v5836_v53 = vpop.f32.mrf.mxu1 }
 0x587   : > { %v5921_v52 = vadd.f32 %v5920_v14, %v5832_v3  ;;  %v12187_v3 = vld [vmem:[#allocation41_spill] sm:$0xff]  ;;  %v4088_v14 = vshrl.u32 %v10753_v31, 16 }
 0x588   : > { %7788 = vst [vmem:[#allocation2 + $0xb8] sm:$0xff] %v7653_v63   ;;  %v2995_v63 = vadd.f32 %v12187_v3, %v2851_v42 }
 0x589   : > { %v3280_v24 = vpop.f32.mrf.mxu0  ;;  %v3627_v26 = vld [vmem:[#allocation2 + $0xb0] sm:$0x1]  ;;  %v10801_v17 = vadd.f32 %v6009_v60, %v5921_v52  ;;  %v4217_v60 = vrot.slane %v7837_v9, 1  ;;  %v10814_v55 = vor.u32 %v4092_v61, %v4088_v14  ;;  %v10827_v14 = vld [vmem:[%s11452_s4] ss:$0 sm:$0xff] }
 0x58a   : > { %v3901_v19 = vunpack.c.l.b16 %v3627_v26  ;;  %v3139_v39 = vadd.f32 %v10423_v34, %v2995_v63  ;;  %v3281_v36 = vadd.f32 %v3280_v24, %v10417_v21  ;;  %v7956_v63 = vld [vmem:[#allocation2 + $0xb4] sm:$0xe] }
 0x58b   : > { %12189 = vst [vmem:[#allocation65_spill] sm:$0xff] %v10814_v55 }
 0x58c   : > { %6349 = vmatmul.bf16.gmra.mxu0 %v10787_v51  ;;  %v3917_v23 = vpack.c.b16 %v3901_v19, %v3901_v19  ;;  %v10817_v26 = vpop.f32.mrf.mxu3  ;;  %v3343_v21 = vmax.f32 %v3281_v36, 0.0 }
 0x58d   : > { %12190 = vst [vmem:[#allocation151_spill] sm:$0xff] %v10817_v26 }
 0x58e   : > { %v10811_v10 = vpop.f32.mrf.mxu2  ;;  %v4218_v52 = vrot.slane %v3917_v23, 1  ;;  %v4095_v4 = vshll.u32 %v3917_v23, 16 }
 0x58f   : > { %12188 = vst [vmem:[#allocation118_spill] sm:$0xff] %v10811_v10  ;;  %v3561_v54 = vld [vmem:[#allocation2 + $0xbc] sm:$0x1]  ;;  %v3611_v19 = vld [vmem:[#allocation2 + $0xb4] sm:$0xff]   ;;  %v3646_v10 = vld [vmem:[#allocation2 + $0xc] sm:$0xff]  }
 0x590   : > { %v7955_v62 = vld [vmem:[#allocation2 + $0xb4] sm:$0xf0]  ;;  %v3562_v42 = vsel %vm10349_vm6, 0, %v3561_v54  ;;  %v4219_v3 = vsel %vm865_vm1, %v4217_v60, %v4218_v52  ;;  %v4097_v9 = vrot.slane %v4095_v4, 1  ;;  %v5837_v60 = vadd.f32 %v10827_v14, %v5836_v53  ;;  %5865 = vmatmul.bf16.gmra.mxu1 %v3611_v19  ;;  %v7958_v53 = vld [vmem:[#allocation2 + $0xc] sm:$0xf0] }
 0x591   : > { %3563 = vst [vmem:[#allocation2 + $0xbc] sm:$0x1] %v3562_v42  ;;  %6038 = vmatmul.bf16.gmra.mxu3 %v4219_v3  ;;  %v3282_v23 = vpop.f32.mrf.mxu0  ;;  %v4102_v54 = vshll.u32 %v3611_v19, 16  ;;  %v7957_v36 = vor.u32 %v7956_v63, %v7955_v62 }
 0x592   : > { %v3283_v34 = vadd.f32 %v3282_v23, %v3139_v39  ;;  %v4098_v61 = vsel %vm594_vm0, %v10814_v55, %v4097_v9 }
 0x593   : > { %5949 = vmatmul.bf16.gmra.mxu2 %v4098_v61  ;;  %v12192_v61 = vld [vmem:[#allocation97_spill] sm:$0xff]  ;;  %v4104_v26 = vrot.slane %v4102_v54, 1 }
 0x594   : > { %v3344_v24 = vmax.f32 %v3283_v34, 0.0  ;;  %v6014_v3 = vpop.f32.mrf.mxu3  ;;  %v12191_v34 = vld [vmem:[#allocation131_spill] sm:$0xff] }
 0x595   : > { %v2856_v55 = vadd.f32 %v12192_v61, %v12191_v34  ;;  %v3678_v34 = vld [vmem:[#allocation2 + $0x14] sm:$0x1] }
 0x596   : > { %v7658_v52 = vpack.c.bf16 %v3344_v24, %v3343_v21  ;;  %v5925_v4 = vpop.f32.mrf.mxu2  ;;  %v4220_v21 = vrot.slane %v7957_v36, 1 }
 0x597   : > { %v5926_v42 = vadd.f32 %v5925_v4, %v5837_v60  ;;  %v4100_v60 = vshrl.u32 %v3611_v19, 16  ;;  %v12193_v4 = vld [vmem:[#allocation44_spill] sm:$0xff] }
 0x598   : > { %7789 = vst [vmem:[#allocation2 + $0xc0] sm:$0xff] %v7658_v52   ;;  %v3628_v39 = vld [vmem:[#allocation2 + $0xbc] sm:$0x1]  ;;  %v3000_v59 = vadd.f32 %v12193_v4, %v2856_v55  ;;  %v4351_v55 = vunpack.c.l.b16 %v3678_v34 }
 0x599   : > { %v3285_v9 = vpop.f32.mrf.mxu0  ;;  %v3902_v23 = vunpack.c.l.b16 %v3628_v39  ;;  %v10832_v51 = vadd.f32 %v6014_v3, %v5926_v42  ;;  %v4105_v63 = vor.u32 %v4104_v26, %v4100_v60  ;;  %v7534_v26 = vld [vmem:[%s11451_s3 + $0x238] sm:$0xff] }
 0x59a   : > { %v3144_v42 = vadd.f32 %v10435_v37, %v3000_v59  ;;  %v3286_v3 = vadd.f32 %v3285_v9, %v10432_v58  ;;  %v7526_v37 = vld [vmem:[%s11451_s3 + $0x1f8] sm:$0xff]  ;;  %v10848_v59 = vld [vmem:[#allocation2 + $0x6c] sm:$0xff]   ;;  %6494 = vmatpush.bf16.msra.mxu2 %v7534_v26  ;;  %v4367_v61 = vpack.c.b16 %v4351_v55, %v4351_v55 }
 0x59b   : > { %v3918_v48 = vpack.c.b16 %v3902_v23, %v3902_v23  ;;  %12194 = vst [vmem:[#allocation145_spill] sm:$0xff] %v10848_v59  ;;  %v7959_v23 = vld [vmem:[#allocation2 + $0xc] sm:$0xe]  ;;  %6405 = vmatpush.bf16.msra.mxu1 %v7526_v37  ;;  %v12196_v4 = vld [vmem:[#allocation119_spill] sm:$0xff] }
 0x59c   : > { %6354 = vmatmul.bf16.gmra.mxu0 %v10520_v5  ;;  %v3345_v58 = vmax.f32 %v3286_v3, 0.0  ;;  %v4384_v3 = vshrl.u32 %v3646_v10, 16 }
 0x59d   : > { %v4221_v24 = vrot.slane %v3918_v48, 1  ;;  %v4107_v52 = vshll.u32 %v3918_v48, 16 }
 0x59e   : > { %6495 = vmatpush.bf16.msra.mxu2 %v7533_v22 }
 0x59f   : > { %v3508_v11 = vld [vmem:[#allocation2 + $0xc0] sm:$0x1]  ;;  %v4222_v62 = vsel %vm865_vm1, %v4220_v21, %v4221_v24  ;;  %v4109_v39 = vrot.slane %v4107_v52, 1  ;;  %v4386_v21 = vshll.u32 %v3646_v10, 16  ;;  %v10852_v24 = vpop.f32.mrf.mxu1  ;;  %v7960_v52 = vor.u32 %v7959_v23, %v7958_v53 }
 0x5a0   : > { %v3509_v54 = vsel %vm10327_vm4, 0, %v3508_v11  ;;  %v10850_v11 = vld [vmem:[#allocation2 + $0x6c] sm:$0xf0]  ;;  %6057 = vmatmul.bf16.vlgmr.msrb.gmra.mxu1 %v3646_v10 }
 0x5a1   : > { %3510 = vst [vmem:[#allocation2 + $0xc0] sm:$0x1] %v3509_v54  ;;  %6043 = vmatmul.bf16.gmra.mxu3 %v4222_v62  ;;  %v3287_v5 = vpop.f32.mrf.mxu0  ;;  %v4110_v48 = vsel %vm594_vm0, %v4105_v63, %v4109_v39  ;;  %v2861_v62 = vadd.f32 %v10460_v57, %v12196_v4  ;;  %v4391_v63 = vshll.u32 %v4367_v61, 16  ;;  %v4640_v39 = vrot.slane %v4367_v61, 1  ;;  %v3679_v57 = vld [vmem:[#allocation2 + $0x20] sm:$0x1] }
 0x5a2   : > { %v3288_v19 = vadd.f32 %v3287_v5, %v3144_v42  ;;  %12195 = vst [vmem:[#allocation115_spill] sm:$0xff] %v10850_v11  ;;  %v4388_v34 = vrot.slane %v4386_v21, 1  ;;  %v10856_v42 = vpop.f32.mrf.mxu3  ;;  %v4639_v54 = vrot.slane %v7960_v52, 1  ;;  %v4352_v52 = vunpack.c.l.b16 %v3679_v57 }
 0x5a3   : > { %5954 = vmatmul.bf16.gmra.mxu2 %v4110_v48  ;;  %v3005_v5 = vadd.f32 %v10471_v16, %v2861_v62  ;;  %v10860_v48 = vpop.f32.mrf.mxu2  ;;  %v12197_v4 = vmov 0  }
 0x5a4   : > { %v3346_v9 = vmax.f32 %v3288_v19, 0.0  ;;  %v4393_v19 = vrot.slane %v4391_v63, 1  ;;  %v4641_v53 = vsel %vm865_vm1, %v4639_v54, %v4640_v39  ;;  %v4389_v37 = vor.u32 %v4388_v34, %v4384_v3 }
 0x5a5   : > { %v4368_v54 = vpack.c.b16 %v4352_v52, %v4352_v52 }
 0x5a6   : > { %v7663_v36 = vpack.c.bf16 %v3346_v9, %v3345_v58  ;;  %v3149_v58 = vadd.f32 %v10469_v49, %v3005_v5  ;;  %v4394_v21 = vsel %vm594_vm0, %v4389_v37, %v4393_v19  ;;  %v7838_v5 = vld [vmem:[#allocation2 + $0x18] sm:$0xf0]  ;;  %v7839_v19 = vld [vmem:[#allocation2 + $0x18] sm:$0xe] }
 0x5a7   : > { %v5841_v9 = vpop.f32.mrf.mxu1  ;;  %v7840_v37 = vor.u32 %v7839_v19, %v7838_v5  ;;  %v4403_v57 = vshll.u32 %v4368_v54, 16 }
 0x5a8   : > { %7790 = vst [vmem:[#allocation2 + $0xc8] sm:$0xff] %v7663_v36  }
 0x5a9   : > { %v3290_v60 = vpop.f32.mrf.mxu0  ;;  %v4405_v52 = vrot.slane %v4403_v57, 1 }
 0x5aa   : > { %v3291_v16 = vadd.f32 %v3290_v60, %v10442_v15  ;;  %v5842_v15 = vadd.f32 %v10827_v14, %v5841_v9  ;;  %v7525_v60 = vld [vmem:[%s11451_s3 + $0x1f0] sm:$0xff]  ;;  %v4643_v9 = vrot.slane %v4368_v54, 1 }
 0x5ab   : > { %6406 = vmatpush.bf16.msra.mxu1 %v7525_v60 }
 0x5ac   : > { %6359 = vmatmul.bf16.gmra.mxu0 %v10848_v59  ;;  %v3347_v49 = vmax.f32 %v3291_v16, 0.0  ;;  %v4848_v16 = vshrl.u32 %v10657_v33, 16  ;;  %v3684_v59 = vld [vmem:[#allocation2 + $0x5c] sm:$0x1] }
 0x5af   : > { %v3511_v55 = vld [vmem:[#allocation2 + $0xcc] sm:$0x1]  ;;  %v3564_v26 = vld [vmem:[#allocation2 + $0xc8] sm:$0x1] }
 0x5b0   : > { %v3512_v23 = vsel %vm10327_vm4, 0, %v3511_v55  ;;  %v3565_v10 = vsel %vm10349_vm6, 0, %v3564_v26  ;;  %6062 = vmatmul.bf16.gmra.mxu1 %v10657_v33  ;;  %v4850_v55 = vshll.u32 %v10657_v33, 16 }
 0x5b1   : > { %3513 = vst [vmem:[#allocation2 + $0xcc] sm:$0x1] %v3512_v23  ;;  %6235 = vmatmul.bf16.vlgmr.msrb.gmra.mxu3 %v4641_v53  ;;  %v3292_v36 = vpop.f32.mrf.mxu0  ;;  %v10883_v53 = vpop.f32.mrf.mxu1  ;;  %v3650_v23 = vld [vmem:[#allocation2 + $0x24] sm:$0xff]  }
 0x5b2   : > { %3566 = vst [vmem:[#allocation2 + $0xc8] sm:$0x1] %v3565_v10  ;;  %v3293_v61 = vadd.f32 %v3292_v36, %v3149_v58  ;;  %v4852_v58 = vrot.slane %v4850_v55, 1  ;;  %v7961_v10 = vld [vmem:[#allocation2 + $0x24] sm:$0xf0] }
 0x5b3   : > { %3578 = vst [vmem:[#allocation2 + $0xcc] sm:$0xf] %v12197_v4  ;;  %6146 = vmatmul.bf16.vlgmr.msrb.gmra.mxu2 %v4394_v21  ;;  %v4642_v21 = vrot.slane %v7840_v37, 1  ;;  %v4410_v37 = vshll.u32 %v3650_v23, 16  ;;  %v7963_v57 = vor.u32 %v7962_v46, %v7961_v10  ;;  %v7532_v10 = vld [vmem:[%s11451_s3 + $0x228] sm:$0xff] }
 0x5b4   : > { %v3348_v62 = vmax.f32 %v3293_v61, 0.0  ;;  %v6019_v63 = vpop.f32.mrf.mxu3  ;;  %6496 = vmatpush.bf16.msra.mxu2 %v7532_v10  ;;  %v7842_v46 = vld [vmem:[#allocation2 + $0x30] sm:$0xe] }
 0x5b6   : > { %v7668_v39 = vpack.c.bf16 %v3348_v62, %v3347_v49  ;;  %v5930_v34 = vpop.f32.mrf.mxu2  ;;  %v3680_v49 = vld [vmem:[#allocation2 + $0x2c] sm:$0x1]  ;;  %v10891_v62 = vor.u32 %v4852_v58, %v4848_v16  ;;  %v4412_v16 = vrot.slane %v4410_v37, 1 }
 0x5b7   : > { %v5931_v3 = vadd.f32 %v5930_v34, %v5842_v15  ;;  %v4353_v60 = vunpack.c.l.b16 %v3680_v49  ;;  %v10901_v34 = vld [vmem:[#allocation2 + $0x84] sm:$0xf0]  ;;  %v3681_v49 = vld [vmem:[#allocation2 + $0x38] sm:$0x1] }
 0x5b8   : > { %7791 = vst [vmem:[#allocation2 + $0xd0] sm:$0xff] %v7668_v39   ;;  %v4406_v15 = vsel %vm594_vm0, %v10891_v62, %v4405_v52  ;;  %v10899_v39 = vld [vmem:[#allocation2 + $0x84] sm:$0xff]   ;;  %v4408_v52 = vshrl.u32 %v3650_v23, 16 }
 0x5b9   : > { %3579 = vst [vmem:[#allocation2 + $0xd0] sm:$0xf] %v12197_v4  ;;  %v10881_v26 = vadd.f32 %v6019_v63, %v5931_v3  ;;  %v5846_v33 = vpop.f32.mrf.mxu1  ;;  %v4369_v5 = vpack.c.b16 %v4353_v60, %v4353_v60 }
 0x5ba   : > { %12198 = vst [vmem:[#allocation85_spill] sm:$0xff] %v10899_v39  ;;  %v5847_v54 = vadd.f32 %v10827_v14, %v5846_v33 }
 0x5bb   : > { %12199 = vst [vmem:[#allocation22_spill] sm:$0xff] %v10901_v34  ;;  %v4415_v58 = vshll.u32 %v4369_v5, 16 }
 0x5bc   : > { %6364 = vmatmul.bf16.gmra.mxu0 %v10603_v41  ;;  %v10887_v36 = vpop.f32.mrf.mxu3  ;;  %v4644_v41 = vsel %vm865_vm1, %v4642_v21, %v4643_v9  ;;  %v4646_v9 = vrot.slane %v4369_v5, 1  ;;  %v4645_v21 = vrot.slane %v7963_v57, 1  ;;  %v4874_v5 = vshll.u32 %v10704_v45, 16 }
 0x5be   : > { %v10889_v61 = vpop.f32.mrf.mxu2  ;;  %v4876_v57 = vrot.slane %v4874_v5, 1  ;;  %v7965_v5 = vld [vmem:[#allocation2 + $0x3c] sm:$0xe] }
 0x5bf   : > { %v3567_v22 = vld [vmem:[#allocation2 + $0xd4] sm:$0x1] }
 0x5c0   : > { %v3568_v63 = vsel %vm10349_vm6, 0, %v3567_v22  ;;  %6067 = vmatmul.bf16.gmra.mxu1 %v3650_v23  ;;  %v4417_v22 = vrot.slane %v4415_v58, 1 }
 0x5c1   : > { %3569 = vst [vmem:[#allocation2 + $0xd4] sm:$0x1] %v3568_v63  ;;  %6240 = vmatmul.bf16.gmra.mxu3 %v4644_v41  ;;  %v4647_v63 = vsel %vm865_vm1, %v4645_v21, %v4646_v9  ;;  %v4413_v41 = vor.u32 %v4412_v16, %v4408_v52  ;;  %v10909_v60 = vpop.f32.mrf.mxu1  ;;  %v3654_v16 = vld [vmem:[#allocation2 + $0x3c] sm:$0xff]   ;;  %v4872_v52 = vshrl.u32 %v10704_v45, 16 }
 0x5c2   : > { %3580 = vst [vmem:[#allocation2 + $0xd4] sm:$0xf] %v12197_v4  ;;  %v7964_v21 = vld [vmem:[#allocation2 + $0x3c] sm:$0xf0]  ;;  %v4432_v11 = vshrl.u32 %v3654_v16, 16 }
 0x5c3   : > { %6151 = vmatmul.bf16.gmra.mxu2 %v4406_v15  ;;  %v4418_v33 = vsel %vm594_vm0, %v4413_v41, %v4417_v22  ;;  %v4354_v15 = vunpack.c.l.b16 %v3681_v49  ;;  %12200 = vst [vmem:[#allocation140_spill] sm:$0xff] %v10909_v60  ;;  %v3682_v41 = vld [vmem:[#allocation2 + $0x44] sm:$0x1] }
 0x5c4   : > { %v6024_v55 = vpop.f32.mrf.mxu3 }
 0x5c5   : > { %v4370_v23 = vpack.c.b16 %v4354_v15, %v4354_v15 }
 0x5c6   : > { %v5935_v3 = vpop.f32.mrf.mxu2 }
 0x5c7   : > { %v5936_v19 = vadd.f32 %v5935_v3, %v5847_v54  ;;  %v7841_v54 = vld [vmem:[#allocation2 + $0x30] sm:$0xf0]  ;;  %v7524_v3 = vld [vmem:[%s11451_s3 + $0x1e8] sm:$0xff]  ;;  %v4649_v9 = vrot.slane %v4370_v23, 1 }
 0x5c8   : > { %6407 = vmatpush.bf16.msra.mxu1 %v7524_v3 }
 0x5c9   : > { %v10904_v4 = vadd.f32 %v6024_v55, %v5936_v19  ;;  %v7843_v19 = vor.u32 %v7842_v46, %v7841_v54  ;;  %v4427_v55 = vshll.u32 %v4370_v23, 16  ;;  %v5851_v37 = vpop.f32.mrf.mxu1  ;;  %v4355_v54 = vunpack.c.l.b16 %v3682_v41  ;;  %v10932_v23 = vld [vmem:[#allocation2 + $0x9c] sm:$0xf0] }
 0x5ca   : > { %12204 = vst [vmem:[#allocation16_spill] sm:$0xff] %v10932_v23  ;;  %v5852_v46 = vadd.f32 %v10827_v14, %v5851_v37 }
 0x5cb   : > { %v4648_v49 = vrot.slane %v7843_v19, 1 }
 0x5cc   : > { %6369 = vmatmul.bf16.gmra.mxu0 %v10899_v39  ;;  %v10919_v58 = vpop.f32.mrf.mxu3 }
 0x5cd   : > { %12201 = vst [vmem:[#allocation120_spill] sm:$0xff] %v10919_v58  ;;  %v4650_v15 = vsel %vm865_vm1, %v4648_v49, %v4649_v9  ;;  %v4434_v9 = vshll.u32 %v3654_v16, 16  ;;  %v10939_v49 = vpop.f32.mrf.mxu0 }
 0x5ce   : > { %v10923_v22 = vpop.f32.mrf.mxu2  ;;  %12205 = vst [vmem:[#allocation154_spill] sm:$0xff] %v10939_v49 }
 0x5cf   : > { %12202 = vst [vmem:[#allocation125_spill] sm:$0xff] %v10923_v22 }
 0x5d0   : > { %6072 = vmatmul.bf16.gmra.mxu1 %v10704_v45 }
 0x5d1   : > { %6245 = vmatmul.bf16.gmra.mxu3 %v4647_v63  ;;  %v4429_v63 = vrot.slane %v4427_v55, 1  ;;  %v10935_v3 = vpop.f32.mrf.mxu1  ;;  %v4371_v55 = vpack.c.b16 %v4355_v54, %v4355_v54 }
 0x5d3   : > { %6156 = vmatmul.bf16.gmra.mxu2 %v4418_v33  ;;  %v10925_v33 = vor.u32 %v4876_v57, %v4872_v52  ;;  %v4439_v41 = vshll.u32 %v4371_v55, 16 }
 0x5d5   : > { %v4430_v10 = vsel %vm594_vm0, %v10925_v33, %v4429_v63  ;;  %v7966_v63 = vor.u32 %v7965_v5, %v7964_v21  ;;  %v4441_v54 = vrot.slane %v4439_v41, 1  ;;  %v7845_v41 = vld [vmem:[#allocation2 + $0x48] sm:$0xe] }
 0x5d7   : > { %v4651_v39 = vrot.slane %v7966_v63, 1 }
 0x5dc   : > { %6374 = vmatmul.bf16.gmra.mxu0 %v10679_v29  ;;  %v10930_v29 = vld [vmem:[#allocation2 + $0x9c] sm:$0xff]  }
 0x5dd   : > { %12203 = vst [vmem:[#allocation90_spill] sm:$0xff] %v10930_v29  ;;  %v5856_v23 = vpop.f32.mrf.mxu1 }
 0x5e0   : > { %6077 = vmatmul.bf16.gmra.mxu1 %v3654_v16 }
 0x5e1   : > { %6250 = vmatmul.bf16.gmra.mxu3 %v4650_v15  ;;  %v4652_v15 = vrot.slane %v4371_v55, 1  ;;  %v7531_v55 = vld [vmem:[%s11451_s3 + $0x220] sm:$0xff] }
 0x5e2   : > { %6497 = vmatpush.bf16.msra.mxu2 %v7531_v55  ;;  %v3658_v55 = vld [vmem:[#allocation2 + $0x54] sm:$0xff]  }
 0x5e3   : > { %6161 = vmatmul.bf16.gmra.mxu2 %v4430_v10  ;;  %v4436_v10 = vrot.slane %v4434_v9, 1  ;;  %v5857_v9 = vadd.f32 %v10827_v14, %v5856_v23 }
 0x5e4   : > { %v6029_v45 = vpop.f32.mrf.mxu3 }
 0x5e6   : > { %v5940_v19 = vpop.f32.mrf.mxu2 }
 0x5e7   : > { %v5941_v57 = vadd.f32 %v5940_v19, %v5852_v46  ;;  %v3683_v46 = vld [vmem:[#allocation2 + $0x50] sm:$0x1]  ;;  %v4437_v19 = vor.u32 %v4436_v10, %v4432_v11  ;;  %v7844_v11 = vld [vmem:[#allocation2 + $0x48] sm:$0xf0]  ;;  %v4898_v10 = vshll.u32 %v10761_v28, 16 }
 0x5e8   : > { %v4356_v5 = vunpack.c.l.b16 %v3683_v46  ;;  %v7846_v23 = vor.u32 %v7845_v41, %v7844_v11  ;;  %v10974_v41 = vld [vmem:[#allocation2 + $0xb4] sm:$0xf0] }
 0x5e9   : > { %v10937_v52 = vadd.f32 %v6029_v45, %v5941_v57  ;;  %v4653_v45 = vsel %vm865_vm1, %v4651_v39, %v4652_v15  ;;  %v4442_v21 = vsel %vm594_vm0, %v4437_v19, %v4441_v54  ;;  %v10951_v57 = vpop.f32.mrf.mxu0  ;;  %v7523_v15 = vld [vmem:[%s11451_s3 + $0x1e0] sm:$0xff]  ;;  %v10959_v54 = vpop.f32.mrf.mxu1  ;;  %12213 = vst [vmem:[#allocation20_spill] sm:$0xff] %v10974_v41 }
 0x5ea   : > { %12208 = vst [vmem:[#allocation91_spill] sm:$0xff] %v10951_v57  ;;  %v4372_v63 = vpack.c.b16 %v4356_v5, %v4356_v5  ;;  %6408 = vmatpush.bf16.msra.mxu1 %v7523_v15  ;;  %v4654_v57 = vrot.slane %v7846_v23, 1  ;;  %v4458_v23 = vshll.u32 %v3658_v55, 16 }
 0x5eb   : > { %12209 = vst [vmem:[#allocation33_spill] sm:$0xff] %v10959_v54 }
 0x5ec   : > { %6379 = vmatmul.bf16.gmra.mxu0 %v10930_v29  ;;  %v10942_v37 = vpop.f32.mrf.mxu3  ;;  %v4451_v19 = vshll.u32 %v4372_v63, 16  ;;  %v4655_v5 = vrot.slane %v4372_v63, 1  ;;  %v10972_v63 = vld [vmem:[#allocation2 + $0xb4] sm:$0xff]  }
 0x5ed   : > { %12206 = vst [vmem:[#allocation124_spill] sm:$0xff] %v10942_v37 }
 0x5ee   : > { %v10944_v34 = vpop.f32.mrf.mxu2  ;;  %v4453_v49 = vrot.slane %v4451_v19, 1  ;;  %12212 = vst [vmem:[#allocation94_spill] sm:$0xff] %v10972_v63 }
 0x5ef   : > { %12207 = vst [vmem:[#allocation143_spill] sm:$0xff] %v10944_v34 }
 0x5f0   : > { %6082 = vmatmul.bf16.gmra.mxu1 %v10761_v28 }
 0x5f1   : > { %6255 = vmatmul.bf16.gmra.mxu3 %v4653_v45  ;;  %v10965_v29 = vpop.f32.mrf.mxu0 }
 0x5f2   : > { %12211 = vst [vmem:[#allocation142_spill] sm:$0xff] %v10965_v29  ;;  %v3685_v29 = vld [vmem:[#allocation2 + $0x68] sm:$0x1] }
 0x5f3   : > { %6166 = vmatmul.bf16.gmra.mxu2 %v4442_v21  ;;  %v4900_v21 = vrot.slane %v4898_v10, 1 }
 0x5f4   : > { %v6034_v46 = vpop.f32.mrf.mxu3 }
 0x5f6   : > { %v5945_v16 = vpop.f32.mrf.mxu2  ;;  %v5861_v15 = vpop.f32.mrf.mxu1 }
 0x5f7   : > { %v5946_v39 = vadd.f32 %v5945_v16, %v5857_v9  ;;  %v7967_v9 = vld [vmem:[#allocation2 + $0x54] sm:$0xf0]  ;;  %v4896_v16 = vshrl.u32 %v10761_v28, 16  ;;  %v7968_v28 = vld [vmem:[#allocation2 + $0x54] sm:$0xe] }
 0x5f9   : > { %v10961_v45 = vadd.f32 %v6034_v46, %v5946_v39  ;;  %v10967_v54 = vor.u32 %v4900_v21, %v4896_v16  ;;  %v4656_v39 = vsel %vm865_vm1, %v4654_v57, %v4655_v5  ;;  %v10976_v46 = vpop.f32.mrf.mxu0  ;;  %v7969_v21 = vor.u32 %v7968_v28, %v7967_v9 }
 0x5fa   : > { %12214 = vst [vmem:[#allocation81_spill] sm:$0xff] %v10976_v46 }
 0x5fb   : > { %12210 = vst [vmem:[#allocation130_spill] sm:$0xff] %v10961_v45  ;;  %v4454_v11 = vsel %vm594_vm0, %v10967_v54, %v4453_v49 }
 0x5fc   : > { %6384 = vmatmul.bf16.gmra.mxu0 %v10753_v31  ;;  %v4357_v31 = vunpack.c.l.b16 %v3684_v59  ;;  %v10978_v57 = vpop.f32.mrf.mxu3  ;;  %v4460_v59 = vrot.slane %v4458_v23, 1 }
 0x5fd   : > { %12215 = vst [vmem:[#allocation161_spill] sm:$0xff] %v10978_v57  ;;  %v4358_v57 = vunpack.c.l.b16 %v3685_v29  ;;  %v7522_v29 = vld [vmem:[%s11451_s3 + $0x1d8] sm:$0xff] }
 0x5fe   : > { %v4373_v10 = vpack.c.b16 %v4357_v31, %v4357_v31  ;;  %v5863_v19 = vpop.f32.mrf.mxu1  ;;  %v10981_v5 = vpop.f32.mrf.mxu2  ;;  %6409 = vmatpush.bf16.msra.mxu1 %v7522_v29 }
 0x5ff   : > { %12216 = vst [vmem:[#allocation150_spill] sm:$0xff] %v10981_v5  ;;  %v7970_v5 = vld [vmem:[#allocation2 + $0x6c] sm:$0xf0]  ;;  %v5864_v58 = vadd.f32 %v10827_v14, %v5863_v19 }
 0x600   : > { %6087 = vmatmul.bf16.gmra.mxu1 %v3658_v55  ;;  %v4463_v16 = vshll.u32 %v4373_v10, 16  ;;  %v4658_v49 = vrot.slane %v4373_v10, 1  ;;  %v7530_v10 = vld [vmem:[%s11451_s3 + $0x218] sm:$0xff] }
 0x601   : > { %6260 = vmatmul.bf16.gmra.mxu3 %v4656_v39  ;;  %v4657_v39 = vrot.slane %v7969_v21, 1  ;;  %v10984_v46 = vpop.f32.mrf.mxu0  ;;  %v7802_v21 = vld [vmem:[#allocation2 + $0x60] sm:$0xff]   ;;  %6498 = vmatpush.bf16.msra.mxu2 %v7530_v10 }
 0x602   : > { %v4465_v41 = vrot.slane %v4463_v16, 1  ;;  %12217 = vst [vmem:[#allocation136_spill] sm:$0xff] %v10984_v46  ;;  %v10996_v46 = vld [vmem:[#allocation2 + $0xc0] sm:$0xff]   ;;  %v4468_v37 = vshrl.u32 %v7802_v21, 16 }
 0x603   : > { %6171 = vmatmul.bf16.gmra.mxu2 %v4454_v11  ;;  %v4456_v11 = vshrl.u32 %v3658_v55, 16  ;;  %v4659_v31 = vsel %vm865_vm1, %v4657_v39, %v4658_v49  ;;  %v5862_v55 = vadd.f32 %v10827_v14, %v5861_v15  ;;  %v4374_v49 = vpack.c.b16 %v4358_v57, %v4358_v57  ;;  %v7847_v39 = vld [vmem:[#allocation2 + $0x60] sm:$0xf0] }
 0x605   : > { %v4461_v45 = vor.u32 %v4460_v59, %v4456_v11  ;;  %v7848_v11 = vld [vmem:[#allocation2 + $0x60] sm:$0xe] }
 0x607   : > { %v4466_v28 = vsel %vm594_vm0, %v4461_v45, %v4465_v41 }
 0x609   : > { %v10998_v15 = vpop.f32.mrf.mxu0 }
 0x60a   : > { %12219 = vst [vmem:[#allocation126_spill] sm:$0xff] %v10998_v15 }
 0x60c   : > { %6389 = vmatmul.bf16.gmra.mxu0 %v10972_v63  ;;  %v4475_v63 = vshll.u32 %v4374_v49, 16 }
 0x60d   : > { %v5866_v9 = vpop.f32.mrf.mxu1 }
 0x610   : > { %6092 = vmatmul.bf16.gmra.mxu1 %v7802_v21 }
 0x611   : > { %6265 = vmatmul.bf16.gmra.mxu3 %v4659_v31  ;;  %v4470_v31 = vshll.u32 %v7802_v21, 16 }
 0x613   : > { %6176 = vmatmul.bf16.gmra.mxu2 %v4466_v28  ;;  %v7849_v28 = vor.u32 %v7848_v11, %v7847_v39  ;;  %v4472_v10 = vrot.slane %v4470_v31, 1  ;;  %v3686_v11 = vld [vmem:[#allocation2 + $0x74] sm:$0x1]  ;;  %v5970_v31 = vadd.f32 %v10485_v47, %v10487_v2 }
 0x614   : > { %v6039_v23 = vpop.f32.mrf.mxu3  ;;  %v4359_v60 = vunpack.c.l.b16 %v3686_v11 }
 0x615   : > { %v5868_v41 = vpop.f32.mrf.mxu1  ;;  %v4473_v22 = vor.u32 %v4472_v10, %v4468_v37 }
 0x616   : > { %v5950_v16 = vpop.f32.mrf.mxu2 }
 0x617   : > { %v5951_v59 = vadd.f32 %v5950_v16, %v5862_v55  ;;  %v4661_v55 = vrot.slane %v4374_v49, 1  ;;  %v3662_v16 = vld [vmem:[#allocation2 + $0x6c] sm:$0xff]  }
 0x619   : > { %v10994_v45 = vadd.f32 %v6039_v23, %v5951_v59  ;;  %v4660_v59 = vrot.slane %v7849_v28, 1  ;;  %v4375_v28 = vpack.c.b16 %v4359_v60, %v4359_v60 }
 0x61b   : > { %12218 = vst [vmem:[#allocation99_spill] sm:$0xff] %v10994_v45  ;;  %v4477_v45 = vrot.slane %v4475_v63, 1  ;;  %v4662_v29 = vsel %vm865_vm1, %v4660_v59, %v4661_v55  ;;  %v5867_v63 = vadd.f32 %v10827_v14, %v5866_v9  ;;  %v4482_v55 = vshll.u32 %v3662_v16, 16 }
 0x61c   : > { %v6041_v57 = vpop.f32.mrf.mxu3  ;;  %6394 = vmatmul.bf16.gmra.mxu0 %v10996_v46 }
 0x61d   : > { %v6058_v49 = vpop.f32.mrf.mxu1  ;;  %v4478_v34 = vsel %vm594_vm0, %v4473_v22, %v4477_v45  ;;  %v4484_v22 = vrot.slane %v4482_v55, 1  ;;  %v5869_v45 = vadd.f32 %v10827_v14, %v5868_v41  ;;  %v7803_v55 = vld [vmem:[#allocation2 + $0x78] sm:$0xff]  }
 0x61e   : > { %v5952_v23 = vpop.f32.mrf.mxu2  ;;  %v6059_v19 = vadd.f32 %v6058_v49, %v5970_v31  ;;  %v3687_v49 = vld [vmem:[#allocation2 + $0x80] sm:$0x1] }
 0x61f   : > { %v5953_v39 = vadd.f32 %v5952_v23, %v5864_v58  ;;  %v7971_v58 = vld [vmem:[#allocation2 + $0x6c] sm:$0xe] }
 0x620   : > { %6097 = vmatmul.bf16.gmra.mxu1 %v3662_v16  ;;  %v7972_v2 = vor.u32 %v7971_v58, %v7970_v5  ;;  %v4360_v58 = vunpack.c.l.b16 %v3687_v49 }
 0x621   : > { %6270 = vmatmul.bf16.gmra.mxu3 %v4662_v29  ;;  %v11005_v15 = vadd.f32 %v6041_v57, %v5953_v39  ;;  %v4487_v57 = vshll.u32 %v4375_v28, 16  ;;  %v4664_v39 = vrot.slane %v4375_v28, 1  ;;  %v4480_v29 = vshrl.u32 %v3662_v16, 16  ;;  %v7529_v16 = vld [vmem:[%s11451_s3 + $0x210] sm:$0xff] }
 0x622   : > { %v4663_v11 = vrot.slane %v7972_v2, 1  ;;  %v5794_v28 = vadd.f32 %v10827_v14, %v10489_v30  ;;  %6499 = vmatpush.bf16.msra.mxu2 %v7529_v16 }
 0x623   : > { %6181 = vmatmul.bf16.gmra.mxu2 %v4478_v34  ;;  %v4489_v9 = vrot.slane %v4487_v57, 1  ;;  %v4376_v57 = vpack.c.b16 %v4360_v58, %v4360_v58 }
 0x624   : > { %v6044_v21 = vpop.f32.mrf.mxu3  ;;  %v4665_v60 = vsel %vm865_vm1, %v4663_v11, %v4664_v39 }
 0x625   : > { %v6060_v47 = vpop.f32.mrf.mxu1 }
 0x626   : > { %v5955_v37 = vpop.f32.mrf.mxu2 }
 0x627   : > { %v5956_v10 = vadd.f32 %v5955_v37, %v5867_v63  ;;  %v4485_v63 = vor.u32 %v4484_v22, %v4480_v29  ;;  %v7850_v22 = vld [vmem:[#allocation2 + $0x78] sm:$0xf0] }
 0x629   : > { %v11009_v23 = vadd.f32 %v6044_v21, %v5956_v10  ;;  %v4490_v5 = vsel %vm594_vm0, %v4485_v63, %v4489_v9  ;;  %v4499_v9 = vshll.u32 %v4376_v57, 16  ;;  %v4667_v63 = vrot.slane %v4376_v57, 1 }
 0x62b   : > { %v4501_v16 = vrot.slane %v4499_v9, 1 }
 0x62c   : > { %v6046_v59 = vpop.f32.mrf.mxu3 }
 0x62d   : > { %v6063_v37 = vpop.f32.mrf.mxu1 }
 0x62e   : > { %v5957_v34 = vpop.f32.mrf.mxu2  ;;  %v6064_v41 = vadd.f32 %v6063_v37, %v10503_v7  ;;  %v7521_v7 = vld [vmem:[%s11451_s3 + $0x1d0] sm:$0xff] }
 0x62f   : > { %v5958_v31 = vadd.f32 %v5957_v34, %v5869_v45  ;;  %v7851_v45 = vld [vmem:[#allocation2 + $0x78] sm:$0xe]  ;;  %v4494_v34 = vshll.u32 %v7803_v55, 16  ;;  %6410 = vmatpush.bf16.msra.mxu1 %v7521_v7 }
 0x630   : > { %6102 = vmatmul.bf16.gmra.mxu1 %v7803_v55  ;;  %v7852_v29 = vor.u32 %v7851_v45, %v7850_v22 }
 0x631   : > { %6275 = vmatmul.bf16.gmra.mxu3 %v4665_v60  ;;  %v11013_v21 = vadd.f32 %v6046_v59, %v5958_v31  ;;  %v5883_v59 = vadd.f32 %v10494_v13, %v5794_v28  ;;  %v4496_v49 = vrot.slane %v4494_v34, 1  ;;  %v3666_v13 = vld [vmem:[#allocation2 + $0x84] sm:$0xff]  }
 0x632   : > { %v4666_v28 = vrot.slane %v7852_v29, 1  ;;  %v7974_v34 = vld [vmem:[#allocation2 + $0x84] sm:$0xe] }
 0x633   : > { %6186 = vmatmul.bf16.gmra.mxu2 %v4490_v5  ;;  %v5972_v31 = vadd.f32 %v10492_v18, %v5883_v59  ;;  %v4492_v5 = vshrl.u32 %v7803_v55, 16  ;;  %v5799_v55 = vadd.f32 %v10827_v14, %v10518_v20 }
 0x634   : > { %v6236_v10 = vpop.f32.mrf.mxu3 }
 0x635   : > { %v6065_v11 = vpop.f32.mrf.mxu1  ;;  %v6061_v37 = vadd.f32 %v6060_v47, %v5972_v31  ;;  %v5888_v9 = vadd.f32 %v10529_v50, %v5799_v55 }
 0x636   : > { %v6147_v2 = vpop.f32.mrf.mxu2 }
 0x637   : > { %v6148_v39 = vadd.f32 %v6147_v2, %v6059_v19  ;;  %v7973_v19 = vld [vmem:[#allocation2 + $0x84] sm:$0xf0]  ;;  %v3688_v2 = vld [vmem:[#allocation2 + $0x8c] sm:$0x1] }
 0x638   : > { %v4361_v45 = vunpack.c.l.b16 %v3688_v2  ;;  %v4504_v2 = vshrl.u32 %v3666_v13, 16 }
 0x639   : > { %v11023_v30 = vadd.f32 %v6236_v10, %v6148_v39  ;;  %v4497_v39 = vor.u32 %v4496_v49, %v4492_v5  ;;  %v4506_v49 = vshll.u32 %v3666_v13, 16 }
 0x63a   : > { %v4377_v29 = vpack.c.b16 %v4361_v45, %v4361_v45 }
 0x63b   : > { %12220 = vst [vmem:[#allocation138_spill] sm:$0xff] %v11023_v30  ;;  %v4668_v30 = vsel %vm865_vm1, %v4666_v28, %v4667_v63  ;;  %v4502_v59 = vsel %vm594_vm0, %v4497_v39, %v4501_v16  ;;  %v7975_v63 = vor.u32 %v7974_v34, %v7973_v19  ;;  %v4508_v28 = vrot.slane %v4506_v49, 1  ;;  %v7804_v34 = vld [vmem:[#allocation2 + $0x90] sm:$0xff]  }
 0x63c   : > { %v6238_v60 = vpop.f32.mrf.mxu3 }
 0x63d   : > { %v6068_v18 = vpop.f32.mrf.mxu1 }
 0x63e   : > { %v6149_v58 = vpop.f32.mrf.mxu2  ;;  %v6069_v57 = vadd.f32 %v6068_v18, %v10541_v0  ;;  %v5977_v0 = vadd.f32 %v10527_v25, %v5888_v9 }
 0x63f   : > { %v6150_v10 = vadd.f32 %v6149_v58, %v6061_v37  ;;  %v4511_v37 = vshll.u32 %v4377_v29, 16  ;;  %v4670_v58 = vrot.slane %v4377_v29, 1 }
 0x640   : > { %6107 = vmatmul.bf16.gmra.mxu1 %v3666_v13  ;;  %v6066_v16 = vadd.f32 %v6065_v11, %v5977_v0  ;;  %v7528_v11 = vld [vmem:[%s11451_s3 + $0x208] sm:$0xff] }
 0x641   : > { %v11030_v22 = vadd.f32 %v6238_v60, %v6150_v10  ;;  %6280 = vmatmul.bf16.gmra.mxu3 %v4668_v30  ;;  %v4669_v10 = vrot.slane %v7975_v63, 1  ;;  %v4513_v39 = vrot.slane %v4511_v37, 1  ;;  %6500 = vmatpush.bf16.msra.mxu2 %v7528_v11  ;;  %v7853_v63 = vld [vmem:[#allocation2 + $0x90] sm:$0xf0]  ;;  %v7854_v37 = vld [vmem:[#allocation2 + $0x90] sm:$0xe] }
 0x643   : > { %6191 = vmatmul.bf16.gmra.mxu2 %v4502_v59  ;;  %v3689_v59 = vld [vmem:[#allocation2 + $0x98] sm:$0x1]  ;;  %v4671_v50 = vsel %vm865_vm1, %v4669_v10, %v4670_v58 }
 0x644   : > { %v6241_v47 = vpop.f32.mrf.mxu3  ;;  %v4362_v25 = vunpack.c.l.b16 %v3689_v59 }
 0x645   : > { %v6070_v60 = vpop.f32.mrf.mxu1 }
 0x646   : > { %v6152_v7 = vpop.f32.mrf.mxu2  ;;  %v4378_v9 = vpack.c.b16 %v4362_v25, %v4362_v25 }
 0x647   : > { %v6153_v31 = vadd.f32 %v6152_v7, %v6064_v41  ;;  %v4509_v41 = vor.u32 %v4508_v28, %v4504_v2  ;;  %v5804_v7 = vadd.f32 %v10827_v14, %v10543_v12  ;;  %v7855_v28 = vor.u32 %v7854_v37, %v7853_v63 }
 0x648   : > { %v4673_v2 = vrot.slane %v4378_v9, 1 }
 0x649   : > { %v11037_v30 = vadd.f32 %v6241_v47, %v6153_v31  ;;  %v4514_v47 = vsel %vm594_vm0, %v4509_v41, %v4513_v39  ;;  %v5893_v31 = vadd.f32 %v10548_v1, %v5804_v7  ;;  %v3670_v1 = vld [vmem:[#allocation2 + $0x9c] sm:$0xff]  }
 0x64b   : > { %v5982_v12 = vadd.f32 %v10556_v38, %v5893_v31 }
 0x64c   : > { %v6243_v5 = vpop.f32.mrf.mxu3 }
 0x64d   : > { %v6073_v19 = vpop.f32.mrf.mxu1  ;;  %v6071_v39 = vadd.f32 %v6070_v60, %v5982_v12  ;;  %v5809_v60 = vadd.f32 %v10827_v14, %v10601_v56 }
 0x64e   : > { %v6154_v20 = vpop.f32.mrf.mxu2  ;;  %v6074_v55 = vadd.f32 %v6073_v19, %v10579_v27  ;;  %v4518_v27 = vshll.u32 %v7804_v34, 16 }
 0x64f   : > { %v6155_v18 = vadd.f32 %v6154_v20, %v6066_v16  ;;  %v4523_v16 = vshll.u32 %v4378_v9, 16  ;;  %v5898_v37 = vadd.f32 %v10621_v44, %v5809_v60 }
 0x650   : > { %6112 = vmatmul.bf16.gmra.mxu1 %v7804_v34  ;;  %v4520_v20 = vrot.slane %v4518_v27, 1 }
 0x651   : > { %v11041_v45 = vadd.f32 %v6243_v5, %v6155_v18  ;;  %6285 = vmatmul.bf16.gmra.mxu3 %v4671_v50  ;;  %v7520_v5 = vld [vmem:[%s11451_s3 + $0x1c8] sm:$0xff]  ;;  %v4516_v18 = vshrl.u32 %v7804_v34, 16  ;;  %v4672_v50 = vrot.slane %v7855_v28, 1  ;;  %v4525_v41 = vrot.slane %v4523_v16, 1  ;;  %v7977_v34 = vld [vmem:[#allocation2 + $0x9c] sm:$0xe] }
 0x652   : > { %6411 = vmatpush.bf16.msra.mxu1 %v7520_v5  ;;  %v4530_v5 = vshll.u32 %v3670_v1, 16 }
 0x653   : > { %6196 = vmatmul.bf16.gmra.mxu2 %v4514_v47  ;;  %v3690_v47 = vld [vmem:[#allocation2 + $0xa4] sm:$0x1]  ;;  %v4521_v25 = vor.u32 %v4520_v20, %v4516_v18  ;;  %v4674_v11 = vsel %vm865_vm1, %v4672_v50, %v4673_v2  ;;  %v4528_v18 = vshrl.u32 %v3670_v1, 16 }
 0x654   : > { %v6246_v13 = vpop.f32.mrf.mxu3  ;;  %v4532_v2 = vrot.slane %v4530_v5, 1  ;;  %v7519_v5 = vld [vmem:[%s11451_s3 + $0x1c0] sm:$0xff] }
 0x655   : > { %v6075_v58 = vpop.f32.mrf.mxu1  ;;  %v4526_v7 = vsel %vm594_vm0, %v4521_v25, %v4525_v41  ;;  %v3691_v41 = vld [vmem:[#allocation2 + $0xb0] sm:$0x1] }
 0x656   : > { %v6157_v29 = vpop.f32.mrf.mxu2  ;;  %6412 = vmatpush.bf16.msra.mxu1 %v7519_v5 }
 0x657   : > { %v6158_v49 = vadd.f32 %v6157_v29, %v6069_v57  ;;  %v7976_v57 = vld [vmem:[#allocation2 + $0x9c] sm:$0xf0]  ;;  %v4363_v29 = vunpack.c.l.b16 %v3690_v47 }
 0x658   : > { %v7978_v12 = vor.u32 %v7977_v34, %v7976_v57 }
 0x659   : > { %v11051_v0 = vadd.f32 %v6246_v13, %v6158_v49  ;;  %v4379_v63 = vpack.c.b16 %v4363_v29, %v4363_v29 }
 0x65a   : > { %v4675_v14 = vrot.slane %v7978_v12, 1 }
 0x65b   : > { %v4535_v20 = vshll.u32 %v4379_v63, 16 }
 0x65c   : > { %v6248_v10 = vpop.f32.mrf.mxu3 }
 0x65d   : > { %v6078_v38 = vpop.f32.mrf.mxu1 }
 0x65e   : > { %v6159_v59 = vpop.f32.mrf.mxu2  ;;  %v6079_v9 = vadd.f32 %v6078_v38, %v10633_v40  ;;  %v5987_v40 = vadd.f32 %v10618_v6, %v5898_v37  ;;  %v4364_v6 = vunpack.c.l.b16 %v3691_v41  ;;  %v11079_v38 = vld [vmem:[%s11452_s4] ss:$0 sm:$0xff]  ;;  %v7857_v37 = vld [vmem:[#allocation2 + $0xa8] sm:$0xe] }
 0x65f   : > { %v6160_v19 = vadd.f32 %v6159_v59, %v6071_v39  ;;  %v4537_v59 = vrot.slane %v4535_v20, 1 }
 0x660   : > { %6117 = vmatmul.bf16.gmra.mxu1 %v3670_v1  ;;  %v6076_v39 = vadd.f32 %v6075_v58, %v5987_v40  ;;  %v7527_v58 = vld [vmem:[%s11451_s3 + $0x200] sm:$0xff]  ;;  %v7805_v1 = vld [vmem:[#allocation2 + $0xa8] sm:$0xff]   ;;  %v4380_v34 = vpack.c.b16 %v4364_v6, %v4364_v6 }
 0x661   : > { %v11058_v13 = vadd.f32 %v6248_v10, %v6160_v19  ;;  %6290 = vmatmul.bf16.gmra.mxu3 %v4674_v11  ;;  %v4676_v10 = vrot.slane %v4379_v63, 1  ;;  %6501 = vmatpush.bf16.msra.mxu2 %v7527_v58  ;;  %v7856_v63 = vld [vmem:[#allocation2 + $0xa8] sm:$0xf0] }
 0x662   : > { %v7858_v20 = vor.u32 %v7857_v37, %v7856_v63  ;;  %v4547_v40 = vshll.u32 %v4380_v34, 16  ;;  %v12226_v63 = vld [vmem:[#allocation116_spill] sm:$0xff] }
 0x663   : > { %6201 = vmatmul.bf16.gmra.mxu2 %v4526_v7  ;;  %v4677_v44 = vsel %vm865_vm1, %v4675_v14, %v4676_v10  ;;  %v12221_v7 = vld [vmem:[#allocation67_spill] sm:$0xff] }
 0x664   : > { %v6251_v31 = vpop.f32.mrf.mxu3  ;;  %v5814_v29 = vadd.f32 %v11079_v38, %v12221_v7  ;;  %v12223_v10 = vld [vmem:[#allocation103_spill] sm:$0xff]  ;;  %v4678_v41 = vrot.slane %v7858_v20, 1 }
 0x665   : > { %v6080_v16 = vpop.f32.mrf.mxu1  ;;  %v3674_v14 = vld [vmem:[#allocation2 + $0xb4] sm:$0xff]  }
 0x666   : > { %v6162_v49 = vpop.f32.mrf.mxu2  ;;  %v4554_v20 = vshll.u32 %v3674_v14, 16 }
 0x667   : > { %v6163_v27 = vadd.f32 %v6162_v49, %v6074_v55  ;;  %v4533_v55 = vor.u32 %v4532_v2, %v4528_v18  ;;  %v7979_v18 = vld [vmem:[#allocation2 + $0xb4] sm:$0xf0] }
 0x669   : > { %v11065_v28 = vadd.f32 %v6251_v31, %v6163_v27  ;;  %v4538_v25 = vsel %vm594_vm0, %v4533_v55, %v4537_v59  ;;  %v12222_v31 = vld [vmem:[#allocation165_spill] sm:$0xff]  ;;  %v4542_v27 = vshll.u32 %v7805_v1, 16  ;;  %v3692_v55 = vld [vmem:[#allocation2 + $0xbc] sm:$0x1] }
 0x66a   : > { %v4365_v7 = vunpack.c.l.b16 %v3692_v55 }
 0x66c   : > { %v6253_v19 = vpop.f32.mrf.mxu3 }
 0x66d   : > { %v6083_v57 = vpop.f32.mrf.mxu1 }
 0x66e   : > { %v6164_v56 = vpop.f32.mrf.mxu2  ;;  %v6084_v11 = vadd.f32 %v6083_v57, %v10655_v43  ;;  %v5903_v43 = vadd.f32 %v12222_v31, %v5814_v29  ;;  %v12224_v29 = vld [vmem:[#allocation73_spill] sm:$0xff] }
 0x66f   : > { %v6165_v50 = vadd.f32 %v6164_v56, %v6076_v39  ;;  %v4544_v39 = vrot.slane %v4542_v27, 1  ;;  %v4679_v56 = vrot.slane %v4380_v34, 1  ;;  %v12225_v34 = vld [vmem:[#allocation166_spill] sm:$0xff]  ;;  %v11098_v27 = vpop.f32.mrf.mxu0 }
 0x670   : > { %6122 = vmatmul.bf16.gmra.mxu1 %v7805_v1  ;;  %v5992_v2 = vadd.f32 %v12223_v10, %v5903_v43  ;;  %v4381_v43 = vpack.c.b16 %v4365_v7, %v4365_v7 }
 0x671   : > { %v11069_v47 = vadd.f32 %v6253_v19, %v6165_v50  ;;  %6295 = vmatmul.bf16.gmra.mxu3 %v4677_v44  ;;  %v4549_v19 = vrot.slane %v4547_v40, 1 }
 0x672   : > { %v6081_v59 = vadd.f32 %v6080_v16, %v5992_v2  ;;  %v5819_v16 = vadd.f32 %v11079_v38, %v12225_v34  ;;  %v4559_v2 = vshll.u32 %v4381_v43, 16  ;;  %v3743_v34 = vld [vmem:[#allocation2 + $0x20] sm:$0x1] }
 0x673   : > { %6206 = vmatmul.bf16.gmra.mxu2 %v4538_v25  ;;  %v4680_v25 = vsel %vm865_vm1, %v4678_v41, %v4679_v56  ;;  %v11105_v41 = vld [vmem:[#allocation2 + $0xcc] sm:$0xf0] }
 0x674   : > { %v5908_v37 = vadd.f32 %v12226_v63, %v5819_v16 }
 0x675   : > { %v6085_v12 = vpop.f32.mrf.mxu1 }
 0x676   : > { %v6167_v60 = vpop.f32.mrf.mxu2 }
 0x677   : > { %v11084_v49 = vadd.f32 %v6167_v60, %v6079_v9  ;;  %v4540_v9 = vshrl.u32 %v7805_v1, 16  ;;  %v7980_v1 = vld [vmem:[#allocation2 + $0xb4] sm:$0xe] }
 0x678   : > { %v7981_v10 = vor.u32 %v7980_v1, %v7979_v18 }
 0x679   : > { %v4545_v57 = vor.u32 %v4544_v39, %v4540_v9  ;;  %v12227_v39 = vld [vmem:[#allocation106_spill] sm:$0xff]  ;;  %v4556_v9 = vrot.slane %v4554_v20, 1 }
 0x67a   : > { %v5997_v56 = vadd.f32 %v12227_v39, %v5908_v37 }
 0x67b   : > { %v4550_v58 = vsel %vm594_vm0, %v4545_v57, %v4549_v19  ;;  %v4681_v57 = vrot.slane %v7981_v10, 1  ;;  %v12229_v10 = vld [vmem:[#allocation57_spill] sm:$0xff] }
 0x67c   : > { %v6086_v19 = vadd.f32 %v6085_v12, %v5997_v56  ;;  %v7859_v56 = vld [vmem:[#allocation2 + $0xc0] sm:$0xf0] }
 0x67d   : > { %v6088_v6 = vpop.f32.mrf.mxu1 }
 0x67e   : > { %v6169_v50 = vpop.f32.mrf.mxu2  ;;  %v6089_v60 = vadd.f32 %v6088_v6, %v12224_v29  ;;  %v4561_v6 = vrot.slane %v4559_v2, 1  ;;  %v11110_v29 = vpop.f32.mrf.mxu0 }
 0x67f   : > { %v11090_v44 = vadd.f32 %v6169_v50, %v6081_v59  ;;  %v4682_v59 = vrot.slane %v4381_v43, 1  ;;  %v11103_v50 = vld [vmem:[#allocation2 + $0xcc] sm:$0xff]   ;;  %v12228_v43 = vld [vmem:[#allocation167_spill] sm:$0xff] }
 0x680   : > { %6127 = vmatmul.bf16.gmra.mxu1 %v3674_v14  ;;  %6399 = vmatmul.bf16.gmra.mxu0 %v11103_v50  ;;  %v5824_v63 = vadd.f32 %v11079_v38, %v12228_v43 }
 0x681   : > { %6300 = vmatmul.bf16.gmra.mxu3 %v4680_v25  ;;  %v4552_v25 = vshrl.u32 %v3674_v14, 16  ;;  %v4683_v7 = vsel %vm865_vm1, %v4681_v57, %v4682_v59  ;;  %v4815_v14 = vunpack.c.l.b16 %v3743_v34  ;;  %v7860_v59 = vld [vmem:[#allocation2 + $0xc0] sm:$0xe] }
 0x682   : > { %v5913_v2 = vadd.f32 %v12229_v10, %v5824_v63  ;;  %v3744_v10 = vld [vmem:[#allocation2 + $0x2c] sm:$0x1] }
 0x683   : > { %6211 = vmatmul.bf16.gmra.mxu2 %v4550_v58  ;;  %v4557_v18 = vor.u32 %v4556_v9, %v4552_v25  ;;  %v5018_v9 = vshll.u32 %v10996_v46, 16  ;;  %v12230_v25 = vld [vmem:[#allocation127_spill] sm:$0xff] }
 0x685   : > { %v6090_v40 = vpop.f32.mrf.mxu1  ;;  %v4562_v1 = vsel %vm594_vm0, %v4557_v18, %v4561_v6  ;;  %v6002_v6 = vadd.f32 %v12230_v25, %v5913_v2  ;;  %v4816_v2 = vunpack.c.l.b16 %v3744_v10 }
 0x686   : > { %v6172_v31 = vpop.f32.mrf.mxu2 }
 0x687   : > { %v11100_v5 = vadd.f32 %v6172_v31, %v6084_v11  ;;  %v3693_v11 = vld [vmem:[#allocation2 + $0xc8] sm:$0x1]  ;;  %v6091_v34 = vadd.f32 %v6090_v40, %v6002_v6  ;;  %v4832_v25 = vpack.c.b16 %v4816_v2, %v4816_v2  ;;  %v7862_v6 = vld [vmem:[#allocation2 + $0x18] sm:$0xf0] }
 0x688   : > { %v4366_v12 = vunpack.c.l.b16 %v3693_v11  ;;  %v5020_v11 = vrot.slane %v5018_v9, 1 }
 0x68a   : > { %v4382_v20 = vpack.c.b16 %v4366_v12, %v4366_v12 }
 0x68c   : > { %v4571_v57 = vshll.u32 %v4382_v20, 16 }
 0x68d   : > { %v6093_v16 = vpop.f32.mrf.mxu1 }
 0x68e   : > { %v6174_v55 = vpop.f32.mrf.mxu2  ;;  %v6094_v31 = vadd.f32 %v6093_v16, %v10735_v35  ;;  %v7861_v35 = vor.u32 %v7860_v59, %v7859_v56  ;;  %v5016_v16 = vshrl.u32 %v10996_v46, 16  ;;  %v5829_v59 = vadd.f32 %v11079_v38, %v10751_v32 }
 0x68f   : > { %v11107_v58 = vadd.f32 %v6174_v55, %v6086_v19  ;;  %v4831_v19 = vpack.c.b16 %v4815_v14, %v4815_v14 }
 0x690   : > { %6132 = vmatmul.bf16.gmra.mxu1 %v10996_v46  ;;  %v4684_v12 = vrot.slane %v7861_v35, 1  ;;  %v11126_v63 = vor.u32 %v5020_v11, %v5016_v16  ;;  %v5918_v35 = vadd.f32 %v10770_v8, %v5829_v59  ;;  %v7863_v11 = vld [vmem:[#allocation2 + $0x18] sm:$0xe] }
 0x691   : > { %6305 = vmatmul.bf16.gmra.mxu3 %v4683_v7  ;;  %v4685_v7 = vrot.slane %v4382_v20, 1  ;;  %v4855_v18 = vshll.u32 %v4831_v19, 16 }
 0x693   : > { %6216 = vmatmul.bf16.gmra.mxu2 %v4562_v1  ;;  %v4686_v14 = vsel %vm865_vm1, %v4684_v12, %v4685_v7  ;;  %v12231_v7 = vld [vmem:[#allocation117_spill] sm:$0xff] }
 0x694   : > { %v4860_v8 = vshrl.u32 %v12231_v7, 16 }
 0x695   : > { %v6095_v55 = vpop.f32.mrf.mxu1 }
 0x696   : > { %v6177_v37 = vpop.f32.mrf.mxu2 }
 0x697   : > { %v11119_v39 = vadd.f32 %v6177_v37, %v6089_v60  ;;  %v4573_v60 = vrot.slane %v4571_v57, 1  ;;  %v4857_v37 = vrot.slane %v4855_v18, 1  ;;  %v4862_v18 = vshll.u32 %v12231_v7, 16 }
 0x699   : > { %v4574_v20 = vsel %vm594_vm0, %v11126_v63, %v4573_v60  ;;  %v4858_v46 = vsel %vm594_vm0, %v10891_v62, %v4857_v37  ;;  %v4867_v62 = vshll.u32 %v4832_v25, 16  ;;  %v4864_v32 = vrot.slane %v4862_v18, 1 }
 0x69b   : > { %v4865_v2 = vor.u32 %v4864_v32, %v4860_v8  ;;  %v5107_v8 = vrot.slane %v4832_v25, 1 }
 0x69d   : > { %v6098_v56 = vpop.f32.mrf.mxu1 }
 0x69e   : > { %v6179_v1 = vpop.f32.mrf.mxu2  ;;  %v6099_v40 = vadd.f32 %v6098_v56, %v10801_v17  ;;  %v3745_v56 = vld [vmem:[#allocation2 + $0x38] sm:$0x1] }
 0x69f   : > { %v11124_v43 = vadd.f32 %v6179_v1, %v6091_v34  ;;  %v12232_v34 = vld [vmem:[#allocation168_spill] sm:$0xff]  ;;  %v7864_v1 = vor.u32 %v7863_v11, %v7862_v6  ;;  %v12234_v11 = vld [vmem:[#allocation118_spill] sm:$0xff] }
 0x6a0   : > { %6413 = vmatmul.bf16.vlgmr.msra.gmra.mxu1 %v4858_v46  ;;  %v6007_v16 = vadd.f32 %v12232_v34, %v5918_v35  ;;  %v12233_v35 = vld [vmem:[#allocation15_spill] sm:$0xff]  ;;  %v7983_v34 = vld [vmem:[#allocation2 + $0x24] sm:$0xe] }
 0x6a1   : > { %6310 = vmatmul.bf16.gmra.mxu3 %v4686_v14  ;;  %v5104_v14 = vrot.slane %v4831_v19, 1  ;;  %v5103_v10 = vrot.slane %v7864_v1, 1  ;;  %v5834_v19 = vadd.f32 %v11079_v38, %v12233_v35 }
 0x6a2   : > { %v6096_v12 = vadd.f32 %v6095_v55, %v6007_v16  ;;  %v4817_v55 = vunpack.c.l.b16 %v3745_v56 }
 0x6a3   : > { %6221 = vmatmul.bf16.gmra.mxu2 %v4574_v20  ;;  %v5105_v46 = vsel %vm865_vm1, %v5103_v10, %v5104_v14  ;;  %v5923_v18 = vadd.f32 %v12234_v11, %v5834_v19 }
 0x6a4   : > { %v4833_v16 = vpack.c.b16 %v4817_v55, %v4817_v55 }
 0x6a5   : > { %v6100_v17 = vpop.f32.mrf.mxu1 }
 0x6a6   : > { %v6182_v9 = vpop.f32.mrf.mxu2  ;;  %v4879_v14 = vshll.u32 %v4833_v16, 16 }
 0x6a7   : > { %v11137_v57 = vadd.f32 %v6182_v9, %v6094_v31  ;;  %v4869_v31 = vrot.slane %v4867_v62, 1  ;;  %v12235_v62 = vld [vmem:[#allocation151_spill] sm:$0xff] }
 0x6a9   : > { %v4870_v9 = vsel %vm594_vm0, %v4865_v2, %v4869_v31 }
 0x6ad   : > { %v6103_v20 = vpop.f32.mrf.mxu1 }
 0x6ae   : > { %v6184_v60 = vpop.f32.mrf.mxu2  ;;  %v6104_v59 = vadd.f32 %v6103_v20, %v10832_v51  ;;  %v4881_v20 = vrot.slane %v4879_v14, 1 }
 0x6af   : > { %v11141_v37 = vadd.f32 %v6184_v60, %v6096_v12  ;;  %v6012_v12 = vadd.f32 %v12235_v62, %v5923_v18  ;;  %v12236_v60 = vld [vmem:[#allocation69_spill] sm:$0xff]  ;;  %v7865_v18 = vld [vmem:[#allocation2 + $0x30] sm:$0xf0]  ;;  %v12237_v62 = vld [vmem:[#allocation111_spill] sm:$0xff] }
 0x6b0   : > { %6418 = vmatmul.bf16.gmra.mxu1 %v4870_v9  ;;  %v7984_v51 = vor.u32 %v7983_v34, %v12236_v60  ;;  %v4882_v55 = vsel %vm594_vm0, %v10925_v33, %v4881_v20  ;;  %v7866_v34 = vld [vmem:[#allocation2 + $0x30] sm:$0xe]  ;;  %v3747_v20 = vld [vmem:[#allocation2 + $0x50] sm:$0x1] }
 0x6b1   : > { %v6101_v32 = vadd.f32 %v6100_v17, %v6012_v12  ;;  %v5839_v17 = vadd.f32 %v11079_v38, %v10852_v24  ;;  %v4886_v12 = vshll.u32 %v12237_v62, 16 }
 0x6b2   : > { %v5106_v56 = vrot.slane %v7984_v51, 1  ;;  %v7867_v51 = vor.u32 %v7866_v34, %v7865_v18 }
 0x6b3   : > { %6502 = vmatmul.bf16.vlgmr.msra.gmra.mxu2 %v5105_v46  ;;  %v3746_v46 = vld [vmem:[#allocation2 + $0x44] sm:$0x1]  ;;  %v5928_v19 = vadd.f32 %v10860_v48, %v5839_v17  ;;  %v4888_v24 = vrot.slane %v4886_v12, 1  ;;  %v4884_v48 = vshrl.u32 %v12237_v62, 16  ;;  %v12238_v12 = vld [vmem:[#allocation78_spill] sm:$0xff] }
 0x6b4   : > { %v4818_v35 = vunpack.c.l.b16 %v3746_v46 }
 0x6b5   : > { %v6105_v1 = vpop.f32.mrf.mxu1  ;;  %v6017_v60 = vadd.f32 %v10856_v42, %v5928_v19  ;;  %v7986_v19 = vld [vmem:[#allocation2 + $0x3c] sm:$0xe] }
 0x6b6   : > { %v6187_v6 = vpop.f32.mrf.mxu2  ;;  %v4834_v11 = vpack.c.b16 %v4818_v35, %v4818_v35 }
 0x6b7   : > { %v11150_v7 = vadd.f32 %v6187_v6, %v6099_v40  ;;  %v5108_v40 = vsel %vm865_vm1, %v5106_v56, %v5107_v8  ;;  %v6106_v14 = vadd.f32 %v6105_v1, %v6017_v60  ;;  %v5109_v56 = vrot.slane %v7867_v51, 1 }
 0x6b8   : > { %v4891_v33 = vshll.u32 %v4834_v11, 16  ;;  %v4819_v1 = vunpack.c.l.b16 %v3747_v20  ;;  %v12240_v20 = vld [vmem:[#allocation143_spill] sm:$0xff] }
 0x6ba   : > { %v4835_v18 = vpack.c.b16 %v4819_v1, %v4819_v1 }
 0x6bc   : > { %v4903_v60 = vshll.u32 %v4835_v18, 16 }
 0x6bd   : > { %v6108_v2 = vpop.f32.mrf.mxu1 }
 0x6be   : > { %v6189_v10 = vpop.f32.mrf.mxu2  ;;  %v6109_v9 = vadd.f32 %v6108_v2, %v10881_v26 }
 0x6bf   : > { %v11154_v31 = vadd.f32 %v6189_v10, %v6101_v32  ;;  %v5110_v10 = vrot.slane %v4833_v16, 1  ;;  %v5844_v16 = vadd.f32 %v11079_v38, %v10883_v53 }
 0x6c0   : > { %6423 = vmatmul.bf16.gmra.mxu1 %v4882_v55 }
 0x6c1   : > { %v5111_v2 = vsel %vm865_vm1, %v5109_v56, %v5110_v10  ;;  %v5933_v17 = vadd.f32 %v10889_v61, %v5844_v16  ;;  %v4905_v10 = vrot.slane %v4903_v60, 1 }
 0x6c3   : > { %6507 = vmatmul.bf16.gmra.mxu2 %v5108_v40  ;;  %v4889_v40 = vor.u32 %v4888_v24, %v4884_v48  ;;  %v6022_v62 = vadd.f32 %v10887_v36, %v5933_v17  ;;  %v3748_v24 = vld [vmem:[#allocation2 + $0x5c] sm:$0x1]  ;;  %v4906_v36 = vsel %vm594_vm0, %v10967_v54, %v4905_v10  ;;  %v7869_v17 = vld [vmem:[#allocation2 + $0x48] sm:$0xe]  ;;  %v5116_v10 = vrot.slane %v4835_v18, 1 }
 0x6c5   : > { %v6110_v26 = vpop.f32.mrf.mxu1 }
 0x6c6   : > { %v6192_v25 = vpop.f32.mrf.mxu2  ;;  %v6111_v51 = vadd.f32 %v6110_v26, %v6022_v62  ;;  %v4820_v26 = vunpack.c.l.b16 %v3748_v24 }
 0x6c7   : > { %v11163_v6 = vadd.f32 %v6192_v25, %v6104_v59  ;;  %v4893_v59 = vrot.slane %v4891_v33, 1 }
 0x6c8   : > { %v4836_v16 = vpack.c.b16 %v4820_v26, %v4820_v26 }
 0x6c9   : > { %v4894_v42 = vsel %vm594_vm0, %v4889_v40, %v4893_v59  ;;  %v12239_v59 = vld [vmem:[#allocation140_spill] sm:$0xff]  ;;  %v12241_v40 = vld [vmem:[#allocation125_spill] sm:$0xff] }
 0x6cd   : > { %v6113_v46 = vpop.f32.mrf.mxu1 }
 0x6ce   : > { %v6194_v32 = vpop.f32.mrf.mxu2  ;;  %v6114_v55 = vadd.f32 %v6113_v46, %v10904_v4  ;;  %v7987_v4 = vor.u32 %v7986_v19, %v12238_v12  ;;  %v12243_v19 = vld [vmem:[#allocation112_spill] sm:$0xff] }
 0x6cf   : > { %v11167_v8 = vadd.f32 %v6194_v32, %v6106_v14  ;;  %v5113_v14 = vrot.slane %v4834_v11, 1  ;;  %v5849_v11 = vadd.f32 %v11079_v38, %v12239_v59  ;;  %v4910_v62 = vshll.u32 %v12243_v19, 16  ;;  %v12244_v12 = vld [vmem:[#allocation120_spill] sm:$0xff] }
 0x6d0   : > { %6428 = vmatmul.bf16.gmra.mxu1 %v4894_v42  ;;  %v5112_v53 = vrot.slane %v7987_v4, 1 }
 0x6d1   : > { %v5938_v42 = vadd.f32 %v12241_v40, %v5849_v11  ;;  %v4912_v24 = vrot.slane %v4910_v62, 1  ;;  %v12248_v62 = vld [vmem:[#allocation161_spill] sm:$0xff] }
 0x6d2   : > { %v5114_v61 = vsel %vm865_vm1, %v5112_v53, %v5113_v14 }
 0x6d3   : > { %6512 = vmatmul.bf16.gmra.mxu2 %v5111_v2  ;;  %v6027_v4 = vadd.f32 %v12244_v12, %v5938_v42  ;;  %v12247_v42 = vld [vmem:[#allocation150_spill] sm:$0xff] }
 0x6d5   : > { %v6115_v34 = vpop.f32.mrf.mxu1 }
 0x6d6   : > { %v6197_v35 = vpop.f32.mrf.mxu2  ;;  %v6116_v14 = vadd.f32 %v6115_v34, %v6027_v4 }
 0x6d7   : > { %v11176_v25 = vadd.f32 %v6197_v35, %v6109_v9  ;;  %v5854_v9 = vadd.f32 %v11079_v38, %v10935_v3  ;;  %v12242_v3 = vld [vmem:[#allocation124_spill] sm:$0xff] }
 0x6d9   : > { %v5943_v46 = vadd.f32 %v12240_v20, %v5854_v9  ;;  %v12245_v20 = vld [vmem:[#allocation33_spill] sm:$0xff] }
 0x6db   : > { %v6032_v35 = vadd.f32 %v12242_v3, %v5943_v46  ;;  %v5859_v46 = vadd.f32 %v11079_v38, %v12245_v20 }
 0x6dd   : > { %v6118_v56 = vpop.f32.mrf.mxu1  ;;  %v5948_v3 = vadd.f32 %v12247_v42, %v5859_v46 }
 0x6de   : > { %v6199_v33 = vpop.f32.mrf.mxu2  ;;  %v6119_v48 = vadd.f32 %v6118_v56, %v10937_v52  ;;  %v7868_v52 = vld [vmem:[#allocation2 + $0x48] sm:$0xf0] }
 0x6df   : > { %v11180_v32 = vadd.f32 %v6199_v33, %v6111_v51  ;;  %v7870_v51 = vor.u32 %v7869_v17, %v7868_v52  ;;  %v4915_v33 = vshll.u32 %v4836_v16, 16  ;;  %v7989_v17 = vld [vmem:[#allocation2 + $0x54] sm:$0xe] }
 0x6e0   : > { %6433 = vmatmul.bf16.gmra.mxu1 %v4906_v36  ;;  %v3749_v36 = vld [vmem:[#allocation2 + $0x68] sm:$0x1] }
 0x6e1   : > { %v4917_v9 = vrot.slane %v4915_v33, 1  ;;  %v4821_v34 = vunpack.c.l.b16 %v3749_v36  ;;  %v12250_v36 = vld [vmem:[#allocation99_spill] sm:$0xff] }
 0x6e3   : > { %6517 = vmatmul.bf16.gmra.mxu2 %v5114_v61  ;;  %v4908_v61 = vshrl.u32 %v12243_v19, 16  ;;  %v4837_v19 = vpack.c.b16 %v4821_v34, %v4821_v34  ;;  %v12252_v34 = vld [vmem:[#allocation145_spill] sm:$0xff] }
 0x6e4   : > { %v4934_v42 = vshll.u32 %v12252_v34, 16 }
 0x6e5   : > { %v6120_v54 = vpop.f32.mrf.mxu1  ;;  %v4913_v11 = vor.u32 %v4912_v24, %v4908_v61  ;;  %v4927_v33 = vshll.u32 %v4837_v19, 16  ;;  %v3750_v61 = vld [vmem:[#allocation2 + $0x74] sm:$0x1] }
 0x6e6   : > { %v6202_v2 = vpop.f32.mrf.mxu2  ;;  %v6121_v60 = vadd.f32 %v6120_v54, %v6032_v35  ;;  %v6037_v54 = vadd.f32 %v12248_v62, %v5948_v3  ;;  %v4822_v20 = vunpack.c.l.b16 %v3750_v61 }
 0x6e7   : > { %v11192_v1 = vadd.f32 %v6202_v2, %v6114_v55  ;;  %v5115_v55 = vrot.slane %v7870_v51, 1  ;;  %v12246_v2 = vld [vmem:[#allocation130_spill] sm:$0xff]  ;;  %v4918_v18 = vsel %vm594_vm0, %v4913_v11, %v4917_v9 }
 0x6e8   : > { %v12249_v51 = vld [vmem:[#allocation82_spill] sm:$0xff] }
 0x6e9   : > { %v5117_v59 = vsel %vm865_vm1, %v5115_v55, %v5116_v10  ;;  %v7990_v38 = vor.u32 %v7989_v17, %v12249_v51  ;;  %v4929_v55 = vrot.slane %v4927_v33, 1  ;;  %v4936_v51 = vrot.slane %v4934_v42, 1 }
 0x6eb   : > { %v5118_v24 = vrot.slane %v7990_v38, 1 }
 0x6ed   : > { %v6123_v26 = vpop.f32.mrf.mxu1 }
 0x6ee   : > { %v6204_v53 = vpop.f32.mrf.mxu2  ;;  %v6124_v40 = vadd.f32 %v6123_v26, %v12246_v2 }
 0x6ef   : > { %v11197_v56 = vadd.f32 %v6204_v53, %v6116_v14  ;;  %v5119_v53 = vrot.slane %v4836_v16, 1  ;;  %v4838_v16 = vpack.c.b16 %v4822_v20, %v4822_v20 }
 0x6f0   : > { %6438 = vmatmul.bf16.gmra.mxu1 %v4918_v18  ;;  %v7872_v18 = vld [vmem:[#allocation2 + $0x60] sm:$0xe] }
 0x6f1   : > { %v4939_v62 = vshll.u32 %v4838_v16, 16  ;;  %v5125_v42 = vrot.slane %v4838_v16, 1  ;;  %v7875_v16 = vld [vmem:[#allocation2 + $0x78] sm:$0xe] }
 0x6f3   : > { %6522 = vmatmul.bf16.gmra.mxu2 %v5117_v59  ;;  %v12251_v59 = vld [vmem:[#allocation104_spill] sm:$0xff] }
 0x6f4   : > { %v4930_v11 = vsel %vm594_vm0, %v12251_v59, %v4929_v55 }
 0x6f5   : > { %v6125_v12 = vpop.f32.mrf.mxu1 }
 0x6f6   : > { %v6207_v35 = vpop.f32.mrf.mxu2  ;;  %v6126_v4 = vadd.f32 %v6125_v12, %v6037_v54  ;;  %v5122_v12 = vrot.slane %v4837_v19, 1 }
 0x6f7   : > { %v11206_v52 = vadd.f32 %v6207_v35, %v6119_v48  ;;  %v5120_v48 = vsel %vm865_vm1, %v5118_v24, %v5119_v53  ;;  %v3751_v53 = vld [vmem:[#allocation2 + $0x80] sm:$0x1] }
 0x6fd   : > { %v6128_v9 = vpop.f32.mrf.mxu1 }
 0x6fe   : > { %v6209_v14 = vpop.f32.mrf.mxu2  ;;  %v6129_v26 = vadd.f32 %v6128_v9, %v12250_v36 }
 0x6ff   : > { %v11210_v10 = vadd.f32 %v6209_v14, %v6121_v60  ;;  %v7871_v60 = vld [vmem:[#allocation2 + $0x60] sm:$0xf0]  ;;  %v4932_v14 = vshrl.u32 %v12252_v34, 16 }
 0x700   : > { %6443 = vmatmul.bf16.gmra.mxu1 %v4930_v11  ;;  %v7873_v17 = vor.u32 %v7872_v18, %v7871_v60 }
 0x701   : > { %v4937_v61 = vor.u32 %v4936_v51, %v4932_v14 }
 0x702   : > { %v5121_v33 = vrot.slane %v7873_v17, 1 }
 0x703   : > { %6527 = vmatmul.bf16.gmra.mxu2 %v5120_v48  ;;  %v4823_v48 = vunpack.c.l.b16 %v3751_v53  ;;  %v7874_v53 = vld [vmem:[#allocation2 + $0x78] sm:$0xf0] }
 0x704   : > { %v5123_v55 = vsel %vm865_vm1, %v5121_v33, %v5122_v12 }
 0x705   : > { %v6130_v3 = vpop.f32.mrf.mxu1  ;;  %v4839_v59 = vpack.c.b16 %v4823_v48, %v4823_v48 }
 0x706   : > { %v6212_v46 = vpop.f32.mrf.mxu2  ;;  %v6131_v35 = vadd.f32 %v6130_v3, %v11005_v15 }
 0x707   : > { %v11216_v2 = vadd.f32 %v6212_v46, %v6124_v40  ;;  %v4941_v40 = vrot.slane %v4939_v62, 1  ;;  %v12253_v46 = vld [vmem:[#allocation115_spill] sm:$0xff]  ;;  %v4951_v18 = vshll.u32 %v4839_v59, 16  ;;  %v3752_v62 = vld [vmem:[#allocation2 + $0x8c] sm:$0x1] }
 0x708   : > { %v4824_v33 = vunpack.c.l.b16 %v3752_v62  ;;  %v12257_v62 = vld [vmem:[#allocation154_spill] sm:$0xff] }
 0x709   : > { %v4942_v15 = vsel %vm594_vm0, %v4937_v61, %v4941_v40  ;;  %v4953_v17 = vrot.slane %v4951_v18, 1  ;;  %v7876_v61 = vor.u32 %v7875_v16, %v7874_v53  ;;  %v3753_v18 = vld [vmem:[#allocation2 + $0x98] sm:$0x1]  ;;  %v7995_v53 = vld [vmem:[#allocation2 + $0x84] sm:$0xe] }
 0x70a   : > { %v4840_v40 = vpack.c.b16 %v4824_v33, %v4824_v33 }
 0x70d   : > { %v6133_v24 = vpop.f32.mrf.mxu1 }
 0x70e   : > { %v6214_v54 = vpop.f32.mrf.mxu2  ;;  %v6134_v9 = vadd.f32 %v6133_v24, %v11009_v23 }
 0x70f   : > { %v11220_v38 = vadd.f32 %v6214_v54, %v6126_v4  ;;  %v7992_v4 = vld [vmem:[#allocation2 + $0x6c] sm:$0xe] }
 0x710   : > { %6448 = vmatmul.bf16.gmra.mxu1 %v4942_v15  ;;  %v7993_v60 = vor.u32 %v7992_v4, %v12253_v46  ;;  %v4963_v15 = vshll.u32 %v4840_v40, 16  ;;  %v5127_v46 = vrot.slane %v7876_v61, 1  ;;  %v12258_v61 = vld [vmem:[#allocation91_spill] sm:$0xff] }
 0x712   : > { %v5124_v23 = vrot.slane %v7993_v60, 1 }
 0x713   : > { %6532 = vmatmul.bf16.gmra.mxu2 %v5123_v55 }
 0x714   : > { %v5126_v12 = vsel %vm865_vm1, %v5124_v23, %v5125_v42 }
 0x715   : > { %v6135_v11 = vpop.f32.mrf.mxu1 }
 0x716   : > { %v6217_v19 = vpop.f32.mrf.mxu2  ;;  %v6136_v20 = vadd.f32 %v6135_v11, %v11013_v21 }
 0x717   : > { %v11226_v36 = vadd.f32 %v6217_v19, %v6129_v26  ;;  %v12254_v26 = vld [vmem:[#allocation135_spill] sm:$0xff]  ;;  %v5128_v19 = vrot.slane %v4839_v59, 1 }
 0x718   : > { %v4954_v51 = vsel %vm594_vm0, %v12254_v26, %v4953_v17  ;;  %v12256_v17 = vld [vmem:[#allocation138_spill] sm:$0xff]  ;;  %v4825_v26 = vunpack.c.l.b16 %v3753_v18  ;;  %v5131_v18 = vrot.slane %v4840_v40, 1 }
 0x719   : > { %v5129_v42 = vsel %vm865_vm1, %v5127_v46, %v5128_v19  ;;  %v12261_v40 = vld [vmem:[#allocation146_spill] sm:$0xff] }
 0x71a   : > { %v4841_v16 = vpack.c.b16 %v4825_v26, %v4825_v26 }
 0x71d   : > { %v6414_v54 = vpop.f32.mrf.mxu1 }
 0x71e   : > { %v6219_v34 = vpop.f32.mrf.mxu2 }
 0x71f   : > { %v11230_v3 = vadd.f32 %v6219_v34, %v6131_v35  ;;  %v12255_v35 = vld [vmem:[#allocation85_spill] sm:$0xff] }
 0x720   : > { %6453 = vmatmul.bf16.gmra.mxu1 %v4954_v51  ;;  %v4958_v24 = vshll.u32 %v12255_v35, 16  ;;  %v4956_v60 = vshrl.u32 %v12255_v35, 16 }
 0x722   : > { %v4960_v4 = vrot.slane %v4958_v24, 1 }
 0x723   : > { %6537 = vmatmul.bf16.gmra.mxu2 %v5126_v12  ;;  %v6326_v12 = vadd.f32 %v12257_v62, %v12256_v17 }
 0x724   : > { %v4961_v23 = vor.u32 %v4960_v4, %v4956_v60  ;;  %v4975_v4 = vshll.u32 %v4841_v16, 16  ;;  %v7069_v60 = vld [vmem:[%s8114_s16 + $0x4a] sm:$0xff] }
 0x725   : > { %v6416_v55 = vpop.f32.mrf.mxu1  ;;  %v6415_v51 = vadd.f32 %v6414_v54, %v6326_v12 }
 0x726   : > { %v6222_v21 = vpop.f32.mrf.mxu2  ;;  %v4977_v62 = vrot.slane %v4975_v4, 1  ;;  %v7877_v4 = vld [vmem:[#allocation2 + $0x90] sm:$0xf0] }
 0x727   : > { %v11235_v14 = vadd.f32 %v6222_v21, %v6134_v9  ;;  %v4965_v9 = vrot.slane %v4963_v15, 1  ;;  %v6328_v15 = vadd.f32 %v12258_v61, %v11030_v22  ;;  %v7070_v61 = vld [vmem:[%s8114_s16 + $0x62] sm:$0xff] }
 0x729   : > { %v4966_v59 = vsel %vm594_vm0, %v4961_v23, %v4965_v9  ;;  %v6417_v46 = vadd.f32 %v6416_v55, %v6328_v15  ;;  %v11257_v23 = vpop.f32.mrf.mxu3  ;;  %v12260_v55 = vld [vmem:[#allocation142_spill] sm:$0xff] }
 0x72d   : > { %v6419_v34 = vpop.f32.mrf.mxu1 }
 0x72e   : > { %v6224_v48 = vpop.f32.mrf.mxu2 }
 0x72f   : > { %v11238_v11 = vadd.f32 %v6224_v48, %v6136_v20  ;;  %v7068_v20 = vld [vmem:[%s8114_s16 + $0x42] sm:$0xff]  ;;  %v12259_v48 = vld [vmem:[#allocation22_spill] sm:$0xff] }
 0x730   : > { %6458 = vmatmul.bf16.gmra.mxu1 %v4966_v59  ;;  %v7996_v19 = vor.u32 %v7995_v53, %v12259_v48  ;;  %v3754_v59 = vld [vmem:[#allocation2 + $0xa4] sm:$0x1] }
 0x731   : > { %v4826_v53 = vunpack.c.l.b16 %v3754_v59 }
 0x732   : > { %v5130_v17 = vrot.slane %v7996_v19, 1 }
 0x733   : > { %6542 = vmatmul.bf16.gmra.mxu2 %v5129_v42  ;;  %v11268_v48 = vpack.c.b16 %v4826_v53, %v4826_v53 }
 0x734   : > { %v5132_v22 = vsel %vm865_vm1, %v5130_v17, %v5131_v18 }
 0x735   : > { %v6421_v24 = vpop.f32.mrf.mxu1 }
 0x736   : > { %v6503_v33 = vpop.f32.mrf.mxu2 }
 0x737   : > { %v6504_v21 = vadd.f32 %v6503_v33, %v6415_v51  ;;  %v11260_v51 = vpop.f32.mrf.mxu0 }
 0x739   : > { %v6583_v35 = vadd.f32 %v7068_v20, %v6504_v21  ;;  %v6331_v20 = vadd.f32 %v12260_v55, %v11037_v30  ;;  %v4978_v21 = vsel %vm594_vm0, %v12261_v40, %v4977_v62  ;;  %v12262_v30 = vld [vmem:[#allocation90_spill] sm:$0xff] }
 0x73a   : > { %v7071_v55 = vld [vmem:[%s8114_s16 + $0x6a] sm:$0xff] }
 0x73b   : > { %v6615_v54 = vmax.f32 %v6583_v35, 0.0  ;;  %v6420_v35 = vadd.f32 %v6419_v34, %v6331_v20 }
 0x73d   : > { %6647 = vst [vmem:[%s11250_s28] sm:$0xff] %v6615_v54  ;;  %v6424_v26 = vpop.f32.mrf.mxu1 }
 0x73e   : > { %v6505_v9 = vpop.f32.mrf.mxu2 }
 0x73f   : > { %v6506_v42 = vadd.f32 %v6505_v9, %v6417_v46  ;;  %v7878_v46 = vld [vmem:[#allocation2 + $0x90] sm:$0xe]  ;;  %v11271_v9 = vpop.f32.mrf.mxu3  ;;  %v11276_v59 = vpop.f32.mrf.mxu0 }
 0x740   : > { %6463 = vmatmul.bf16.gmra.mxu1 %v4978_v21  ;;  %v7879_v62 = vor.u32 %v7878_v46, %v7877_v4 }
 0x741   : > { %v6584_v12 = vadd.f32 %v7069_v60, %v6506_v42  ;;  %v4982_v60 = vshll.u32 %v12262_v30, 16  ;;  %v12263_v42 = vld [vmem:[#allocation81_spill] sm:$0xff] }
 0x742   : > { %v6333_v34 = vadd.f32 %v12263_v42, %v11041_v45  ;;  %v5133_v53 = vrot.slane %v7879_v62, 1 }
 0x743   : > { %v6616_v33 = vmax.f32 %v6584_v12, 0.0  ;;  %6547 = vmatmul.bf16.gmra.mxu2 %v5132_v22  ;;  %v4987_v12 = vshll.u32 %v11268_v48, 16  ;;  %v4984_v40 = vrot.slane %v4982_v60, 1 }
 0x744   : > { %v6422_v22 = vadd.f32 %v6421_v24, %v6333_v34  ;;  %v12264_v24 = vld [vmem:[#allocation136_spill] sm:$0xff] }
 0x745   : > { %6648 = vst [vmem:[%s11250_s28 + $0x8] sm:$0xff] %v6616_v33  ;;  %v6426_v18 = vpop.f32.mrf.mxu1  ;;  %v5134_v33 = vrot.slane %v4841_v16, 1  ;;  %v6336_v46 = vadd.f32 %v12264_v24, %v11051_v0  ;;  %v5137_v24 = vrot.slane %v11268_v48, 1 }
 0x746   : > { %v6508_v15 = vpop.f32.mrf.mxu2 }
 0x747   : > { %v6509_v54 = vadd.f32 %v6508_v15, %v6420_v35  ;;  %v4980_v35 = vshrl.u32 %v12262_v30, 16  ;;  %v3755_v15 = vld [vmem:[#allocation2 + $0xb0] sm:$0x1]  ;;  %v11284_v16 = vpop.f32.mrf.mxu3  ;;  %v7072_v30 = vld [vmem:[%s8114_s16 + $0x82] sm:$0xff] }
 0x748   : > { %v4827_v34 = vunpack.c.l.b16 %v3755_v15 }
 0x749   : > { %v6585_v19 = vadd.f32 %v7070_v61, %v6509_v54  ;;  %v4989_v61 = vrot.slane %v4987_v12, 1  ;;  %v4985_v4 = vor.u32 %v4984_v40, %v4980_v35  ;;  %v11289_v12 = vpop.f32.mrf.mxu0  ;;  %v12265_v40 = vld [vmem:[#allocation126_spill] sm:$0xff]  ;;  %v12266_v35 = vld [vmem:[#allocation16_spill] sm:$0xff] }
 0x74b   : > { %v6617_v17 = vmax.f32 %v6585_v19, 0.0  ;;  %v5135_v19 = vsel %vm865_vm1, %v5133_v53, %v5134_v33  ;;  %v4990_v60 = vsel %vm594_vm0, %v4985_v4, %v4989_v61 }
 0x74d   : > { %6649 = vst [vmem:[%s11250_s28 + $0x10] sm:$0xff] %v6617_v17  ;;  %v6429_v54 = vpop.f32.mrf.mxu1  ;;  %v6425_v17 = vadd.f32 %v6424_v26, %v6336_v46 }
 0x74e   : > { %v6510_v20 = vpop.f32.mrf.mxu2 }
 0x74f   : > { %v6511_v21 = vadd.f32 %v6510_v20, %v6422_v22  ;;  %v4843_v20 = vpack.c.b16 %v4827_v34, %v4827_v34  ;;  %v11295_v15 = vpop.f32.mrf.mxu3 }
 0x750   : > { %6468 = vmatmul.bf16.gmra.mxu1 %v4990_v60 }
 0x751   : > { %v6586_v45 = vadd.f32 %v7071_v55, %v6511_v21  ;;  %v7998_v55 = vld [vmem:[#allocation2 + $0x9c] sm:$0xe]  ;;  %v6338_v21 = vadd.f32 %v12265_v40, %v11058_v13  ;;  %v4999_v26 = vshll.u32 %v4843_v20, 16  ;;  %v11299_v34 = vpop.f32.mrf.mxu0 }
 0x752   : > { %v7999_v61 = vor.u32 %v7998_v55, %v12266_v35  ;;  %v12267_v55 = vld [vmem:[#allocation65_spill] sm:$0xff] }
 0x753   : > { %v6618_v42 = vmax.f32 %v6586_v45, 0.0  ;;  %6552 = vmatmul.bf16.gmra.mxu2 %v5135_v19  ;;  %v6427_v45 = vadd.f32 %v6426_v18, %v6338_v21  ;;  %v7073_v19 = vld [vmem:[%s8114_s16 + $0x8a] sm:$0xff]  ;;  %v5001_v60 = vrot.slane %v4999_v26, 1  ;;  %v6341_v18 = vadd.f32 %v11098_v27, %v11065_v28  ;;  %v7074_v21 = vld [vmem:[%s8114_s16 + $0xa2] sm:$0xff] }
 0x754   : > { %v7880_v28 = vld [vmem:[#allocation2 + $0xa8] sm:$0xf0]  ;;  %v7881_v27 = vld [vmem:[#allocation2 + $0xa8] sm:$0xe] }
 0x755   : > { %6650 = vst [vmem:[%s11250_s28 + $0x18] sm:$0xff] %v6618_v42  ;;  %v6431_v33 = vpop.f32.mrf.mxu1  ;;  %v5136_v42 = vrot.slane %v7999_v61, 1  ;;  %v6430_v40 = vadd.f32 %v6429_v54, %v6341_v18  ;;  %v6343_v54 = vadd.f32 %v11110_v29, %v11069_v47  ;;  %v3757_v29 = vld [vmem:[#allocation2 + $0xc8] sm:$0x1] }
 0x756   : > { %v6513_v62 = vpop.f32.mrf.mxu2 }
 0x757   : > { %v6514_v22 = vadd.f32 %v6513_v62, %v6425_v17  ;;  %v3756_v17 = vld [vmem:[#allocation2 + $0xbc] sm:$0x1]  ;;  %v5138_v62 = vsel %vm865_vm1, %v5136_v42, %v5137_v24  ;;  %v11308_v61 = vpop.f32.mrf.mxu3 }
 0x758   : > { %v4828_v48 = vunpack.c.l.b16 %v3756_v17  ;;  %v6432_v17 = vadd.f32 %v6431_v33, %v6343_v54  ;;  %v7076_v54 = vld [vmem:[%s8114_s16 + $0xc2] sm:$0xff] }
 0x759   : > { %v6587_v0 = vadd.f32 %v7072_v30, %v6514_v22 }
 0x75a   : > { %v11310_v26 = vpack.c.b16 %v4828_v48, %v4828_v48 }
 0x75b   : > { %v6619_v53 = vmax.f32 %v6587_v0, 0.0  ;;  %v5002_v0 = vsel %vm594_vm0, %v12267_v55, %v5001_v60  ;;  %v7882_v60 = vor.u32 %v7881_v27, %v7880_v28 }
 0x75d   : > { %6651 = vst [vmem:[%s11250_s28 + $0x20] sm:$0xff] %v6619_v53  ;;  %v6434_v30 = vpop.f32.mrf.mxu1 }
 0x75e   : > { %v6515_v4 = vpop.f32.mrf.mxu2 }
 0x75f   : > { %v6516_v46 = vadd.f32 %v6515_v4, %v6427_v45 }
 0x760   : > { %6473 = vmatmul.bf16.gmra.mxu1 %v5002_v0  ;;  %v6257_v0 = vadd.f32 %v11257_v23, %v11084_v49  ;;  %v4829_v23 = vunpack.c.l.b16 %v3757_v29  ;;  %v6262_v29 = vadd.f32 %v11284_v16, %v11100_v5  ;;  %v5030_v16 = vshll.u32 %v11103_v50, 16 }
 0x761   : > { %v6588_v13 = vadd.f32 %v7073_v19, %v6516_v46  ;;  %v12268_v19 = vld [vmem:[#allocation94_spill] sm:$0xff]  ;;  %v11313_v46 = vpop.f32.mrf.mxu0 }
 0x762   : > { %v5006_v4 = vshll.u32 %v12268_v19, 16 }
 0x763   : > { %v6620_v22 = vmax.f32 %v6588_v13, 0.0  ;;  %6557 = vmatmul.bf16.gmra.mxu2 %v5138_v62  ;;  %v5011_v13 = vshll.u32 %v11310_v26, 16  ;;  %v7075_v62 = vld [vmem:[%s8114_s16 + $0xaa] sm:$0xff] }
 0x764   : > { %v5008_v55 = vrot.slane %v5006_v4, 1 }
 0x765   : > { %6652 = vst [vmem:[%s11250_s28 + $0x28] sm:$0xff] %v6620_v22  ;;  %v6436_v24 = vpop.f32.mrf.mxu1  ;;  %v5140_v22 = vrot.slane %v4843_v20, 1  ;;  %v6346_v20 = vadd.f32 %v11260_v51, %v6257_v0  ;;  %v11334_v51 = vpack.c.b16 %v4829_v23, %v4829_v23 }
 0x766   : > { %v6518_v53 = vpop.f32.mrf.mxu2 }
 0x767   : > { %v6519_v35 = vadd.f32 %v6518_v53, %v6430_v40  ;;  %v5139_v40 = vrot.slane %v7882_v60, 1  ;;  %v5013_v53 = vrot.slane %v5011_v13, 1  ;;  %v6259_v60 = vadd.f32 %v11271_v9, %v11090_v44 }
 0x768   : > { %v5143_v44 = vrot.slane %v11310_v26, 1 }
 0x769   : > { %v6589_v45 = vadd.f32 %v7074_v21, %v6519_v35  ;;  %v5004_v21 = vshrl.u32 %v12268_v19, 16  ;;  %v11323_v35 = vpop.f32.mrf.mxu3  ;;  %v11328_v4 = vpop.f32.mrf.mxu0  ;;  %v6435_v19 = vadd.f32 %v6434_v30, %v6346_v20  ;;  %v12269_v30 = vld [vmem:[#allocation20_spill] sm:$0xff] }
 0x76b   : > { %v6621_v42 = vmax.f32 %v6589_v45, 0.0  ;;  %v5141_v45 = vsel %vm865_vm1, %v5139_v40, %v5140_v22  ;;  %v5009_v28 = vor.u32 %v5008_v55, %v5004_v21  ;;  %v6348_v22 = vadd.f32 %v11276_v59, %v6259_v60  ;;  %v7078_v60 = vld [vmem:[%s8114_s16 + $0xe2] sm:$0xff] }
 0x76c   : > { %v5023_v40 = vshll.u32 %v11334_v51, 16 }
 0x76d   : > { %6653 = vst [vmem:[%s11250_s28 + $0x30] sm:$0xff] %v6621_v42  ;;  %v6439_v33 = vpop.f32.mrf.mxu1  ;;  %v5014_v49 = vsel %vm594_vm0, %v5009_v28, %v5013_v53  ;;  %v6437_v21 = vadd.f32 %v6436_v24, %v6348_v22  ;;  %v7077_v53 = vld [vmem:[%s8114_s16 + $0xca] sm:$0xff] }
 0x76e   : > { %v6520_v18 = vpop.f32.mrf.mxu2  ;;  %v5025_v20 = vrot.slane %v5023_v40, 1  ;;  %v5032_v40 = vrot.slane %v5030_v16, 1 }
 0x76f   : > { %v6521_v48 = vadd.f32 %v6520_v18, %v6432_v17  ;;  %v8001_v17 = vld [vmem:[#allocation2 + $0xb4] sm:$0xe] }
 0x770   : > { %6478 = vmatmul.bf16.gmra.mxu1 %v5014_v49  ;;  %v5026_v26 = vsel %vm594_vm0, %v11126_v63, %v5025_v20  ;;  %v7883_v63 = vld [vmem:[#allocation2 + $0xc0] sm:$0xf0]  ;;  %v6267_v20 = vadd.f32 %v11308_v61, %v11119_v39 }
 0x771   : > { %v6590_v47 = vadd.f32 %v7075_v62, %v6521_v48  ;;  %v11337_v0 = vpop.f32.mrf.mxu3  ;;  %v8002_v48 = vor.u32 %v8001_v17, %v12269_v30  ;;  %v11344_v9 = vpop.f32.mrf.mxu0  ;;  %v7080_v39 = vld [vmem:[%s8114_s16 + $0x102] sm:$0xff] }
 0x773   : > { %v6622_v27 = vmax.f32 %v6590_v47, 0.0  ;;  %6562 = vmatmul.bf16.gmra.mxu2 %v5141_v45  ;;  %v3758_v45 = vld [vmem:[#allocation2 + $0xd4] sm:$0x1]  ;;  %v5142_v28 = vrot.slane %v8002_v48, 1  ;;  %v5028_v48 = vshrl.u32 %v11103_v50, 16 }
 0x774   : > { %v4830_v23 = vunpack.c.l.b16 %v3758_v45 }
 0x775   : > { %6654 = vst [vmem:[%s11250_s28 + $0x38] sm:$0xff] %v6622_v27  ;;  %v6441_v18 = vpop.f32.mrf.mxu1  ;;  %v5144_v24 = vsel %vm865_vm1, %v5142_v28, %v5143_v44 }
 0x776   : > { %v6523_v42 = vpop.f32.mrf.mxu2  ;;  %v4846_v17 = vpack.c.b16 %v4830_v23, %v4830_v23 }
 0x777   : > { %v6524_v13 = vadd.f32 %v6523_v42, %v6435_v19  ;;  %v6351_v19 = vadd.f32 %v11289_v12, %v6262_v29  ;;  %v6264_v12 = vadd.f32 %v11295_v15, %v11107_v58  ;;  %v5146_v58 = vrot.slane %v11334_v51, 1 }
 0x778   : > { %v5033_v15 = vor.u32 %v5032_v40, %v5028_v48  ;;  %v6356_v51 = vadd.f32 %v11313_v46, %v6267_v20 }
 0x779   : > { %v6591_v62 = vadd.f32 %v7076_v54, %v6524_v13  ;;  %v6440_v42 = vadd.f32 %v6439_v33, %v6351_v19  ;;  %v11353_v5 = vpop.f32.mrf.mxu3  ;;  %v11359_v22 = vpop.f32.mrf.mxu0  ;;  %v7884_v33 = vld [vmem:[#allocation2 + $0xc0] sm:$0xe] }
 0x77a   : > { %v7885_v44 = vor.u32 %v7884_v33, %v7883_v63 }
 0x77b   : > { %v6623_v55 = vmax.f32 %v6591_v62, 0.0 }
 0x77d   : > { %6655 = vst [vmem:[%s11250_s28 + $0x40] sm:$0xff] %v6623_v55  ;;  %v6444_v49 = vpop.f32.mrf.mxu1 }
 0x77e   : > { %v6525_v47 = vpop.f32.mrf.mxu2  ;;  %v6445_v16 = vadd.f32 %v6444_v49, %v6356_v51  ;;  %v5149_v49 = vrot.slane %v4846_v17, 1 }
 0x77f   : > { %v6526_v59 = vadd.f32 %v6525_v47, %v6437_v21  ;;  %v5035_v21 = vshll.u32 %v4846_v17, 16 }
 0x780   : > { %6483 = vmatmul.bf16.gmra.mxu1 %v5026_v26 }
 0x781   : > { %v6592_v27 = vadd.f32 %v7077_v53, %v6526_v59  ;;  %v6353_v53 = vadd.f32 %v11299_v34, %v6264_v12  ;;  %v7079_v59 = vld [vmem:[%s8114_s16 + $0xea] sm:$0xff]  ;;  %v5037_v28 = vrot.slane %v5035_v21, 1  ;;  %v6365_v26 = vpop.f32.mrf.mxu0 }
 0x782   : > { %v8004_v34 = vld [vmem:[#allocation2 + $0xcc] sm:$0xe] }
 0x783   : > { %v6624_v54 = vmax.f32 %v6592_v27, 0.0  ;;  %6567 = vmatmul.bf16.gmra.mxu2 %v5144_v24  ;;  %v6442_v29 = vadd.f32 %v6441_v18, %v6353_v53  ;;  %v6276_v27 = vpop.f32.mrf.mxu3  ;;  %v5145_v24 = vrot.slane %v7885_v44, 1  ;;  %v8005_v12 = vor.u32 %v8004_v34, %v11105_v41  ;;  %v7081_v53 = vld [vmem:[%s8114_s16 + $0x10a] sm:$0xff] }
 0x784   : > { %v7083_v34 = vld [vmem:[%s8114_s16 + $0x12a] sm:$0xff] }
 0x785   : > { %6656 = vst [vmem:[%s11250_s28 + $0x48] sm:$0xff] %v6624_v54  ;;  %v6446_v30 = vpop.f32.mrf.mxu1  ;;  %v5147_v18 = vsel %vm865_vm1, %v5145_v24, %v5146_v58  ;;  %v5038_v54 = vsel %vm594_vm0, %v5033_v15, %v5037_v28  ;;  %v5148_v48 = vrot.slane %v8005_v12, 1 }
 0x786   : > { %v6528_v13 = vpop.f32.mrf.mxu2 }
 0x787   : > { %v6529_v62 = vadd.f32 %v6528_v13, %v6440_v42  ;;  %v5150_v41 = vsel %vm865_vm1, %v5148_v48, %v5149_v49 }
 0x789   : > { %v6593_v55 = vadd.f32 %v7078_v60, %v6529_v62  ;;  %v6269_v60 = vadd.f32 %v11323_v35, %v11124_v43  ;;  %v6367_v40 = vpop.f32.mrf.mxu0  ;;  %v6272_v43 = vadd.f32 %v11337_v0, %v11137_v57  ;;  %v6274_v57 = vadd.f32 %v11353_v5, %v11141_v37 }
 0x78b   : > { %v6625_v47 = vmax.f32 %v6593_v55, 0.0  ;;  %v6278_v55 = vpop.f32.mrf.mxu3  ;;  %v6358_v46 = vadd.f32 %v11328_v4, %v6269_v60  ;;  %v6361_v4 = vadd.f32 %v11344_v9, %v6272_v43 }
 0x78c   : > { %v6279_v60 = vadd.f32 %v6278_v55, %v11154_v31 }
 0x78d   : > { %6657 = vst [vmem:[%s11250_s28 + $0x50] sm:$0xff] %v6625_v47  ;;  %v6449_v19 = vpop.f32.mrf.mxu1  ;;  %v6447_v21 = vadd.f32 %v6446_v30, %v6358_v46  ;;  %v7082_v30 = vld [vmem:[%s8114_s16 + $0x122] sm:$0xff] }
 0x78e   : > { %v6530_v45 = vpop.f32.mrf.mxu2 }
 0x78f   : > { %v6531_v50 = vadd.f32 %v6530_v45, %v6442_v29  ;;  %v6450_v45 = vadd.f32 %v6449_v19, %v6361_v4 }
 0x790   : > { %6488 = vmatmul.bf16.gmra.mxu1 %v5038_v54 }
 0x791   : > { %v6594_v23 = vadd.f32 %v7079_v59, %v6531_v50  ;;  %v6370_v15 = vpop.f32.mrf.mxu0  ;;  %v6363_v50 = vadd.f32 %v11359_v22, %v6274_v57  ;;  %v7084_v22 = vld [vmem:[%s8114_s16 + $0x142] sm:$0xff] }
 0x793   : > { %v6626_v42 = vmax.f32 %v6594_v23, 0.0  ;;  %6572 = vmatmul.bf16.gmra.mxu2 %v5147_v18  ;;  %v6281_v17 = vpop.f32.mrf.mxu3  ;;  %v6277_v18 = vadd.f32 %v6276_v27, %v11150_v7  ;;  %v6368_v7 = vadd.f32 %v6367_v40, %v6279_v60  ;;  %v7086_v40 = vld [vmem:[%s8114_s16 + $0x162] sm:$0xff] }
 0x794   : > { %v6282_v49 = vadd.f32 %v6281_v17, %v11163_v6 }
 0x795   : > { %6658 = vst [vmem:[%s11250_s28 + $0x58] sm:$0xff] %v6626_v42  ;;  %v6451_v63 = vpop.f32.mrf.mxu1  ;;  %v6366_v37 = vadd.f32 %v6365_v26, %v6277_v18  ;;  %v7085_v26 = vld [vmem:[%s8114_s16 + $0x14a] sm:$0xff] }
 0x796   : > { %v6533_v61 = vpop.f32.mrf.mxu2  ;;  %v6452_v24 = vadd.f32 %v6451_v63, %v6363_v50  ;;  %v6371_v31 = vadd.f32 %v6370_v15, %v6282_v49  ;;  %v7087_v15 = vld [vmem:[%s8114_s16 + $0x16a] sm:$0xff] }
 0x797   : > { %v6534_v13 = vadd.f32 %v6533_v61, %v6445_v16 }
 0x799   : > { %v6595_v62 = vadd.f32 %v7080_v39, %v6534_v13  ;;  %v6372_v51 = vpop.f32.mrf.mxu0 }
 0x79b   : > { %v6627_v33 = vmax.f32 %v6595_v62, 0.0  ;;  %v6283_v23 = vpop.f32.mrf.mxu3 }
 0x79d   : > { %6659 = vst [vmem:[%s11250_s28 + $0x60] sm:$0xff] %v6627_v33  ;;  %v6454_v29 = vpop.f32.mrf.mxu1 }
 0x79e   : > { %v6535_v47 = vpop.f32.mrf.mxu2  ;;  %v6455_v39 = vadd.f32 %v6454_v29, %v6366_v37  ;;  %v6284_v29 = vadd.f32 %v6283_v23, %v11167_v8 }
 0x79f   : > { %v6536_v35 = vadd.f32 %v6535_v47, %v6447_v21 }
 0x7a0   : > { %v6373_v6 = vadd.f32 %v6372_v51, %v6284_v29 }
 0x7a1   : > { %v6596_v44 = vadd.f32 %v7081_v53, %v6536_v35  ;;  %v6375_v46 = vpop.f32.mrf.mxu0 }
 0x7a3   : > { %v6628_v59 = vmax.f32 %v6596_v44, 0.0  ;;  %6577 = vmatmul.bf16.gmra.mxu2 %v5150_v41  ;;  %v6286_v12 = vpop.f32.mrf.mxu3 }
 0x7a5   : > { %6660 = vst [vmem:[%s11250_s28 + $0x68] sm:$0xff] %v6628_v59  ;;  %v6456_v20 = vpop.f32.mrf.mxu1 }
 0x7a6   : > { %v6538_v58 = vpop.f32.mrf.mxu2  ;;  %v6457_v33 = vadd.f32 %v6456_v20, %v6368_v7 }
 0x7a7   : > { %v6539_v0 = vadd.f32 %v6538_v58, %v6450_v45 }
 0x7a9   : > { %v6597_v28 = vadd.f32 %v7082_v30, %v6539_v0  ;;  %v6377_v35 = vpop.f32.mrf.mxu0 }
 0x7ab   : > { %v6629_v9 = vmax.f32 %v6597_v28, 0.0  ;;  %v6288_v47 = vpop.f32.mrf.mxu3  ;;  %v6287_v28 = vadd.f32 %v6286_v12, %v11176_v25 }
 0x7ad   : > { %6661 = vst [vmem:[%s11250_s28 + $0x70] sm:$0xff] %v6629_v9  ;;  %v6459_v16 = vpop.f32.mrf.mxu1  ;;  %v6376_v8 = vadd.f32 %v6375_v46, %v6287_v28 }
 0x7ae   : > { %v6540_v19 = vpop.f32.mrf.mxu2  ;;  %v6460_v41 = vadd.f32 %v6459_v16, %v6371_v31 }
 0x7af   : > { %v6541_v54 = vadd.f32 %v6540_v19, %v6452_v24  ;;  %v7088_v19 = vld [vmem:[%s8114_s16 + $0x182] sm:$0xff] }
 0x7b1   : > { %v6598_v42 = vadd.f32 %v7083_v34, %v6541_v54  ;;  %v6380_v0 = vpop.f32.mrf.mxu0  ;;  %v6289_v54 = vadd.f32 %v6288_v47, %v11180_v32 }
 0x7b3   : > { %v6630_v5 = vmax.f32 %v6598_v42, 0.0  ;;  %v6291_v30 = vpop.f32.mrf.mxu3  ;;  %v6378_v25 = vadd.f32 %v6377_v35, %v6289_v54  ;;  %v7091_v35 = vld [vmem:[%s8114_s16 + $0x1aa] sm:$0xff] }
 0x7b4   : > { %v6292_v60 = vadd.f32 %v6291_v30, %v11192_v1 }
 0x7b5   : > { %6662 = vst [vmem:[%s11250_s28 + $0x78] sm:$0xff] %v6630_v5  ;;  %v6461_v63 = vpop.f32.mrf.mxu1 }
 0x7b6   : > { %v6543_v61 = vpop.f32.mrf.mxu2  ;;  %v6462_v58 = vadd.f32 %v6461_v63, %v6373_v6  ;;  %v6381_v32 = vadd.f32 %v6380_v0, %v6292_v60  ;;  %v7092_v6 = vld [vmem:[%s8114_s16 + $0x1c2] sm:$0xff] }
 0x7b7   : > { %v6544_v13 = vadd.f32 %v6543_v61, %v6455_v39 }
 0x7b9   : > { %v6599_v62 = vadd.f32 %v7084_v22, %v6544_v13  ;;  %v6382_v42 = vpop.f32.mrf.mxu0  ;;  %v7089_v22 = vld [vmem:[%s8114_s16 + $0x18a] sm:$0xff] }
 0x7bb   : > { %v6631_v27 = vmax.f32 %v6599_v62, 0.0  ;;  %v6293_v34 = vpop.f32.mrf.mxu3 }
 0x7bd   : > { %6663 = vst [vmem:[%s11250_s28 + $0x80] sm:$0xff] %v6631_v27  ;;  %v6464_v43 = vpop.f32.mrf.mxu1 }
 0x7be   : > { %v6545_v48 = vpop.f32.mrf.mxu2  ;;  %v6465_v23 = vadd.f32 %v6464_v43, %v6376_v8 }
 0x7bf   : > { %v6546_v21 = vadd.f32 %v6545_v48, %v6457_v33  ;;  %v7090_v33 = vld [vmem:[%s8114_s16 + $0x1a2] sm:$0xff]  ;;  %v6294_v48 = vadd.f32 %v6293_v34, %v11197_v56 }
 0x7c1   : > { %v6600_v53 = vadd.f32 %v7085_v26, %v6546_v21  ;;  %v6385_v63 = vpop.f32.mrf.mxu0  ;;  %v6383_v1 = vadd.f32 %v6382_v42, %v6294_v48  ;;  %v7094_v42 = vld [vmem:[%s8114_s16 + $0x1e2] sm:$0xff] }
 0x7c3   : > { %v6632_v55 = vmax.f32 %v6600_v53, 0.0  ;;  %v6296_v12 = vpop.f32.mrf.mxu3 }
 0x7c5   : > { %6664 = vst [vmem:[%s11250_s28 + $0x88] sm:$0xff] %v6632_v55  ;;  %v6466_v45 = vpop.f32.mrf.mxu1 }
 0x7c6   : > { %v6548_v44 = vpop.f32.mrf.mxu2  ;;  %v6467_v39 = vadd.f32 %v6466_v45, %v6378_v25 }
 0x7c7   : > { %v6549_v4 = vadd.f32 %v6548_v44, %v6460_v41 }
 0x7c9   : > { %v6601_v59 = vadd.f32 %v7086_v40, %v6549_v4  ;;  %v6387_v43 = vpop.f32.mrf.mxu0  ;;  %v6297_v40 = vadd.f32 %v6296_v12, %v11206_v52  ;;  %v7095_v12 = vld [vmem:[%s8114_s16 + $0x1ea] sm:$0xff] }
 0x7cb   : > { %v6633_v17 = vmax.f32 %v6601_v59, 0.0  ;;  %v6298_v53 = vpop.f32.mrf.mxu3  ;;  %v6386_v4 = vadd.f32 %v6385_v63, %v6297_v40 }
 0x7cd   : > { %6665 = vst [vmem:[%s11250_s28 + $0x90] sm:$0xff] %v6633_v17  ;;  %v6469_v9 = vpop.f32.mrf.mxu1 }
 0x7ce   : > { %v6550_v57 = vpop.f32.mrf.mxu2  ;;  %v6470_v27 = vadd.f32 %v6469_v9, %v6381_v32  ;;  %v7093_v9 = vld [vmem:[%s8114_s16 + $0x1ca] sm:$0xff] }
 0x7cf   : > { %v6551_v20 = vadd.f32 %v6550_v57, %v6462_v58  ;;  %v6299_v58 = vadd.f32 %v6298_v53, %v11210_v10 }
 0x7d1   : > { %v6602_v50 = vadd.f32 %v7087_v15, %v6551_v20  ;;  %v6390_v30 = vpop.f32.mrf.mxu0  ;;  %v6388_v28 = vadd.f32 %v6387_v43, %v6299_v58 }
 0x7d3   : > { %v6634_v24 = vmax.f32 %v6602_v50, 0.0  ;;  %v6301_v59 = vpop.f32.mrf.mxu3 }
 0x7d5   : > { %6666 = vst [vmem:[%s11250_s28 + $0x98] sm:$0xff] %v6634_v24  ;;  %v6471_v37 = vpop.f32.mrf.mxu1  ;;  %v6302_v24 = vadd.f32 %v6301_v59, %v11216_v2 }
 0x7d6   : > { %v6553_v18 = vpop.f32.mrf.mxu2  ;;  %v6472_v31 = vadd.f32 %v6471_v37, %v6383_v1 }
 0x7d7   : > { %v6554_v51 = vadd.f32 %v6553_v18, %v6465_v23  ;;  %v6391_v10 = vadd.f32 %v6390_v30, %v6302_v24 }
 0x7d9   : > { %v6603_v16 = vadd.f32 %v7088_v19, %v6554_v51  ;;  %v6392_v34 = vpop.f32.mrf.mxu0 }
 0x7db   : > { %v6635_v5 = vmax.f32 %v6603_v16, 0.0  ;;  %v6303_v50 = vpop.f32.mrf.mxu3 }
 0x7dc   : > { %v6304_v37 = vadd.f32 %v6303_v50, %v11220_v38  ;;  %v7099_v50 = vld [vmem:[%s8114_s16 + $0x22a] sm:$0xff] }
 0x7dd   : > { %6667 = vst [vmem:[%s11250_s28 + $0xa0] sm:$0xff] %v6635_v5  ;;  %v6474_v7 = vpop.f32.mrf.mxu1 }
 0x7de   : > { %v6555_v61 = vpop.f32.mrf.mxu2  ;;  %v6475_v45 = vadd.f32 %v6474_v7, %v6386_v4  ;;  %v6393_v2 = vadd.f32 %v6392_v34, %v6304_v37 }
 0x7df   : > { %v6556_v13 = vadd.f32 %v6555_v61, %v6467_v39 }
 0x7e1   : > { %v6604_v62 = vadd.f32 %v7089_v22, %v6556_v13  ;;  %v6395_v22 = vpop.f32.mrf.mxu0 }
 0x7e3   : > { %v6636_v46 = vmax.f32 %v6604_v62, 0.0  ;;  %v6306_v5 = vpop.f32.mrf.mxu3 }
 0x7e4   : > { %v6307_v63 = vadd.f32 %v6306_v5, %v11226_v36 }
 0x7e5   : > { %6668 = vst [vmem:[%s11250_s28 + $0xa8] sm:$0xff] %v6636_v46  ;;  %v6476_v55 = vpop.f32.mrf.mxu1 }
 0x7e6   : > { %v6558_v26 = vpop.f32.mrf.mxu2  ;;  %v6477_v20 = vadd.f32 %v6476_v55, %v6388_v28  ;;  %v6396_v38 = vadd.f32 %v6395_v22, %v6307_v63 }
 0x7e7   : > { %v6559_v49 = vadd.f32 %v6558_v26, %v6470_v27 }
 0x7e9   : > { %v6605_v21 = vadd.f32 %v7090_v33, %v6559_v49  ;;  %v6397_v33 = vpop.f32.mrf.mxu0  ;;  %v7096_v49 = vld [vmem:[%s8114_s16 + $0x202] sm:$0xff] }
 0x7eb   : > { %v6637_v47 = vmax.f32 %v6605_v21, 0.0  ;;  %v6308_v7 = vpop.f32.mrf.mxu3 }
 0x7ec   : > { %v6309_v53 = vadd.f32 %v6308_v7, %v11230_v3 }
 0x7ed   : > { %6669 = vst [vmem:[%s11250_s28 + $0xb0] sm:$0xff] %v6637_v47  ;;  %v6479_v57 = vpop.f32.mrf.mxu1 }
 0x7ee   : > { %v6560_v41 = vpop.f32.mrf.mxu2  ;;  %v6480_v51 = vadd.f32 %v6479_v57, %v6391_v10  ;;  %v6398_v43 = vadd.f32 %v6397_v33, %v6309_v53 }
 0x7ef   : > { %v6561_v44 = vadd.f32 %v6560_v41, %v6472_v31  ;;  %v7097_v41 = vld [vmem:[%s8114_s16 + $0x20a] sm:$0xff] }
 0x7f1   : > { %v6606_v29 = vadd.f32 %v7091_v35, %v6561_v44  ;;  %v6400_v35 = vpop.f32.mrf.mxu0 }
 0x7f3   : > { %v6638_v56 = vmax.f32 %v6606_v29, 0.0  ;;  %v6311_v31 = vpop.f32.mrf.mxu3 }
 0x7f4   : > { %v6312_v44 = vadd.f32 %v6311_v31, %v11235_v14 }
 0x7f5   : > { %6670 = vst [vmem:[%s11250_s28 + $0xb8] sm:$0xff] %v6638_v56  ;;  %v6481_v18 = vpop.f32.mrf.mxu1 }
 0x7f6   : > { %v6563_v17 = vpop.f32.mrf.mxu2  ;;  %v6482_v13 = vadd.f32 %v6481_v18, %v6393_v2  ;;  %v6401_v59 = vadd.f32 %v6400_v35, %v6312_v44 }
 0x7f7   : > { %v6564_v15 = vadd.f32 %v6563_v17, %v6475_v45  ;;  %v7098_v17 = vld [vmem:[%s8114_s16 + $0x222] sm:$0xff] }
 0x7f9   : > { %v6607_v0 = vadd.f32 %v7092_v6, %v6564_v15  ;;  %v6402_v57 = vpop.f32.mrf.mxu0 }
 0x7fb   : > { %v6639_v52 = vmax.f32 %v6607_v0, 0.0  ;;  %v6313_v6 = vpop.f32.mrf.mxu3 }
 0x7fc   : > { %v6314_v58 = vadd.f32 %v6313_v6, %v11238_v11 }
 0x7fd   : > { %6671 = vst [vmem:[%s11250_s28 + $0xc0] sm:$0xff] %v6639_v52  ;;  %v6484_v60 = vpop.f32.mrf.mxu1 }
 0x7fe   : > { %v6565_v8 = vpop.f32.mrf.mxu2  ;;  %v6485_v26 = vadd.f32 %v6484_v60, %v6396_v38  ;;  %v6403_v14 = vadd.f32 %v6402_v57, %v6314_v58 }
 0x7ff   : > { %v6566_v23 = vadd.f32 %v6565_v8, %v6477_v20 }
 0x801   : > { %v6608_v19 = vadd.f32 %v7093_v9, %v6566_v23 }
 0x803   : > { %v6640_v54 = vmax.f32 %v6608_v19, 0.0 }
 0x805   : > { %6672 = vst [vmem:[%s11250_s28 + $0xc8] sm:$0xff] %v6640_v54  ;;  %v6486_v48 = vpop.f32.mrf.mxu1 }
 0x806   : > { %v6568_v16 = vpop.f32.mrf.mxu2  ;;  %v6487_v55 = vadd.f32 %v6486_v48, %v6398_v43 }
 0x807   : > { %v6569_v25 = vadd.f32 %v6568_v16, %v6480_v51 }
 0x809   : > { %v6609_v39 = vadd.f32 %v7094_v42, %v6569_v25 }
 0x80b   : > { %v6641_v61 = vmax.f32 %v6609_v39, 0.0 }
 0x80d   : > { %6673 = vst [vmem:[%s11250_s28 + $0xd0] sm:$0xff] %v6641_v61  ;;  %v6489_v4 = vpop.f32.mrf.mxu1 }
 0x80e   : > { %v6570_v62 = vpop.f32.mrf.mxu2  ;;  %v6490_v45 = vadd.f32 %v6489_v4, %v6401_v59 }
 0x80f   : > { %v6571_v32 = vadd.f32 %v6570_v62, %v6482_v13 }
 0x811   : > { %v6610_v46 = vadd.f32 %v7095_v12, %v6571_v32 }
 0x813   : > { %v6642_v27 = vmax.f32 %v6610_v46, 0.0 }
 0x815   : > { %6674 = vst [vmem:[%s11250_s28 + $0xd8] sm:$0xff] %v6642_v27  ;;  %v6491_v28 = vpop.f32.mrf.mxu1 }
 0x816   : > { %v6573_v21 = vpop.f32.mrf.mxu2  ;;  %v6492_v20 = vadd.f32 %v6491_v28, %v6403_v14 }
 0x817   : > { %v6574_v1 = vadd.f32 %v6573_v21, %v6485_v26 }
 0x819   : > { %v6611_v47 = vadd.f32 %v7096_v49, %v6574_v1 }
 0x81b   : > { %v6643_v36 = vmax.f32 %v6611_v47, 0.0 }
 0x81d   : > { %6675 = vst [vmem:[%s11250_s28 + $0xe0] sm:$0xff] %v6643_v36 }
 0x81e   : > { %v6575_v40 = vpop.f32.mrf.mxu2 }
 0x81f   : > { %v6576_v29 = vadd.f32 %v6575_v40, %v6487_v55 }
 0x821   : > { %v6612_v56 = vadd.f32 %v7097_v41, %v6576_v29 }
 0x823   : > { %v6644_v3 = vmax.f32 %v6612_v56, 0.0 }
 0x825   : > { %6676 = vst [vmem:[%s11250_s28 + $0xe8] sm:$0xff] %v6644_v3 }
 0x826   : > { %v6578_v30 = vpop.f32.mrf.mxu2 }
 0x827   : > { %v6579_v15 = vadd.f32 %v6578_v30, %v6490_v45 }
 0x829   : > { %v6613_v0 = vadd.f32 %v7098_v17, %v6579_v15 }
 0x82b   : > { %v6645_v52 = vmax.f32 %v6613_v0, 0.0 }
 0x82d   : > { %6677 = vst [vmem:[%s11250_s28 + $0xf0] sm:$0xff] %v6645_v52 }
 0x82e   : > { %v6580_v9 = vpop.f32.mrf.mxu2 }
 0x82f   : > { %v6581_v8 = vadd.f32 %v6580_v9, %v6492_v20 }
 0x831   : > { %v6614_v24 = vadd.f32 %v7099_v50, %v6581_v8 }
 0x833   : > { %v6646_v23 = vmax.f32 %v6614_v24, 0.0 }
 0x835   : > { %6678 = vst [vmem:[%s11250_s28 + $0xf8] sm:$0xff] %v6646_v23 }
 0x836 PF: > { %s15_s20 = sadd.s32 1, %s8028_s20   ;;  %s12270_s18 = smov %s8024_s19 }
 0x837   : > { %p12_p5 = scmp.ge.s32.totalorder %s15_s20, 4   ;;  %s12271_s19 = smov %s12273_s21 }
 0x839   :  { %14 = sbr.rel (!%p12_p5) target bundleno = 2 (0x2), region = 79 }

</bundles_post_ra>
